<compile_context>
chip_gen: v7x
topology: tpu7x:2x2x1
jax: 0.10.0
libtpu: 0.0.40
codegen_flags: <defaults>
</compile_context>

<pallas_src>
import functools

import jax
import jax.numpy as jnp
from jax.experimental import pallas as pl
from jax.experimental.pallas import tpu as pltpu

# ----- demo hyper-params (scaled-down stand-ins; structure identical) ---------
BATCH = 4          # total batch
B_TILE = 2         # batch elements folded into the matmul M dim per grid step
SEQ_LEN = 8
EMB_DIM = 24       # stands in for 1541 (deliberately NOT a 128 multiple)
PROJ_DIM = 64      # stands in for 1544 (divisible by N_HEADS, not by 128)
HIDDEN_DIM = 32    # stands in for 1024
N_HEADS = 4

LANE = 128         # TPU lane width: every kernel-visible last dim padded to this


# ------------------------------ padding helpers --------------------------------
def _round_up(n, m=LANE):
    return ((n + m - 1) // m) * m


def _pad(a, shape):
    """Zero-pad `a` (at the end of every axis) up to `shape` (wrapper-side)."""
    out = jnp.zeros(shape, a.dtype)
    return out.at[tuple(slice(0, s) for s in a.shape)].set(a)


def _vmem_limit_bytes():
    """Per-generation VMEM limit: ~90% of physical, capped at 100 MiB
    (v5e/v6e: 128 MiB physical -> 100 MiB; v7x: 64 MiB -> ~57 MiB)."""
    try:
        cap = int(pltpu.get_tpu_info().vmem_capacity_bytes)
    except Exception:
        cap = 64 * 1024 * 1024          # conservative default (v7x-sized)
    return int(min(cap * 0.9, 100 * 1024 * 1024))


# ------------------------------ in-kernel pieces -------------------------------
def _padded_layer_norm(x, gamma, beta, n_real, eps=1e-5):
    """LayerNorm over a lane-padded feature dim (padded lanes of x are 0).

    Two-pass variance (sum of masked (x-mean)^2) for numerical robustness;
    the lane mask keeps padded lanes out of the stats, and gamma/beta are 0 in
    padded lanes so the output padded lanes stay exactly 0.
    """
    inv_n = 1.0 / float(n_real)
    lane = jax.lax.broadcasted_iota(jnp.int32, x.shape, x.ndim - 1)
    mask = lane < n_real
    mean = jnp.sum(x, axis=-1, keepdims=True) * inv_n
    xc = jnp.where(mask, x - mean, 0.0)
    var = jnp.sum(xc * xc, axis=-1, keepdims=True) * inv_n
    return xc * jax.lax.rsqrt(var + eps) * gamma + beta


def _attention_block(x, refs, n_heads, b_tile, seq_len, e_real, o_real):
    """Assumed TransformerBlock: MHA -> LN(x + attn) -> Linear/ReLU/Linear -> LN.

    `x`: (b_tile*seq_len, E_pad) f32 with zero padded lanes.  Weights bf16,
    stored (in, out).  Token-parallel matmuls use all b_tile*seq_len rows;
    only scores / PV are per batch element (batched dot_general over b_tile).
    """
    (wqkv, bqkv, wo, bo, ln1_g, ln1_b, w1, b1, w2, b2, ln2_g, ln2_b) = refs
    tokens = x.shape[0]                       # b_tile * seq_len
    hdp = wo.shape[0]                         # n_heads * dp
    dp = hdp // n_heads                       # per-head dim, padded to 128 mult
    dh_real = e_real // n_heads
    scale = 1.0 / float(dh_real) ** 0.5

    # --- QKV projection: one big matmul over all tokens ---
    xb = x.astype(jnp.bfloat16)
    qkv = jnp.dot(xb, wqkv[...], preferred_element_type=jnp.float32) + bqkv[...]

    def head_slice(base, hh):
        # static 128-aligned lane slice (free view), then split leading dim.
        sl = qkv[:, base + hh * dp: base + (hh + 1) * dp]
        return sl.reshape(b_tile, seq_len, dp).astype(jnp.bfloat16)

    # --- per-head attention (short static unroll, no transposes/concats) ---
    attn = None
    for hh in range(n_heads):
        q_h = head_slice(0, hh)
        k_h = head_slice(hdp, hh)
        v_h = head_slice(2 * hdp, hh)
        s = jax.lax.dot_general(q_h, k_h, (((2,), (2,)), ((0,), (0,))),
                                preferred_element_type=jnp.float32) * scale
        s = s - jnp.max(s, axis=-1, keepdims=True)            # f32 softmax
        p = jnp.exp(s)
        p = p * pl.reciprocal(jnp.sum(p, axis=-1, keepdims=True), approx=True)
        ctx = jax.lax.dot_general(p.astype(jnp.bfloat16), v_h,
                                  (((2,), (1,)), ((0,), (0,))),
                                  preferred_element_type=jnp.float32)
        ctx = ctx.reshape(tokens, dp).astype(jnp.bfloat16)
        # accumulate the output projection per head (128-aligned sublane slice
        # of WO) -> no lane concatenate of the per-head contexts.
        part = jnp.dot(ctx, wo[hh * dp:(hh + 1) * dp, :],
                       preferred_element_type=jnp.float32)
        attn = part if attn is None else attn + part
    attn = attn + bo[...]

    # --- residual + layernorm 1 ---
    h1 = _padded_layer_norm(attn + x, ln1_g[...], ln1_b[...], e_real)

    # --- feed-forward: Linear -> ReLU -> Linear (token-parallel matmuls) ---
    ff = jnp.dot(h1.astype(jnp.bfloat16), w1[...],
                 preferred_element_type=jnp.float32) + b1[...]
    ff = jnp.maximum(ff, 0.0)
    ff = jnp.dot(ff.astype(jnp.bfloat16), w2[...],
                 preferred_element_type=jnp.float32) + b2[...]

    # --- layernorm 2 ---
    return _padded_layer_norm(ff, ln2_g[...], ln2_b[...], o_real)


def _articles_fused_kernel(n_heads, b_tile, seq_len, proj_real, hidden_real,
                           x_ref, pw_ref, pb_ref, pos_ref, *rest):
    b1_refs = rest[:12]
    b2_refs = rest[12:24]
    o_ref = rest[24]
    tokens = b_tile * seq_len

    # ---- projection + positional encoding (all tokens of the batch tile) ----
    x = x_ref[...].reshape(tokens, x_ref.shape[-1])            # bf16 in
    h = jnp.dot(x, pw_ref[...], preferred_element_type=jnp.float32)
    h = h + pb_ref[...] + pos_ref[...]                         # pos pre-tiled

    # permute(1,0,2) / permute back are layout no-ops here.
    h = _attention_block(h, b1_refs, n_heads, b_tile, seq_len,
                         proj_real, hidden_real)
    h = _attention_block(h, b2_refs, n_heads, b_tile, seq_len,
                         hidden_real, hidden_real)

    o_ref[...] = h.astype(o_ref.dtype).reshape(b_tile, seq_len, h.shape[-1])


# ------------------------------ wrapper ----------------------------------------
def articles_nn_forward(x, packed, *, n_heads, proj_real, hidden_real,
                        b_tile, single_buffer_weights=True):
    B, S, _ = x.shape
    assert B % b_tile == 0, "batch must be divisible by the batch tile"
    e_in_pad, p_pad = packed["proj_w"].shape
    o_pad = _round_up(hidden_real)

    x_pad = _pad(x, (B, S, e_in_pad)).astype(jnp.bfloat16)     # bf16 activation IO
    pos_tiled = jnp.tile(packed["pos"], (b_tile, 1))           # (b_tile*S, p_pad)

    weights = ([packed["proj_w"], packed["proj_b"], pos_tiled]
               + list(packed["block1"]) + list(packed["block2"]))

    def w_spec(arr):
        """Grid-invariant weight spec: constant index_map (never re-DMAd) and,
        when supported, single-buffered to halve resident weight VMEM."""
        nd = arr.ndim
        kwargs = {}
        if single_buffer_weights:
            kwargs["pipeline_mode"] = pl.Buffered(1)
        return pl.BlockSpec(arr.shape, lambda b, _nd=nd: (0,) * _nd, **kwargs)

    kernel = functools.partial(_articles_fused_kernel,
                               n_heads, b_tile, S, proj_real, hidden_real)
    out = pl.pallas_call(
        kernel,
        out_shape=jax.ShapeDtypeStruct((B, S, o_pad), jnp.bfloat16),
        grid=(B // b_tile,),
        in_specs=[pl.BlockSpec((b_tile, S, e_in_pad), lambda b: (b, 0, 0))]
                 + [w_spec(w) for w in weights],
        out_specs=pl.BlockSpec((b_tile, S, o_pad), lambda b: (b, 0, 0)),
        compiler_params=pltpu.CompilerParams(
            # keep batch on one core: on v7x "parallel" would replicate the
            # full (large) weight working set per TensorCore.
            dimension_semantics=("arbitrary",),
            vmem_limit_bytes=_vmem_limit_bytes(),
        ),
    )(x_pad, *weights)
    return out[..., :hidden_real].astype(jnp.float32)


# ------------------------------ parameter init ---------------------------------
def _init_block_real(key, e, o, f):
    ks = jax.random.split(key, 6)
    s = 0.02
    return {
        "wqkv": jax.random.normal(ks[0], (e, 3 * e)) * s,   # stored (in, out)
        "bqkv": jnp.zeros((3 * e,)),
        "wo":   jax.random.normal(ks[1], (e, e)) * s,
        "bo":   jnp.zeros((e,)),
        "ln1_g": jnp.ones((e,)), "ln1_b": jnp.zeros((e,)),
        "w1": jax.random.normal(ks[2], (e, f)) * s,
        "b1": jax.random.normal(ks[3], (f,)) * s,
        "w2": jax.random.normal(ks[4], (f, o)) * s,
        "b2": jax.random.normal(ks[5], (o,)) * s,
        "ln2_g": jnp.ones((o,)), "ln2_b": jnp.zeros((o,)),
    }


def init_articles_nn_params(key, seq_len, emb_dim, proj_dim, n_heads, hidden_dim):
    """Unpadded f32 params; weight matrices stored (in_dim, out_dim) (i.e. the
    transpose of torch's nn.Linear.weight) so the kernel never transposes."""
    del n_heads
    k0, k1, k2, k3, k4 = jax.random.split(key, 5)
    s = 0.02
    return {
        "proj_w": jax.random.normal(k0, (emb_dim, proj_dim)) * s,
        "proj_b": jax.random.normal(k1, (proj_dim,)) * s,
        "pos":    jax.random.normal(k2, (seq_len, proj_dim)),
        "block1": _init_block_real(k3, proj_dim, hidden_dim, hidden_dim),
        "block2": _init_block_real(k4, hidden_dim, hidden_dim, hidden_dim),
    }


def _pack_block(p, e, o, f, n_heads):
    """Pad a block's params to lane-aligned shapes with per-head layout
    [head0 | pad | head1 | pad | ...] so the kernel never slices lanes at
    non-128 boundaries.  Weights -> bf16; biases / LN params stay f32 with
    zeros in padded lanes (required by _padded_layer_norm)."""
    dh = e // n_heads
    dp = _round_up(dh)
    hdp = n_heads * dp
    e_pad, o_pad, f_pad = _round_up(e), _round_up(o), _round_up(f)

    def heads_out(w):          # (e, e) -> (e_pad, hdp): head-major out cols
        return _pad(w.reshape(e, n_heads, dh),
                    (e_pad, n_heads, dp)).reshape(e_pad, hdp)

    def heads_b(b):            # (e,) -> (hdp,)
        return _pad(b.reshape(n_heads, dh), (n_heads, dp)).reshape(hdp)

    wqkv = jnp.concatenate(
        [heads_out(p["wqkv"][:, i * e:(i + 1) * e]) for i in range(3)],
        axis=-1).astype(jnp.bfloat16)
    bqkv = jnp.concatenate(
        [heads_b(p["bqkv"][i * e:(i + 1) * e]) for i in range(3)]
    ).reshape(1, 3 * hdp)
    wo = _pad(p["wo"].reshape(n_heads, dh, e),
              (n_heads, dp, e_pad)).reshape(hdp, e_pad).astype(jnp.bfloat16)
    bo = _pad(p["bo"], (e_pad,)).reshape(1, e_pad)
    return [
        wqkv, bqkv, wo, bo,
        _pad(p["ln1_g"], (e_pad,)).reshape(1, e_pad),
        _pad(p["ln1_b"], (e_pad,)).reshape(1, e_pad),
        _pad(p["w1"], (e_pad, f_pad)).astype(jnp.bfloat16),
        _pad(p["b1"], (f_pad,)).reshape(1, f_pad),
        _pad(p["w2"], (f_pad, o_pad)).astype(jnp.bfloat16),
        _pad(p["b2"], (o_pad,)).reshape(1, o_pad),
        _pad(p["ln2_g"], (o_pad,)).reshape(1, o_pad),
        _pad(p["ln2_b"], (o_pad,)).reshape(1, o_pad),
    ]


def pack_params(real, n_heads, proj_dim, hidden_dim):
    emb_dim = real["proj_w"].shape[0]
    e_in_pad, p_pad = _round_up(emb_dim), _round_up(proj_dim)
    return {
        "proj_w": _pad(real["proj_w"], (e_in_pad, p_pad)).astype(jnp.bfloat16),
        "proj_b": _pad(real["proj_b"], (p_pad,)).reshape(1, p_pad),
        "pos":    _pad(real["pos"], (real["pos"].shape[0], p_pad)),
        "block1": _pack_block(real["block1"], proj_dim, hidden_dim, hidden_dim, n_heads),
        "block2": _pack_block(real["block2"], hidden_dim, hidden_dim, hidden_dim, n_heads),
    }


# ------------------------------ pure-JAX f32 reference -------------------------
def _ref_layer_norm(x, g, b, eps=1e-5):
    m = jnp.mean(x, axis=-1, keepdims=True)
    v = jnp.mean((x - m) ** 2, axis=-1, keepdims=True)
    return (x - m) * jax.lax.rsqrt(v + eps) * g + b


def _ref_block(x, p, n_heads):
    B, S, E = x.shape
    dh = E // n_heads
    qkv = x @ p["wqkv"] + p["bqkv"]
    q, k, v = jnp.split(qkv, 3, axis=-1)
    q = q.reshape(B, S, n_heads, dh)
    k = k.reshape(B, S, n_heads, dh)
    v = v.reshape(B, S, n_heads, dh)
    s = jnp.einsum("bqhd,bkhd->bhqk", q, k) / (dh ** 0.5)
    a = jax.nn.softmax(s, axis=-1)
    ctx = jnp.einsum("bhqk,bkhd->bqhd", a, v).reshape(B, S, E)
    attn = ctx @ p["wo"] + p["bo"]
    h1 = _ref_layer_norm(attn + x, p["ln1_g"], p["ln1_b"])
    ff = jnp.maximum(h1 @ p["w1"] + p["b1"], 0.0)
    ff = ff @ p["w2"] + p["b2"]
    return _ref_layer_norm(ff, p["ln2_g"], p["ln2_b"])


def articles_nn_reference(x, real, n_heads):
    h = x @ real["proj_w"] + real["proj_b"] + real["pos"][None]
    h = _ref_block(h, real["block1"], n_heads)
    return _ref_block(h, real["block2"], n_heads)


# ------------------------------ main --------------------------------------------
if __name__ == "__main__":
    key = jax.random.PRNGKey(0)
    k_x, k_p = jax.random.split(key)
    x = jax.random.normal(k_x, (BATCH, SEQ_LEN, EMB_DIM), jnp.float32)
    real = init_articles_nn_params(k_p, SEQ_LEN, EMB_DIM, PROJ_DIM,
                                   N_HEADS, HIDDEN_DIM)
    packed = pack_params(real, N_HEADS, PROJ_DIM, HIDDEN_DIM)

    def run(single_buffer):
        fwd = jax.jit(functools.partial(
            articles_nn_forward, n_heads=N_HEADS, proj_real=PROJ_DIM,
            hidden_real=HIDDEN_DIM, b_tile=B_TILE,
            single_buffer_weights=single_buffer))
        out = fwd(x, packed)
        jax.block_until_ready(out)
        return out

    try:
        out = run(True)        # single-buffered grid-invariant weights
    except Exception:
        # pipeline_mode=pl.Buffered(1) not supported on this jax/libtpu build;
        # fall back to default (double-buffered) weight specs.
        out = run(False)

    assert out.shape == (BATCH, SEQ_LEN, HIDDEN_DIM), out.shape
    assert bool(jnp.all(jnp.isfinite(out)))

    # Self-consistency vs the f32 pure-JAX reference of the same (assumed) block
    # structure.  Loose tolerance: kernel uses bf16 activations/matmul inputs
    # (f32 accumulation) and an approx-reciprocal softmax.
    ref = articles_nn_reference(x, real, N_HEADS)
    max_err = float(jnp.max(jnp.abs(out - ref)))
    assert max_err < 2e-1, f"max |pallas - ref| = {max_err}"
    print("KERNEL_OK")
</pallas_src>

<mosaic_0001>
module attributes {stable_mosaic.version = 11 : i64} {
  func.func @_articles_fused_kernel(%arg0: i32, %arg1: memref<2x8x128xbf16, #tpu.memory_space<vmem>>, %arg2: memref<128x128xbf16, #tpu.memory_space<vmem>>, %arg3: memref<1x128xf32, #tpu.memory_space<vmem>>, %arg4: memref<16x128xf32, #tpu.memory_space<vmem>>, %arg5: memref<128x1536xbf16, #tpu.memory_space<vmem>>, %arg6: memref<1x1536xf32, #tpu.memory_space<vmem>>, %arg7: memref<512x128xbf16, #tpu.memory_space<vmem>>, %arg8: memref<1x128xf32, #tpu.memory_space<vmem>>, %arg9: memref<1x128xf32, #tpu.memory_space<vmem>>, %arg10: memref<1x128xf32, #tpu.memory_space<vmem>>, %arg11: memref<128x128xbf16, #tpu.memory_space<vmem>>, %arg12: memref<1x128xf32, #tpu.memory_space<vmem>>, %arg13: memref<128x128xbf16, #tpu.memory_space<vmem>>, %arg14: memref<1x128xf32, #tpu.memory_space<vmem>>, %arg15: memref<1x128xf32, #tpu.memory_space<vmem>>, %arg16: memref<1x128xf32, #tpu.memory_space<vmem>>, %arg17: memref<128x1536xbf16, #tpu.memory_space<vmem>>, %arg18: memref<1x1536xf32, #tpu.memory_space<vmem>>, %arg19: memref<512x128xbf16, #tpu.memory_space<vmem>>, %arg20: memref<1x128xf32, #tpu.memory_space<vmem>>, %arg21: memref<1x128xf32, #tpu.memory_space<vmem>>, %arg22: memref<1x128xf32, #tpu.memory_space<vmem>>, %arg23: memref<128x128xbf16, #tpu.memory_space<vmem>>, %arg24: memref<1x128xf32, #tpu.memory_space<vmem>>, %arg25: memref<128x128xbf16, #tpu.memory_space<vmem>>, %arg26: memref<1x128xf32, #tpu.memory_space<vmem>>, %arg27: memref<1x128xf32, #tpu.memory_space<vmem>>, %arg28: memref<1x128xf32, #tpu.memory_space<vmem>>, %arg29: memref<2x8x128xbf16, #tpu.memory_space<vmem>>) attributes {dimension_semantics = [#tpu.dimension_semantics<arbitrary>], iteration_bounds = array<i64: 2>, scalar_prefetch = 0 : i64, scratch_operands = 0 : i64, tpu.core_type = #tpu.core_type<tc>, window_params = [{transform_indices = @transform_0, window_bounds = array<i64: 2, 8, 128>}, {pipeline_mode = #tpu.pipeline_mode<synchronous>, transform_indices = @transform_1, window_bounds = array<i64: 128, 128>}, {pipeline_mode = #tpu.pipeline_mode<synchronous>, transform_indices = @transform_2, window_bounds = array<i64: 1, 128>}, {pipeline_mode = #tpu.pipeline_mode<synchronous>, transform_indices = @transform_3, window_bounds = array<i64: 16, 128>}, {pipeline_mode = #tpu.pipeline_mode<synchronous>, transform_indices = @transform_4, window_bounds = array<i64: 128, 1536>}, {pipeline_mode = #tpu.pipeline_mode<synchronous>, transform_indices = @transform_5, window_bounds = array<i64: 1, 1536>}, {pipeline_mode = #tpu.pipeline_mode<synchronous>, transform_indices = @transform_6, window_bounds = array<i64: 512, 128>}, {pipeline_mode = #tpu.pipeline_mode<synchronous>, transform_indices = @transform_7, window_bounds = array<i64: 1, 128>}, {pipeline_mode = #tpu.pipeline_mode<synchronous>, transform_indices = @transform_8, window_bounds = array<i64: 1, 128>}, {pipeline_mode = #tpu.pipeline_mode<synchronous>, transform_indices = @transform_9, window_bounds = array<i64: 1, 128>}, {pipeline_mode = #tpu.pipeline_mode<synchronous>, transform_indices = @transform_10, window_bounds = array<i64: 128, 128>}, {pipeline_mode = #tpu.pipeline_mode<synchronous>, transform_indices = @transform_11, window_bounds = array<i64: 1, 128>}, {pipeline_mode = #tpu.pipeline_mode<synchronous>, transform_indices = @transform_12, window_bounds = array<i64: 128, 128>}, {pipeline_mode = #tpu.pipeline_mode<synchronous>, transform_indices = @transform_13, window_bounds = array<i64: 1, 128>}, {pipeline_mode = #tpu.pipeline_mode<synchronous>, transform_indices = @transform_14, window_bounds = array<i64: 1, 128>}, {pipeline_mode = #tpu.pipeline_mode<synchronous>, transform_indices = @transform_15, window_bounds = array<i64: 1, 128>}, {pipeline_mode = #tpu.pipeline_mode<synchronous>, transform_indices = @transform_16, window_bounds = array<i64: 128, 1536>}, {pipeline_mode = #tpu.pipeline_mode<synchronous>, transform_indices = @transform_17, window_bounds = array<i64: 1, 1536>}, {pipeline_mode = #tpu.pipeline_mode<synchronous>, transform_indices = @transform_18, window_bounds = array<i64: 512, 128>}, {pipeline_mode = #tpu.pipeline_mode<synchronous>, transform_indices = @transform_19, window_bounds = array<i64: 1, 128>}, {pipeline_mode = #tpu.pipeline_mode<synchronous>, transform_indices = @transform_20, window_bounds = array<i64: 1, 128>}, {pipeline_mode = #tpu.pipeline_mode<synchronous>, transform_indices = @transform_21, window_bounds = array<i64: 1, 128>}, {pipeline_mode = #tpu.pipeline_mode<synchronous>, transform_indices = @transform_22, window_bounds = array<i64: 128, 128>}, {pipeline_mode = #tpu.pipeline_mode<synchronous>, transform_indices = @transform_23, window_bounds = array<i64: 1, 128>}, {pipeline_mode = #tpu.pipeline_mode<synchronous>, transform_indices = @transform_24, window_bounds = array<i64: 128, 128>}, {pipeline_mode = #tpu.pipeline_mode<synchronous>, transform_indices = @transform_25, window_bounds = array<i64: 1, 128>}, {pipeline_mode = #tpu.pipeline_mode<synchronous>, transform_indices = @transform_26, window_bounds = array<i64: 1, 128>}, {pipeline_mode = #tpu.pipeline_mode<synchronous>, transform_indices = @transform_27, window_bounds = array<i64: 1, 128>}, {transform_indices = @transform_28, window_bounds = array<i64: 2, 8, 128>}]} {
    %c0 = arith.constant 0 : index
    %c0_0 = arith.constant 0 : index
    %c0_1 = arith.constant 0 : index
    %0 = vector.load %arg1[%c0, %c0_0, %c0_1] : memref<2x8x128xbf16, #tpu.memory_space<vmem>>, vector<2x8x128xbf16>
    %1 = vector.shape_cast %0 : vector<2x8x128xbf16> to vector<16x128xbf16>
    %c0_2 = arith.constant 0 : index
    %c0_3 = arith.constant 0 : index
    %2 = vector.load %arg2[%c0_2, %c0_3] : memref<128x128xbf16, #tpu.memory_space<vmem>>, vector<128x128xbf16>
    %cst = arith.constant dense<0.000000e+00> : vector<16x128xf32>
    %3 = tpu.matmul %1, %2, %cst {dimension_numbers = #tpu.dot_dimension_numbers<[1], [0], [0], [1], [0, 0, 1, 1], [], []>} : vector<16x128xbf16>, vector<128x128xbf16>, vector<16x128xf32> -> vector<16x128xf32>
    %c0_4 = arith.constant 0 : index
    %c0_5 = arith.constant 0 : index
    %4 = vector.load %arg3[%c0_4, %c0_5] : memref<1x128xf32, #tpu.memory_space<vmem>>, vector<1x128xf32>
    %5 = vector.broadcast %4 : vector<1x128xf32> to vector<16x128xf32>
    %6 = arith.addf %3, %5 : vector<16x128xf32>
    %c0_6 = arith.constant 0 : index
    %c0_7 = arith.constant 0 : index
    %7 = vector.load %arg4[%c0_6, %c0_7] : memref<16x128xf32, #tpu.memory_space<vmem>>, vector<16x128xf32>
    %8 = arith.addf %6, %7 : vector<16x128xf32>
    %9 = arith.truncf %8 : vector<16x128xf32> to vector<16x128xbf16>
    %c0_8 = arith.constant 0 : index
    %c0_9 = arith.constant 0 : index
    %10 = vector.load %arg5[%c0_8, %c0_9] : memref<128x1536xbf16, #tpu.memory_space<vmem>>, vector<128x1536xbf16>
    %cst_10 = arith.constant dense<0.000000e+00> : vector<16x1536xf32>
    %11 = tpu.matmul %9, %10, %cst_10 {dimension_numbers = #tpu.dot_dimension_numbers<[1], [0], [0], [1], [0, 0, 1, 1], [], []>} : vector<16x128xbf16>, vector<128x1536xbf16>, vector<16x1536xf32> -> vector<16x1536xf32>
    %c0_11 = arith.constant 0 : index
    %c0_12 = arith.constant 0 : index
    %12 = vector.load %arg6[%c0_11, %c0_12] : memref<1x1536xf32, #tpu.memory_space<vmem>>, vector<1x1536xf32>
    %13 = vector.broadcast %12 : vector<1x1536xf32> to vector<16x1536xf32>
    %14 = arith.addf %11, %13 : vector<16x1536xf32>
    %15 = vector.extract_strided_slice %14 {offsets = [0, 0], sizes = [16, 128], strides = [1, 1]} : vector<16x1536xf32> to vector<16x128xf32>
    %16 = vector.shape_cast %15 : vector<16x128xf32> to vector<2x8x128xf32>
    %17 = arith.truncf %16 : vector<2x8x128xf32> to vector<2x8x128xbf16>
    %18 = vector.extract_strided_slice %14 {offsets = [0, 512], sizes = [16, 128], strides = [1, 1]} : vector<16x1536xf32> to vector<16x128xf32>
    %19 = vector.shape_cast %18 : vector<16x128xf32> to vector<2x8x128xf32>
    %20 = arith.truncf %19 : vector<2x8x128xf32> to vector<2x8x128xbf16>
    %21 = vector.extract_strided_slice %14 {offsets = [0, 1024], sizes = [16, 128], strides = [1, 1]} : vector<16x1536xf32> to vector<16x128xf32>
    %22 = vector.shape_cast %21 : vector<16x128xf32> to vector<2x8x128xf32>
    %23 = arith.truncf %22 : vector<2x8x128xf32> to vector<2x8x128xbf16>
    %cst_13 = arith.constant dense<0.000000e+00> : vector<2x8x8xf32>
    %24 = tpu.matmul %17, %20, %cst_13 {dimension_numbers = #tpu.dot_dimension_numbers<[2], [2], [1], [1], [0, 0, 0, 1, 1, 1], [0], [0]>} : vector<2x8x128xbf16>, vector<2x8x128xbf16>, vector<2x8x8xf32> -> vector<2x8x8xf32>
    %cst_14 = arith.constant 2.500000e-01 : f32
    %25 = vector.broadcast %cst_14 : f32 to vector<2x8x8xf32>
    %26 = arith.mulf %24, %25 : vector<2x8x8xf32>
    %cst_15 = arith.constant dense<0xFF800000> : vector<2x8xf32>
    %27 = vector.multi_reduction <maximumf>, %26, %cst_15 [2] : vector<2x8x8xf32> to vector<2x8xf32>
    %28 = vector.shape_cast %27 : vector<2x8xf32> to vector<2x8x1xf32>
    %29 = vector.broadcast %28 : vector<2x8x1xf32> to vector<2x8x8xf32>
    %30 = arith.subf %26, %29 : vector<2x8x8xf32>
    %31 = math.exp %30 : vector<2x8x8xf32>
    %cst_16 = arith.constant dense<0.000000e+00> : vector<2x8xf32>
    %32 = vector.multi_reduction <add>, %31, %cst_16 [2] : vector<2x8x8xf32> to vector<2x8xf32>
    %33 = vector.shape_cast %32 : vector<2x8xf32> to vector<2x8x1xf32>
    %34 = tpu.reciprocal %33 {approx = true} : vector<2x8x1xf32> -> vector<2x8x1xf32>
    %35 = vector.broadcast %34 : vector<2x8x1xf32> to vector<2x8x8xf32>
    %36 = arith.mulf %31, %35 : vector<2x8x8xf32>
    %37 = arith.truncf %36 : vector<2x8x8xf32> to vector<2x8x8xbf16>
    %cst_17 = arith.constant dense<0.000000e+00> : vector<2x8x128xf32>
    %38 = tpu.matmul %37, %23, %cst_17 {dimension_numbers = #tpu.dot_dimension_numbers<[2], [1], [1], [2], [0, 0, 0, 1, 1, 2], [0], [0]>} : vector<2x8x8xbf16>, vector<2x8x128xbf16>, vector<2x8x128xf32> -> vector<2x8x128xf32>
    %39 = vector.shape_cast %38 : vector<2x8x128xf32> to vector<16x128xf32>
    %40 = arith.truncf %39 : vector<16x128xf32> to vector<16x128xbf16>
    %c0_18 = arith.constant 0 : index
    %c0_19 = arith.constant 0 : index
    %41 = vector.load %arg7[%c0_18, %c0_19] : memref<512x128xbf16, #tpu.memory_space<vmem>>, vector<128x128xbf16>
    %cst_20 = arith.constant dense<0.000000e+00> : vector<16x128xf32>
    %42 = tpu.matmul %40, %41, %cst_20 {dimension_numbers = #tpu.dot_dimension_numbers<[1], [0], [0], [1], [0, 0, 1, 1], [], []>} : vector<16x128xbf16>, vector<128x128xbf16>, vector<16x128xf32> -> vector<16x128xf32>
    %43 = vector.extract_strided_slice %14 {offsets = [0, 128], sizes = [16, 128], strides = [1, 1]} : vector<16x1536xf32> to vector<16x128xf32>
    %44 = vector.shape_cast %43 : vector<16x128xf32> to vector<2x8x128xf32>
    %45 = arith.truncf %44 : vector<2x8x128xf32> to vector<2x8x128xbf16>
    %46 = vector.extract_strided_slice %14 {offsets = [0, 640], sizes = [16, 128], strides = [1, 1]} : vector<16x1536xf32> to vector<16x128xf32>
    %47 = vector.shape_cast %46 : vector<16x128xf32> to vector<2x8x128xf32>
    %48 = arith.truncf %47 : vector<2x8x128xf32> to vector<2x8x128xbf16>
    %49 = vector.extract_strided_slice %14 {offsets = [0, 1152], sizes = [16, 128], strides = [1, 1]} : vector<16x1536xf32> to vector<16x128xf32>
    %50 = vector.shape_cast %49 : vector<16x128xf32> to vector<2x8x128xf32>
    %51 = arith.truncf %50 : vector<2x8x128xf32> to vector<2x8x128xbf16>
    %cst_21 = arith.constant dense<0.000000e+00> : vector<2x8x8xf32>
    %52 = tpu.matmul %45, %48, %cst_21 {dimension_numbers = #tpu.dot_dimension_numbers<[2], [2], [1], [1], [0, 0, 0, 1, 1, 1], [0], [0]>} : vector<2x8x128xbf16>, vector<2x8x128xbf16>, vector<2x8x8xf32> -> vector<2x8x8xf32>
    %cst_22 = arith.constant 2.500000e-01 : f32
    %53 = vector.broadcast %cst_22 : f32 to vector<2x8x8xf32>
    %54 = arith.mulf %52, %53 : vector<2x8x8xf32>
    %cst_23 = arith.constant dense<0xFF800000> : vector<2x8xf32>
    %55 = vector.multi_reduction <maximumf>, %54, %cst_23 [2] : vector<2x8x8xf32> to vector<2x8xf32>
    %56 = vector.shape_cast %55 : vector<2x8xf32> to vector<2x8x1xf32>
    %57 = vector.broadcast %56 : vector<2x8x1xf32> to vector<2x8x8xf32>
    %58 = arith.subf %54, %57 : vector<2x8x8xf32>
    %59 = math.exp %58 : vector<2x8x8xf32>
    %cst_24 = arith.constant dense<0.000000e+00> : vector<2x8xf32>
    %60 = vector.multi_reduction <add>, %59, %cst_24 [2] : vector<2x8x8xf32> to vector<2x8xf32>
    %61 = vector.shape_cast %60 : vector<2x8xf32> to vector<2x8x1xf32>
    %62 = tpu.reciprocal %61 {approx = true} : vector<2x8x1xf32> -> vector<2x8x1xf32>
    %63 = vector.broadcast %62 : vector<2x8x1xf32> to vector<2x8x8xf32>
    %64 = arith.mulf %59, %63 : vector<2x8x8xf32>
    %65 = arith.truncf %64 : vector<2x8x8xf32> to vector<2x8x8xbf16>
    %cst_25 = arith.constant dense<0.000000e+00> : vector<2x8x128xf32>
    %66 = tpu.matmul %65, %51, %cst_25 {dimension_numbers = #tpu.dot_dimension_numbers<[2], [1], [1], [2], [0, 0, 0, 1, 1, 2], [0], [0]>} : vector<2x8x8xbf16>, vector<2x8x128xbf16>, vector<2x8x128xf32> -> vector<2x8x128xf32>
    %67 = vector.shape_cast %66 : vector<2x8x128xf32> to vector<16x128xf32>
    %68 = arith.truncf %67 : vector<16x128xf32> to vector<16x128xbf16>
    %c128 = arith.constant 128 : index
    %c0_26 = arith.constant 0 : index
    %69 = vector.load %arg7[%c128, %c0_26] : memref<512x128xbf16, #tpu.memory_space<vmem>>, vector<128x128xbf16>
    %cst_27 = arith.constant dense<0.000000e+00> : vector<16x128xf32>
    %70 = tpu.matmul %68, %69, %cst_27 {dimension_numbers = #tpu.dot_dimension_numbers<[1], [0], [0], [1], [0, 0, 1, 1], [], []>} : vector<16x128xbf16>, vector<128x128xbf16>, vector<16x128xf32> -> vector<16x128xf32>
    %71 = arith.addf %42, %70 : vector<16x128xf32>
    %72 = vector.extract_strided_slice %14 {offsets = [0, 256], sizes = [16, 128], strides = [1, 1]} : vector<16x1536xf32> to vector<16x128xf32>
    %73 = vector.shape_cast %72 : vector<16x128xf32> to vector<2x8x128xf32>
    %74 = arith.truncf %73 : vector<2x8x128xf32> to vector<2x8x128xbf16>
    %75 = vector.extract_strided_slice %14 {offsets = [0, 768], sizes = [16, 128], strides = [1, 1]} : vector<16x1536xf32> to vector<16x128xf32>
    %76 = vector.shape_cast %75 : vector<16x128xf32> to vector<2x8x128xf32>
    %77 = arith.truncf %76 : vector<2x8x128xf32> to vector<2x8x128xbf16>
    %78 = vector.extract_strided_slice %14 {offsets = [0, 1280], sizes = [16, 128], strides = [1, 1]} : vector<16x1536xf32> to vector<16x128xf32>
    %79 = vector.shape_cast %78 : vector<16x128xf32> to vector<2x8x128xf32>
    %80 = arith.truncf %79 : vector<2x8x128xf32> to vector<2x8x128xbf16>
    %cst_28 = arith.constant dense<0.000000e+00> : vector<2x8x8xf32>
    %81 = tpu.matmul %74, %77, %cst_28 {dimension_numbers = #tpu.dot_dimension_numbers<[2], [2], [1], [1], [0, 0, 0, 1, 1, 1], [0], [0]>} : vector<2x8x128xbf16>, vector<2x8x128xbf16>, vector<2x8x8xf32> -> vector<2x8x8xf32>
    %cst_29 = arith.constant 2.500000e-01 : f32
    %82 = vector.broadcast %cst_29 : f32 to vector<2x8x8xf32>
    %83 = arith.mulf %81, %82 : vector<2x8x8xf32>
    %cst_30 = arith.constant dense<0xFF800000> : vector<2x8xf32>
    %84 = vector.multi_reduction <maximumf>, %83, %cst_30 [2] : vector<2x8x8xf32> to vector<2x8xf32>
    %85 = vector.shape_cast %84 : vector<2x8xf32> to vector<2x8x1xf32>
    %86 = vector.broadcast %85 : vector<2x8x1xf32> to vector<2x8x8xf32>
    %87 = arith.subf %83, %86 : vector<2x8x8xf32>
    %88 = math.exp %87 : vector<2x8x8xf32>
    %cst_31 = arith.constant dense<0.000000e+00> : vector<2x8xf32>
    %89 = vector.multi_reduction <add>, %88, %cst_31 [2] : vector<2x8x8xf32> to vector<2x8xf32>
    %90 = vector.shape_cast %89 : vector<2x8xf32> to vector<2x8x1xf32>
    %91 = tpu.reciprocal %90 {approx = true} : vector<2x8x1xf32> -> vector<2x8x1xf32>
    %92 = vector.broadcast %91 : vector<2x8x1xf32> to vector<2x8x8xf32>
    %93 = arith.mulf %88, %92 : vector<2x8x8xf32>
    %94 = arith.truncf %93 : vector<2x8x8xf32> to vector<2x8x8xbf16>
    %cst_32 = arith.constant dense<0.000000e+00> : vector<2x8x128xf32>
    %95 = tpu.matmul %94, %80, %cst_32 {dimension_numbers = #tpu.dot_dimension_numbers<[2], [1], [1], [2], [0, 0, 0, 1, 1, 2], [0], [0]>} : vector<2x8x8xbf16>, vector<2x8x128xbf16>, vector<2x8x128xf32> -> vector<2x8x128xf32>
    %96 = vector.shape_cast %95 : vector<2x8x128xf32> to vector<16x128xf32>
    %97 = arith.truncf %96 : vector<16x128xf32> to vector<16x128xbf16>
    %c256 = arith.constant 256 : index
    %c0_33 = arith.constant 0 : index
    %98 = vector.load %arg7[%c256, %c0_33] : memref<512x128xbf16, #tpu.memory_space<vmem>>, vector<128x128xbf16>
    %cst_34 = arith.constant dense<0.000000e+00> : vector<16x128xf32>
    %99 = tpu.matmul %97, %98, %cst_34 {dimension_numbers = #tpu.dot_dimension_numbers<[1], [0], [0], [1], [0, 0, 1, 1], [], []>} : vector<16x128xbf16>, vector<128x128xbf16>, vector<16x128xf32> -> vector<16x128xf32>
    %100 = arith.addf %71, %99 : vector<16x128xf32>
    %101 = vector.extract_strided_slice %14 {offsets = [0, 384], sizes = [16, 128], strides = [1, 1]} : vector<16x1536xf32> to vector<16x128xf32>
    %102 = vector.shape_cast %101 : vector<16x128xf32> to vector<2x8x128xf32>
    %103 = arith.truncf %102 : vector<2x8x128xf32> to vector<2x8x128xbf16>
    %104 = vector.extract_strided_slice %14 {offsets = [0, 896], sizes = [16, 128], strides = [1, 1]} : vector<16x1536xf32> to vector<16x128xf32>
    %105 = vector.shape_cast %104 : vector<16x128xf32> to vector<2x8x128xf32>
    %106 = arith.truncf %105 : vector<2x8x128xf32> to vector<2x8x128xbf16>
    %107 = vector.extract_strided_slice %14 {offsets = [0, 1408], sizes = [16, 128], strides = [1, 1]} : vector<16x1536xf32> to vector<16x128xf32>
    %108 = vector.shape_cast %107 : vector<16x128xf32> to vector<2x8x128xf32>
    %109 = arith.truncf %108 : vector<2x8x128xf32> to vector<2x8x128xbf16>
    %cst_35 = arith.constant dense<0.000000e+00> : vector<2x8x8xf32>
    %110 = tpu.matmul %103, %106, %cst_35 {dimension_numbers = #tpu.dot_dimension_numbers<[2], [2], [1], [1], [0, 0, 0, 1, 1, 1], [0], [0]>} : vector<2x8x128xbf16>, vector<2x8x128xbf16>, vector<2x8x8xf32> -> vector<2x8x8xf32>
    %cst_36 = arith.constant 2.500000e-01 : f32
    %111 = vector.broadcast %cst_36 : f32 to vector<2x8x8xf32>
    %112 = arith.mulf %110, %111 : vector<2x8x8xf32>
    %cst_37 = arith.constant dense<0xFF800000> : vector<2x8xf32>
    %113 = vector.multi_reduction <maximumf>, %112, %cst_37 [2] : vector<2x8x8xf32> to vector<2x8xf32>
    %114 = vector.shape_cast %113 : vector<2x8xf32> to vector<2x8x1xf32>
    %115 = vector.broadcast %114 : vector<2x8x1xf32> to vector<2x8x8xf32>
    %116 = arith.subf %112, %115 : vector<2x8x8xf32>
    %117 = math.exp %116 : vector<2x8x8xf32>
    %cst_38 = arith.constant dense<0.000000e+00> : vector<2x8xf32>
    %118 = vector.multi_reduction <add>, %117, %cst_38 [2] : vector<2x8x8xf32> to vector<2x8xf32>
    %119 = vector.shape_cast %118 : vector<2x8xf32> to vector<2x8x1xf32>
    %120 = tpu.reciprocal %119 {approx = true} : vector<2x8x1xf32> -> vector<2x8x1xf32>
    %121 = vector.broadcast %120 : vector<2x8x1xf32> to vector<2x8x8xf32>
    %122 = arith.mulf %117, %121 : vector<2x8x8xf32>
    %123 = arith.truncf %122 : vector<2x8x8xf32> to vector<2x8x8xbf16>
    %cst_39 = arith.constant dense<0.000000e+00> : vector<2x8x128xf32>
    %124 = tpu.matmul %123, %109, %cst_39 {dimension_numbers = #tpu.dot_dimension_numbers<[2], [1], [1], [2], [0, 0, 0, 1, 1, 2], [0], [0]>} : vector<2x8x8xbf16>, vector<2x8x128xbf16>, vector<2x8x128xf32> -> vector<2x8x128xf32>
    %125 = vector.shape_cast %124 : vector<2x8x128xf32> to vector<16x128xf32>
    %126 = arith.truncf %125 : vector<16x128xf32> to vector<16x128xbf16>
    %c384 = arith.constant 384 : index
    %c0_40 = arith.constant 0 : index
    %127 = vector.load %arg7[%c384, %c0_40] : memref<512x128xbf16, #tpu.memory_space<vmem>>, vector<128x128xbf16>
    %cst_41 = arith.constant dense<0.000000e+00> : vector<16x128xf32>
    %128 = tpu.matmul %126, %127, %cst_41 {dimension_numbers = #tpu.dot_dimension_numbers<[1], [0], [0], [1], [0, 0, 1, 1], [], []>} : vector<16x128xbf16>, vector<128x128xbf16>, vector<16x128xf32> -> vector<16x128xf32>
    %129 = arith.addf %100, %128 : vector<16x128xf32>
    %c0_42 = arith.constant 0 : index
    %c0_43 = arith.constant 0 : index
    %130 = vector.load %arg8[%c0_42, %c0_43] : memref<1x128xf32, #tpu.memory_space<vmem>>, vector<1x128xf32>
    %131 = vector.broadcast %130 : vector<1x128xf32> to vector<16x128xf32>
    %132 = arith.addf %129, %131 : vector<16x128xf32>
    %133 = arith.addf %132, %8 : vector<16x128xf32>
    %c0_44 = arith.constant 0 : index
    %c0_45 = arith.constant 0 : index
    %134 = vector.load %arg9[%c0_44, %c0_45] : memref<1x128xf32, #tpu.memory_space<vmem>>, vector<1x128xf32>
    %c0_46 = arith.constant 0 : index
    %c0_47 = arith.constant 0 : index
    %135 = vector.load %arg10[%c0_46, %c0_47] : memref<1x128xf32, #tpu.memory_space<vmem>>, vector<1x128xf32>
    %136 = tpu.iota {dimensions = array<i32: 1>} : vector<16x128xi32>
    %c64_i32 = arith.constant 64 : i32
    %137 = vector.broadcast %c64_i32 : i32 to vector<16x128xi32>
    %138 = arith.cmpi slt, %136, %137 : vector<16x128xi32>
    %cst_48 = arith.constant dense<0.000000e+00> : vector<16xf32>
    %139 = vector.multi_reduction <add>, %133, %cst_48 [1] : vector<16x128xf32> to vector<16xf32>
    %140 = vector.shape_cast %139 : vector<16xf32> to vector<16x1xf32>
    %cst_49 = arith.constant 1.562500e-02 : f32
    %141 = vector.broadcast %cst_49 : f32 to vector<16x1xf32>
    %142 = arith.mulf %140, %141 : vector<16x1xf32>
    %143 = vector.broadcast %142 : vector<16x1xf32> to vector<16x128xf32>
    %144 = arith.subf %133, %143 : vector<16x128xf32>
    %cst_50 = arith.constant 0.000000e+00 : f32
    %145 = vector.broadcast %cst_50 : f32 to vector<16x128xf32>
    %146 = arith.select %138, %144, %145 : vector<16x128xi1>, vector<16x128xf32>
    %147 = arith.mulf %146, %146 : vector<16x128xf32>
    %cst_51 = arith.constant dense<0.000000e+00> : vector<16xf32>
    %148 = vector.multi_reduction <add>, %147, %cst_51 [1] : vector<16x128xf32> to vector<16xf32>
    %149 = vector.shape_cast %148 : vector<16xf32> to vector<16x1xf32>
    %cst_52 = arith.constant 1.562500e-02 : f32
    %150 = vector.broadcast %cst_52 : f32 to vector<16x1xf32>
    %151 = arith.mulf %149, %150 : vector<16x1xf32>
    %cst_53 = arith.constant 9.99999974E-6 : f32
    %152 = vector.broadcast %cst_53 : f32 to vector<16x1xf32>
    %153 = arith.addf %151, %152 : vector<16x1xf32>
    %154 = math.rsqrt %153 : vector<16x1xf32>
    %155 = vector.broadcast %154 : vector<16x1xf32> to vector<16x128xf32>
    %156 = arith.mulf %146, %155 : vector<16x128xf32>
    %157 = vector.broadcast %134 : vector<1x128xf32> to vector<16x128xf32>
    %158 = arith.mulf %156, %157 : vector<16x128xf32>
    %159 = vector.broadcast %135 : vector<1x128xf32> to vector<16x128xf32>
    %160 = arith.addf %158, %159 : vector<16x128xf32>
    %161 = arith.truncf %160 : vector<16x128xf32> to vector<16x128xbf16>
    %c0_54 = arith.constant 0 : index
    %c0_55 = arith.constant 0 : index
    %162 = vector.load %arg11[%c0_54, %c0_55] : memref<128x128xbf16, #tpu.memory_space<vmem>>, vector<128x128xbf16>
    %cst_56 = arith.constant dense<0.000000e+00> : vector<16x128xf32>
    %163 = tpu.matmul %161, %162, %cst_56 {dimension_numbers = #tpu.dot_dimension_numbers<[1], [0], [0], [1], [0, 0, 1, 1], [], []>} : vector<16x128xbf16>, vector<128x128xbf16>, vector<16x128xf32> -> vector<16x128xf32>
    %c0_57 = arith.constant 0 : index
    %c0_58 = arith.constant 0 : index
    %164 = vector.load %arg12[%c0_57, %c0_58] : memref<1x128xf32, #tpu.memory_space<vmem>>, vector<1x128xf32>
    %165 = vector.broadcast %164 : vector<1x128xf32> to vector<16x128xf32>
    %166 = arith.addf %163, %165 : vector<16x128xf32>
    %cst_59 = arith.constant 0.000000e+00 : f32
    %167 = vector.broadcast %cst_59 : f32 to vector<16x128xf32>
    %168 = arith.maximumf %166, %167 : vector<16x128xf32>
    %169 = arith.truncf %168 : vector<16x128xf32> to vector<16x128xbf16>
    %c0_60 = arith.constant 0 : index
    %c0_61 = arith.constant 0 : index
    %170 = vector.load %arg13[%c0_60, %c0_61] : memref<128x128xbf16, #tpu.memory_space<vmem>>, vector<128x128xbf16>
    %cst_62 = arith.constant dense<0.000000e+00> : vector<16x128xf32>
    %171 = tpu.matmul %169, %170, %cst_62 {dimension_numbers = #tpu.dot_dimension_numbers<[1], [0], [0], [1], [0, 0, 1, 1], [], []>} : vector<16x128xbf16>, vector<128x128xbf16>, vector<16x128xf32> -> vector<16x128xf32>
    %c0_63 = arith.constant 0 : index
    %c0_64 = arith.constant 0 : index
    %172 = vector.load %arg14[%c0_63, %c0_64] : memref<1x128xf32, #tpu.memory_space<vmem>>, vector<1x128xf32>
    %173 = vector.broadcast %172 : vector<1x128xf32> to vector<16x128xf32>
    %174 = arith.addf %171, %173 : vector<16x128xf32>
    %c0_65 = arith.constant 0 : index
    %c0_66 = arith.constant 0 : index
    %175 = vector.load %arg15[%c0_65, %c0_66] : memref<1x128xf32, #tpu.memory_space<vmem>>, vector<1x128xf32>
    %c0_67 = arith.constant 0 : index
    %c0_68 = arith.constant 0 : index
    %176 = vector.load %arg16[%c0_67, %c0_68] : memref<1x128xf32, #tpu.memory_space<vmem>>, vector<1x128xf32>
    %177 = tpu.iota {dimensions = array<i32: 1>} : vector<16x128xi32>
    %c32_i32 = arith.constant 32 : i32
    %178 = vector.broadcast %c32_i32 : i32 to vector<16x128xi32>
    %179 = arith.cmpi slt, %177, %178 : vector<16x128xi32>
    %cst_69 = arith.constant dense<0.000000e+00> : vector<16xf32>
    %180 = vector.multi_reduction <add>, %174, %cst_69 [1] : vector<16x128xf32> to vector<16xf32>
    %181 = vector.shape_cast %180 : vector<16xf32> to vector<16x1xf32>
    %cst_70 = arith.constant 3.125000e-02 : f32
    %182 = vector.broadcast %cst_70 : f32 to vector<16x1xf32>
    %183 = arith.mulf %181, %182 : vector<16x1xf32>
    %184 = vector.broadcast %183 : vector<16x1xf32> to vector<16x128xf32>
    %185 = arith.subf %174, %184 : vector<16x128xf32>
    %cst_71 = arith.constant 0.000000e+00 : f32
    %186 = vector.broadcast %cst_71 : f32 to vector<16x128xf32>
    %187 = arith.select %179, %185, %186 : vector<16x128xi1>, vector<16x128xf32>
    %188 = arith.mulf %187, %187 : vector<16x128xf32>
    %cst_72 = arith.constant dense<0.000000e+00> : vector<16xf32>
    %189 = vector.multi_reduction <add>, %188, %cst_72 [1] : vector<16x128xf32> to vector<16xf32>
    %190 = vector.shape_cast %189 : vector<16xf32> to vector<16x1xf32>
    %cst_73 = arith.constant 3.125000e-02 : f32
    %191 = vector.broadcast %cst_73 : f32 to vector<16x1xf32>
    %192 = arith.mulf %190, %191 : vector<16x1xf32>
    %cst_74 = arith.constant 9.99999974E-6 : f32
    %193 = vector.broadcast %cst_74 : f32 to vector<16x1xf32>
    %194 = arith.addf %192, %193 : vector<16x1xf32>
    %195 = math.rsqrt %194 : vector<16x1xf32>
    %196 = vector.broadcast %195 : vector<16x1xf32> to vector<16x128xf32>
    %197 = arith.mulf %187, %196 : vector<16x128xf32>
    %198 = vector.broadcast %175 : vector<1x128xf32> to vector<16x128xf32>
    %199 = arith.mulf %197, %198 : vector<16x128xf32>
    %200 = vector.broadcast %176 : vector<1x128xf32> to vector<16x128xf32>
    %201 = arith.addf %199, %200 : vector<16x128xf32>
    %202 = arith.truncf %201 : vector<16x128xf32> to vector<16x128xbf16>
    %c0_75 = arith.constant 0 : index
    %c0_76 = arith.constant 0 : index
    %203 = vector.load %arg17[%c0_75, %c0_76] : memref<128x1536xbf16, #tpu.memory_space<vmem>>, vector<128x1536xbf16>
    %cst_77 = arith.constant dense<0.000000e+00> : vector<16x1536xf32>
    %204 = tpu.matmul %202, %203, %cst_77 {dimension_numbers = #tpu.dot_dimension_numbers<[1], [0], [0], [1], [0, 0, 1, 1], [], []>} : vector<16x128xbf16>, vector<128x1536xbf16>, vector<16x1536xf32> -> vector<16x1536xf32>
    %c0_78 = arith.constant 0 : index
    %c0_79 = arith.constant 0 : index
    %205 = vector.load %arg18[%c0_78, %c0_79] : memref<1x1536xf32, #tpu.memory_space<vmem>>, vector<1x1536xf32>
    %206 = vector.broadcast %205 : vector<1x1536xf32> to vector<16x1536xf32>
    %207 = arith.addf %204, %206 : vector<16x1536xf32>
    %208 = vector.extract_strided_slice %207 {offsets = [0, 0], sizes = [16, 128], strides = [1, 1]} : vector<16x1536xf32> to vector<16x128xf32>
    %209 = vector.shape_cast %208 : vector<16x128xf32> to vector<2x8x128xf32>
    %210 = arith.truncf %209 : vector<2x8x128xf32> to vector<2x8x128xbf16>
    %211 = vector.extract_strided_slice %207 {offsets = [0, 512], sizes = [16, 128], strides = [1, 1]} : vector<16x1536xf32> to vector<16x128xf32>
    %212 = vector.shape_cast %211 : vector<16x128xf32> to vector<2x8x128xf32>
    %213 = arith.truncf %212 : vector<2x8x128xf32> to vector<2x8x128xbf16>
    %214 = vector.extract_strided_slice %207 {offsets = [0, 1024], sizes = [16, 128], strides = [1, 1]} : vector<16x1536xf32> to vector<16x128xf32>
    %215 = vector.shape_cast %214 : vector<16x128xf32> to vector<2x8x128xf32>
    %216 = arith.truncf %215 : vector<2x8x128xf32> to vector<2x8x128xbf16>
    %cst_80 = arith.constant dense<0.000000e+00> : vector<2x8x8xf32>
    %217 = tpu.matmul %210, %213, %cst_80 {dimension_numbers = #tpu.dot_dimension_numbers<[2], [2], [1], [1], [0, 0, 0, 1, 1, 1], [0], [0]>} : vector<2x8x128xbf16>, vector<2x8x128xbf16>, vector<2x8x8xf32> -> vector<2x8x8xf32>
    %cst_81 = arith.constant 0.353553385 : f32
    %218 = vector.broadcast %cst_81 : f32 to vector<2x8x8xf32>
    %219 = arith.mulf %217, %218 : vector<2x8x8xf32>
    %cst_82 = arith.constant dense<0xFF800000> : vector<2x8xf32>
    %220 = vector.multi_reduction <maximumf>, %219, %cst_82 [2] : vector<2x8x8xf32> to vector<2x8xf32>
    %221 = vector.shape_cast %220 : vector<2x8xf32> to vector<2x8x1xf32>
    %222 = vector.broadcast %221 : vector<2x8x1xf32> to vector<2x8x8xf32>
    %223 = arith.subf %219, %222 : vector<2x8x8xf32>
    %224 = math.exp %223 : vector<2x8x8xf32>
    %cst_83 = arith.constant dense<0.000000e+00> : vector<2x8xf32>
    %225 = vector.multi_reduction <add>, %224, %cst_83 [2] : vector<2x8x8xf32> to vector<2x8xf32>
    %226 = vector.shape_cast %225 : vector<2x8xf32> to vector<2x8x1xf32>
    %227 = tpu.reciprocal %226 {approx = true} : vector<2x8x1xf32> -> vector<2x8x1xf32>
    %228 = vector.broadcast %227 : vector<2x8x1xf32> to vector<2x8x8xf32>
    %229 = arith.mulf %224, %228 : vector<2x8x8xf32>
    %230 = arith.truncf %229 : vector<2x8x8xf32> to vector<2x8x8xbf16>
    %cst_84 = arith.constant dense<0.000000e+00> : vector<2x8x128xf32>
    %231 = tpu.matmul %230, %216, %cst_84 {dimension_numbers = #tpu.dot_dimension_numbers<[2], [1], [1], [2], [0, 0, 0, 1, 1, 2], [0], [0]>} : vector<2x8x8xbf16>, vector<2x8x128xbf16>, vector<2x8x128xf32> -> vector<2x8x128xf32>
    %232 = vector.shape_cast %231 : vector<2x8x128xf32> to vector<16x128xf32>
    %233 = arith.truncf %232 : vector<16x128xf32> to vector<16x128xbf16>
    %c0_85 = arith.constant 0 : index
    %c0_86 = arith.constant 0 : index
    %234 = vector.load %arg19[%c0_85, %c0_86] : memref<512x128xbf16, #tpu.memory_space<vmem>>, vector<128x128xbf16>
    %cst_87 = arith.constant dense<0.000000e+00> : vector<16x128xf32>
    %235 = tpu.matmul %233, %234, %cst_87 {dimension_numbers = #tpu.dot_dimension_numbers<[1], [0], [0], [1], [0, 0, 1, 1], [], []>} : vector<16x128xbf16>, vector<128x128xbf16>, vector<16x128xf32> -> vector<16x128xf32>
    %236 = vector.extract_strided_slice %207 {offsets = [0, 128], sizes = [16, 128], strides = [1, 1]} : vector<16x1536xf32> to vector<16x128xf32>
    %237 = vector.shape_cast %236 : vector<16x128xf32> to vector<2x8x128xf32>
    %238 = arith.truncf %237 : vector<2x8x128xf32> to vector<2x8x128xbf16>
    %239 = vector.extract_strided_slice %207 {offsets = [0, 640], sizes = [16, 128], strides = [1, 1]} : vector<16x1536xf32> to vector<16x128xf32>
    %240 = vector.shape_cast %239 : vector<16x128xf32> to vector<2x8x128xf32>
    %241 = arith.truncf %240 : vector<2x8x128xf32> to vector<2x8x128xbf16>
    %242 = vector.extract_strided_slice %207 {offsets = [0, 1152], sizes = [16, 128], strides = [1, 1]} : vector<16x1536xf32> to vector<16x128xf32>
    %243 = vector.shape_cast %242 : vector<16x128xf32> to vector<2x8x128xf32>
    %244 = arith.truncf %243 : vector<2x8x128xf32> to vector<2x8x128xbf16>
    %cst_88 = arith.constant dense<0.000000e+00> : vector<2x8x8xf32>
    %245 = tpu.matmul %238, %241, %cst_88 {dimension_numbers = #tpu.dot_dimension_numbers<[2], [2], [1], [1], [0, 0, 0, 1, 1, 1], [0], [0]>} : vector<2x8x128xbf16>, vector<2x8x128xbf16>, vector<2x8x8xf32> -> vector<2x8x8xf32>
    %cst_89 = arith.constant 0.353553385 : f32
    %246 = vector.broadcast %cst_89 : f32 to vector<2x8x8xf32>
    %247 = arith.mulf %245, %246 : vector<2x8x8xf32>
    %cst_90 = arith.constant dense<0xFF800000> : vector<2x8xf32>
    %248 = vector.multi_reduction <maximumf>, %247, %cst_90 [2] : vector<2x8x8xf32> to vector<2x8xf32>
    %249 = vector.shape_cast %248 : vector<2x8xf32> to vector<2x8x1xf32>
    %250 = vector.broadcast %249 : vector<2x8x1xf32> to vector<2x8x8xf32>
    %251 = arith.subf %247, %250 : vector<2x8x8xf32>
    %252 = math.exp %251 : vector<2x8x8xf32>
    %cst_91 = arith.constant dense<0.000000e+00> : vector<2x8xf32>
    %253 = vector.multi_reduction <add>, %252, %cst_91 [2] : vector<2x8x8xf32> to vector<2x8xf32>
    %254 = vector.shape_cast %253 : vector<2x8xf32> to vector<2x8x1xf32>
    %255 = tpu.reciprocal %254 {approx = true} : vector<2x8x1xf32> -> vector<2x8x1xf32>
    %256 = vector.broadcast %255 : vector<2x8x1xf32> to vector<2x8x8xf32>
    %257 = arith.mulf %252, %256 : vector<2x8x8xf32>
    %258 = arith.truncf %257 : vector<2x8x8xf32> to vector<2x8x8xbf16>
    %cst_92 = arith.constant dense<0.000000e+00> : vector<2x8x128xf32>
    %259 = tpu.matmul %258, %244, %cst_92 {dimension_numbers = #tpu.dot_dimension_numbers<[2], [1], [1], [2], [0, 0, 0, 1, 1, 2], [0], [0]>} : vector<2x8x8xbf16>, vector<2x8x128xbf16>, vector<2x8x128xf32> -> vector<2x8x128xf32>
    %260 = vector.shape_cast %259 : vector<2x8x128xf32> to vector<16x128xf32>
    %261 = arith.truncf %260 : vector<16x128xf32> to vector<16x128xbf16>
    %c128_93 = arith.constant 128 : index
    %c0_94 = arith.constant 0 : index
    %262 = vector.load %arg19[%c128_93, %c0_94] : memref<512x128xbf16, #tpu.memory_space<vmem>>, vector<128x128xbf16>
    %cst_95 = arith.constant dense<0.000000e+00> : vector<16x128xf32>
    %263 = tpu.matmul %261, %262, %cst_95 {dimension_numbers = #tpu.dot_dimension_numbers<[1], [0], [0], [1], [0, 0, 1, 1], [], []>} : vector<16x128xbf16>, vector<128x128xbf16>, vector<16x128xf32> -> vector<16x128xf32>
    %264 = arith.addf %235, %263 : vector<16x128xf32>
    %265 = vector.extract_strided_slice %207 {offsets = [0, 256], sizes = [16, 128], strides = [1, 1]} : vector<16x1536xf32> to vector<16x128xf32>
    %266 = vector.shape_cast %265 : vector<16x128xf32> to vector<2x8x128xf32>
    %267 = arith.truncf %266 : vector<2x8x128xf32> to vector<2x8x128xbf16>
    %268 = vector.extract_strided_slice %207 {offsets = [0, 768], sizes = [16, 128], strides = [1, 1]} : vector<16x1536xf32> to vector<16x128xf32>
    %269 = vector.shape_cast %268 : vector<16x128xf32> to vector<2x8x128xf32>
    %270 = arith.truncf %269 : vector<2x8x128xf32> to vector<2x8x128xbf16>
    %271 = vector.extract_strided_slice %207 {offsets = [0, 1280], sizes = [16, 128], strides = [1, 1]} : vector<16x1536xf32> to vector<16x128xf32>
    %272 = vector.shape_cast %271 : vector<16x128xf32> to vector<2x8x128xf32>
    %273 = arith.truncf %272 : vector<2x8x128xf32> to vector<2x8x128xbf16>
    %cst_96 = arith.constant dense<0.000000e+00> : vector<2x8x8xf32>
    %274 = tpu.matmul %267, %270, %cst_96 {dimension_numbers = #tpu.dot_dimension_numbers<[2], [2], [1], [1], [0, 0, 0, 1, 1, 1], [0], [0]>} : vector<2x8x128xbf16>, vector<2x8x128xbf16>, vector<2x8x8xf32> -> vector<2x8x8xf32>
    %cst_97 = arith.constant 0.353553385 : f32
    %275 = vector.broadcast %cst_97 : f32 to vector<2x8x8xf32>
    %276 = arith.mulf %274, %275 : vector<2x8x8xf32>
    %cst_98 = arith.constant dense<0xFF800000> : vector<2x8xf32>
    %277 = vector.multi_reduction <maximumf>, %276, %cst_98 [2] : vector<2x8x8xf32> to vector<2x8xf32>
    %278 = vector.shape_cast %277 : vector<2x8xf32> to vector<2x8x1xf32>
    %279 = vector.broadcast %278 : vector<2x8x1xf32> to vector<2x8x8xf32>
    %280 = arith.subf %276, %279 : vector<2x8x8xf32>
    %281 = math.exp %280 : vector<2x8x8xf32>
    %cst_99 = arith.constant dense<0.000000e+00> : vector<2x8xf32>
    %282 = vector.multi_reduction <add>, %281, %cst_99 [2] : vector<2x8x8xf32> to vector<2x8xf32>
    %283 = vector.shape_cast %282 : vector<2x8xf32> to vector<2x8x1xf32>
    %284 = tpu.reciprocal %283 {approx = true} : vector<2x8x1xf32> -> vector<2x8x1xf32>
    %285 = vector.broadcast %284 : vector<2x8x1xf32> to vector<2x8x8xf32>
    %286 = arith.mulf %281, %285 : vector<2x8x8xf32>
    %287 = arith.truncf %286 : vector<2x8x8xf32> to vector<2x8x8xbf16>
    %cst_100 = arith.constant dense<0.000000e+00> : vector<2x8x128xf32>
    %288 = tpu.matmul %287, %273, %cst_100 {dimension_numbers = #tpu.dot_dimension_numbers<[2], [1], [1], [2], [0, 0, 0, 1, 1, 2], [0], [0]>} : vector<2x8x8xbf16>, vector<2x8x128xbf16>, vector<2x8x128xf32> -> vector<2x8x128xf32>
    %289 = vector.shape_cast %288 : vector<2x8x128xf32> to vector<16x128xf32>
    %290 = arith.truncf %289 : vector<16x128xf32> to vector<16x128xbf16>
    %c256_101 = arith.constant 256 : index
    %c0_102 = arith.constant 0 : index
    %291 = vector.load %arg19[%c256_101, %c0_102] : memref<512x128xbf16, #tpu.memory_space<vmem>>, vector<128x128xbf16>
    %cst_103 = arith.constant dense<0.000000e+00> : vector<16x128xf32>
    %292 = tpu.matmul %290, %291, %cst_103 {dimension_numbers = #tpu.dot_dimension_numbers<[1], [0], [0], [1], [0, 0, 1, 1], [], []>} : vector<16x128xbf16>, vector<128x128xbf16>, vector<16x128xf32> -> vector<16x128xf32>
    %293 = arith.addf %264, %292 : vector<16x128xf32>
    %294 = vector.extract_strided_slice %207 {offsets = [0, 384], sizes = [16, 128], strides = [1, 1]} : vector<16x1536xf32> to vector<16x128xf32>
    %295 = vector.shape_cast %294 : vector<16x128xf32> to vector<2x8x128xf32>
    %296 = arith.truncf %295 : vector<2x8x128xf32> to vector<2x8x128xbf16>
    %297 = vector.extract_strided_slice %207 {offsets = [0, 896], sizes = [16, 128], strides = [1, 1]} : vector<16x1536xf32> to vector<16x128xf32>
    %298 = vector.shape_cast %297 : vector<16x128xf32> to vector<2x8x128xf32>
    %299 = arith.truncf %298 : vector<2x8x128xf32> to vector<2x8x128xbf16>
    %300 = vector.extract_strided_slice %207 {offsets = [0, 1408], sizes = [16, 128], strides = [1, 1]} : vector<16x1536xf32> to vector<16x128xf32>
    %301 = vector.shape_cast %300 : vector<16x128xf32> to vector<2x8x128xf32>
    %302 = arith.truncf %301 : vector<2x8x128xf32> to vector<2x8x128xbf16>
    %cst_104 = arith.constant dense<0.000000e+00> : vector<2x8x8xf32>
    %303 = tpu.matmul %296, %299, %cst_104 {dimension_numbers = #tpu.dot_dimension_numbers<[2], [2], [1], [1], [0, 0, 0, 1, 1, 1], [0], [0]>} : vector<2x8x128xbf16>, vector<2x8x128xbf16>, vector<2x8x8xf32> -> vector<2x8x8xf32>
    %cst_105 = arith.constant 0.353553385 : f32
    %304 = vector.broadcast %cst_105 : f32 to vector<2x8x8xf32>
    %305 = arith.mulf %303, %304 : vector<2x8x8xf32>
    %cst_106 = arith.constant dense<0xFF800000> : vector<2x8xf32>
    %306 = vector.multi_reduction <maximumf>, %305, %cst_106 [2] : vector<2x8x8xf32> to vector<2x8xf32>
    %307 = vector.shape_cast %306 : vector<2x8xf32> to vector<2x8x1xf32>
    %308 = vector.broadcast %307 : vector<2x8x1xf32> to vector<2x8x8xf32>
    %309 = arith.subf %305, %308 : vector<2x8x8xf32>
    %310 = math.exp %309 : vector<2x8x8xf32>
    %cst_107 = arith.constant dense<0.000000e+00> : vector<2x8xf32>
    %311 = vector.multi_reduction <add>, %310, %cst_107 [2] : vector<2x8x8xf32> to vector<2x8xf32>
    %312 = vector.shape_cast %311 : vector<2x8xf32> to vector<2x8x1xf32>
    %313 = tpu.reciprocal %312 {approx = true} : vector<2x8x1xf32> -> vector<2x8x1xf32>
    %314 = vector.broadcast %313 : vector<2x8x1xf32> to vector<2x8x8xf32>
    %315 = arith.mulf %310, %314 : vector<2x8x8xf32>
    %316 = arith.truncf %315 : vector<2x8x8xf32> to vector<2x8x8xbf16>
    %cst_108 = arith.constant dense<0.000000e+00> : vector<2x8x128xf32>
    %317 = tpu.matmul %316, %302, %cst_108 {dimension_numbers = #tpu.dot_dimension_numbers<[2], [1], [1], [2], [0, 0, 0, 1, 1, 2], [0], [0]>} : vector<2x8x8xbf16>, vector<2x8x128xbf16>, vector<2x8x128xf32> -> vector<2x8x128xf32>
    %318 = vector.shape_cast %317 : vector<2x8x128xf32> to vector<16x128xf32>
    %319 = arith.truncf %318 : vector<16x128xf32> to vector<16x128xbf16>
    %c384_109 = arith.constant 384 : index
    %c0_110 = arith.constant 0 : index
    %320 = vector.load %arg19[%c384_109, %c0_110] : memref<512x128xbf16, #tpu.memory_space<vmem>>, vector<128x128xbf16>
    %cst_111 = arith.constant dense<0.000000e+00> : vector<16x128xf32>
    %321 = tpu.matmul %319, %320, %cst_111 {dimension_numbers = #tpu.dot_dimension_numbers<[1], [0], [0], [1], [0, 0, 1, 1], [], []>} : vector<16x128xbf16>, vector<128x128xbf16>, vector<16x128xf32> -> vector<16x128xf32>
    %322 = arith.addf %293, %321 : vector<16x128xf32>
    %c0_112 = arith.constant 0 : index
    %c0_113 = arith.constant 0 : index
    %323 = vector.load %arg20[%c0_112, %c0_113] : memref<1x128xf32, #tpu.memory_space<vmem>>, vector<1x128xf32>
    %324 = vector.broadcast %323 : vector<1x128xf32> to vector<16x128xf32>
    %325 = arith.addf %322, %324 : vector<16x128xf32>
    %326 = arith.addf %325, %201 : vector<16x128xf32>
    %c0_114 = arith.constant 0 : index
    %c0_115 = arith.constant 0 : index
    %327 = vector.load %arg21[%c0_114, %c0_115] : memref<1x128xf32, #tpu.memory_space<vmem>>, vector<1x128xf32>
    %c0_116 = arith.constant 0 : index
    %c0_117 = arith.constant 0 : index
    %328 = vector.load %arg22[%c0_116, %c0_117] : memref<1x128xf32, #tpu.memory_space<vmem>>, vector<1x128xf32>
    %329 = tpu.iota {dimensions = array<i32: 1>} : vector<16x128xi32>
    %c32_i32_118 = arith.constant 32 : i32
    %330 = vector.broadcast %c32_i32_118 : i32 to vector<16x128xi32>
    %331 = arith.cmpi slt, %329, %330 : vector<16x128xi32>
    %cst_119 = arith.constant dense<0.000000e+00> : vector<16xf32>
    %332 = vector.multi_reduction <add>, %326, %cst_119 [1] : vector<16x128xf32> to vector<16xf32>
    %333 = vector.shape_cast %332 : vector<16xf32> to vector<16x1xf32>
    %cst_120 = arith.constant 3.125000e-02 : f32
    %334 = vector.broadcast %cst_120 : f32 to vector<16x1xf32>
    %335 = arith.mulf %333, %334 : vector<16x1xf32>
    %336 = vector.broadcast %335 : vector<16x1xf32> to vector<16x128xf32>
    %337 = arith.subf %326, %336 : vector<16x128xf32>
    %cst_121 = arith.constant 0.000000e+00 : f32
    %338 = vector.broadcast %cst_121 : f32 to vector<16x128xf32>
    %339 = arith.select %331, %337, %338 : vector<16x128xi1>, vector<16x128xf32>
    %340 = arith.mulf %339, %339 : vector<16x128xf32>
    %cst_122 = arith.constant dense<0.000000e+00> : vector<16xf32>
    %341 = vector.multi_reduction <add>, %340, %cst_122 [1] : vector<16x128xf32> to vector<16xf32>
    %342 = vector.shape_cast %341 : vector<16xf32> to vector<16x1xf32>
    %cst_123 = arith.constant 3.125000e-02 : f32
    %343 = vector.broadcast %cst_123 : f32 to vector<16x1xf32>
    %344 = arith.mulf %342, %343 : vector<16x1xf32>
    %cst_124 = arith.constant 9.99999974E-6 : f32
    %345 = vector.broadcast %cst_124 : f32 to vector<16x1xf32>
    %346 = arith.addf %344, %345 : vector<16x1xf32>
    %347 = math.rsqrt %346 : vector<16x1xf32>
    %348 = vector.broadcast %347 : vector<16x1xf32> to vector<16x128xf32>
    %349 = arith.mulf %339, %348 : vector<16x128xf32>
    %350 = vector.broadcast %327 : vector<1x128xf32> to vector<16x128xf32>
    %351 = arith.mulf %349, %350 : vector<16x128xf32>
    %352 = vector.broadcast %328 : vector<1x128xf32> to vector<16x128xf32>
    %353 = arith.addf %351, %352 : vector<16x128xf32>
    %354 = arith.truncf %353 : vector<16x128xf32> to vector<16x128xbf16>
    %c0_125 = arith.constant 0 : index
    %c0_126 = arith.constant 0 : index
    %355 = vector.load %arg23[%c0_125, %c0_126] : memref<128x128xbf16, #tpu.memory_space<vmem>>, vector<128x128xbf16>
    %cst_127 = arith.constant dense<0.000000e+00> : vector<16x128xf32>
    %356 = tpu.matmul %354, %355, %cst_127 {dimension_numbers = #tpu.dot_dimension_numbers<[1], [0], [0], [1], [0, 0, 1, 1], [], []>} : vector<16x128xbf16>, vector<128x128xbf16>, vector<16x128xf32> -> vector<16x128xf32>
    %c0_128 = arith.constant 0 : index
    %c0_129 = arith.constant 0 : index
    %357 = vector.load %arg24[%c0_128, %c0_129] : memref<1x128xf32, #tpu.memory_space<vmem>>, vector<1x128xf32>
    %358 = vector.broadcast %357 : vector<1x128xf32> to vector<16x128xf32>
    %359 = arith.addf %356, %358 : vector<16x128xf32>
    %cst_130 = arith.constant 0.000000e+00 : f32
    %360 = vector.broadcast %cst_130 : f32 to vector<16x128xf32>
    %361 = arith.maximumf %359, %360 : vector<16x128xf32>
    %362 = arith.truncf %361 : vector<16x128xf32> to vector<16x128xbf16>
    %c0_131 = arith.constant 0 : index
    %c0_132 = arith.constant 0 : index
    %363 = vector.load %arg25[%c0_131, %c0_132] : memref<128x128xbf16, #tpu.memory_space<vmem>>, vector<128x128xbf16>
    %cst_133 = arith.constant dense<0.000000e+00> : vector<16x128xf32>
    %364 = tpu.matmul %362, %363, %cst_133 {dimension_numbers = #tpu.dot_dimension_numbers<[1], [0], [0], [1], [0, 0, 1, 1], [], []>} : vector<16x128xbf16>, vector<128x128xbf16>, vector<16x128xf32> -> vector<16x128xf32>
    %c0_134 = arith.constant 0 : index
    %c0_135 = arith.constant 0 : index
    %365 = vector.load %arg26[%c0_134, %c0_135] : memref<1x128xf32, #tpu.memory_space<vmem>>, vector<1x128xf32>
    %366 = vector.broadcast %365 : vector<1x128xf32> to vector<16x128xf32>
    %367 = arith.addf %364, %366 : vector<16x128xf32>
    %c0_136 = arith.constant 0 : index
    %c0_137 = arith.constant 0 : index
    %368 = vector.load %arg27[%c0_136, %c0_137] : memref<1x128xf32, #tpu.memory_space<vmem>>, vector<1x128xf32>
    %c0_138 = arith.constant 0 : index
    %c0_139 = arith.constant 0 : index
    %369 = vector.load %arg28[%c0_138, %c0_139] : memref<1x128xf32, #tpu.memory_space<vmem>>, vector<1x128xf32>
    %370 = tpu.iota {dimensions = array<i32: 1>} : vector<16x128xi32>
    %c32_i32_140 = arith.constant 32 : i32
    %371 = vector.broadcast %c32_i32_140 : i32 to vector<16x128xi32>
    %372 = arith.cmpi slt, %370, %371 : vector<16x128xi32>
    %cst_141 = arith.constant dense<0.000000e+00> : vector<16xf32>
    %373 = vector.multi_reduction <add>, %367, %cst_141 [1] : vector<16x128xf32> to vector<16xf32>
    %374 = vector.shape_cast %373 : vector<16xf32> to vector<16x1xf32>
    %cst_142 = arith.constant 3.125000e-02 : f32
    %375 = vector.broadcast %cst_142 : f32 to vector<16x1xf32>
    %376 = arith.mulf %374, %375 : vector<16x1xf32>
    %377 = vector.broadcast %376 : vector<16x1xf32> to vector<16x128xf32>
    %378 = arith.subf %367, %377 : vector<16x128xf32>
    %cst_143 = arith.constant 0.000000e+00 : f32
    %379 = vector.broadcast %cst_143 : f32 to vector<16x128xf32>
    %380 = arith.select %372, %378, %379 : vector<16x128xi1>, vector<16x128xf32>
    %381 = arith.mulf %380, %380 : vector<16x128xf32>
    %cst_144 = arith.constant dense<0.000000e+00> : vector<16xf32>
    %382 = vector.multi_reduction <add>, %381, %cst_144 [1] : vector<16x128xf32> to vector<16xf32>
    %383 = vector.shape_cast %382 : vector<16xf32> to vector<16x1xf32>
    %cst_145 = arith.constant 3.125000e-02 : f32
    %384 = vector.broadcast %cst_145 : f32 to vector<16x1xf32>
    %385 = arith.mulf %383, %384 : vector<16x1xf32>
    %cst_146 = arith.constant 9.99999974E-6 : f32
    %386 = vector.broadcast %cst_146 : f32 to vector<16x1xf32>
    %387 = arith.addf %385, %386 : vector<16x1xf32>
    %388 = math.rsqrt %387 : vector<16x1xf32>
    %389 = vector.broadcast %388 : vector<16x1xf32> to vector<16x128xf32>
    %390 = arith.mulf %380, %389 : vector<16x128xf32>
    %391 = vector.broadcast %368 : vector<1x128xf32> to vector<16x128xf32>
    %392 = arith.mulf %390, %391 : vector<16x128xf32>
    %393 = vector.broadcast %369 : vector<1x128xf32> to vector<16x128xf32>
    %394 = arith.addf %392, %393 : vector<16x128xf32>
    %395 = arith.truncf %394 : vector<16x128xf32> to vector<16x128xbf16>
    %396 = vector.shape_cast %395 : vector<16x128xbf16> to vector<2x8x128xbf16>
    %c0_147 = arith.constant 0 : index
    %c0_148 = arith.constant 0 : index
    %c0_149 = arith.constant 0 : index
    %397 = vector.load %arg29[%c0_147, %c0_148, %c0_149] : memref<2x8x128xbf16, #tpu.memory_space<vmem>>, vector<2x8x128xbf16>
    tpu.vector_store %arg29[%c0_147, %c0_148, %c0_149], %396 {strides = array<i32>} : memref<2x8x128xbf16, #tpu.memory_space<vmem>>, vector<2x8x128xbf16>,
    return
  }
  func.func @transform_0(%arg0: i32) -> (i32, i32, i32) {
    %c0_i32 = arith.constant 0 : i32
    %c0_i32_0 = arith.constant 0 : i32
    %c0_i32_1 = arith.constant 0 : i32
    return %arg0, %c0_i32, %c0_i32_0 : i32, i32, i32
  }
  func.func @transform_1(%arg0: i32) -> (i32, i32) {
    %c0_i32 = arith.constant 0 : i32
    %c0_i32_0 = arith.constant 0 : i32
    %c0_i32_1 = arith.constant 0 : i32
    return %c0_i32, %c0_i32_0 : i32, i32
  }
  func.func @transform_2(%arg0: i32) -> (i32, i32) {
    %c0_i32 = arith.constant 0 : i32
    %c0_i32_0 = arith.constant 0 : i32
    %c0_i32_1 = arith.constant 0 : i32
    return %c0_i32, %c0_i32_0 : i32, i32
  }
  func.func @transform_3(%arg0: i32) -> (i32, i32) {
    %c0_i32 = arith.constant 0 : i32
    %c0_i32_0 = arith.constant 0 : i32
    %c0_i32_1 = arith.constant 0 : i32
    return %c0_i32, %c0_i32_0 : i32, i32
  }
  func.func @transform_4(%arg0: i32) -> (i32, i32) {
    %c0_i32 = arith.constant 0 : i32
    %c0_i32_0 = arith.constant 0 : i32
    %c0_i32_1 = arith.constant 0 : i32
    return %c0_i32, %c0_i32_0 : i32, i32
  }
  func.func @transform_5(%arg0: i32) -> (i32, i32) {
    %c0_i32 = arith.constant 0 : i32
    %c0_i32_0 = arith.constant 0 : i32
    %c0_i32_1 = arith.constant 0 : i32
    return %c0_i32, %c0_i32_0 : i32, i32
  }
  func.func @transform_6(%arg0: i32) -> (i32, i32) {
    %c0_i32 = arith.constant 0 : i32
    %c0_i32_0 = arith.constant 0 : i32
    %c0_i32_1 = arith.constant 0 : i32
    return %c0_i32, %c0_i32_0 : i32, i32
  }
  func.func @transform_7(%arg0: i32) -> (i32, i32) {
    %c0_i32 = arith.constant 0 : i32
    %c0_i32_0 = arith.constant 0 : i32
    %c0_i32_1 = arith.constant 0 : i32
    return %c0_i32, %c0_i32_0 : i32, i32
  }
  func.func @transform_8(%arg0: i32) -> (i32, i32) {
    %c0_i32 = arith.constant 0 : i32
    %c0_i32_0 = arith.constant 0 : i32
    %c0_i32_1 = arith.constant 0 : i32
    return %c0_i32, %c0_i32_0 : i32, i32
  }
  func.func @transform_9(%arg0: i32) -> (i32, i32) {
    %c0_i32 = arith.constant 0 : i32
    %c0_i32_0 = arith.constant 0 : i32
    %c0_i32_1 = arith.constant 0 : i32
    return %c0_i32, %c0_i32_0 : i32, i32
  }
  func.func @transform_10(%arg0: i32) -> (i32, i32) {
    %c0_i32 = arith.constant 0 : i32
    %c0_i32_0 = arith.constant 0 : i32
    %c0_i32_1 = arith.constant 0 : i32
    return %c0_i32, %c0_i32_0 : i32, i32
  }
  func.func @transform_11(%arg0: i32) -> (i32, i32) {
    %c0_i32 = arith.constant 0 : i32
    %c0_i32_0 = arith.constant 0 : i32
    %c0_i32_1 = arith.constant 0 : i32
    return %c0_i32, %c0_i32_0 : i32, i32
  }
  func.func @transform_12(%arg0: i32) -> (i32, i32) {
    %c0_i32 = arith.constant 0 : i32
    %c0_i32_0 = arith.constant 0 : i32
    %c0_i32_1 = arith.constant 0 : i32
    return %c0_i32, %c0_i32_0 : i32, i32
  }
  func.func @transform_13(%arg0: i32) -> (i32, i32) {
    %c0_i32 = arith.constant 0 : i32
    %c0_i32_0 = arith.constant 0 : i32
    %c0_i32_1 = arith.constant 0 : i32
    return %c0_i32, %c0_i32_0 : i32, i32
  }
  func.func @transform_14(%arg0: i32) -> (i32, i32) {
    %c0_i32 = arith.constant 0 : i32
    %c0_i32_0 = arith.constant 0 : i32
    %c0_i32_1 = arith.constant 0 : i32
    return %c0_i32, %c0_i32_0 : i32, i32
  }
  func.func @transform_15(%arg0: i32) -> (i32, i32) {
    %c0_i32 = arith.constant 0 : i32
    %c0_i32_0 = arith.constant 0 : i32
    %c0_i32_1 = arith.constant 0 : i32
    return %c0_i32, %c0_i32_0 : i32, i32
  }
  func.func @transform_16(%arg0: i32) -> (i32, i32) {
    %c0_i32 = arith.constant 0 : i32
    %c0_i32_0 = arith.constant 0 : i32
    %c0_i32_1 = arith.constant 0 : i32
    return %c0_i32, %c0_i32_0 : i32, i32
  }
  func.func @transform_17(%arg0: i32) -> (i32, i32) {
    %c0_i32 = arith.constant 0 : i32
    %c0_i32_0 = arith.constant 0 : i32
    %c0_i32_1 = arith.constant 0 : i32
    return %c0_i32, %c0_i32_0 : i32, i32
  }
  func.func @transform_18(%arg0: i32) -> (i32, i32) {
    %c0_i32 = arith.constant 0 : i32
    %c0_i32_0 = arith.constant 0 : i32
    %c0_i32_1 = arith.constant 0 : i32
    return %c0_i32, %c0_i32_0 : i32, i32
  }
  func.func @transform_19(%arg0: i32) -> (i32, i32) {
    %c0_i32 = arith.constant 0 : i32
    %c0_i32_0 = arith.constant 0 : i32
    %c0_i32_1 = arith.constant 0 : i32
    return %c0_i32, %c0_i32_0 : i32, i32
  }
  func.func @transform_20(%arg0: i32) -> (i32, i32) {
    %c0_i32 = arith.constant 0 : i32
    %c0_i32_0 = arith.constant 0 : i32
    %c0_i32_1 = arith.constant 0 : i32
    return %c0_i32, %c0_i32_0 : i32, i32
  }
  func.func @transform_21(%arg0: i32) -> (i32, i32) {
    %c0_i32 = arith.constant 0 : i32
    %c0_i32_0 = arith.constant 0 : i32
    %c0_i32_1 = arith.constant 0 : i32
    return %c0_i32, %c0_i32_0 : i32, i32
  }
  func.func @transform_22(%arg0: i32) -> (i32, i32) {
    %c0_i32 = arith.constant 0 : i32
    %c0_i32_0 = arith.constant 0 : i32
    %c0_i32_1 = arith.constant 0 : i32
    return %c0_i32, %c0_i32_0 : i32, i32
  }
  func.func @transform_23(%arg0: i32) -> (i32, i32) {
    %c0_i32 = arith.constant 0 : i32
    %c0_i32_0 = arith.constant 0 : i32
    %c0_i32_1 = arith.constant 0 : i32
    return %c0_i32, %c0_i32_0 : i32, i32
  }
  func.func @transform_24(%arg0: i32) -> (i32, i32) {
    %c0_i32 = arith.constant 0 : i32
    %c0_i32_0 = arith.constant 0 : i32
    %c0_i32_1 = arith.constant 0 : i32
    return %c0_i32, %c0_i32_0 : i32, i32
  }
  func.func @transform_25(%arg0: i32) -> (i32, i32) {
    %c0_i32 = arith.constant 0 : i32
    %c0_i32_0 = arith.constant 0 : i32
    %c0_i32_1 = arith.constant 0 : i32
    return %c0_i32, %c0_i32_0 : i32, i32
  }
  func.func @transform_26(%arg0: i32) -> (i32, i32) {
    %c0_i32 = arith.constant 0 : i32
    %c0_i32_0 = arith.constant 0 : i32
    %c0_i32_1 = arith.constant 0 : i32
    return %c0_i32, %c0_i32_0 : i32, i32
  }
  func.func @transform_27(%arg0: i32) -> (i32, i32) {
    %c0_i32 = arith.constant 0 : i32
    %c0_i32_0 = arith.constant 0 : i32
    %c0_i32_1 = arith.constant 0 : i32
    return %c0_i32, %c0_i32_0 : i32, i32
  }
  func.func @transform_28(%arg0: i32) -> (i32, i32, i32) {
    %c0_i32 = arith.constant 0 : i32
    %c0_i32_0 = arith.constant 0 : i32
    %c0_i32_1 = arith.constant 0 : i32
    return %arg0, %c0_i32, %c0_i32_0 : i32, i32, i32
  }
}

module attributes {stable_mosaic.version = 11 : i64} {
  func.func @_articles_fused_kernel(%arg0: i32, %arg1: memref<2x8x128xbf16, #tpu.memory_space<vmem>>, %arg2: memref<128x128xbf16, #tpu.memory_space<vmem>>, %arg3: memref<1x128xf32, #tpu.memory_space<vmem>>, %arg4: memref<16x128xf32, #tpu.memory_space<vmem>>, %arg5: memref<128x1536xbf16, #tpu.memory_space<vmem>>, %arg6: memref<1x1536xf32, #tpu.memory_space<vmem>>, %arg7: memref<512x128xbf16, #tpu.memory_space<vmem>>, %arg8: memref<1x128xf32, #tpu.memory_space<vmem>>, %arg9: memref<1x128xf32, #tpu.memory_space<vmem>>, %arg10: memref<1x128xf32, #tpu.memory_space<vmem>>, %arg11: memref<128x128xbf16, #tpu.memory_space<vmem>>, %arg12: memref<1x128xf32, #tpu.memory_space<vmem>>, %arg13: memref<128x128xbf16, #tpu.memory_space<vmem>>, %arg14: memref<1x128xf32, #tpu.memory_space<vmem>>, %arg15: memref<1x128xf32, #tpu.memory_space<vmem>>, %arg16: memref<1x128xf32, #tpu.memory_space<vmem>>, %arg17: memref<128x1536xbf16, #tpu.memory_space<vmem>>, %arg18: memref<1x1536xf32, #tpu.memory_space<vmem>>, %arg19: memref<512x128xbf16, #tpu.memory_space<vmem>>, %arg20: memref<1x128xf32, #tpu.memory_space<vmem>>, %arg21: memref<1x128xf32, #tpu.memory_space<vmem>>, %arg22: memref<1x128xf32, #tpu.memory_space<vmem>>, %arg23: memref<128x128xbf16, #tpu.memory_space<vmem>>, %arg24: memref<1x128xf32, #tpu.memory_space<vmem>>, %arg25: memref<128x128xbf16, #tpu.memory_space<vmem>>, %arg26: memref<1x128xf32, #tpu.memory_space<vmem>>, %arg27: memref<1x128xf32, #tpu.memory_space<vmem>>, %arg28: memref<1x128xf32, #tpu.memory_space<vmem>>, %arg29: memref<2x8x128xbf16, #tpu.memory_space<vmem>>) attributes {dimension_semantics = [#tpu.dimension_semantics<arbitrary>], iteration_bounds = array<i64: 2>, scalar_prefetch = 0 : i64, scratch_operands = 0 : i64, tpu.core_type = #tpu.core_type<tc>, window_params = [{transform_indices = @transform_0, window_bounds = array<i64: 2, 8, 128>}, {pipeline_mode = #tpu.pipeline_mode<synchronous>, transform_indices = @transform_1, window_bounds = array<i64: 128, 128>}, {pipeline_mode = #tpu.pipeline_mode<synchronous>, transform_indices = @transform_2, window_bounds = array<i64: 1, 128>}, {pipeline_mode = #tpu.pipeline_mode<synchronous>, transform_indices = @transform_3, window_bounds = array<i64: 16, 128>}, {pipeline_mode = #tpu.pipeline_mode<synchronous>, transform_indices = @transform_4, window_bounds = array<i64: 128, 1536>}, {pipeline_mode = #tpu.pipeline_mode<synchronous>, transform_indices = @transform_5, window_bounds = array<i64: 1, 1536>}, {pipeline_mode = #tpu.pipeline_mode<synchronous>, transform_indices = @transform_6, window_bounds = array<i64: 512, 128>}, {pipeline_mode = #tpu.pipeline_mode<synchronous>, transform_indices = @transform_7, window_bounds = array<i64: 1, 128>}, {pipeline_mode = #tpu.pipeline_mode<synchronous>, transform_indices = @transform_8, window_bounds = array<i64: 1, 128>}, {pipeline_mode = #tpu.pipeline_mode<synchronous>, transform_indices = @transform_9, window_bounds = array<i64: 1, 128>}, {pipeline_mode = #tpu.pipeline_mode<synchronous>, transform_indices = @transform_10, window_bounds = array<i64: 128, 128>}, {pipeline_mode = #tpu.pipeline_mode<synchronous>, transform_indices = @transform_11, window_bounds = array<i64: 1, 128>}, {pipeline_mode = #tpu.pipeline_mode<synchronous>, transform_indices = @transform_12, window_bounds = array<i64: 128, 128>}, {pipeline_mode = #tpu.pipeline_mode<synchronous>, transform_indices = @transform_13, window_bounds = array<i64: 1, 128>}, {pipeline_mode = #tpu.pipeline_mode<synchronous>, transform_indices = @transform_14, window_bounds = array<i64: 1, 128>}, {pipeline_mode = #tpu.pipeline_mode<synchronous>, transform_indices = @transform_15, window_bounds = array<i64: 1, 128>}, {pipeline_mode = #tpu.pipeline_mode<synchronous>, transform_indices = @transform_16, window_bounds = array<i64: 128, 1536>}, {pipeline_mode = #tpu.pipeline_mode<synchronous>, transform_indices = @transform_17, window_bounds = array<i64: 1, 1536>}, {pipeline_mode = #tpu.pipeline_mode<synchronous>, transform_indices = @transform_18, window_bounds = array<i64: 512, 128>}, {pipeline_mode = #tpu.pipeline_mode<synchronous>, transform_indices = @transform_19, window_bounds = array<i64: 1, 128>}, {pipeline_mode = #tpu.pipeline_mode<synchronous>, transform_indices = @transform_20, window_bounds = array<i64: 1, 128>}, {pipeline_mode = #tpu.pipeline_mode<synchronous>, transform_indices = @transform_21, window_bounds = array<i64: 1, 128>}, {pipeline_mode = #tpu.pipeline_mode<synchronous>, transform_indices = @transform_22, window_bounds = array<i64: 128, 128>}, {pipeline_mode = #tpu.pipeline_mode<synchronous>, transform_indices = @transform_23, window_bounds = array<i64: 1, 128>}, {pipeline_mode = #tpu.pipeline_mode<synchronous>, transform_indices = @transform_24, window_bounds = array<i64: 128, 128>}, {pipeline_mode = #tpu.pipeline_mode<synchronous>, transform_indices = @transform_25, window_bounds = array<i64: 1, 128>}, {pipeline_mode = #tpu.pipeline_mode<synchronous>, transform_indices = @transform_26, window_bounds = array<i64: 1, 128>}, {pipeline_mode = #tpu.pipeline_mode<synchronous>, transform_indices = @transform_27, window_bounds = array<i64: 1, 128>}, {transform_indices = @transform_28, window_bounds = array<i64: 2, 8, 128>}]} {
    %c0 = arith.constant 0 : index
    %c0_0 = arith.constant 0 : index
    %c0_1 = arith.constant 0 : index
    %0 = vector.load %arg1[%c0, %c0_0, %c0_1] : memref<2x8x128xbf16, #tpu.memory_space<vmem>>, vector<2x8x128xbf16>
    %1 = vector.shape_cast %0 : vector<2x8x128xbf16> to vector<16x128xbf16>
    %c0_2 = arith.constant 0 : index
    %c0_3 = arith.constant 0 : index
    %2 = vector.load %arg2[%c0_2, %c0_3] : memref<128x128xbf16, #tpu.memory_space<vmem>>, vector<128x128xbf16>
    %cst = arith.constant dense<0.000000e+00> : vector<16x128xf32>
    %3 = tpu.matmul %1, %2, %cst {dimension_numbers = #tpu.dot_dimension_numbers<[1], [0], [0], [1], [0, 0, 1, 1], [], []>} : vector<16x128xbf16>, vector<128x128xbf16>, vector<16x128xf32> -> vector<16x128xf32>
    %c0_4 = arith.constant 0 : index
    %c0_5 = arith.constant 0 : index
    %4 = vector.load %arg3[%c0_4, %c0_5] : memref<1x128xf32, #tpu.memory_space<vmem>>, vector<1x128xf32>
    %5 = vector.broadcast %4 : vector<1x128xf32> to vector<16x128xf32>
    %6 = arith.addf %3, %5 : vector<16x128xf32>
    %c0_6 = arith.constant 0 : index
    %c0_7 = arith.constant 0 : index
    %7 = vector.load %arg4[%c0_6, %c0_7] : memref<16x128xf32, #tpu.memory_space<vmem>>, vector<16x128xf32>
    %8 = arith.addf %6, %7 : vector<16x128xf32>
    %9 = arith.truncf %8 : vector<16x128xf32> to vector<16x128xbf16>
    %c0_8 = arith.constant 0 : index
    %c0_9 = arith.constant 0 : index
    %10 = vector.load %arg5[%c0_8, %c0_9] : memref<128x1536xbf16, #tpu.memory_space<vmem>>, vector<128x1536xbf16>
    %cst_10 = arith.constant dense<0.000000e+00> : vector<16x1536xf32>
    %11 = tpu.matmul %9, %10, %cst_10 {dimension_numbers = #tpu.dot_dimension_numbers<[1], [0], [0], [1], [0, 0, 1, 1], [], []>} : vector<16x128xbf16>, vector<128x1536xbf16>, vector<16x1536xf32> -> vector<16x1536xf32>
    %c0_11 = arith.constant 0 : index
    %c0_12 = arith.constant 0 : index
    %12 = vector.load %arg6[%c0_11, %c0_12] : memref<1x1536xf32, #tpu.memory_space<vmem>>, vector<1x1536xf32>
    %13 = vector.broadcast %12 : vector<1x1536xf32> to vector<16x1536xf32>
    %14 = arith.addf %11, %13 : vector<16x1536xf32>
    %15 = vector.extract_strided_slice %14 {offsets = [0, 0], sizes = [16, 128], strides = [1, 1]} : vector<16x1536xf32> to vector<16x128xf32>
    %16 = vector.shape_cast %15 : vector<16x128xf32> to vector<2x8x128xf32>
    %17 = arith.truncf %16 : vector<2x8x128xf32> to vector<2x8x128xbf16>
    %18 = vector.extract_strided_slice %14 {offsets = [0, 512], sizes = [16, 128], strides = [1, 1]} : vector<16x1536xf32> to vector<16x128xf32>
    %19 = vector.shape_cast %18 : vector<16x128xf32> to vector<2x8x128xf32>
    %20 = arith.truncf %19 : vector<2x8x128xf32> to vector<2x8x128xbf16>
    %21 = vector.extract_strided_slice %14 {offsets = [0, 1024], sizes = [16, 128], strides = [1, 1]} : vector<16x1536xf32> to vector<16x128xf32>
    %22 = vector.shape_cast %21 : vector<16x128xf32> to vector<2x8x128xf32>
    %23 = arith.truncf %22 : vector<2x8x128xf32> to vector<2x8x128xbf16>
    %cst_13 = arith.constant dense<0.000000e+00> : vector<2x8x8xf32>
    %24 = tpu.matmul %17, %20, %cst_13 {dimension_numbers = #tpu.dot_dimension_numbers<[2], [2], [1], [1], [0, 0, 0, 1, 1, 1], [0], [0]>} : vector<2x8x128xbf16>, vector<2x8x128xbf16>, vector<2x8x8xf32> -> vector<2x8x8xf32>
    %cst_14 = arith.constant 2.500000e-01 : f32
    %25 = vector.broadcast %cst_14 : f32 to vector<2x8x8xf32>
    %26 = arith.mulf %24, %25 : vector<2x8x8xf32>
    %cst_15 = arith.constant dense<0xFF800000> : vector<2x8xf32>
    %27 = vector.multi_reduction <maximumf>, %26, %cst_15 [2] : vector<2x8x8xf32> to vector<2x8xf32>
    %28 = vector.shape_cast %27 : vector<2x8xf32> to vector<2x8x1xf32>
    %29 = vector.broadcast %28 : vector<2x8x1xf32> to vector<2x8x8xf32>
    %30 = arith.subf %26, %29 : vector<2x8x8xf32>
    %31 = math.exp %30 : vector<2x8x8xf32>
    %cst_16 = arith.constant dense<0.000000e+00> : vector<2x8xf32>
    %32 = vector.multi_reduction <add>, %31, %cst_16 [2] : vector<2x8x8xf32> to vector<2x8xf32>
    %33 = vector.shape_cast %32 : vector<2x8xf32> to vector<2x8x1xf32>
    %34 = tpu.reciprocal %33 {approx = true} : vector<2x8x1xf32> -> vector<2x8x1xf32>
    %35 = vector.broadcast %34 : vector<2x8x1xf32> to vector<2x8x8xf32>
    %36 = arith.mulf %31, %35 : vector<2x8x8xf32>
    %37 = arith.truncf %36 : vector<2x8x8xf32> to vector<2x8x8xbf16>
    %cst_17 = arith.constant dense<0.000000e+00> : vector<2x8x128xf32>
    %38 = tpu.matmul %37, %23, %cst_17 {dimension_numbers = #tpu.dot_dimension_numbers<[2], [1], [1], [2], [0, 0, 0, 1, 1, 2], [0], [0]>} : vector<2x8x8xbf16>, vector<2x8x128xbf16>, vector<2x8x128xf32> -> vector<2x8x128xf32>
    %39 = vector.shape_cast %38 : vector<2x8x128xf32> to vector<16x128xf32>
    %40 = arith.truncf %39 : vector<16x128xf32> to vector<16x128xbf16>
    %c0_18 = arith.constant 0 : index
    %c0_19 = arith.constant 0 : index
    %41 = vector.load %arg7[%c0_18, %c0_19] : memref<512x128xbf16, #tpu.memory_space<vmem>>, vector<128x128xbf16>
    %cst_20 = arith.constant dense<0.000000e+00> : vector<16x128xf32>
    %42 = tpu.matmul %40, %41, %cst_20 {dimension_numbers = #tpu.dot_dimension_numbers<[1], [0], [0], [1], [0, 0, 1, 1], [], []>} : vector<16x128xbf16>, vector<128x128xbf16>, vector<16x128xf32> -> vector<16x128xf32>
    %43 = vector.extract_strided_slice %14 {offsets = [0, 128], sizes = [16, 128], strides = [1, 1]} : vector<16x1536xf32> to vector<16x128xf32>
    %44 = vector.shape_cast %43 : vector<16x128xf32> to vector<2x8x128xf32>
    %45 = arith.truncf %44 : vector<2x8x128xf32> to vector<2x8x128xbf16>
    %46 = vector.extract_strided_slice %14 {offsets = [0, 640], sizes = [16, 128], strides = [1, 1]} : vector<16x1536xf32> to vector<16x128xf32>
    %47 = vector.shape_cast %46 : vector<16x128xf32> to vector<2x8x128xf32>
    %48 = arith.truncf %47 : vector<2x8x128xf32> to vector<2x8x128xbf16>
    %49 = vector.extract_strided_slice %14 {offsets = [0, 1152], sizes = [16, 128], strides = [1, 1]} : vector<16x1536xf32> to vector<16x128xf32>
    %50 = vector.shape_cast %49 : vector<16x128xf32> to vector<2x8x128xf32>
    %51 = arith.truncf %50 : vector<2x8x128xf32> to vector<2x8x128xbf16>
    %cst_21 = arith.constant dense<0.000000e+00> : vector<2x8x8xf32>
    %52 = tpu.matmul %45, %48, %cst_21 {dimension_numbers = #tpu.dot_dimension_numbers<[2], [2], [1], [1], [0, 0, 0, 1, 1, 1], [0], [0]>} : vector<2x8x128xbf16>, vector<2x8x128xbf16>, vector<2x8x8xf32> -> vector<2x8x8xf32>
    %cst_22 = arith.constant 2.500000e-01 : f32
    %53 = vector.broadcast %cst_22 : f32 to vector<2x8x8xf32>
    %54 = arith.mulf %52, %53 : vector<2x8x8xf32>
    %cst_23 = arith.constant dense<0xFF800000> : vector<2x8xf32>
    %55 = vector.multi_reduction <maximumf>, %54, %cst_23 [2] : vector<2x8x8xf32> to vector<2x8xf32>
    %56 = vector.shape_cast %55 : vector<2x8xf32> to vector<2x8x1xf32>
    %57 = vector.broadcast %56 : vector<2x8x1xf32> to vector<2x8x8xf32>
    %58 = arith.subf %54, %57 : vector<2x8x8xf32>
    %59 = math.exp %58 : vector<2x8x8xf32>
    %cst_24 = arith.constant dense<0.000000e+00> : vector<2x8xf32>
    %60 = vector.multi_reduction <add>, %59, %cst_24 [2] : vector<2x8x8xf32> to vector<2x8xf32>
    %61 = vector.shape_cast %60 : vector<2x8xf32> to vector<2x8x1xf32>
    %62 = tpu.reciprocal %61 {approx = true} : vector<2x8x1xf32> -> vector<2x8x1xf32>
    %63 = vector.broadcast %62 : vector<2x8x1xf32> to vector<2x8x8xf32>
    %64 = arith.mulf %59, %63 : vector<2x8x8xf32>
    %65 = arith.truncf %64 : vector<2x8x8xf32> to vector<2x8x8xbf16>
    %cst_25 = arith.constant dense<0.000000e+00> : vector<2x8x128xf32>
    %66 = tpu.matmul %65, %51, %cst_25 {dimension_numbers = #tpu.dot_dimension_numbers<[2], [1], [1], [2], [0, 0, 0, 1, 1, 2], [0], [0]>} : vector<2x8x8xbf16>, vector<2x8x128xbf16>, vector<2x8x128xf32> -> vector<2x8x128xf32>
    %67 = vector.shape_cast %66 : vector<2x8x128xf32> to vector<16x128xf32>
    %68 = arith.truncf %67 : vector<16x128xf32> to vector<16x128xbf16>
    %c128 = arith.constant 128 : index
    %c0_26 = arith.constant 0 : index
    %69 = vector.load %arg7[%c128, %c0_26] : memref<512x128xbf16, #tpu.memory_space<vmem>>, vector<128x128xbf16>
    %cst_27 = arith.constant dense<0.000000e+00> : vector<16x128xf32>
    %70 = tpu.matmul %68, %69, %cst_27 {dimension_numbers = #tpu.dot_dimension_numbers<[1], [0], [0], [1], [0, 0, 1, 1], [], []>} : vector<16x128xbf16>, vector<128x128xbf16>, vector<16x128xf32> -> vector<16x128xf32>
    %71 = arith.addf %42, %70 : vector<16x128xf32>
    %72 = vector.extract_strided_slice %14 {offsets = [0, 256], sizes = [16, 128], strides = [1, 1]} : vector<16x1536xf32> to vector<16x128xf32>
    %73 = vector.shape_cast %72 : vector<16x128xf32> to vector<2x8x128xf32>
    %74 = arith.truncf %73 : vector<2x8x128xf32> to vector<2x8x128xbf16>
    %75 = vector.extract_strided_slice %14 {offsets = [0, 768], sizes = [16, 128], strides = [1, 1]} : vector<16x1536xf32> to vector<16x128xf32>
    %76 = vector.shape_cast %75 : vector<16x128xf32> to vector<2x8x128xf32>
    %77 = arith.truncf %76 : vector<2x8x128xf32> to vector<2x8x128xbf16>
    %78 = vector.extract_strided_slice %14 {offsets = [0, 1280], sizes = [16, 128], strides = [1, 1]} : vector<16x1536xf32> to vector<16x128xf32>
    %79 = vector.shape_cast %78 : vector<16x128xf32> to vector<2x8x128xf32>
    %80 = arith.truncf %79 : vector<2x8x128xf32> to vector<2x8x128xbf16>
    %cst_28 = arith.constant dense<0.000000e+00> : vector<2x8x8xf32>
    %81 = tpu.matmul %74, %77, %cst_28 {dimension_numbers = #tpu.dot_dimension_numbers<[2], [2], [1], [1], [0, 0, 0, 1, 1, 1], [0], [0]>} : vector<2x8x128xbf16>, vector<2x8x128xbf16>, vector<2x8x8xf32> -> vector<2x8x8xf32>
    %cst_29 = arith.constant 2.500000e-01 : f32
    %82 = vector.broadcast %cst_29 : f32 to vector<2x8x8xf32>
    %83 = arith.mulf %81, %82 : vector<2x8x8xf32>
    %cst_30 = arith.constant dense<0xFF800000> : vector<2x8xf32>
    %84 = vector.multi_reduction <maximumf>, %83, %cst_30 [2] : vector<2x8x8xf32> to vector<2x8xf32>
    %85 = vector.shape_cast %84 : vector<2x8xf32> to vector<2x8x1xf32>
    %86 = vector.broadcast %85 : vector<2x8x1xf32> to vector<2x8x8xf32>
    %87 = arith.subf %83, %86 : vector<2x8x8xf32>
    %88 = math.exp %87 : vector<2x8x8xf32>
    %cst_31 = arith.constant dense<0.000000e+00> : vector<2x8xf32>
    %89 = vector.multi_reduction <add>, %88, %cst_31 [2] : vector<2x8x8xf32> to vector<2x8xf32>
    %90 = vector.shape_cast %89 : vector<2x8xf32> to vector<2x8x1xf32>
    %91 = tpu.reciprocal %90 {approx = true} : vector<2x8x1xf32> -> vector<2x8x1xf32>
    %92 = vector.broadcast %91 : vector<2x8x1xf32> to vector<2x8x8xf32>
    %93 = arith.mulf %88, %92 : vector<2x8x8xf32>
    %94 = arith.truncf %93 : vector<2x8x8xf32> to vector<2x8x8xbf16>
    %cst_32 = arith.constant dense<0.000000e+00> : vector<2x8x128xf32>
    %95 = tpu.matmul %94, %80, %cst_32 {dimension_numbers = #tpu.dot_dimension_numbers<[2], [1], [1], [2], [0, 0, 0, 1, 1, 2], [0], [0]>} : vector<2x8x8xbf16>, vector<2x8x128xbf16>, vector<2x8x128xf32> -> vector<2x8x128xf32>
    %96 = vector.shape_cast %95 : vector<2x8x128xf32> to vector<16x128xf32>
    %97 = arith.truncf %96 : vector<16x128xf32> to vector<16x128xbf16>
    %c256 = arith.constant 256 : index
    %c0_33 = arith.constant 0 : index
    %98 = vector.load %arg7[%c256, %c0_33] : memref<512x128xbf16, #tpu.memory_space<vmem>>, vector<128x128xbf16>
    %cst_34 = arith.constant dense<0.000000e+00> : vector<16x128xf32>
    %99 = tpu.matmul %97, %98, %cst_34 {dimension_numbers = #tpu.dot_dimension_numbers<[1], [0], [0], [1], [0, 0, 1, 1], [], []>} : vector<16x128xbf16>, vector<128x128xbf16>, vector<16x128xf32> -> vector<16x128xf32>
    %100 = arith.addf %71, %99 : vector<16x128xf32>
    %101 = vector.extract_strided_slice %14 {offsets = [0, 384], sizes = [16, 128], strides = [1, 1]} : vector<16x1536xf32> to vector<16x128xf32>
    %102 = vector.shape_cast %101 : vector<16x128xf32> to vector<2x8x128xf32>
    %103 = arith.truncf %102 : vector<2x8x128xf32> to vector<2x8x128xbf16>
    %104 = vector.extract_strided_slice %14 {offsets = [0, 896], sizes = [16, 128], strides = [1, 1]} : vector<16x1536xf32> to vector<16x128xf32>
    %105 = vector.shape_cast %104 : vector<16x128xf32> to vector<2x8x128xf32>
    %106 = arith.truncf %105 : vector<2x8x128xf32> to vector<2x8x128xbf16>
    %107 = vector.extract_strided_slice %14 {offsets = [0, 1408], sizes = [16, 128], strides = [1, 1]} : vector<16x1536xf32> to vector<16x128xf32>
    %108 = vector.shape_cast %107 : vector<16x128xf32> to vector<2x8x128xf32>
    %109 = arith.truncf %108 : vector<2x8x128xf32> to vector<2x8x128xbf16>
    %cst_35 = arith.constant dense<0.000000e+00> : vector<2x8x8xf32>
    %110 = tpu.matmul %103, %106, %cst_35 {dimension_numbers = #tpu.dot_dimension_numbers<[2], [2], [1], [1], [0, 0, 0, 1, 1, 1], [0], [0]>} : vector<2x8x128xbf16>, vector<2x8x128xbf16>, vector<2x8x8xf32> -> vector<2x8x8xf32>
    %cst_36 = arith.constant 2.500000e-01 : f32
    %111 = vector.broadcast %cst_36 : f32 to vector<2x8x8xf32>
    %112 = arith.mulf %110, %111 : vector<2x8x8xf32>
    %cst_37 = arith.constant dense<0xFF800000> : vector<2x8xf32>
    %113 = vector.multi_reduction <maximumf>, %112, %cst_37 [2] : vector<2x8x8xf32> to vector<2x8xf32>
    %114 = vector.shape_cast %113 : vector<2x8xf32> to vector<2x8x1xf32>
    %115 = vector.broadcast %114 : vector<2x8x1xf32> to vector<2x8x8xf32>
    %116 = arith.subf %112, %115 : vector<2x8x8xf32>
    %117 = math.exp %116 : vector<2x8x8xf32>
    %cst_38 = arith.constant dense<0.000000e+00> : vector<2x8xf32>
    %118 = vector.multi_reduction <add>, %117, %cst_38 [2] : vector<2x8x8xf32> to vector<2x8xf32>
    %119 = vector.shape_cast %118 : vector<2x8xf32> to vector<2x8x1xf32>
    %120 = tpu.reciprocal %119 {approx = true} : vector<2x8x1xf32> -> vector<2x8x1xf32>
    %121 = vector.broadcast %120 : vector<2x8x1xf32> to vector<2x8x8xf32>
    %122 = arith.mulf %117, %121 : vector<2x8x8xf32>
    %123 = arith.truncf %122 : vector<2x8x8xf32> to vector<2x8x8xbf16>
    %cst_39 = arith.constant dense<0.000000e+00> : vector<2x8x128xf32>
    %124 = tpu.matmul %123, %109, %cst_39 {dimension_numbers = #tpu.dot_dimension_numbers<[2], [1], [1], [2], [0, 0, 0, 1, 1, 2], [0], [0]>} : vector<2x8x8xbf16>, vector<2x8x128xbf16>, vector<2x8x128xf32> -> vector<2x8x128xf32>
    %125 = vector.shape_cast %124 : vector<2x8x128xf32> to vector<16x128xf32>
    %126 = arith.truncf %125 : vector<16x128xf32> to vector<16x128xbf16>
    %c384 = arith.constant 384 : index
    %c0_40 = arith.constant 0 : index
    %127 = vector.load %arg7[%c384, %c0_40] : memref<512x128xbf16, #tpu.memory_space<vmem>>, vector<128x128xbf16>
    %cst_41 = arith.constant dense<0.000000e+00> : vector<16x128xf32>
    %128 = tpu.matmul %126, %127, %cst_41 {dimension_numbers = #tpu.dot_dimension_numbers<[1], [0], [0], [1], [0, 0, 1, 1], [], []>} : vector<16x128xbf16>, vector<128x128xbf16>, vector<16x128xf32> -> vector<16x128xf32>
    %129 = arith.addf %100, %128 : vector<16x128xf32>
    %c0_42 = arith.constant 0 : index
    %c0_43 = arith.constant 0 : index
    %130 = vector.load %arg8[%c0_42, %c0_43] : memref<1x128xf32, #tpu.memory_space<vmem>>, vector<1x128xf32>
    %131 = vector.broadcast %130 : vector<1x128xf32> to vector<16x128xf32>
    %132 = arith.addf %129, %131 : vector<16x128xf32>
    %133 = arith.addf %132, %8 : vector<16x128xf32>
    %c0_44 = arith.constant 0 : index
    %c0_45 = arith.constant 0 : index
    %134 = vector.load %arg9[%c0_44, %c0_45] : memref<1x128xf32, #tpu.memory_space<vmem>>, vector<1x128xf32>
    %c0_46 = arith.constant 0 : index
    %c0_47 = arith.constant 0 : index
    %135 = vector.load %arg10[%c0_46, %c0_47] : memref<1x128xf32, #tpu.memory_space<vmem>>, vector<1x128xf32>
    %136 = tpu.iota {dimensions = array<i32: 1>} : vector<16x128xi32>
    %c64_i32 = arith.constant 64 : i32
    %137 = vector.broadcast %c64_i32 : i32 to vector<16x128xi32>
    %138 = arith.cmpi slt, %136, %137 : vector<16x128xi32>
    %cst_48 = arith.constant dense<0.000000e+00> : vector<16xf32>
    %139 = vector.multi_reduction <add>, %133, %cst_48 [1] : vector<16x128xf32> to vector<16xf32>
    %140 = vector.shape_cast %139 : vector<16xf32> to vector<16x1xf32>
    %cst_49 = arith.constant 1.562500e-02 : f32
    %141 = vector.broadcast %cst_49 : f32 to vector<16x1xf32>
    %142 = arith.mulf %140, %141 : vector<16x1xf32>
    %143 = vector.broadcast %142 : vector<16x1xf32> to vector<16x128xf32>
    %144 = arith.subf %133, %143 : vector<16x128xf32>
    %cst_50 = arith.constant 0.000000e+00 : f32
    %145 = vector.broadcast %cst_50 : f32 to vector<16x128xf32>
    %146 = arith.select %138, %144, %145 : vector<16x128xi1>, vector<16x128xf32>
    %147 = arith.mulf %146, %146 : vector<16x128xf32>
    %cst_51 = arith.constant dense<0.000000e+00> : vector<16xf32>
    %148 = vector.multi_reduction <add>, %147, %cst_51 [1] : vector<16x128xf32> to vector<16xf32>
    %149 = vector.shape_cast %148 : vector<16xf32> to vector<16x1xf32>
    %cst_52 = arith.constant 1.562500e-02 : f32
    %150 = vector.broadcast %cst_52 : f32 to vector<16x1xf32>
    %151 = arith.mulf %149, %150 : vector<16x1xf32>
    %cst_53 = arith.constant 9.99999974E-6 : f32
    %152 = vector.broadcast %cst_53 : f32 to vector<16x1xf32>
    %153 = arith.addf %151, %152 : vector<16x1xf32>
    %154 = math.rsqrt %153 : vector<16x1xf32>
    %155 = vector.broadcast %154 : vector<16x1xf32> to vector<16x128xf32>
    %156 = arith.mulf %146, %155 : vector<16x128xf32>
    %157 = vector.broadcast %134 : vector<1x128xf32> to vector<16x128xf32>
    %158 = arith.mulf %156, %157 : vector<16x128xf32>
    %159 = vector.broadcast %135 : vector<1x128xf32> to vector<16x128xf32>
    %160 = arith.addf %158, %159 : vector<16x128xf32>
    %161 = arith.truncf %160 : vector<16x128xf32> to vector<16x128xbf16>
    %c0_54 = arith.constant 0 : index
    %c0_55 = arith.constant 0 : index
    %162 = vector.load %arg11[%c0_54, %c0_55] : memref<128x128xbf16, #tpu.memory_space<vmem>>, vector<128x128xbf16>
    %cst_56 = arith.constant dense<0.000000e+00> : vector<16x128xf32>
    %163 = tpu.matmul %161, %162, %cst_56 {dimension_numbers = #tpu.dot_dimension_numbers<[1], [0], [0], [1], [0, 0, 1, 1], [], []>} : vector<16x128xbf16>, vector<128x128xbf16>, vector<16x128xf32> -> vector<16x128xf32>
    %c0_57 = arith.constant 0 : index
    %c0_58 = arith.constant 0 : index
    %164 = vector.load %arg12[%c0_57, %c0_58] : memref<1x128xf32, #tpu.memory_space<vmem>>, vector<1x128xf32>
    %165 = vector.broadcast %164 : vector<1x128xf32> to vector<16x128xf32>
    %166 = arith.addf %163, %165 : vector<16x128xf32>
    %cst_59 = arith.constant 0.000000e+00 : f32
    %167 = vector.broadcast %cst_59 : f32 to vector<16x128xf32>
    %168 = arith.maximumf %166, %167 : vector<16x128xf32>
    %169 = arith.truncf %168 : vector<16x128xf32> to vector<16x128xbf16>
    %c0_60 = arith.constant 0 : index
    %c0_61 = arith.constant 0 : index
    %170 = vector.load %arg13[%c0_60, %c0_61] : memref<128x128xbf16, #tpu.memory_space<vmem>>, vector<128x128xbf16>
    %cst_62 = arith.constant dense<0.000000e+00> : vector<16x128xf32>
    %171 = tpu.matmul %169, %170, %cst_62 {dimension_numbers = #tpu.dot_dimension_numbers<[1], [0], [0], [1], [0, 0, 1, 1], [], []>} : vector<16x128xbf16>, vector<128x128xbf16>, vector<16x128xf32> -> vector<16x128xf32>
    %c0_63 = arith.constant 0 : index
    %c0_64 = arith.constant 0 : index
    %172 = vector.load %arg14[%c0_63, %c0_64] : memref<1x128xf32, #tpu.memory_space<vmem>>, vector<1x128xf32>
    %173 = vector.broadcast %172 : vector<1x128xf32> to vector<16x128xf32>
    %174 = arith.addf %171, %173 : vector<16x128xf32>
    %c0_65 = arith.constant 0 : index
    %c0_66 = arith.constant 0 : index
    %175 = vector.load %arg15[%c0_65, %c0_66] : memref<1x128xf32, #tpu.memory_space<vmem>>, vector<1x128xf32>
    %c0_67 = arith.constant 0 : index
    %c0_68 = arith.constant 0 : index
    %176 = vector.load %arg16[%c0_67, %c0_68] : memref<1x128xf32, #tpu.memory_space<vmem>>, vector<1x128xf32>
    %177 = tpu.iota {dimensions = array<i32: 1>} : vector<16x128xi32>
    %c32_i32 = arith.constant 32 : i32
    %178 = vector.broadcast %c32_i32 : i32 to vector<16x128xi32>
    %179 = arith.cmpi slt, %177, %178 : vector<16x128xi32>
    %cst_69 = arith.constant dense<0.000000e+00> : vector<16xf32>
    %180 = vector.multi_reduction <add>, %174, %cst_69 [1] : vector<16x128xf32> to vector<16xf32>
    %181 = vector.shape_cast %180 : vector<16xf32> to vector<16x1xf32>
    %cst_70 = arith.constant 3.125000e-02 : f32
    %182 = vector.broadcast %cst_70 : f32 to vector<16x1xf32>
    %183 = arith.mulf %181, %182 : vector<16x1xf32>
    %184 = vector.broadcast %183 : vector<16x1xf32> to vector<16x128xf32>
    %185 = arith.subf %174, %184 : vector<16x128xf32>
    %cst_71 = arith.constant 0.000000e+00 : f32
    %186 = vector.broadcast %cst_71 : f32 to vector<16x128xf32>
    %187 = arith.select %179, %185, %186 : vector<16x128xi1>, vector<16x128xf32>
    %188 = arith.mulf %187, %187 : vector<16x128xf32>
    %cst_72 = arith.constant dense<0.000000e+00> : vector<16xf32>
    %189 = vector.multi_reduction <add>, %188, %cst_72 [1] : vector<16x128xf32> to vector<16xf32>
    %190 = vector.shape_cast %189 : vector<16xf32> to vector<16x1xf32>
    %cst_73 = arith.constant 3.125000e-02 : f32
    %191 = vector.broadcast %cst_73 : f32 to vector<16x1xf32>
    %192 = arith.mulf %190, %191 : vector<16x1xf32>
    %cst_74 = arith.constant 9.99999974E-6 : f32
    %193 = vector.broadcast %cst_74 : f32 to vector<16x1xf32>
    %194 = arith.addf %192, %193 : vector<16x1xf32>
    %195 = math.rsqrt %194 : vector<16x1xf32>
    %196 = vector.broadcast %195 : vector<16x1xf32> to vector<16x128xf32>
    %197 = arith.mulf %187, %196 : vector<16x128xf32>
    %198 = vector.broadcast %175 : vector<1x128xf32> to vector<16x128xf32>
    %199 = arith.mulf %197, %198 : vector<16x128xf32>
    %200 = vector.broadcast %176 : vector<1x128xf32> to vector<16x128xf32>
    %201 = arith.addf %199, %200 : vector<16x128xf32>
    %202 = arith.truncf %201 : vector<16x128xf32> to vector<16x128xbf16>
    %c0_75 = arith.constant 0 : index
    %c0_76 = arith.constant 0 : index
    %203 = vector.load %arg17[%c0_75, %c0_76] : memref<128x1536xbf16, #tpu.memory_space<vmem>>, vector<128x1536xbf16>
    %cst_77 = arith.constant dense<0.000000e+00> : vector<16x1536xf32>
    %204 = tpu.matmul %202, %203, %cst_77 {dimension_numbers = #tpu.dot_dimension_numbers<[1], [0], [0], [1], [0, 0, 1, 1], [], []>} : vector<16x128xbf16>, vector<128x1536xbf16>, vector<16x1536xf32> -> vector<16x1536xf32>
    %c0_78 = arith.constant 0 : index
    %c0_79 = arith.constant 0 : index
    %205 = vector.load %arg18[%c0_78, %c0_79] : memref<1x1536xf32, #tpu.memory_space<vmem>>, vector<1x1536xf32>
    %206 = vector.broadcast %205 : vector<1x1536xf32> to vector<16x1536xf32>
    %207 = arith.addf %204, %206 : vector<16x1536xf32>
    %208 = vector.extract_strided_slice %207 {offsets = [0, 0], sizes = [16, 128], strides = [1, 1]} : vector<16x1536xf32> to vector<16x128xf32>
    %209 = vector.shape_cast %208 : vector<16x128xf32> to vector<2x8x128xf32>
    %210 = arith.truncf %209 : vector<2x8x128xf32> to vector<2x8x128xbf16>
    %211 = vector.extract_strided_slice %207 {offsets = [0, 512], sizes = [16, 128], strides = [1, 1]} : vector<16x1536xf32> to vector<16x128xf32>
    %212 = vector.shape_cast %211 : vector<16x128xf32> to vector<2x8x128xf32>
    %213 = arith.truncf %212 : vector<2x8x128xf32> to vector<2x8x128xbf16>
    %214 = vector.extract_strided_slice %207 {offsets = [0, 1024], sizes = [16, 128], strides = [1, 1]} : vector<16x1536xf32> to vector<16x128xf32>
    %215 = vector.shape_cast %214 : vector<16x128xf32> to vector<2x8x128xf32>
    %216 = arith.truncf %215 : vector<2x8x128xf32> to vector<2x8x128xbf16>
    %cst_80 = arith.constant dense<0.000000e+00> : vector<2x8x8xf32>
    %217 = tpu.matmul %210, %213, %cst_80 {dimension_numbers = #tpu.dot_dimension_numbers<[2], [2], [1], [1], [0, 0, 0, 1, 1, 1], [0], [0]>} : vector<2x8x128xbf16>, vector<2x8x128xbf16>, vector<2x8x8xf32> -> vector<2x8x8xf32>
    %cst_81 = arith.constant 0.353553385 : f32
    %218 = vector.broadcast %cst_81 : f32 to vector<2x8x8xf32>
    %219 = arith.mulf %217, %218 : vector<2x8x8xf32>
    %cst_82 = arith.constant dense<0xFF800000> : vector<2x8xf32>
    %220 = vector.multi_reduction <maximumf>, %219, %cst_82 [2] : vector<2x8x8xf32> to vector<2x8xf32>
    %221 = vector.shape_cast %220 : vector<2x8xf32> to vector<2x8x1xf32>
    %222 = vector.broadcast %221 : vector<2x8x1xf32> to vector<2x8x8xf32>
    %223 = arith.subf %219, %222 : vector<2x8x8xf32>
    %224 = math.exp %223 : vector<2x8x8xf32>
    %cst_83 = arith.constant dense<0.000000e+00> : vector<2x8xf32>
    %225 = vector.multi_reduction <add>, %224, %cst_83 [2] : vector<2x8x8xf32> to vector<2x8xf32>
    %226 = vector.shape_cast %225 : vector<2x8xf32> to vector<2x8x1xf32>
    %227 = tpu.reciprocal %226 {approx = true} : vector<2x8x1xf32> -> vector<2x8x1xf32>
    %228 = vector.broadcast %227 : vector<2x8x1xf32> to vector<2x8x8xf32>
    %229 = arith.mulf %224, %228 : vector<2x8x8xf32>
    %230 = arith.truncf %229 : vector<2x8x8xf32> to vector<2x8x8xbf16>
    %cst_84 = arith.constant dense<0.000000e+00> : vector<2x8x128xf32>
    %231 = tpu.matmul %230, %216, %cst_84 {dimension_numbers = #tpu.dot_dimension_numbers<[2], [1], [1], [2], [0, 0, 0, 1, 1, 2], [0], [0]>} : vector<2x8x8xbf16>, vector<2x8x128xbf16>, vector<2x8x128xf32> -> vector<2x8x128xf32>
    %232 = vector.shape_cast %231 : vector<2x8x128xf32> to vector<16x128xf32>
    %233 = arith.truncf %232 : vector<16x128xf32> to vector<16x128xbf16>
    %c0_85 = arith.constant 0 : index
    %c0_86 = arith.constant 0 : index
    %234 = vector.load %arg19[%c0_85, %c0_86] : memref<512x128xbf16, #tpu.memory_space<vmem>>, vector<128x128xbf16>
    %cst_87 = arith.constant dense<0.000000e+00> : vector<16x128xf32>
    %235 = tpu.matmul %233, %234, %cst_87 {dimension_numbers = #tpu.dot_dimension_numbers<[1], [0], [0], [1], [0, 0, 1, 1], [], []>} : vector<16x128xbf16>, vector<128x128xbf16>, vector<16x128xf32> -> vector<16x128xf32>
    %236 = vector.extract_strided_slice %207 {offsets = [0, 128], sizes = [16, 128], strides = [1, 1]} : vector<16x1536xf32> to vector<16x128xf32>
    %237 = vector.shape_cast %236 : vector<16x128xf32> to vector<2x8x128xf32>
    %238 = arith.truncf %237 : vector<2x8x128xf32> to vector<2x8x128xbf16>
    %239 = vector.extract_strided_slice %207 {offsets = [0, 640], sizes = [16, 128], strides = [1, 1]} : vector<16x1536xf32> to vector<16x128xf32>
    %240 = vector.shape_cast %239 : vector<16x128xf32> to vector<2x8x128xf32>
    %241 = arith.truncf %240 : vector<2x8x128xf32> to vector<2x8x128xbf16>
    %242 = vector.extract_strided_slice %207 {offsets = [0, 1152], sizes = [16, 128], strides = [1, 1]} : vector<16x1536xf32> to vector<16x128xf32>
    %243 = vector.shape_cast %242 : vector<16x128xf32> to vector<2x8x128xf32>
    %244 = arith.truncf %243 : vector<2x8x128xf32> to vector<2x8x128xbf16>
    %cst_88 = arith.constant dense<0.000000e+00> : vector<2x8x8xf32>
    %245 = tpu.matmul %238, %241, %cst_88 {dimension_numbers = #tpu.dot_dimension_numbers<[2], [2], [1], [1], [0, 0, 0, 1, 1, 1], [0], [0]>} : vector<2x8x128xbf16>, vector<2x8x128xbf16>, vector<2x8x8xf32> -> vector<2x8x8xf32>
    %cst_89 = arith.constant 0.353553385 : f32
    %246 = vector.broadcast %cst_89 : f32 to vector<2x8x8xf32>
    %247 = arith.mulf %245, %246 : vector<2x8x8xf32>
    %cst_90 = arith.constant dense<0xFF800000> : vector<2x8xf32>
    %248 = vector.multi_reduction <maximumf>, %247, %cst_90 [2] : vector<2x8x8xf32> to vector<2x8xf32>
    %249 = vector.shape_cast %248 : vector<2x8xf32> to vector<2x8x1xf32>
    %250 = vector.broadcast %249 : vector<2x8x1xf32> to vector<2x8x8xf32>
    %251 = arith.subf %247, %250 : vector<2x8x8xf32>
    %252 = math.exp %251 : vector<2x8x8xf32>
    %cst_91 = arith.constant dense<0.000000e+00> : vector<2x8xf32>
    %253 = vector.multi_reduction <add>, %252, %cst_91 [2] : vector<2x8x8xf32> to vector<2x8xf32>
    %254 = vector.shape_cast %253 : vector<2x8xf32> to vector<2x8x1xf32>
    %255 = tpu.reciprocal %254 {approx = true} : vector<2x8x1xf32> -> vector<2x8x1xf32>
    %256 = vector.broadcast %255 : vector<2x8x1xf32> to vector<2x8x8xf32>
    %257 = arith.mulf %252, %256 : vector<2x8x8xf32>
    %258 = arith.truncf %257 : vector<2x8x8xf32> to vector<2x8x8xbf16>
    %cst_92 = arith.constant dense<0.000000e+00> : vector<2x8x128xf32>
    %259 = tpu.matmul %258, %244, %cst_92 {dimension_numbers = #tpu.dot_dimension_numbers<[2], [1], [1], [2], [0, 0, 0, 1, 1, 2], [0], [0]>} : vector<2x8x8xbf16>, vector<2x8x128xbf16>, vector<2x8x128xf32> -> vector<2x8x128xf32>
    %260 = vector.shape_cast %259 : vector<2x8x128xf32> to vector<16x128xf32>
    %261 = arith.truncf %260 : vector<16x128xf32> to vector<16x128xbf16>
    %c128_93 = arith.constant 128 : index
    %c0_94 = arith.constant 0 : index
    %262 = vector.load %arg19[%c128_93, %c0_94] : memref<512x128xbf16, #tpu.memory_space<vmem>>, vector<128x128xbf16>
    %cst_95 = arith.constant dense<0.000000e+00> : vector<16x128xf32>
    %263 = tpu.matmul %261, %262, %cst_95 {dimension_numbers = #tpu.dot_dimension_numbers<[1], [0], [0], [1], [0, 0, 1, 1], [], []>} : vector<16x128xbf16>, vector<128x128xbf16>, vector<16x128xf32> -> vector<16x128xf32>
    %264 = arith.addf %235, %263 : vector<16x128xf32>
    %265 = vector.extract_strided_slice %207 {offsets = [0, 256], sizes = [16, 128], strides = [1, 1]} : vector<16x1536xf32> to vector<16x128xf32>
    %266 = vector.shape_cast %265 : vector<16x128xf32> to vector<2x8x128xf32>
    %267 = arith.truncf %266 : vector<2x8x128xf32> to vector<2x8x128xbf16>
    %268 = vector.extract_strided_slice %207 {offsets = [0, 768], sizes = [16, 128], strides = [1, 1]} : vector<16x1536xf32> to vector<16x128xf32>
    %269 = vector.shape_cast %268 : vector<16x128xf32> to vector<2x8x128xf32>
    %270 = arith.truncf %269 : vector<2x8x128xf32> to vector<2x8x128xbf16>
    %271 = vector.extract_strided_slice %207 {offsets = [0, 1280], sizes = [16, 128], strides = [1, 1]} : vector<16x1536xf32> to vector<16x128xf32>
    %272 = vector.shape_cast %271 : vector<16x128xf32> to vector<2x8x128xf32>
    %273 = arith.truncf %272 : vector<2x8x128xf32> to vector<2x8x128xbf16>
    %cst_96 = arith.constant dense<0.000000e+00> : vector<2x8x8xf32>
    %274 = tpu.matmul %267, %270, %cst_96 {dimension_numbers = #tpu.dot_dimension_numbers<[2], [2], [1], [1], [0, 0, 0, 1, 1, 1], [0], [0]>} : vector<2x8x128xbf16>, vector<2x8x128xbf16>, vector<2x8x8xf32> -> vector<2x8x8xf32>
    %cst_97 = arith.constant 0.353553385 : f32
    %275 = vector.broadcast %cst_97 : f32 to vector<2x8x8xf32>
    %276 = arith.mulf %274, %275 : vector<2x8x8xf32>
    %cst_98 = arith.constant dense<0xFF800000> : vector<2x8xf32>
    %277 = vector.multi_reduction <maximumf>, %276, %cst_98 [2] : vector<2x8x8xf32> to vector<2x8xf32>
    %278 = vector.shape_cast %277 : vector<2x8xf32> to vector<2x8x1xf32>
    %279 = vector.broadcast %278 : vector<2x8x1xf32> to vector<2x8x8xf32>
    %280 = arith.subf %276, %279 : vector<2x8x8xf32>
    %281 = math.exp %280 : vector<2x8x8xf32>
    %cst_99 = arith.constant dense<0.000000e+00> : vector<2x8xf32>
    %282 = vector.multi_reduction <add>, %281, %cst_99 [2] : vector<2x8x8xf32> to vector<2x8xf32>
    %283 = vector.shape_cast %282 : vector<2x8xf32> to vector<2x8x1xf32>
    %284 = tpu.reciprocal %283 {approx = true} : vector<2x8x1xf32> -> vector<2x8x1xf32>
    %285 = vector.broadcast %284 : vector<2x8x1xf32> to vector<2x8x8xf32>
    %286 = arith.mulf %281, %285 : vector<2x8x8xf32>
    %287 = arith.truncf %286 : vector<2x8x8xf32> to vector<2x8x8xbf16>
    %cst_100 = arith.constant dense<0.000000e+00> : vector<2x8x128xf32>
    %288 = tpu.matmul %287, %273, %cst_100 {dimension_numbers = #tpu.dot_dimension_numbers<[2], [1], [1], [2], [0, 0, 0, 1, 1, 2], [0], [0]>} : vector<2x8x8xbf16>, vector<2x8x128xbf16>, vector<2x8x128xf32> -> vector<2x8x128xf32>
    %289 = vector.shape_cast %288 : vector<2x8x128xf32> to vector<16x128xf32>
    %290 = arith.truncf %289 : vector<16x128xf32> to vector<16x128xbf16>
    %c256_101 = arith.constant 256 : index
    %c0_102 = arith.constant 0 : index
    %291 = vector.load %arg19[%c256_101, %c0_102] : memref<512x128xbf16, #tpu.memory_space<vmem>>, vector<128x128xbf16>
    %cst_103 = arith.constant dense<0.000000e+00> : vector<16x128xf32>
    %292 = tpu.matmul %290, %291, %cst_103 {dimension_numbers = #tpu.dot_dimension_numbers<[1], [0], [0], [1], [0, 0, 1, 1], [], []>} : vector<16x128xbf16>, vector<128x128xbf16>, vector<16x128xf32> -> vector<16x128xf32>
    %293 = arith.addf %264, %292 : vector<16x128xf32>
    %294 = vector.extract_strided_slice %207 {offsets = [0, 384], sizes = [16, 128], strides = [1, 1]} : vector<16x1536xf32> to vector<16x128xf32>
    %295 = vector.shape_cast %294 : vector<16x128xf32> to vector<2x8x128xf32>
    %296 = arith.truncf %295 : vector<2x8x128xf32> to vector<2x8x128xbf16>
    %297 = vector.extract_strided_slice %207 {offsets = [0, 896], sizes = [16, 128], strides = [1, 1]} : vector<16x1536xf32> to vector<16x128xf32>
    %298 = vector.shape_cast %297 : vector<16x128xf32> to vector<2x8x128xf32>
    %299 = arith.truncf %298 : vector<2x8x128xf32> to vector<2x8x128xbf16>
    %300 = vector.extract_strided_slice %207 {offsets = [0, 1408], sizes = [16, 128], strides = [1, 1]} : vector<16x1536xf32> to vector<16x128xf32>
    %301 = vector.shape_cast %300 : vector<16x128xf32> to vector<2x8x128xf32>
    %302 = arith.truncf %301 : vector<2x8x128xf32> to vector<2x8x128xbf16>
    %cst_104 = arith.constant dense<0.000000e+00> : vector<2x8x8xf32>
    %303 = tpu.matmul %296, %299, %cst_104 {dimension_numbers = #tpu.dot_dimension_numbers<[2], [2], [1], [1], [0, 0, 0, 1, 1, 1], [0], [0]>} : vector<2x8x128xbf16>, vector<2x8x128xbf16>, vector<2x8x8xf32> -> vector<2x8x8xf32>
    %cst_105 = arith.constant 0.353553385 : f32
    %304 = vector.broadcast %cst_105 : f32 to vector<2x8x8xf32>
    %305 = arith.mulf %303, %304 : vector<2x8x8xf32>
    %cst_106 = arith.constant dense<0xFF800000> : vector<2x8xf32>
    %306 = vector.multi_reduction <maximumf>, %305, %cst_106 [2] : vector<2x8x8xf32> to vector<2x8xf32>
    %307 = vector.shape_cast %306 : vector<2x8xf32> to vector<2x8x1xf32>
    %308 = vector.broadcast %307 : vector<2x8x1xf32> to vector<2x8x8xf32>
    %309 = arith.subf %305, %308 : vector<2x8x8xf32>
    %310 = math.exp %309 : vector<2x8x8xf32>
    %cst_107 = arith.constant dense<0.000000e+00> : vector<2x8xf32>
    %311 = vector.multi_reduction <add>, %310, %cst_107 [2] : vector<2x8x8xf32> to vector<2x8xf32>
    %312 = vector.shape_cast %311 : vector<2x8xf32> to vector<2x8x1xf32>
    %313 = tpu.reciprocal %312 {approx = true} : vector<2x8x1xf32> -> vector<2x8x1xf32>
    %314 = vector.broadcast %313 : vector<2x8x1xf32> to vector<2x8x8xf32>
    %315 = arith.mulf %310, %314 : vector<2x8x8xf32>
    %316 = arith.truncf %315 : vector<2x8x8xf32> to vector<2x8x8xbf16>
    %cst_108 = arith.constant dense<0.000000e+00> : vector<2x8x128xf32>
    %317 = tpu.matmul %316, %302, %cst_108 {dimension_numbers = #tpu.dot_dimension_numbers<[2], [1], [1], [2], [0, 0, 0, 1, 1, 2], [0], [0]>} : vector<2x8x8xbf16>, vector<2x8x128xbf16>, vector<2x8x128xf32> -> vector<2x8x128xf32>
    %318 = vector.shape_cast %317 : vector<2x8x128xf32> to vector<16x128xf32>
    %319 = arith.truncf %318 : vector<16x128xf32> to vector<16x128xbf16>
    %c384_109 = arith.constant 384 : index
    %c0_110 = arith.constant 0 : index
    %320 = vector.load %arg19[%c384_109, %c0_110] : memref<512x128xbf16, #tpu.memory_space<vmem>>, vector<128x128xbf16>
    %cst_111 = arith.constant dense<0.000000e+00> : vector<16x128xf32>
    %321 = tpu.matmul %319, %320, %cst_111 {dimension_numbers = #tpu.dot_dimension_numbers<[1], [0], [0], [1], [0, 0, 1, 1], [], []>} : vector<16x128xbf16>, vector<128x128xbf16>, vector<16x128xf32> -> vector<16x128xf32>
    %322 = arith.addf %293, %321 : vector<16x128xf32>
    %c0_112 = arith.constant 0 : index
    %c0_113 = arith.constant 0 : index
    %323 = vector.load %arg20[%c0_112, %c0_113] : memref<1x128xf32, #tpu.memory_space<vmem>>, vector<1x128xf32>
    %324 = vector.broadcast %323 : vector<1x128xf32> to vector<16x128xf32>
    %325 = arith.addf %322, %324 : vector<16x128xf32>
    %326 = arith.addf %325, %201 : vector<16x128xf32>
    %c0_114 = arith.constant 0 : index
    %c0_115 = arith.constant 0 : index
    %327 = vector.load %arg21[%c0_114, %c0_115] : memref<1x128xf32, #tpu.memory_space<vmem>>, vector<1x128xf32>
    %c0_116 = arith.constant 0 : index
    %c0_117 = arith.constant 0 : index
    %328 = vector.load %arg22[%c0_116, %c0_117] : memref<1x128xf32, #tpu.memory_space<vmem>>, vector<1x128xf32>
    %329 = tpu.iota {dimensions = array<i32: 1>} : vector<16x128xi32>
    %c32_i32_118 = arith.constant 32 : i32
    %330 = vector.broadcast %c32_i32_118 : i32 to vector<16x128xi32>
    %331 = arith.cmpi slt, %329, %330 : vector<16x128xi32>
    %cst_119 = arith.constant dense<0.000000e+00> : vector<16xf32>
    %332 = vector.multi_reduction <add>, %326, %cst_119 [1] : vector<16x128xf32> to vector<16xf32>
    %333 = vector.shape_cast %332 : vector<16xf32> to vector<16x1xf32>
    %cst_120 = arith.constant 3.125000e-02 : f32
    %334 = vector.broadcast %cst_120 : f32 to vector<16x1xf32>
    %335 = arith.mulf %333, %334 : vector<16x1xf32>
    %336 = vector.broadcast %335 : vector<16x1xf32> to vector<16x128xf32>
    %337 = arith.subf %326, %336 : vector<16x128xf32>
    %cst_121 = arith.constant 0.000000e+00 : f32
    %338 = vector.broadcast %cst_121 : f32 to vector<16x128xf32>
    %339 = arith.select %331, %337, %338 : vector<16x128xi1>, vector<16x128xf32>
    %340 = arith.mulf %339, %339 : vector<16x128xf32>
    %cst_122 = arith.constant dense<0.000000e+00> : vector<16xf32>
    %341 = vector.multi_reduction <add>, %340, %cst_122 [1] : vector<16x128xf32> to vector<16xf32>
    %342 = vector.shape_cast %341 : vector<16xf32> to vector<16x1xf32>
    %cst_123 = arith.constant 3.125000e-02 : f32
    %343 = vector.broadcast %cst_123 : f32 to vector<16x1xf32>
    %344 = arith.mulf %342, %343 : vector<16x1xf32>
    %cst_124 = arith.constant 9.99999974E-6 : f32
    %345 = vector.broadcast %cst_124 : f32 to vector<16x1xf32>
    %346 = arith.addf %344, %345 : vector<16x1xf32>
    %347 = math.rsqrt %346 : vector<16x1xf32>
    %348 = vector.broadcast %347 : vector<16x1xf32> to vector<16x128xf32>
    %349 = arith.mulf %339, %348 : vector<16x128xf32>
    %350 = vector.broadcast %327 : vector<1x128xf32> to vector<16x128xf32>
    %351 = arith.mulf %349, %350 : vector<16x128xf32>
    %352 = vector.broadcast %328 : vector<1x128xf32> to vector<16x128xf32>
    %353 = arith.addf %351, %352 : vector<16x128xf32>
    %354 = arith.truncf %353 : vector<16x128xf32> to vector<16x128xbf16>
    %c0_125 = arith.constant 0 : index
    %c0_126 = arith.constant 0 : index
    %355 = vector.load %arg23[%c0_125, %c0_126] : memref<128x128xbf16, #tpu.memory_space<vmem>>, vector<128x128xbf16>
    %cst_127 = arith.constant dense<0.000000e+00> : vector<16x128xf32>
    %356 = tpu.matmul %354, %355, %cst_127 {dimension_numbers = #tpu.dot_dimension_numbers<[1], [0], [0], [1], [0, 0, 1, 1], [], []>} : vector<16x128xbf16>, vector<128x128xbf16>, vector<16x128xf32> -> vector<16x128xf32>
    %c0_128 = arith.constant 0 : index
    %c0_129 = arith.constant 0 : index
    %357 = vector.load %arg24[%c0_128, %c0_129] : memref<1x128xf32, #tpu.memory_space<vmem>>, vector<1x128xf32>
    %358 = vector.broadcast %357 : vector<1x128xf32> to vector<16x128xf32>
    %359 = arith.addf %356, %358 : vector<16x128xf32>
    %cst_130 = arith.constant 0.000000e+00 : f32
    %360 = vector.broadcast %cst_130 : f32 to vector<16x128xf32>
    %361 = arith.maximumf %359, %360 : vector<16x128xf32>
    %362 = arith.truncf %361 : vector<16x128xf32> to vector<16x128xbf16>
    %c0_131 = arith.constant 0 : index
    %c0_132 = arith.constant 0 : index
    %363 = vector.load %arg25[%c0_131, %c0_132] : memref<128x128xbf16, #tpu.memory_space<vmem>>, vector<128x128xbf16>
    %cst_133 = arith.constant dense<0.000000e+00> : vector<16x128xf32>
    %364 = tpu.matmul %362, %363, %cst_133 {dimension_numbers = #tpu.dot_dimension_numbers<[1], [0], [0], [1], [0, 0, 1, 1], [], []>} : vector<16x128xbf16>, vector<128x128xbf16>, vector<16x128xf32> -> vector<16x128xf32>
    %c0_134 = arith.constant 0 : index
    %c0_135 = arith.constant 0 : index
    %365 = vector.load %arg26[%c0_134, %c0_135] : memref<1x128xf32, #tpu.memory_space<vmem>>, vector<1x128xf32>
    %366 = vector.broadcast %365 : vector<1x128xf32> to vector<16x128xf32>
    %367 = arith.addf %364, %366 : vector<16x128xf32>
    %c0_136 = arith.constant 0 : index
    %c0_137 = arith.constant 0 : index
    %368 = vector.load %arg27[%c0_136, %c0_137] : memref<1x128xf32, #tpu.memory_space<vmem>>, vector<1x128xf32>
    %c0_138 = arith.constant 0 : index
    %c0_139 = arith.constant 0 : index
    %369 = vector.load %arg28[%c0_138, %c0_139] : memref<1x128xf32, #tpu.memory_space<vmem>>, vector<1x128xf32>
    %370 = tpu.iota {dimensions = array<i32: 1>} : vector<16x128xi32>
    %c32_i32_140 = arith.constant 32 : i32
    %371 = vector.broadcast %c32_i32_140 : i32 to vector<16x128xi32>
    %372 = arith.cmpi slt, %370, %371 : vector<16x128xi32>
    %cst_141 = arith.constant dense<0.000000e+00> : vector<16xf32>
    %373 = vector.multi_reduction <add>, %367, %cst_141 [1] : vector<16x128xf32> to vector<16xf32>
    %374 = vector.shape_cast %373 : vector<16xf32> to vector<16x1xf32>
    %cst_142 = arith.constant 3.125000e-02 : f32
    %375 = vector.broadcast %cst_142 : f32 to vector<16x1xf32>
    %376 = arith.mulf %374, %375 : vector<16x1xf32>
    %377 = vector.broadcast %376 : vector<16x1xf32> to vector<16x128xf32>
    %378 = arith.subf %367, %377 : vector<16x128xf32>
    %cst_143 = arith.constant 0.000000e+00 : f32
    %379 = vector.broadcast %cst_143 : f32 to vector<16x128xf32>
    %380 = arith.select %372, %378, %379 : vector<16x128xi1>, vector<16x128xf32>
    %381 = arith.mulf %380, %380 : vector<16x128xf32>
    %cst_144 = arith.constant dense<0.000000e+00> : vector<16xf32>
    %382 = vector.multi_reduction <add>, %381, %cst_144 [1] : vector<16x128xf32> to vector<16xf32>
    %383 = vector.shape_cast %382 : vector<16xf32> to vector<16x1xf32>
    %cst_145 = arith.constant 3.125000e-02 : f32
    %384 = vector.broadcast %cst_145 : f32 to vector<16x1xf32>
    %385 = arith.mulf %383, %384 : vector<16x1xf32>
    %cst_146 = arith.constant 9.99999974E-6 : f32
    %386 = vector.broadcast %cst_146 : f32 to vector<16x1xf32>
    %387 = arith.addf %385, %386 : vector<16x1xf32>
    %388 = math.rsqrt %387 : vector<16x1xf32>
    %389 = vector.broadcast %388 : vector<16x1xf32> to vector<16x128xf32>
    %390 = arith.mulf %380, %389 : vector<16x128xf32>
    %391 = vector.broadcast %368 : vector<1x128xf32> to vector<16x128xf32>
    %392 = arith.mulf %390, %391 : vector<16x128xf32>
    %393 = vector.broadcast %369 : vector<1x128xf32> to vector<16x128xf32>
    %394 = arith.addf %392, %393 : vector<16x128xf32>
    %395 = arith.truncf %394 : vector<16x128xf32> to vector<16x128xbf16>
    %396 = vector.shape_cast %395 : vector<16x128xbf16> to vector<2x8x128xbf16>
    %c0_147 = arith.constant 0 : index
    %c0_148 = arith.constant 0 : index
    %c0_149 = arith.constant 0 : index
    %397 = vector.load %arg29[%c0_147, %c0_148, %c0_149] : memref<2x8x128xbf16, #tpu.memory_space<vmem>>, vector<2x8x128xbf16>
    tpu.vector_store %arg29[%c0_147, %c0_148, %c0_149], %396 {strides = array<i32>} : memref<2x8x128xbf16, #tpu.memory_space<vmem>>, vector<2x8x128xbf16>,
    return
  }
  func.func @transform_0(%arg0: i32) -> (i32, i32, i32) {
    %c0_i32 = arith.constant 0 : i32
    %c0_i32_0 = arith.constant 0 : i32
    %c0_i32_1 = arith.constant 0 : i32
    return %arg0, %c0_i32, %c0_i32_0 : i32, i32, i32
  }
  func.func @transform_1(%arg0: i32) -> (i32, i32) {
    %c0_i32 = arith.constant 0 : i32
    %c0_i32_0 = arith.constant 0 : i32
    %c0_i32_1 = arith.constant 0 : i32
    return %c0_i32, %c0_i32_0 : i32, i32
  }
  func.func @transform_2(%arg0: i32) -> (i32, i32) {
    %c0_i32 = arith.constant 0 : i32
    %c0_i32_0 = arith.constant 0 : i32
    %c0_i32_1 = arith.constant 0 : i32
    return %c0_i32, %c0_i32_0 : i32, i32
  }
  func.func @transform_3(%arg0: i32) -> (i32, i32) {
    %c0_i32 = arith.constant 0 : i32
    %c0_i32_0 = arith.constant 0 : i32
    %c0_i32_1 = arith.constant 0 : i32
    return %c0_i32, %c0_i32_0 : i32, i32
  }
  func.func @transform_4(%arg0: i32) -> (i32, i32) {
    %c0_i32 = arith.constant 0 : i32
    %c0_i32_0 = arith.constant 0 : i32
    %c0_i32_1 = arith.constant 0 : i32
    return %c0_i32, %c0_i32_0 : i32, i32
  }
  func.func @transform_5(%arg0: i32) -> (i32, i32) {
    %c0_i32 = arith.constant 0 : i32
    %c0_i32_0 = arith.constant 0 : i32
    %c0_i32_1 = arith.constant 0 : i32
    return %c0_i32, %c0_i32_0 : i32, i32
  }
  func.func @transform_6(%arg0: i32) -> (i32, i32) {
    %c0_i32 = arith.constant 0 : i32
    %c0_i32_0 = arith.constant 0 : i32
    %c0_i32_1 = arith.constant 0 : i32
    return %c0_i32, %c0_i32_0 : i32, i32
  }
  func.func @transform_7(%arg0: i32) -> (i32, i32) {
    %c0_i32 = arith.constant 0 : i32
    %c0_i32_0 = arith.constant 0 : i32
    %c0_i32_1 = arith.constant 0 : i32
    return %c0_i32, %c0_i32_0 : i32, i32
  }
  func.func @transform_8(%arg0: i32) -> (i32, i32) {
    %c0_i32 = arith.constant 0 : i32
    %c0_i32_0 = arith.constant 0 : i32
    %c0_i32_1 = arith.constant 0 : i32
    return %c0_i32, %c0_i32_0 : i32, i32
  }
  func.func @transform_9(%arg0: i32) -> (i32, i32) {
    %c0_i32 = arith.constant 0 : i32
    %c0_i32_0 = arith.constant 0 : i32
    %c0_i32_1 = arith.constant 0 : i32
    return %c0_i32, %c0_i32_0 : i32, i32
  }
  func.func @transform_10(%arg0: i32) -> (i32, i32) {
    %c0_i32 = arith.constant 0 : i32
    %c0_i32_0 = arith.constant 0 : i32
    %c0_i32_1 = arith.constant 0 : i32
    return %c0_i32, %c0_i32_0 : i32, i32
  }
  func.func @transform_11(%arg0: i32) -> (i32, i32) {
    %c0_i32 = arith.constant 0 : i32
    %c0_i32_0 = arith.constant 0 : i32
    %c0_i32_1 = arith.constant 0 : i32
    return %c0_i32, %c0_i32_0 : i32, i32
  }
  func.func @transform_12(%arg0: i32) -> (i32, i32) {
    %c0_i32 = arith.constant 0 : i32
    %c0_i32_0 = arith.constant 0 : i32
    %c0_i32_1 = arith.constant 0 : i32
    return %c0_i32, %c0_i32_0 : i32, i32
  }
  func.func @transform_13(%arg0: i32) -> (i32, i32) {
    %c0_i32 = arith.constant 0 : i32
    %c0_i32_0 = arith.constant 0 : i32
    %c0_i32_1 = arith.constant 0 : i32
    return %c0_i32, %c0_i32_0 : i32, i32
  }
  func.func @transform_14(%arg0: i32) -> (i32, i32) {
    %c0_i32 = arith.constant 0 : i32
    %c0_i32_0 = arith.constant 0 : i32
    %c0_i32_1 = arith.constant 0 : i32
    return %c0_i32, %c0_i32_0 : i32, i32
  }
  func.func @transform_15(%arg0: i32) -> (i32, i32) {
    %c0_i32 = arith.constant 0 : i32
    %c0_i32_0 = arith.constant 0 : i32
    %c0_i32_1 = arith.constant 0 : i32
    return %c0_i32, %c0_i32_0 : i32, i32
  }
  func.func @transform_16(%arg0: i32) -> (i32, i32) {
    %c0_i32 = arith.constant 0 : i32
    %c0_i32_0 = arith.constant 0 : i32
    %c0_i32_1 = arith.constant 0 : i32
    return %c0_i32, %c0_i32_0 : i32, i32
  }
  func.func @transform_17(%arg0: i32) -> (i32, i32) {
    %c0_i32 = arith.constant 0 : i32
    %c0_i32_0 = arith.constant 0 : i32
    %c0_i32_1 = arith.constant 0 : i32
    return %c0_i32, %c0_i32_0 : i32, i32
  }
  func.func @transform_18(%arg0: i32) -> (i32, i32) {
    %c0_i32 = arith.constant 0 : i32
    %c0_i32_0 = arith.constant 0 : i32
    %c0_i32_1 = arith.constant 0 : i32
    return %c0_i32, %c0_i32_0 : i32, i32
  }
  func.func @transform_19(%arg0: i32) -> (i32, i32) {
    %c0_i32 = arith.constant 0 : i32
    %c0_i32_0 = arith.constant 0 : i32
    %c0_i32_1 = arith.constant 0 : i32
    return %c0_i32, %c0_i32_0 : i32, i32
  }
  func.func @transform_20(%arg0: i32) -> (i32, i32) {
    %c0_i32 = arith.constant 0 : i32
    %c0_i32_0 = arith.constant 0 : i32
    %c0_i32_1 = arith.constant 0 : i32
    return %c0_i32, %c0_i32_0 : i32, i32
  }
  func.func @transform_21(%arg0: i32) -> (i32, i32) {
    %c0_i32 = arith.constant 0 : i32
    %c0_i32_0 = arith.constant 0 : i32
    %c0_i32_1 = arith.constant 0 : i32
    return %c0_i32, %c0_i32_0 : i32, i32
  }
  func.func @transform_22(%arg0: i32) -> (i32, i32) {
    %c0_i32 = arith.constant 0 : i32
    %c0_i32_0 = arith.constant 0 : i32
    %c0_i32_1 = arith.constant 0 : i32
    return %c0_i32, %c0_i32_0 : i32, i32
  }
  func.func @transform_23(%arg0: i32) -> (i32, i32) {
    %c0_i32 = arith.constant 0 : i32
    %c0_i32_0 = arith.constant 0 : i32
    %c0_i32_1 = arith.constant 0 : i32
    return %c0_i32, %c0_i32_0 : i32, i32
  }
  func.func @transform_24(%arg0: i32) -> (i32, i32) {
    %c0_i32 = arith.constant 0 : i32
    %c0_i32_0 = arith.constant 0 : i32
    %c0_i32_1 = arith.constant 0 : i32
    return %c0_i32, %c0_i32_0 : i32, i32
  }
  func.func @transform_25(%arg0: i32) -> (i32, i32) {
    %c0_i32 = arith.constant 0 : i32
    %c0_i32_0 = arith.constant 0 : i32
    %c0_i32_1 = arith.constant 0 : i32
    return %c0_i32, %c0_i32_0 : i32, i32
  }
  func.func @transform_26(%arg0: i32) -> (i32, i32) {
    %c0_i32 = arith.constant 0 : i32
    %c0_i32_0 = arith.constant 0 : i32
    %c0_i32_1 = arith.constant 0 : i32
    return %c0_i32, %c0_i32_0 : i32, i32
  }
  func.func @transform_27(%arg0: i32) -> (i32, i32) {
    %c0_i32 = arith.constant 0 : i32
    %c0_i32_0 = arith.constant 0 : i32
    %c0_i32_1 = arith.constant 0 : i32
    return %c0_i32, %c0_i32_0 : i32, i32
  }
  func.func @transform_28(%arg0: i32) -> (i32, i32, i32) {
    %c0_i32 = arith.constant 0 : i32
    %c0_i32_0 = arith.constant 0 : i32
    %c0_i32_1 = arith.constant 0 : i32
    return %arg0, %c0_i32, %c0_i32_0 : i32, i32, i32
  }
}

</mosaic_0001>

<bundles_post_ra>
// kernel: articles_nn_forward.1
= control target key start
LH: loop header
LB: loop body
LE: loop exit
PB: predicated region body
PF: predicated region fallthrough
CT: control target
= control target key end

     0   :  { %s9457_s0 = inlined_call_operand.vmem [shape: bf16[4,8,128], index: 0, kind: input, shape index: {}]   ;;  %s9458_s1 = inlined_call_operand.vmem [shape: bf16[128,128], index: 1, kind: input, shape index: {}]   ;;  %s9459_s2 = inlined_call_operand.vmem [shape: f32[1,128], index: 2, kind: input, shape index: {}]   ;;  %s9460_s3 = inlined_call_operand.vmem [shape: f32[16,128], index: 3, kind: input, shape index: {}]   ;;  %s9461_s4 = inlined_call_operand.hbm [shape: bf16[128,1536], index: 4, kind: input, shape index: {}]   ;;  %s9462_s5 = inlined_call_operand.hbm [shape: f32[1,1536], index: 5, kind: input, shape index: {}]   ;;  %s9463_s6 = inlined_call_operand.hbm [shape: bf16[512,128], index: 6, kind: input, shape index: {}]   ;;  %s9464_s7 = inlined_call_operand.vmem [shape: f32[1,128], index: 7, kind: input, shape index: {}]   ;;  %s9465_s8 = inlined_call_operand.hbm [shape: f32[1,128], index: 8, kind: input, shape index: {}]   ;;  %s9466_s9 = inlined_call_operand.hbm [shape: f32[1,128], index: 9, kind: input, shape index: {}]   ;;  %s9467_s10 = inlined_call_operand.vmem [shape: bf16[128,128], index: 10, kind: input, shape index: {}]   ;;  %s9468_s11 = inlined_call_operand.hbm [shape: f32[1,128], index: 11, kind: input, shape index: {}]   ;;  %s9469_s12 = inlined_call_operand.hbm [shape: bf16[128,128], index: 12, kind: input, shape index: {}]   ;;  %s9470_s13 = inlined_call_operand.hbm [shape: f32[1,128], index: 13, kind: input, shape index: {}]   ;;  %s9471_s14 = inlined_call_operand.vmem [shape: f32[1,128], index: 14, kind: input, shape index: {}]   ;;  %s9472_s15 = inlined_call_operand.vmem [shape: f32[1,128], index: 15, kind: input, shape index: {}]   ;;  %s9473_s16 = inlined_call_operand.hbm [shape: bf16[128,1536], index: 16, kind: input, shape index: {}]   ;;  %s9474_s17 = inlined_call_operand.vmem [shape: f32[1,1536], index: 17, kind: input, shape index: {}]   ;;  %s9475_s18 = inlined_call_operand.hbm [shape: bf16[512,128], index: 18, kind: input, shape index: {}]   ;;  %s9476_s19 = inlined_call_operand.vmem [shape: f32[1,128], index: 19, kind: input, shape index: {}]   ;;  %s9477_s20 = inlined_call_operand.vmem [shape: f32[1,128], index: 20, kind: input, shape index: {}]   ;;  %s9478_s21 = inlined_call_operand.vmem [shape: f32[1,128], index: 21, kind: input, shape index: {}]   ;;  %s9479_s22 = inlined_call_operand.hbm [shape: bf16[128,128], index: 22, kind: input, shape index: {}]   ;;  %s9480_s23 = inlined_call_operand.vmem [shape: f32[1,128], index: 23, kind: input, shape index: {}]   ;;  %s9481_s24 = inlined_call_operand.hbm [shape: bf16[128,128], index: 24, kind: input, shape index: {}]   ;;  %s9482_s25 = inlined_call_operand.vmem [shape: f32[1,128], index: 25, kind: input, shape index: {}]   ;;  %s9483_s26 = inlined_call_operand.vmem [shape: f32[1,128], index: 26, kind: input, shape index: {}]   ;;  %s9484_s27 = inlined_call_operand.vmem [shape: f32[1,128], index: 27, kind: input, shape index: {}]   ;;  %s9485_s28 = inlined_call_operand.vmem [shape: bf16[4,8,128], index: 28, kind: output, shape index: {}]  }
   0x1   :  { %9512 = sst [smem:[#allocation28_spill]] %s9457_s0 }
   0x2   :  { %9513 = sst [smem:[#allocation29_spill]] %s9458_s1 }
   0x3   :  { %9514 = sst [smem:[#allocation30_spill]] %s9459_s2 }
   0x4   :  { %9515 = sst [smem:[#allocation31_spill]] %s9460_s3 }
   0x5   :  { %9516 = sst [smem:[#allocation32_spill]] %s9461_s4 }
   0x6   :  { %9517 = sst [smem:[#allocation33_spill]] %s9462_s5 }
   0x7   :  { %9518 = sst [smem:[#allocation34_spill]] %s9463_s6 }
   0x8   :  { %9519 = sst [smem:[#allocation35_spill]] %s9464_s7 }
   0x9   :  { %9520 = sst [smem:[#allocation36_spill]] %s9465_s8 }
   0xa   :  { %9521 = sst [smem:[#allocation37_spill]] %s9466_s9 }
   0xb   :  { %9522 = sst [smem:[#allocation38_spill]] %s9467_s10 }
   0xc   :  { %9523 = sst [smem:[#allocation39_spill]] %s9468_s11 }
   0xd   :  { %9524 = sst [smem:[#allocation40_spill]] %s9469_s12 }
   0xe   :  { %9525 = sst [smem:[#allocation41_spill]] %s9470_s13 }
   0xf   :  { %9526 = sst [smem:[#allocation42_spill]] %s9475_s18 }
  0x10   :  { %9527 = sst [smem:[#allocation43_spill]] %s9478_s21 }
  0x11   :  { %9528 = sst [smem:[#allocation44_spill]] %s9480_s23 }
  0x12   :  { %9529 = sst [smem:[#allocation45_spill]] %s9482_s25 }
  0x13   :  { %9530 = sst [smem:[#allocation46_spill]] %s9483_s26 }
  0x14   :  { %9531 = sst [smem:[#allocation47_spill]] %s9484_s27 }
  0x15   :  { %9532 = sst [smem:[#allocation48_spill]] %s9485_s28 }
  0x16   :  { %33 = vsyncpa [#allocation3], 0 }
  0x17   :  { %34 = vsyncpa [#allocation5], 0 }
  0x18   :  { %35 = vsyncpa [#allocation8], 0 }
  0x19   :  { %36 = vsyncpa [#allocation11], 0 }
  0x1a   :  { %37 = vsyncpa [#allocation14], 0 }
  0x1b   :  { %38 = vsyncpa [#allocation17], 0 }
  0x1c   :  { %39 = vsyncpa [#allocation20], 0  ;;  %s8410_s8 = smov 0  }
  0x1d LB: > { %s8246_s5 = smov [#allocation4]   ;;  %s9496_s30 = sadd.s32 4294967295, %s8244_s8   ;;  %s8244_s8 = sphi %s8410_s8, %s45_s8  }
  0x1e   : > { %s704_s9 = sshll.u32 %s8246_s5, 4  ;;  %p6262_p0 = scmp.ge.s32.totalorder %s8244_s8, 1  ;;  %s8424_s9 = int_to_ptr.vmem [resolvable:$true] %s704_s9 }
  0x1f   : > { %p669_p1 = scmp.lt.s32.totalorder %s8244_s8, 3  ;;  %p8420_p2 = scmp.eq.s32.totalorder %s9496_s30, 0 }
  0x20   : > { %s8247_s10 = smov [#allocation7]   ;;  %s8248_s11 = smov [#allocation10]  }
  0x21   : > { %s9533_s3 = scalar_select %p8420_p2, 1, 0 }
  0x22   : > { %p8426_p3 = pnand %p6262_p0, %p669_p1  ;;  %s731_s0 = sshll.u32 %s8247_s10, 4  ;;  %s8432_s0 = int_to_ptr.vmem [resolvable:$true] %s731_s0 }
  0x23   : > { %s756_s29 = sshll.u32 %s8248_s11, 4  ;;  %s8249_s7 = smov [#allocation13]   ;;  %s8440_s29 = int_to_ptr.vmem [resolvable:$true] %s756_s29 }
  0x24   : > { %s9534_s6 = scalar_select %p8426_p3, 1, 0 }
  0x25   : > { %p7313_p4 = pneg %p8426_p3  ;;  %s780_s12 = sshll.u32 %s8249_s7, 4  ;;  %s8442_s12 = int_to_ptr.vmem [resolvable:$true] %s780_s12 }
  0x26   : > { %s9536_s5 = sld [smem:[#allocation33_spill]] }
  0x27   : > { %p8436_p5 = pnand %p8420_p2, %p7313_p4 }
  0x29   : > { %p8452_p7 = pneg %p8436_p5 }
  0x2c   : > { %s7874_s10 = scalar_lea.hbm %s9536_s5, 192 }
  0x2d   : > { %p7875_p6 = scmp.ne.s32.totalorder %s9536_s5, %s7874_s10  ;;  %p7881_p10 = scmp.lt.u32.totalorder %s7874_s10, %s9536_s5 }
  0x2f   : > { %p7877_p8 = pnand %p8452_p7, %p7875_p6 }
  0x31   : > { %p7878_p9 = pneg %p7877_p8 }
  0x33   : > { %p7883_p11 = pnand %p7881_p10, %p7878_p9 }
  0x35   : > { %7886 = shalt.err (!%p7883_p11)
}
  0x36   : > { %s7887_s28 = scalar_lea.vmem %s8424_s9, 192  ;;  %p7895_p1 = scmp.lt.s32.totalorder %s8424_s9, %s8424_s9 }
  0x37   : > { %p7888_p12 = scmp.ne.s32.totalorder %s8424_s9, %s7887_s28  ;;  %p7896_p4 = scmp.lt.s32.totalorder %s7887_s28, %s7887_s28 }
  0x39   : > { %p7890_p13 = pnand %p7888_p12, %p8452_p7  ;;  %p7897_p6 = por %p7896_p4, %p7895_p1 }
  0x3b   : > { %p7891_p0 = pneg %p7890_p13 }
  0x3d   : > { %p7898_p8 = pnand %p7897_p6, %p7891_p0 }
  0x3f   : > { %7901 = shalt.err (!%p7898_p8)
}
  0x40   : > { %7319 = dma.hbm_to_vmem [thread:$0]  (!%p8436_p5), %s9536_s5, 192, %s8424_s9, [#allocation5]  }
  0x41   : > { %s9538_s10 = sld [smem:[#allocation36_spill]] }
  0x47   : > { %s7902_s7 = scalar_lea.hbm %s9538_s10, 16 }
  0x48   : > { %p7903_p9 = scmp.ne.s32.totalorder %s9538_s10, %s7902_s7  ;;  %p7909_p12 = scmp.lt.u32.totalorder %s7902_s7, %s9538_s10 }
  0x4a   : > { %p7905_p10 = pnand %p7903_p9, %p8452_p7 }
  0x4c   : > { %p7906_p11 = pneg %p7905_p10 }
  0x4e   : > { %p7911_p13 = pnand %p7909_p12, %p7906_p11 }
  0x50   : > { %7914 = shalt.err (!%p7911_p13)
}
  0x51   : > { %s7915_s9 = scalar_lea.vmem %s8432_s0, 16  ;;  %s7922_s25 = scalar_lea.vmem %s8432_s0, 32 }
  0x52   : > { %p7916_p0 = scmp.ne.s32.totalorder %s8432_s0, %s7915_s9  ;;  %p7923_p6 = scmp.lt.s32.totalorder %s8432_s0, %s8432_s0 }
  0x53   : > { %p7924_p8 = scmp.lt.s32.totalorder %s7922_s25, %s7915_s9 }
  0x54   : > { %p7918_p1 = pnand %p7916_p0, %p8452_p7 }
  0x55   : > { %p7925_p9 = por %p7924_p8, %p7923_p6 }
  0x56   : > { %p7919_p4 = pneg %p7918_p1 }
  0x58   : > { %p7926_p10 = pnand %p7925_p9, %p7919_p4 }
  0x5a   : > { %7929 = shalt.err (!%p7926_p10)
}
  0x5b   : > { %7325 = dma.hbm_to_vmem [thread:$0]  (!%p8436_p5), %s9538_s10, 16, %s8432_s0, [#allocation8]  }
  0x5c   : > { %s9539_s1 = sld [smem:[#allocation39_spill]] }
  0x62   : > { %s7930_s4 = scalar_lea.hbm %s9539_s1, 16 }
  0x63   : > { %p7931_p11 = scmp.ne.s32.totalorder %s9539_s1, %s7930_s4  ;;  %p7937_p0 = scmp.lt.u32.totalorder %s7930_s4, %s9539_s1 }
  0x65   : > { %p7933_p12 = pnand %p7931_p11, %p8452_p7 }
  0x67   : > { %p7934_p13 = pneg %p7933_p12 }
  0x69   : > { %p7939_p1 = pnand %p7937_p0, %p7934_p13 }
  0x6b   : > { %7942 = shalt.err (!%p7939_p1)
}
  0x6c   : > { %s7943_s0 = scalar_lea.vmem %s8440_s29, 16  ;;  %s7950_s23 = scalar_lea.vmem %s8440_s29, 32 }
  0x6d   : > { %p7944_p4 = scmp.ne.s32.totalorder %s8440_s29, %s7943_s0  ;;  %p7951_p9 = scmp.lt.s32.totalorder %s8440_s29, %s8440_s29 }
  0x6e   : > { %p7952_p10 = scmp.lt.s32.totalorder %s7950_s23, %s7943_s0 }
  0x6f   : > { %p7946_p6 = pnand %p7944_p4, %p8452_p7 }
  0x70   : > { %p7953_p11 = por %p7952_p10, %p7951_p9 }
  0x71   : > { %p7947_p8 = pneg %p7946_p6 }
  0x73   : > { %p7954_p12 = pnand %p7953_p11, %p7947_p8 }
  0x75   : > { %7957 = shalt.err (!%p7954_p12)
}
  0x76   : > { %7331 = dma.hbm_to_vmem [thread:$0]  (!%p8436_p5), %s9539_s1, 16, %s8440_s29, [#allocation11]  }
  0x77   : > { %s9540_s13 = sld [smem:[#allocation41_spill]] }
  0x7d   : > { %s7958_s7 = scalar_lea.hbm %s9540_s13, 16 }
  0x7e   : > { %p7959_p13 = scmp.ne.s32.totalorder %s9540_s13, %s7958_s7  ;;  %p7965_p4 = scmp.lt.u32.totalorder %s7958_s7, %s9540_s13 }
  0x80   : > { %p7961_p0 = pnand %p7959_p13, %p8452_p7 }
  0x82   : > { %p7962_p1 = pneg %p7961_p0 }
  0x84   : > { %p7967_p6 = pnand %p7965_p4, %p7962_p1 }
  0x86   : > { %7970 = shalt.err (!%p7967_p6)
}
  0x87   : > { %s7971_s29 = scalar_lea.vmem %s8442_s12, 16  ;;  %s7978_s23 = scalar_lea.vmem %s8442_s12, 32 }
  0x88   : > { %p7972_p8 = scmp.ne.s32.totalorder %s8442_s12, %s7971_s29  ;;  %p7979_p11 = scmp.lt.s32.totalorder %s8442_s12, %s8442_s12 }
  0x89   : > { %p7980_p12 = scmp.lt.s32.totalorder %s7978_s23, %s7971_s29 }
  0x8a   : > { %p7974_p9 = pnand %p7972_p8, %p8452_p7 }
  0x8b   : > { %p7981_p13 = por %p7980_p12, %p7979_p11 }
  0x8c   : > { %p7975_p10 = pneg %p7974_p9 }
  0x8e   : > { %p7982_p0 = pnand %p7981_p13, %p7975_p10 }
  0x90   : > { %7985 = shalt.err (!%p7982_p0)
}
  0x91   : > { %7337 = dma.hbm_to_vmem [thread:$0]  (!%p8436_p5), %s9540_s13, 16, %s8442_s12, [#allocation14]  }
  0x92   : > { %s8250_s30 = smov [#allocation16]   ;;  %s8251_s7 = smov [#allocation2]  }
  0x93   : > { %s812_s4 = sshll.u32 %s8250_s30, 4  ;;  %s690_s28 = sshll.u32 %s8251_s7, 4  ;;  %s813_s4 = int_to_ptr.vmem [resolvable:$true] %s812_s4  ;;  %s691_s28 = int_to_ptr.vmem [resolvable:$true] %s690_s28 }
  0x94   : > { %s9541_s18 = sld [smem:[#allocation42_spill]] }
  0x9a   : > { %s7986_s0 = scalar_lea.hbm %s9541_s18, 4096 }
  0x9b   : > { %p7987_p1 = scmp.ne.s32.totalorder %s9541_s18, %s7986_s0  ;;  %p7993_p8 = scmp.lt.u32.totalorder %s7986_s0, %s9541_s18 }
  0x9d   : > { %p7989_p4 = pnand %p7987_p1, %p8452_p7 }
  0x9f   : > { %p7990_p6 = pneg %p7989_p4 }
  0xa1   : > { %p7995_p9 = pnand %p7993_p8, %p7990_p6 }
  0xa3   : > { %7998 = shalt.err (!%p7995_p9)
}
  0xa4   : > { %s7999_s12 = scalar_lea.vmem %s813_s4, 4096  ;;  %p8007_p13 = scmp.lt.s32.totalorder %s813_s4, %s813_s4 }
  0xa5   : > { %p8000_p10 = scmp.ne.s32.totalorder %s813_s4, %s7999_s12  ;;  %p8008_p0 = scmp.lt.s32.totalorder %s7999_s12, %s7999_s12 }
  0xa7   : > { %p8002_p11 = pnand %p8000_p10, %p8452_p7  ;;  %p8009_p2 = por %p8008_p0, %p8007_p13 }
  0xa9   : > { %p8003_p12 = pneg %p8002_p11 }
  0xab   : > { %p8010_p3 = pnand %p8009_p2, %p8003_p12 }
  0xad   : > { %8013 = shalt.err (!%p8010_p3)
}
  0xae   : > { %s9502_s27 = smov 64   ;;  %s9504_s30 = smov 4  }
  0xaf   : > { %7343 = dma.hbm_to_vmem [thread:$0]  (!%p8436_p5), %s9541_s18, 4096, %s813_s4, [#allocation17], %s9502_s27, %s9502_s27, %s9504_s30  }
  0xb0   : > { %s9542_s0 = sld [smem:[#allocation32_spill]] }
  0xb6   : > { %s8014_s29 = scalar_lea.hbm %s9542_s0, 12288 }
  0xb7   : > { %p8015_p2 = scmp.ne.s32.totalorder %s9542_s0, %s8014_s29  ;;  %p8021_p4 = scmp.lt.u32.totalorder %s8014_s29, %s9542_s0 }
  0xb9   : > { %p8017_p3 = pnand %p8015_p2, %p8452_p7 }
  0xbb   : > { %p8018_p1 = pneg %p8017_p3 }
  0xbd   : > { %p8023_p6 = pnand %p8021_p4, %p8018_p1 }
  0xbf   : > { %8026 = shalt.err (!%p8023_p6)
}
  0xc0   : > { %s8027_s1 = scalar_lea.vmem %s691_s28, 12288  ;;  %p8035_p11 = scmp.lt.s32.totalorder %s691_s28, %s691_s28 }
  0xc1   : > { %p8028_p8 = scmp.ne.s32.totalorder %s691_s28, %s8027_s1  ;;  %p8036_p12 = scmp.lt.s32.totalorder %s8027_s1, %s8027_s1 }
  0xc3   : > { %p8030_p9 = pnand %p8028_p8, %p8452_p7  ;;  %p8037_p13 = por %p8036_p12, %p8035_p11 }
  0xc5   : > { %p8031_p10 = pneg %p8030_p9 }
  0xc7   : > { %p8038_p0 = pnand %p8037_p13, %p8031_p10 }
  0xc9   : > { %8041 = shalt.err (!%p8038_p0)
}
  0xca   : > { %s9507_s4 = smov 768   ;;  %s9508_s7 = smov 48  }
  0xcb   : > { %7316 = dma.hbm_to_vmem [thread:$0]  (!%p8436_p5), %s9542_s0, 12288, %s691_s28, [#allocation3], %s9507_s4, %s9507_s4, %s9508_s7  }
  0xcc   : > { %s8256_s25 = smov [#allocation6]   ;;  %s8257_s23 = smov [#allocation9]  }
  0xcd   : > { %s714_s29 = sshll.u32 %s8256_s25, 4  ;;  %s742_s26 = sshll.u32 %s8257_s23, 4  ;;  %s715_s29 = int_to_ptr.vmem [resolvable:$true] %s714_s29  ;;  %s743_s26 = int_to_ptr.vmem [resolvable:$true] %s742_s26 }
  0xce   : > { %s9543_s27 = sld [smem:[#allocation34_spill]] }
  0xd4   : > { %s8042_s30 = scalar_lea.hbm %s9543_s27, 4096 }
  0xd5   : > { %p8043_p2 = scmp.ne.s32.totalorder %s9543_s27, %s8042_s30  ;;  %p8049_p4 = scmp.lt.u32.totalorder %s8042_s30, %s9543_s27 }
  0xd7   : > { %p8045_p3 = pnand %p8043_p2, %p8452_p7 }
  0xd9   : > { %p8046_p1 = pneg %p8045_p3 }
  0xdb   : > { %p8051_p6 = pnand %p8049_p4, %p8046_p1 }
  0xdd   : > { %8054 = shalt.err (!%p8051_p6)
}
  0xde   : > { %s8055_s28 = scalar_lea.vmem %s715_s29, 4096  ;;  %p8063_p11 = scmp.lt.s32.totalorder %s715_s29, %s715_s29 }
  0xdf   : > { %p8056_p8 = scmp.ne.s32.totalorder %s715_s29, %s8055_s28  ;;  %p8064_p12 = scmp.lt.s32.totalorder %s8055_s28, %s8055_s28 }
  0xe1   : > { %p8058_p9 = pnand %p8056_p8, %p8452_p7  ;;  %p8065_p13 = por %p8064_p12, %p8063_p11 }
  0xe3   : > { %p8059_p10 = pneg %p8058_p9 }
  0xe5   : > { %p8066_p0 = pnand %p8065_p13, %p8059_p10 }
  0xe7   : > { %8069 = shalt.err (!%p8066_p0)
}
  0xe8   : > { %s9544_s13 = smov 4   ;;  %s9545_s10 = smov 64  }
  0xe9   : > { %7322 = dma.hbm_to_vmem [thread:$0]  (!%p8436_p5), %s9543_s27, 4096, %s715_s29, [#allocation5], %s9545_s10, %s9545_s10, %s9544_s13  }
  0xea   : > { %s9546_s9 = sld [smem:[#allocation37_spill]] }
  0xf0   : > { %s8070_s25 = scalar_lea.hbm %s9546_s9, 16 }
  0xf1   : > { %p8071_p2 = scmp.ne.s32.totalorder %s9546_s9, %s8070_s25  ;;  %p8077_p4 = scmp.lt.u32.totalorder %s8070_s25, %s9546_s9 }
  0xf3   : > { %p8073_p3 = pnand %p8071_p2, %p8452_p7 }
  0xf5   : > { %p8074_p1 = pneg %p8073_p3 }
  0xf7   : > { %p8079_p6 = pnand %p8077_p4, %p8074_p1 }
  0xf9   : > { %8082 = shalt.err (!%p8079_p6)
}
  0xfa   : > { %s8083_s18 = scalar_lea.vmem %s743_s26, 16  ;;  %s8090_s29 = scalar_lea.vmem %s743_s26, 32 }
  0xfb   : > { %p8084_p8 = scmp.ne.s32.totalorder %s743_s26, %s8083_s18  ;;  %p8091_p11 = scmp.lt.s32.totalorder %s743_s26, %s743_s26 }
  0xfc   : > { %p8092_p12 = scmp.lt.s32.totalorder %s8090_s29, %s8083_s18 }
  0xfd   : > { %p8086_p9 = pnand %p8084_p8, %p8452_p7 }
  0xfe   : > { %p8093_p13 = por %p8092_p12, %p8091_p11 }
  0xff   : > { %p8087_p10 = pneg %p8086_p9 }
 0x101   : > { %p8094_p0 = pnand %p8093_p13, %p8087_p10 }
 0x103   : > { %8097 = shalt.err (!%p8094_p0)
}
 0x104   : > { %7328 = dma.hbm_to_vmem [thread:$0]  (!%p8436_p5), %s9546_s9, 16, %s743_s26, [#allocation8]  }
 0x105   : > { %s8258_s5 = smov [#allocation12]   ;;  %s8259_s23 = smov [#allocation15]  }
 0x106   : > { %s766_s25 = sshll.u32 %s8258_s5, 4  ;;  %s796_s12 = sshll.u32 %s8259_s23, 4  ;;  %s767_s25 = int_to_ptr.vmem [resolvable:$true] %s766_s25  ;;  %s797_s12 = int_to_ptr.vmem [resolvable:$true] %s796_s12 }
 0x107   : > { %s9547_s4 = sld [smem:[#allocation40_spill]] }
 0x10d   : > { %s8098_s7 = scalar_lea.hbm %s9547_s4, 1024 }
 0x10e   : > { %p8099_p2 = scmp.ne.s32.totalorder %s9547_s4, %s8098_s7  ;;  %p8105_p4 = scmp.lt.u32.totalorder %s8098_s7, %s9547_s4 }
 0x110   : > { %p8101_p3 = pnand %p8099_p2, %p8452_p7 }
 0x112   : > { %p8102_p1 = pneg %p8101_p3 }
 0x114   : > { %p8107_p6 = pnand %p8105_p4, %p8102_p1 }
 0x116   : > { %8110 = shalt.err (!%p8107_p6)
}
 0x117   : > { %s8111_s26 = scalar_lea.vmem %s767_s25, 1024  ;;  %p8119_p11 = scmp.lt.s32.totalorder %s767_s25, %s767_s25 }
 0x118   : > { %p8112_p8 = scmp.ne.s32.totalorder %s767_s25, %s8111_s26  ;;  %p8120_p12 = scmp.lt.s32.totalorder %s8111_s26, %s8111_s26 }
 0x11a   : > { %p8114_p9 = pnand %p8112_p8, %p8452_p7  ;;  %p8121_p13 = por %p8120_p12, %p8119_p11 }
 0x11c   : > { %p8115_p10 = pneg %p8114_p9 }
 0x11e   : > { %p8122_p0 = pnand %p8121_p13, %p8115_p10 }
 0x120   : > { %8125 = shalt.err (!%p8122_p0)
}
 0x121   : > { %7334 = dma.hbm_to_vmem [thread:$0]  (!%p8436_p5), %s9547_s4, 1024, %s767_s25, [#allocation11], %s9545_s10, %s9545_s10, %s9544_s13  }
 0x122   : > { %s8126_s23 = scalar_lea.hbm %s9473_s16, 12288 }
 0x123   : > { %p8127_p2 = scmp.ne.s32.totalorder %s9473_s16, %s8126_s23  ;;  %p8133_p4 = scmp.lt.u32.totalorder %s8126_s23, %s9473_s16 }
 0x125   : > { %p8129_p3 = pnand %p8127_p2, %p8452_p7 }
 0x127   : > { %p8130_p1 = pneg %p8129_p3 }
 0x129   : > { %p8135_p6 = pnand %p8133_p4, %p8130_p1 }
 0x12b   : > { %8138 = shalt.err (!%p8135_p6)
}
 0x12c   : > { %s8139_s21 = scalar_lea.vmem %s797_s12, 12288  ;;  %p8147_p11 = scmp.lt.s32.totalorder %s797_s12, %s797_s12 }
 0x12d   : > { %p8140_p8 = scmp.ne.s32.totalorder %s797_s12, %s8139_s21  ;;  %p8148_p12 = scmp.lt.s32.totalorder %s8139_s21, %s8139_s21 }
 0x12f   : > { %p8142_p9 = pnand %p8140_p8, %p8452_p7  ;;  %p8149_p13 = por %p8148_p12, %p8147_p11 }
 0x131   : > { %p8143_p10 = pneg %p8142_p9 }
 0x133   : > { %p8150_p0 = pnand %p8149_p13, %p8143_p10 }
 0x135   : > { %8153 = shalt.err (!%p8150_p0)
}
 0x136   : > { %s9548_s25 = smov 48   ;;  %s9549_s26 = smov 768  }
 0x137   : > { %7340 = dma.hbm_to_vmem [thread:$0]  (!%p8436_p5), %s9473_s16, 12288, %s797_s12, [#allocation14], %s9549_s26, %s9549_s26, %s9548_s25  }
 0x138   : > { %s8260_s30 = smov [#allocation18]   ;;  %s8261_s23 = smov [#allocation19]  }
 0x139   : > { %s834_s5 = sshll.u32 %s8260_s30, 4  ;;  %s850_s1 = sshll.u32 %s8261_s23, 4  ;;  %s835_s5 = int_to_ptr.vmem [resolvable:$true] %s834_s5  ;;  %s851_s1 = int_to_ptr.vmem [resolvable:$true] %s850_s1 }
 0x13a   : > { %s8154_s29 = scalar_lea.hbm %s9479_s22, 1024 }
 0x13b   : > { %p8155_p2 = scmp.ne.s32.totalorder %s9479_s22, %s8154_s29  ;;  %p8161_p4 = scmp.lt.u32.totalorder %s8154_s29, %s9479_s22 }
 0x13d   : > { %p8157_p3 = pnand %p8155_p2, %p8452_p7 }
 0x13f   : > { %p8158_p1 = pneg %p8157_p3 }
 0x141   : > { %p8163_p6 = pnand %p8161_p4, %p8158_p1 }
 0x143   : > { %8166 = shalt.err (!%p8163_p6)
}
 0x144   : > { %s8167_s12 = scalar_lea.vmem %s835_s5, 1024  ;;  %p8175_p11 = scmp.lt.s32.totalorder %s835_s5, %s835_s5 }
 0x145   : > { %p8168_p8 = scmp.ne.s32.totalorder %s835_s5, %s8167_s12  ;;  %p8176_p12 = scmp.lt.s32.totalorder %s8167_s12, %s8167_s12 }
 0x147   : > { %p8170_p9 = pnand %p8168_p8, %p8452_p7  ;;  %p8177_p13 = por %p8176_p12, %p8175_p11 }
 0x149   : > { %p8171_p10 = pneg %p8170_p9 }
 0x14b   : > { %p8178_p0 = pnand %p8177_p13, %p8171_p10 }
 0x14d   : > { %8181 = shalt.err (!%p8178_p0)
}
 0x14e   : > { %7346 = dma.hbm_to_vmem [thread:$0]  (!%p8436_p5), %s9479_s22, 1024, %s835_s5, [#allocation17], %s9545_s10, %s9545_s10, %s9544_s13  }
 0x14f   : > { %s8182_s7 = scalar_lea.hbm %s9481_s24, 1024 }
 0x150   : > { %p8183_p2 = scmp.ne.s32.totalorder %s9481_s24, %s8182_s7  ;;  %p8189_p4 = scmp.lt.u32.totalorder %s8182_s7, %s9481_s24 }
 0x152   : > { %p8185_p3 = pnand %p8183_p2, %p8452_p7 }
 0x154   : > { %p8186_p1 = pneg %p8185_p3 }
 0x156   : > { %p8191_p6 = pnand %p8189_p4, %p8186_p1 }
 0x158   : > { %8194 = shalt.err (!%p8191_p6)
}
 0x159   : > { %s8195_s29 = scalar_lea.vmem %s851_s1, 1024  ;;  %p8203_p11 = scmp.lt.s32.totalorder %s851_s1, %s851_s1 }
 0x15a   : > { %p8196_p8 = scmp.ne.s32.totalorder %s851_s1, %s8195_s29  ;;  %p8204_p12 = scmp.lt.s32.totalorder %s8195_s29, %s8195_s29 }
 0x15c   : > { %p8198_p9 = pnand %p8196_p8, %p8452_p7  ;;  %p8205_p13 = por %p8204_p12, %p8203_p11 }
 0x15e   : > { %p8199_p10 = pneg %p8198_p9 }
 0x160   : > { %p8206_p0 = pnand %p8205_p13, %p8199_p10 }
 0x162   : > { %8209 = shalt.err (!%p8206_p0)
}
 0x163   : > { %7349 = dma.hbm_to_vmem [thread:$0]  (!%p8436_p5), %s9481_s24, 1024, %s851_s1, [#allocation20], %s9545_s10, %s9545_s10, %s9544_s13  }
 0x164   : > { %p9550_p2 = scmp.ne.s32.totalorder %s9534_s6, 0 }
 0x165   : > { %p9551_p7 = scmp.ne.s32.totalorder (!%p9550_p2), %s9533_s3, 0 }
 0x166   : > { %884 = sbr.rel (%p9550_p2) target bundleno = 8547 (0x2163), region = 132 }
 0x16d   : > { %8215 = dma.done.wait (%p9551_p7), [#allocation3], 12288  }
 0x16e   : > { %8217 = vsyncadd (%p9551_p7), [#allocation3], 4294955008 }
 0x16f   : > { %8219 = dma.done.wait (%p9551_p7), [#allocation5], 4288  }
 0x170   : > { %8221 = vsyncadd (%p9551_p7), [#allocation5], 4294963008 }
 0x171   : > { %8223 = dma.done.wait (%p9551_p7), [#allocation8], 32  }
 0x172   : > { %8225 = vsyncadd (%p9551_p7), [#allocation8], 4294967264 }
 0x173   : > { %8227 = dma.done.wait (%p9551_p7), [#allocation11], 1040  }
 0x174   : > { %8229 = vsyncadd (%p9551_p7), [#allocation11], 4294966256 }
 0x175   : > { %8231 = dma.done.wait (%p9551_p7), [#allocation14], 12304  }
 0x176   : > { %8233 = vsyncadd (%p9551_p7), [#allocation14], 4294954992 }
 0x177   : > { %8235 = dma.done.wait (%p9551_p7), [#allocation17], 5120  }
 0x178   : > { %8237 = vsyncadd (%p9551_p7), [#allocation17], 4294962176 }
 0x179   : > { %8239 = dma.done.wait (%p9551_p7), [#allocation20], 1024  }
 0x17a   : > { %8241 = vsyncadd (%p9551_p7), [#allocation20], 4294966272  ;;  %s9552_s6 = sadd.s32 4294967295, %s8244_s8   ;;  %v8262_v0 = vmov 0.0   ;;  %vm8263_vm0 = vmmov 0   ;;  %s9553_s10 = sld [smem:[#allocation29_spill]] }
 0x17b   : > { %s6289_s2 = sshll.u32 %s9552_s6, 1  ;;  %6813 = vmatprep.subr.bf16.mxu0 %v8262_v0  ;;  %6829 = vmatprep.mubr.msk.bf16.mxu0 %vm8263_vm0, %v8262_v0  ;;  %s9554_s26 = sld [smem:[#allocation28_spill]]  ;;  %v7410_v4 = vld [vmem:[#allocation2 + $0x4] ss:$48 sps:$4 sm:$0xff]   ;;  %v7415_v6 = vld [vmem:[#allocation2] ss:$48 sps:$4 sm:$0xff]  }
 0x17c   : > { %p1003_p5 = scmp.lt.s32.totalorder %s6289_s2, 3  ;;  %1780 = vmatprep.subr.bf16.mxu1 %v7410_v4  ;;  %v7416_v7 = vld [vmem:[#allocation2 + $0x64] ss:$48 sps:$4 sm:$0xff]   ;;  %v7421_v9 = vld [vmem:[#allocation2 + $0x60] ss:$48 sps:$4 sm:$0xff]   ;;  %v8264_v44 = vmov 0  }
 0x17d   : > { %1781 = vmatpush1.bf16.msra.mxu1 %v7415_v6  ;;  %v7422_v10 = vld [vmem:[#allocation2 + $0xc4] ss:$48 sps:$4 sm:$0xff]   ;;  %v7427_v12 = vld [vmem:[#allocation2 + $0xc0] ss:$48 sps:$4 sm:$0xff]   ;;  %v7414_v19 = vld [vmem:[#allocation2 + $0xc] ss:$48 sps:$4 sm:$0xff]   ;;  %1812 = vmatprep.mubr.bf16.mxu1 %v8264_v44 }
 0x17e   : > { %s9566_s2 = smov (!%p1003_p5, %s6289_s2), 3  ;;  %1782 = vmatprep.subr.bf16.mxu1 %v7416_v7  ;;  %v7428_v13 = vld [vmem:[#allocation2 + $0x124] ss:$48 sps:$4 sm:$0xff]   ;;  %v7433_v15 = vld [vmem:[#allocation2 + $0x120] ss:$48 sps:$4 sm:$0xff]   ;;  %s9555_s12 = sld [smem:[#allocation30_spill]] }
 0x17f   : > { %s6290_s0 = sshll.u32 %s9566_s2, 2  ;;  %v7434_v16 = vld [vmem:[#allocation2 + $0x184] ss:$48 sps:$4 sm:$0xff]   ;;  %v7439_v18 = vld [vmem:[#allocation2 + $0x180] ss:$48 sps:$4 sm:$0xff]   ;;  %s9556_s25 = sld [smem:[#allocation31_spill]] }
 0x180   : > { %v7401_v1 = vld [vmem:[%s9553_s10] sm:$0xff]   ;;  %v7402_v2 = vld [vmem:[%s9553_s10 + $0x8] sm:$0xff]   ;;  %v7403_v3 = vld [vmem:[%s9553_s10 + $0x10] sm:$0xff]   ;;  %vm2154_vm1 = vcmask 1043456   ;;  %vm2126_vm2 = vcmask 64512   ;;  %s9557_s28 = sld [smem:[#allocation35_spill]] }
 0x181   : > { %6814 = vmatpush3.bf16.msra.mxu0 %v7401_v1  ;;  %s8764_s7 = scalar_lea.vmem %s9554_s26, %s6290_s0  ;;  %v7404_v5 = vld [vmem:[%s9553_s10 + $0x18] sm:$0xff]   ;;  %v7405_v8 = vld [vmem:[%s9553_s10 + $0x20] sm:$0xff]   ;;  %v7406_v11 = vld [vmem:[%s9553_s10 + $0x28] sm:$0xff]   ;;  %1783 = vmatpush1.bf16.msra.mxu1 %v7421_v9  ;;  %s9558_s5 = sld [smem:[#allocation38_spill]] }
 0x182   : > { %6815 = vmatprep.subr.bf16.mxu0 %v8262_v0  ;;  %1784 = vmatprep.subr.bf16.mxu1 %v7422_v10  ;;  %v7407_v14 = vld [vmem:[%s9553_s10 + $0x30] sm:$0xff]   ;;  %v7408_v17 = vld [vmem:[%s9553_s10 + $0x38] sm:$0xff]   ;;  %v7409_v21 = vld [vmem:[%s8764_s7] sm:$0xff]   ;;  %s9559_s23 = sld [smem:[#allocation43_spill]]  ;;  %s9560_s29 = sld [smem:[#allocation44_spill]] }
 0x183   : > { %v7440_v20 = vld [vmem:[#allocation2 + $0x1e4] ss:$48 sps:$4 sm:$0xff]   ;;  %v7445_v22 = vld [vmem:[#allocation2 + $0x1e0] ss:$48 sps:$4 sm:$0xff]   ;;  %v7412_v23 = vld [vmem:[#allocation2 + $0x8] ss:$48 sps:$4 sm:$0xff]  }
 0x184   : > { %v7420_v24 = vld [vmem:[#allocation2 + $0x6c] ss:$48 sps:$4 sm:$0xff]   ;;  %v7418_v25 = vld [vmem:[#allocation2 + $0x68] ss:$48 sps:$4 sm:$0xff]   ;;  %v7446_v34 = vld [vmem:[#allocation2 + $0x244] ss:$48 sps:$4 sm:$0xff]  }
 0x185   : > { %6816 = vmatpush3.bf16.msra.mxu0 %v7402_v2  ;;  %1785 = vmatpush1.bf16.msra.mxu1 %v7427_v12  ;;  %v7426_v26 = vld [vmem:[#allocation2 + $0xcc] ss:$48 sps:$4 sm:$0xff]   ;;  %v7424_v27 = vld [vmem:[#allocation2 + $0xc8] ss:$48 sps:$4 sm:$0xff]   ;;  %v7451_v37 = vld [vmem:[#allocation2 + $0x240] ss:$48 sps:$4 sm:$0xff]  }
 0x186   : > { %6817 = vmatprep.subr.bf16.mxu0 %v8262_v0  ;;  %1786 = vmatprep.subr.bf16.mxu1 %v7428_v13  ;;  %v7432_v28 = vld [vmem:[#allocation2 + $0x12c] ss:$48 sps:$4 sm:$0xff]   ;;  %v7430_v29 = vld [vmem:[#allocation2 + $0x128] ss:$48 sps:$4 sm:$0xff]   ;;  %v7452_v38 = vld [vmem:[#allocation2 + $0x2a4] ss:$48 sps:$4 sm:$0xff]  }
 0x187   : > { %v7438_v30 = vld [vmem:[#allocation2 + $0x18c] ss:$48 sps:$4 sm:$0xff]   ;;  %v7436_v31 = vld [vmem:[#allocation2 + $0x188] ss:$48 sps:$4 sm:$0xff]   ;;  %v7457_v41 = vld [vmem:[#allocation2 + $0x2a0] ss:$48 sps:$4 sm:$0xff]  }
 0x188   : > { %v7444_v32 = vld [vmem:[#allocation2 + $0x1ec] ss:$48 sps:$4 sm:$0xff]   ;;  %v7442_v33 = vld [vmem:[#allocation2 + $0x1e8] ss:$48 sps:$4 sm:$0xff]   ;;  %v7460_v42 = vld [vmem:[#allocation2 + $0x14] ss:$48 sps:$4 sm:$0xff]  }
 0x189   : > { %6818 = vmatpush3.bf16.msra.mxu0 %v7403_v3  ;;  %1787 = vmatpush1.bf16.msra.mxu1 %v7433_v15  ;;  %v7450_v35 = vld [vmem:[#allocation2 + $0x24c] ss:$48 sps:$4 sm:$0xff]   ;;  %v7448_v36 = vld [vmem:[#allocation2 + $0x248] ss:$48 sps:$4 sm:$0xff]   ;;  %v1136_v51 = vld [vmem:[%s9556_s25 + $0x8] sm:$0xff]  ;;  %s9561_s11 = sld [smem:[#allocation45_spill]] }
 0x18a   : > { %6819 = vmatprep.subr.bf16.mxu0 %v8262_v0  ;;  %1788 = vmatprep.subr.bf16.mxu1 %v7434_v16  ;;  %v7456_v39 = vld [vmem:[#allocation2 + $0x2ac] ss:$48 sps:$4 sm:$0xff]   ;;  %v7454_v40 = vld [vmem:[#allocation2 + $0x2a8] ss:$48 sps:$4 sm:$0xff]   ;;  %v7458_v56 = vld [vmem:[#allocation2 + $0x10] ss:$48 sps:$4 sm:$0xff]  }
 0x18b   : > { %v7463_v43 = vld [vmem:[#allocation2 + $0x1c] ss:$48 sps:$4 sm:$0xff]   ;;  %v6293_v45 = vld [vmem:[%s9555_s12] ss:$0 sm:$0xff]  ;;  %v7466_v59 = vld [vmem:[#allocation2 + $0x74] ss:$48 sps:$4 sm:$0xff]  }
 0x18c   : > { %v1135_v49 = vld [vmem:[%s9556_s25] sm:$0xff]  ;;  %v7464_v61 = vld [vmem:[#allocation2 + $0x70] ss:$48 sps:$4 sm:$0xff]   ;;  %v7472_v63 = vld [vmem:[#allocation2 + $0xd4] ss:$48 sps:$4 sm:$0xff]   ;;  %s9562_s1 = sld [smem:[#allocation46_spill]] }
 0x18d   : > { %6820 = vmatpush3.bf16.msra.mxu0 %v7404_v5  ;;  %1789 = vmatpush1.bf16.msra.mxu1 %v7439_v18  ;;  %v7461_v57 = vld [vmem:[#allocation2 + $0x18] ss:$48 sps:$4 sm:$0xff]   ;;  %v7469_v60 = vld [vmem:[#allocation2 + $0x7c] ss:$48 sps:$4 sm:$0xff]   ;;  %v7470_v2 = vld [vmem:[#allocation2 + $0xd0] ss:$48 sps:$4 sm:$0xff]  }
 0x18e   : > { %6821 = vmatprep.subr.bf16.mxu0 %v8262_v0  ;;  %1790 = vmatprep.subr.bf16.mxu1 %v7440_v20  ;;  %v7467_v62 = vld [vmem:[#allocation2 + $0x78] ss:$48 sps:$4 sm:$0xff]   ;;  %v7475_v1 = vld [vmem:[#allocation2 + $0xdc] ss:$48 sps:$4 sm:$0xff]   ;;  %v7478_v4 = vld [vmem:[#allocation2 + $0x134] ss:$48 sps:$4 sm:$0xff]  }
 0x18f   : > { %v7473_v3 = vld [vmem:[#allocation2 + $0xd8] ss:$48 sps:$4 sm:$0xff]   ;;  %v7481_v5 = vld [vmem:[#allocation2 + $0x13c] ss:$48 sps:$4 sm:$0xff]   ;;  %v7476_v6 = vld [vmem:[#allocation2 + $0x130] ss:$48 sps:$4 sm:$0xff]  }
 0x190   : > { %v7479_v7 = vld [vmem:[#allocation2 + $0x138] ss:$48 sps:$4 sm:$0xff]   ;;  %v7487_v9 = vld [vmem:[#allocation2 + $0x19c] ss:$48 sps:$4 sm:$0xff]   ;;  %v7482_v10 = vld [vmem:[#allocation2 + $0x190] ss:$48 sps:$4 sm:$0xff]  }
 0x191   : > { %6822 = vmatpush3.bf16.msra.mxu0 %v7405_v8  ;;  %1791 = vmatpush1.bf16.msra.mxu1 %v7445_v22  ;;  %v7484_v8 = vld [vmem:[#allocation2 + $0x194] ss:$48 sps:$4 sm:$0xff]   ;;  %v7493_v13 = vld [vmem:[#allocation2 + $0x1fc] ss:$48 sps:$4 sm:$0xff]   ;;  %v7491_v15 = vld [vmem:[#allocation2 + $0x1f8] ss:$48 sps:$4 sm:$0xff]  }
 0x192   : > { %6823 = vmatprep.subr.bf16.mxu0 %v8262_v0  ;;  %1792 = vmatprep.subr.bf16.mxu1 %v7446_v34  ;;  %v7490_v12 = vld [vmem:[#allocation2 + $0x1f4] ss:$48 sps:$4 sm:$0xff]   ;;  %v7494_v18 = vld [vmem:[#allocation2 + $0x250] ss:$48 sps:$4 sm:$0xff]   ;;  %s9563_s9 = sld [smem:[#allocation47_spill]]  ;;  %s9564_s30 = sld [smem:[#allocation48_spill]] }
 0x193   : > { %v7496_v16 = vld [vmem:[#allocation2 + $0x254] ss:$48 sps:$4 sm:$0xff]   ;;  %v7500_v22 = vld [vmem:[#allocation2 + $0x2b0] ss:$48 sps:$4 sm:$0xff]  }
 0x194   : > { %v7502_v20 = vld [vmem:[#allocation2 + $0x2b4] ss:$48 sps:$4 sm:$0xff]   ;;  %v7518_v34 = vld [vmem:[#allocation2 + $0xe0] ss:$48 sps:$4 sm:$0xff]  }
 0x195   : > { %6824 = vmatpush3.bf16.msra.mxu0 %v7406_v11  ;;  %1793 = vmatpush1.bf16.msra.mxu1 %v7451_v37  ;;  %v7485_v11 = vld [vmem:[#allocation2 + $0x198] ss:$48 sps:$4 sm:$0xff]   ;;  %v7529_v37 = vld [vmem:[#allocation2 + $0x14c] ss:$48 sps:$4 sm:$0xff]  }
 0x196   : > { %6825 = vmatprep.subr.bf16.mxu0 %v8262_v0  ;;  %1794 = vmatprep.subr.bf16.mxu1 %v7452_v38  ;;  %v7524_v38 = vld [vmem:[#allocation2 + $0x140] ss:$48 sps:$4 sm:$0xff]  }
 0x199   : > { %6826 = vmatpush3.bf16.msra.mxu0 %v7407_v14  ;;  %1795 = vmatpush1.bf16.msra.mxu1 %v7457_v41  ;;  %v7488_v14 = vld [vmem:[#allocation2 + $0x1f0] ss:$48 sps:$4 sm:$0xff]   ;;  %v7535_v41 = vld [vmem:[#allocation2 + $0x1ac] ss:$48 sps:$4 sm:$0xff]  }
 0x19a   : > { %6827 = vmatprep.subr.bf16.mxu0 %v8262_v0  ;;  %1866 = vmatprep.subr.bf16.mxu1 %v7460_v42  ;;  %v7530_v42 = vld [vmem:[#allocation2 + $0x1a0] ss:$48 sps:$4 sm:$0xff]  }
 0x19d   : > { %6828 = vmatpush3.bf16.msra.mxu0 %v7408_v17  ;;  %v7499_v17 = vld [vmem:[#allocation2 + $0x25c] ss:$48 sps:$4 sm:$0xff]  }
 0x19e   : > { %1823 = vmatprep.subr.bf16.mxu0 %v7414_v19  ;;  %v7497_v19 = vld [vmem:[#allocation2 + $0x258] ss:$48 sps:$4 sm:$0xff]  }
 0x1a0   : > { %6830 = vmatmul.mubr.bf16.vlgmr.msra.gmra.mrb[0].mxu0 %v7409_v21  ;;  %v7505_v21 = vld [vmem:[#allocation2 + $0x2bc] ss:$48 sps:$4 sm:$0xff]  }
 0x1a1   : > { %1824 = vmatpush1.bf16.msra.mxu0 %v7412_v23  ;;  %1855 = vmatprep.mubr.bf16.mxu0 %v8264_v44  ;;  %v7503_v23 = vld [vmem:[#allocation2 + $0x2b8] ss:$48 sps:$4 sm:$0xff]  }
 0x1a2   : > { %1825 = vmatprep.subr.bf16.mxu0 %v7420_v24  ;;  %v7508_v24 = vld [vmem:[#allocation2 + $0x24] ss:$48 sps:$4 sm:$0xff]  }
 0x1a5   : > { %1826 = vmatpush1.bf16.msra.mxu0 %v7418_v25  ;;  %v7511_v25 = vld [vmem:[#allocation2 + $0x2c] ss:$48 sps:$4 sm:$0xff]  }
 0x1a6   : > { %1827 = vmatprep.subr.bf16.mxu0 %v7426_v26  ;;  %v7506_v26 = vld [vmem:[#allocation2 + $0x20] ss:$48 sps:$4 sm:$0xff]  }
 0x1a9   : > { %1828 = vmatpush1.bf16.msra.mxu0 %v7424_v27  ;;  %v7509_v27 = vld [vmem:[#allocation2 + $0x28] ss:$48 sps:$4 sm:$0xff]  }
 0x1aa   : > { %1829 = vmatprep.subr.bf16.mxu0 %v7432_v28  ;;  %v7514_v28 = vld [vmem:[#allocation2 + $0x84] ss:$48 sps:$4 sm:$0xff]  }
 0x1ad   : > { %1830 = vmatpush1.bf16.msra.mxu0 %v7430_v29  ;;  %v7517_v29 = vld [vmem:[#allocation2 + $0x8c] ss:$48 sps:$4 sm:$0xff]  }
 0x1ae   : > { %1831 = vmatprep.subr.bf16.mxu0 %v7438_v30  ;;  %v7512_v30 = vld [vmem:[#allocation2 + $0x80] ss:$48 sps:$4 sm:$0xff]  }
 0x1b1   : > { %1832 = vmatpush1.bf16.msra.mxu0 %v7436_v31  ;;  %v7515_v31 = vld [vmem:[#allocation2 + $0x88] ss:$48 sps:$4 sm:$0xff]  }
 0x1b2   : > { %1833 = vmatprep.subr.bf16.mxu0 %v7444_v32  ;;  %v7520_v32 = vld [vmem:[#allocation2 + $0xe4] ss:$48 sps:$4 sm:$0xff]  }
 0x1b5   : > { %1834 = vmatpush1.bf16.msra.mxu0 %v7442_v33  ;;  %v7523_v33 = vld [vmem:[#allocation2 + $0xec] ss:$48 sps:$4 sm:$0xff]  }
 0x1b6   : > { %1835 = vmatprep.subr.bf16.mxu0 %v7450_v35  ;;  %v7521_v35 = vld [vmem:[#allocation2 + $0xe8] ss:$48 sps:$4 sm:$0xff]  }
 0x1b9   : > { %1836 = vmatpush1.bf16.msra.mxu0 %v7448_v36  ;;  %v7526_v36 = vld [vmem:[#allocation2 + $0x144] ss:$48 sps:$4 sm:$0xff]  }
 0x1ba   : > { %1837 = vmatprep.subr.bf16.mxu0 %v7456_v39  ;;  %v7527_v39 = vld [vmem:[#allocation2 + $0x148] ss:$48 sps:$4 sm:$0xff]  }
 0x1bd   : > { %1838 = vmatpush1.bf16.msra.mxu0 %v7454_v40  ;;  %v7532_v40 = vld [vmem:[#allocation2 + $0x1a4] ss:$48 sps:$4 sm:$0xff]  }
 0x1be   : > { %1909 = vmatprep.subr.bf16.mxu0 %v7463_v43  ;;  %v7533_v43 = vld [vmem:[#allocation2 + $0x1a8] ss:$48 sps:$4 sm:$0xff]  }
 0x273   : > { %v1128_v46 = vpop.f32.mrb[0].mxu0 }
 0x274   : > { %v1129_v47 = vadd.f32 %v6293_v45, %v1128_v46  ;;  %v6831_v48 = vpop.f32.mrb[1].mxu0  ;;  %v7541_v46 = vld [vmem:[#allocation2 + $0x20c] ss:$48 sps:$4 sm:$0xff]  }
 0x275   : > { %v1131_v50 = vpop.f32.mrb[2].mxu0  ;;  %v7539_v48 = vld [vmem:[#allocation2 + $0x208] ss:$48 sps:$4 sm:$0xff]  }
 0x276   : > { %v1132_v52 = vadd.f32 %v6293_v45, %v1131_v50  ;;  %v6832_v53 = vpop.f32.mrb[3].mxu0  ;;  %v8798_v54 = vadd.f32 %v1135_v49, %v1129_v47  ;;  %v7538_v45 = vld [vmem:[#allocation2 + $0x204] ss:$48 sps:$4 sm:$0xff]   ;;  %v7536_v47 = vld [vmem:[#allocation2 + $0x200] ss:$48 sps:$4 sm:$0xff]  }
 0x277   : > { %v7544_v49 = vld [vmem:[#allocation2 + $0x264] ss:$48 sps:$4 sm:$0xff]   ;;  %v7547_v50 = vld [vmem:[#allocation2 + $0x26c] ss:$48 sps:$4 sm:$0xff]  }
 0x278   : > { %v8800_v55 = vadd.f32 %v1136_v51, %v1132_v52  ;;  %v7542_v51 = vld [vmem:[#allocation2 + $0x260] ss:$48 sps:$4 sm:$0xff]   ;;  %v7545_v52 = vld [vmem:[#allocation2 + $0x268] ss:$48 sps:$4 sm:$0xff]   ;;  %v7550_v53 = vld [vmem:[#allocation2 + $0x2c4] ss:$48 sps:$4 sm:$0xff]  }
 0x27a   : > { %v8804_v58 = vpack.c.bf16 %v8800_v55, %v8798_v54 }
 0x27c   : > { %1813 = vmatmul.mubr.bf16.vlgmr.msra.gmra.mrb[0].mxu1 %v8804_v58  ;;  %1856 = vmatmul.mubr.bf16.vlgmr.msra.gmra.mrb[4].mxu0 %v8804_v58 }
 0x27d   : > { %1867 = vmatpush1.bf16.msra.mxu1 %v7458_v56  ;;  %1910 = vmatpush1.bf16.msra.mxu0 %v7461_v57  ;;  %v7553_v56 = vld [vmem:[#allocation2 + $0x2cc] ss:$48 sps:$4 sm:$0xff]   ;;  %v7548_v57 = vld [vmem:[#allocation2 + $0x2c0] ss:$48 sps:$4 sm:$0xff]  }
 0x27e   : > { %1868 = vmatprep.subr.bf16.mxu1 %v7466_v59  ;;  %1911 = vmatprep.subr.bf16.mxu0 %v7469_v60  ;;  %v7551_v59 = vld [vmem:[#allocation2 + $0x2c8] ss:$48 sps:$4 sm:$0xff]   ;;  %v1240_v60 = vlaneseq }
 0x27f   : > { %1898 = vmatprep.mubr.bf16.mxu1 %v8264_v44  ;;  %1941 = vmatprep.mubr.bf16.mxu0 %v8264_v44 }
 0x281   : > { %1869 = vmatpush1.bf16.msra.mxu1 %v7464_v61  ;;  %1912 = vmatpush1.bf16.msra.mxu0 %v7467_v62  ;;  %v8823_v61 = vshrl.u32 %v1240_v60, 7 }
 0x282   : > { %1870 = vmatprep.subr.bf16.mxu1 %v7472_v63  ;;  %1913 = vmatprep.subr.bf16.mxu0 %v7475_v1  ;;  %v8828_v63 = vld [vmem:[#allocation4] sm:$0xff] }
 0x283   : > { %v8826_v62 = vsub.s32 2, %v8823_v61 }
 0x285   : > { %1871 = vmatpush1.bf16.msra.mxu1 %v7470_v2  ;;  %1914 = vmatpush1.bf16.msra.mxu0 %v7473_v3  ;;  %v8832_v1 = vrot.slane %v8828_v63, %v8826_v62 }
 0x286   : > { %1872 = vmatprep.subr.bf16.mxu1 %v7478_v4  ;;  %1915 = vmatprep.subr.bf16.mxu0 %v7481_v5 }
 0x289   : > { %1873 = vmatpush1.bf16.msra.mxu1 %v7476_v6  ;;  %1916 = vmatpush1.bf16.msra.mxu0 %v7479_v7 }
 0x28a   : > { %1874 = vmatprep.subr.bf16.mxu1 %v7484_v8  ;;  %1917 = vmatprep.subr.bf16.mxu0 %v7487_v9 }
 0x28d   : > { %1875 = vmatpush1.bf16.msra.mxu1 %v7482_v10  ;;  %1918 = vmatpush1.bf16.msra.mxu0 %v7485_v11  ;;  %v1258_v10 = vsub.s32 4, %v8823_v61  ;;  %v1266_v11 = vsub.s32 6, %v8823_v61 }
 0x28e   : > { %1876 = vmatprep.subr.bf16.mxu1 %v7490_v12  ;;  %1919 = vmatprep.subr.bf16.mxu0 %v7493_v13 }
 0x28f   : > { %v1259_v12 = vrot.slane %v8828_v63, %v1258_v10  ;;  %v8855_v13 = vrot.slane %v8828_v63, %v1266_v11 }
 0x291   : > { %1877 = vmatpush1.bf16.msra.mxu1 %v7488_v14  ;;  %1920 = vmatpush1.bf16.msra.mxu0 %v7491_v15  ;;  %v8858_v14 = vsub.s32 0, %v8823_v61 }
 0x292   : > { %1878 = vmatprep.subr.bf16.mxu1 %v7496_v16  ;;  %1921 = vmatprep.subr.bf16.mxu0 %v7499_v17 }
 0x295   : > { %1879 = vmatpush1.bf16.msra.mxu1 %v7494_v18  ;;  %1922 = vmatpush1.bf16.msra.mxu0 %v7497_v19 }
 0x296   : > { %1880 = vmatprep.subr.bf16.mxu1 %v7502_v20  ;;  %1923 = vmatprep.subr.bf16.mxu0 %v7505_v21  ;;  %v1243_v21 = vrot.slane %v8828_v63, %v8858_v14 }
 0x299   : > { %1881 = vmatpush1.bf16.msra.mxu1 %v7500_v22  ;;  %1924 = vmatpush1.bf16.msra.mxu0 %v7503_v23 }
 0x29a   : > { %1952 = vmatprep.subr.bf16.mxu1 %v7508_v24  ;;  %1995 = vmatprep.subr.bf16.mxu0 %v7511_v25 }
 0x29c   : > { %1899 = vmatmul.mubr.bf16.vlgmr.msra.gmra.mrb[4].mxu1 %v8804_v58  ;;  %1942 = vmatmul.mubr.bf16.vlgmr.msra.gmra.mrb[8].mxu0 %v8804_v58 }
 0x29d   : > { %1953 = vmatpush1.bf16.msra.mxu1 %v7506_v26  ;;  %1996 = vmatpush1.bf16.msra.mxu0 %v7509_v27 }
 0x29e   : > { %1954 = vmatprep.subr.bf16.mxu1 %v7514_v28  ;;  %1997 = vmatprep.subr.bf16.mxu0 %v7517_v29 }
 0x29f   : > { %1984 = vmatprep.mubr.bf16.mxu1 %v8264_v44  ;;  %2027 = vmatprep.mubr.bf16.mxu0 %v8264_v44 }
 0x2a1   : > { %1955 = vmatpush1.bf16.msra.mxu1 %v7512_v30  ;;  %1998 = vmatpush1.bf16.msra.mxu0 %v7515_v31 }
 0x2a2   : > { %1956 = vmatprep.subr.bf16.mxu1 %v7520_v32  ;;  %1999 = vmatprep.subr.bf16.mxu0 %v7523_v33  ;;  %v1237_v33 = vld [vmem:[#allocation4 + $0x8] sm:$0xf] }
 0x2a5   : > { %1957 = vmatpush1.bf16.msra.mxu1 %v7518_v34  ;;  %2000 = vmatpush1.bf16.msra.mxu0 %v7521_v35  ;;  %v8882_v34 = vsub.s32 1, %v8823_v61  ;;  %v8885_v35 = vsub.s32 3, %v8823_v61 }
 0x2a6   : > { %1958 = vmatprep.subr.bf16.mxu1 %v7526_v36  ;;  %2001 = vmatprep.subr.bf16.mxu0 %v7529_v37  ;;  %v1275_v36 = vrot.slane %v1237_v33, %v8858_v14  ;;  %v1283_v37 = vrot.slane %v1237_v33, %v8826_v62 }
 0x2a9   : > { %1959 = vmatpush1.bf16.msra.mxu1 %v7524_v38  ;;  %2002 = vmatpush1.bf16.msra.mxu0 %v7527_v39  ;;  %v1279_v38 = vrot.slane %v1237_v33, %v8882_v34  ;;  %v1287_v39 = vrot.slane %v1237_v33, %v8885_v35 }
 0x2aa   : > { %1960 = vmatprep.subr.bf16.mxu1 %v7532_v40  ;;  %2003 = vmatprep.subr.bf16.mxu0 %v7535_v41 }
 0x2ad   : > { %1961 = vmatpush1.bf16.msra.mxu1 %v7530_v42  ;;  %2004 = vmatpush1.bf16.msra.mxu0 %v7533_v43 }
 0x2ae   : > { %1962 = vmatprep.subr.bf16.mxu1 %v7538_v45  ;;  %2005 = vmatprep.subr.bf16.mxu0 %v7541_v46 }
 0x2b1   : > { %1963 = vmatpush1.bf16.msra.mxu1 %v7536_v47  ;;  %2006 = vmatpush1.bf16.msra.mxu0 %v7539_v48 }
 0x2b2   : > { %1964 = vmatprep.subr.bf16.mxu1 %v7544_v49  ;;  %2007 = vmatprep.subr.bf16.mxu0 %v7547_v50 }
 0x2b5   : > { %1965 = vmatpush1.bf16.msra.mxu1 %v7542_v51  ;;  %2008 = vmatpush1.bf16.msra.mxu0 %v7545_v52 }
 0x2b6   : > { %1966 = vmatprep.subr.bf16.mxu1 %v7550_v53  ;;  %2009 = vmatprep.subr.bf16.mxu0 %v7553_v56 }
 0x2b9   : > { %1967 = vmatpush1.bf16.msra.mxu1 %v7548_v57  ;;  %2010 = vmatpush1.bf16.msra.mxu0 %v7551_v59 }
 0x2ba   : > { %6833 = vmatprep.subr.bf16.mxu1 %v8262_v0  ;;  %6881 = vmatprep.subr.bf16.mxu0 %v8262_v0 }
 0x2bc   : > { %1985 = vmatmul.mubr.bf16.vlgmr.msra.gmra.mrb[8].mxu1 %v8804_v58  ;;  %2028 = vmatmul.mubr.bf16.vlgmr.msra.gmra.mrb[12].mxu0 %v8804_v58 }
 0x2bd   : > { %6835 = vmatprep.mubr.msk.bf16.mxu1 %vm8263_vm0, %v8262_v0  ;;  %6897 = vmatprep.mubr.msk.bf16.mxu0 %vm8263_vm0, %v8262_v0 }
 0x34f   : > { %v1814_v58 = vpop.f32.mrb[0].mxu1  ;;  %v1857_v2 = vpop.f32.mrb[4].mxu0 }
 0x350   : > { %v8835_v3 = vadd.f32 %v1857_v2, %v8832_v1  ;;  %v8837_v4 = vpop.f32.mrb[1].mxu1  ;;  %v8839_v5 = vpop.f32.mrb[5].mxu0  ;;  %v1815_v27 = vadd.f32 %v1814_v58, %v1243_v21 }
 0x351   : > { %v1818_v6 = vpop.f32.mrb[2].mxu1  ;;  %v8841_v7 = vpop.f32.mrb[6].mxu0 }
 0x352   : > { %v8843_v8 = vpop.f32.mrb[3].mxu1  ;;  %v8845_v9 = vpop.f32.mrb[7].mxu0  ;;  %v2038_v29 = vpack.c.bf16 %v1815_v27, %v1815_v27  ;;  %v1819_v31 = vadd.f32 %v1818_v6, %v1243_v21 }
 0x354   : > { %v2039_v32 = vpack.c.bf16 %v1819_v31, %v1819_v31 }
 0x36f   : > { %v1900_v15 = vpop.f32.mrb[4].mxu1  ;;  %v1943_v16 = vpop.f32.mrb[8].mxu0 }
 0x370   : > { %v1901_v17 = vadd.f32 %v1900_v15, %v1259_v12  ;;  %v8861_v18 = vadd.f32 %v1943_v16, %v8855_v13  ;;  %v8863_v19 = vpop.f32.mrb[5].mxu1  ;;  %v8865_v20 = vpop.f32.mrb[9].mxu0 }
 0x371   : > { %v1904_v22 = vpop.f32.mrb[6].mxu1  ;;  %v8869_v23 = vpop.f32.mrb[10].mxu0 }
 0x372   : > { %v2040_v24 = vpack.c.bf16 %v1901_v17, %v1901_v17  ;;  %v8871_v25 = vpop.f32.mrb[7].mxu1  ;;  %v8873_v26 = vpop.f32.mrb[11].mxu0  ;;  %v1905_v28 = vadd.f32 %v1904_v22, %v1259_v12 }
 0x374   : > { %6834 = vmatpush3.bf16.xpose.msra.mxu1 %v2040_v24  ;;  %v2041_v30 = vpack.c.bf16 %v1905_v28, %v1905_v28 }
 0x375   : > { %6839 = vmatprep.subr.bf16.mxu1 %v8262_v0 }
 0x37b   : > { %6836 = vmatmul.mubr.bf16.vlgmr.msra.gmra.mrb[12].mxu1 %v2038_v29 }
 0x37c   : > { %6840 = vmatpush3.bf16.xpose.msra.mxu1 %v2041_v30  ;;  %6841 = vmatprep.mubr.msk.bf16.mxu1 %vm8263_vm0, %v8262_v0 }
 0x37d   : > { %6845 = vmatprep.subr.bf16.mxu1 %v8262_v0 }
 0x383   : > { %6842 = vmatmul.mubr.bf16.vlgmr.msra.gmra.mrb[16].mxu1 %v2039_v32 }
 0x384   : > { %6847 = vmatprep.mubr.msk.bf16.mxu1 %vm8263_vm0, %v8262_v0 }
 0x38f   : > { %v1986_v40 = vpop.f32.mrb[8].mxu1  ;;  %v2029_v41 = vpop.f32.mrb[12].mxu0 }
 0x390   : > { %v1987_v42 = vadd.f32 %v1986_v40, %v1275_v36  ;;  %v8891_v43 = vadd.f32 %v2029_v41, %v1283_v37  ;;  %v1988_v45 = vpop.f32.mrb[9].mxu1  ;;  %v2031_v46 = vpop.f32.mrb[13].mxu0 }
 0x391   : > { %v8893_v47 = vadd.f32 %v1988_v45, %v1279_v38  ;;  %v8895_v48 = vadd.f32 %v2031_v46, %v1287_v39  ;;  %v1990_v49 = vpop.f32.mrb[10].mxu1  ;;  %v2033_v50 = vpop.f32.mrb[14].mxu0 }
 0x392   : > { %v2042_v51 = vpack.c.bf16 %v1987_v42, %v1987_v42  ;;  %v1991_v52 = vadd.f32 %v1990_v49, %v1275_v36  ;;  %v8897_v53 = vadd.f32 %v2033_v50, %v1283_v37  ;;  %v1992_v56 = vpop.f32.mrb[11].mxu1  ;;  %v2035_v57 = vpop.f32.mrb[15].mxu0  ;;  %v1262_v50 = vsub.s32 5, %v8823_v61 }
 0x393   : > { %v8899_v59 = vadd.f32 %v1992_v56, %v1279_v38  ;;  %v8901_v58 = vadd.f32 %v2035_v57, %v1287_v39 }
 0x394   : > { %v2156_v2 = vsel %vm2154_vm1, %v2042_v51, 0  ;;  %v2043_v51 = vpack.c.bf16 %v1991_v52, %v1991_v52 }
 0x395   : > { %6846 = vmatpush3.bf16.msra.mxu1 %v2156_v2  ;;  %v1263_v2 = vrot.slane %v8828_v63, %v1262_v50 }
 0x396   : > { %6851 = vmatprep.subr.bf16.mxu1 %v8262_v0 }
 0x44e   : > { %v2078_v6 = vpop.f32.mrb[12].mxu1 }
 0x44f   : > { %v2124_v12 = vmul.f32 0.25, %v2078_v6  ;;  %v6837_v15 = vpop.f32.mrb[13].mxu1  ;;  %v2202_v6 = vsel %vm2154_vm1, %v2043_v51, 0 }
 0x450   : > { %v2081_v16 = vpop.f32.mrb[14].mxu1  ;;  %v1903_v15 = vadd.f32 %v8863_v19, %v1263_v2 }
 0x451   : > { %v6838_v17 = vpop.f32.mrb[15].mxu1  ;;  %v2127_v21 = vsel %vm2126_vm2, %v2124_v12, -inf }
 0x452   : > { %2128 = vmax.xlane.f32.xlu0 %v2127_v21  ;;  %v1247_v17 = vrot.slane %v8828_v63, %v8882_v34  ;;  %v2263_v21 = vpack.c.bf16 %v1903_v15, %v1903_v15 }
 0x456   : > { %v2118_v22 = vpop.f32.mrb[16].mxu1 }
 0x457   : > { %v2125_v24 = vmul.f32 0.25, %v2118_v22  ;;  %v6843_v27 = vpop.f32.mrb[17].mxu1  ;;  %v1817_v22 = vadd.f32 %v8837_v4, %v1247_v17 }
 0x458   : > { %v2121_v28 = vpop.f32.mrb[18].mxu1 }
 0x459   : > { %v6844_v29 = vpop.f32.mrb[19].mxu1  ;;  %v2130_v30 = vsel %vm2126_vm2, %v2125_v24, -inf  ;;  %v2261_v27 = vpack.c.bf16 %v1817_v22, %v1817_v22  ;;  %v1821_v28 = vadd.f32 %v8843_v8, %v1247_v17 }
 0x45a   : > { %2131 = vmax.xlane.f32.xlu0 %v2130_v30  ;;  %v2265_v29 = vpack.c.bf16 %v8893_v47, %v8893_v47 }
 0x45b   : > { %v2262_v30 = vpack.c.bf16 %v1821_v28, %v1821_v28  ;;  %v7562_v28 = vld [vmem:[#allocation6 + $0x40] sm:$0xff]  }
 0x45c   : > { %v2377_v4 = vsel %vm2154_vm1, %v2265_v29, 0  ;;  %6882 = vmatpush3.bf16.msra.mxu0 %v7562_v28  ;;  %v7563_v29 = vld [vmem:[#allocation6 + $0x48] sm:$0xff]  }
 0x45d   : > { %6883 = vmatprep.subr.bf16.mxu0 %v8262_v0 }
 0x460   : > { %6884 = vmatpush3.bf16.msra.mxu0 %v7563_v29  ;;  %v2664_v29 = vpack.c.bf16 %v8891_v43, %v8891_v43 }
 0x461   : > { %6885 = vmatprep.subr.bf16.mxu0 %v8262_v0 }
 0x4df   : > { %v2129_v31 = vpop.xlane.xlu0 %2128 }
 0x4e0   : > { %v2133_v32 = vsub.f32 %v2124_v12, %v2129_v31 }
 0x4e2   : > { %v2135_v33 = vmul.f32 1.442695, %v2133_v32 }
 0x4e4   : > { %7794 = vpow2.f32 %v2135_v33 }
 0x4e7   : > { %v2132_v36 = vpop.xlane.xlu0 %2131 }
 0x4e8   : > { %v2134_v37 = vsub.f32 %v2125_v24, %v2132_v36  ;;  %v1907_v24 = vadd.f32 %v8871_v25, %v1263_v2 }
 0x4ea   : > { %v2137_v38 = vmul.f32 1.442695, %v2134_v37  ;;  %v2264_v19 = vpack.c.bf16 %v1907_v24, %v1907_v24 }
 0x4ec   : > { %7796 = vpow2.f32 %v2137_v38 }
 0x4ee   : > { %v7795_v39 = vpop.eup %7794 }
 0x4ef   : > { %v2139_v40 = vsel %vm2126_vm2, %v7795_v39, 0.0 }
 0x4f0   : > { %2140 = vadd.xlane.f32.xlu1 %v2139_v40 }
 0x4f6   : > { %v7797_v41 = vpop.eup %7796 }
 0x4f7   : > { %v2142_v42 = vsel %vm2126_vm2, %v7797_v41, 0.0 }
 0x4f8   : > { %2143 = vadd.xlane.f32.xlu1 %v2142_v42 }
 0x57d   : > { %v2141_v45 = vpop.xlane.xlu1 %2140 }
 0x57e   : > { %7798 = vrcp.f32 %v2141_v45 }
 0x585   : > { %v2144_v46 = vpop.xlane.xlu1 %2143 }
 0x586   : > { %7800 = vrcp.f32 %v2144_v46 }
 0x588   : > { %v7799_v49 = vpop.eup %7798 }
 0x589   : > { %v2147_v56 = vmul.f32 %v7799_v49, %v7795_v39 }
 0x58b   : > { %v2149_v57 = vpack.c.bf16 %v2147_v56, %v2147_v56 }
 0x58d   : > { %6848 = vmatmul.mubr.msk.bf16.vlgmr.msra.gmra.mrb[20].mxu1 %vm2126_vm2, %v2149_v57 }
 0x58e   : > { %6852 = vmatpush3.bf16.msra.mxu1 %v2202_v6  ;;  %6853 = vmatprep.mubr.msk.bf16.mxu1 %vm8263_vm0, %v8262_v0 }
 0x58f   : > { %6857 = vmatprep.subr.bf16.mxu1 %v8262_v0 }
 0x590   : > { %v7801_v12 = vpop.eup %7800 }
 0x591   : > { %v2148_v52 = vmul.f32 %v7801_v12, %v7797_v41 }
 0x593   : > { %v2150_v16 = vpack.c.bf16 %v2148_v52, %v2148_v52 }
 0x595   : > { %6854 = vmatmul.mubr.msk.bf16.vlgmr.msra.gmra.mrb[24].mxu1 %vm2126_vm2, %v2150_v16 }
 0x596   : > { %6859 = vmatprep.mubr.msk.bf16.mxu1 %vm8263_vm0, %v8262_v0 }
 0x597   : > { %6858 = vmatpush3.bf16.xpose.msra.mxu1 %v2263_v21 }
 0x598   : > { %6863 = vmatprep.subr.bf16.mxu1 %v8262_v0 }
 0x59e   : > { %6860 = vmatmul.mubr.bf16.vlgmr.msra.gmra.mrb[28].mxu1 %v2261_v27 }
 0x59f   : > { %6864 = vmatpush3.bf16.xpose.msra.mxu1 %v2264_v19  ;;  %6865 = vmatprep.mubr.msk.bf16.mxu1 %vm8263_vm0, %v8262_v0 }
 0x5a0   : > { %6869 = vmatprep.subr.bf16.mxu1 %v8262_v0 }
 0x5a6   : > { %6866 = vmatmul.mubr.bf16.vlgmr.msra.gmra.mrb[32].mxu1 %v2262_v30  ;;  %v7564_v30 = vld [vmem:[#allocation6 + $0x50] sm:$0xff]  }
 0x5a7   : > { %6870 = vmatpush3.bf16.msra.mxu1 %v2377_v4  ;;  %6871 = vmatprep.mubr.msk.bf16.mxu1 %vm8263_vm0, %v8262_v0  ;;  %v7565_v4 = vld [vmem:[#allocation6 + $0x58] sm:$0xff]  }
 0x5a8   : > { %6875 = vmatprep.subr.bf16.mxu1 %v8262_v0  ;;  %6886 = vmatpush3.bf16.msra.mxu0 %v7564_v30  ;;  %v2660_v30 = vpack.c.bf16 %v8835_v3, %v8835_v3 }
 0x5a9   : > { %6887 = vmatprep.subr.bf16.mxu0 %v8262_v0 }
 0x5ac   : > { %6888 = vmatpush3.bf16.msra.mxu0 %v7565_v4  ;;  %v2776_v4 = vsel %vm2154_vm1, %v2664_v29, 0 }
 0x5ad   : > { %6889 = vmatprep.subr.bf16.mxu0 %v8262_v0 }
 0x660   : > { %v8937_v25 = vpop.f32.mrb[20].mxu1 }
 0x661   : > { %v6849_v31 = vpop.f32.mrb[21].mxu1 }
 0x662   : > { %v2195_v32 = vpop.f32.mrb[22].mxu1  ;;  %v7566_v31 = vld [vmem:[#allocation6 + $0x60] sm:$0xff]  }
 0x663   : > { %v6850_v8 = vpop.f32.mrb[23].mxu1  ;;  %6890 = vmatpush3.bf16.msra.mxu0 %v7566_v31  ;;  %v7567_v32 = vld [vmem:[#allocation6 + $0x68] sm:$0xff]  }
 0x664   : > { %6891 = vmatprep.subr.bf16.mxu0 %v8262_v0  ;;  %v7568_v8 = vld [vmem:[#allocation6 + $0x70] sm:$0xff]  }
 0x667   : > { %6892 = vmatpush3.bf16.msra.mxu0 %v7567_v32 }
 0x668   : > { %v8939_v33 = vpop.f32.mrb[24].mxu1  ;;  %6893 = vmatprep.subr.bf16.mxu0 %v8262_v0 }
 0x669   : > { %v2244_v47 = vpack.c.bf16 %v8939_v33, %v8937_v25  ;;  %v6855_v36 = vpop.f32.mrb[25].mxu1 }
 0x66a   : > { %v2241_v37 = vpop.f32.mrb[26].mxu1 }
 0x66b   : > { %v6856_v38 = vpop.f32.mrb[27].mxu1  ;;  %6894 = vmatpush3.bf16.msra.mxu0 %v7568_v8 }
 0x66c   : > { %6895 = vmatprep.subr.bf16.mxu0 %v8262_v0 }
 0x671   : > { %v2301_v39 = vpop.f32.mrb[28].mxu1 }
 0x672   : > { %v2347_v40 = vmul.f32 0.25, %v2301_v39  ;;  %v6861_v41 = vpop.f32.mrb[29].mxu1  ;;  %v2266_v39 = vpack.c.bf16 %v8899_v59, %v8899_v59  ;;  %v7555_v59 = vld [vmem:[#allocation6 + $0x8] sm:$0xff]  }
 0x673   : > { %v2304_v42 = vpop.f32.mrb[30].mxu1 }
 0x674   : > { %v6862_v45 = vpop.f32.mrb[31].mxu1  ;;  %v2349_v46 = vsel %vm2126_vm2, %v2347_v40, -inf  ;;  %v2423_v42 = vsel %vm2154_vm1, %v2266_v39, 0 }
 0x675   : > { %2350 = vmax.xlane.f32.xlu0 %v2349_v46 }
 0x679   : > { %v2341_v49 = vpop.f32.mrb[32].mxu1 }
 0x67a   : > { %v2348_v51 = vmul.f32 0.25, %v2341_v49  ;;  %v6867_v56 = vpop.f32.mrb[33].mxu1  ;;  %v7554_v49 = vld [vmem:[#allocation6] sm:$0xff]  }
 0x67b   : > { %v2344_v57 = vpop.f32.mrb[34].mxu1  ;;  %v7556_v56 = vld [vmem:[#allocation6 + $0x10] sm:$0xff]  }
 0x67c   : > { %v6868_v2 = vpop.f32.mrb[35].mxu1  ;;  %v2352_v6 = vsel %vm2126_vm2, %v2348_v51, -inf  ;;  %v7557_v57 = vld [vmem:[#allocation6 + $0x18] sm:$0xff]  }
 0x67d   : > { %2353 = vmax.xlane.f32.xlu1 %v2352_v6  ;;  %v7558_v2 = vld [vmem:[#allocation6 + $0x20] sm:$0xff]   ;;  %v7559_v6 = vld [vmem:[#allocation6 + $0x28] sm:$0xff]  }
 0x702   : > { %v2351_v12 = vpop.xlane.xlu0 %2350 }
 0x703   : > { %v2355_v15 = vsub.f32 %v2347_v40, %v2351_v12  ;;  %v7560_v12 = vld [vmem:[#allocation6 + $0x30] sm:$0xff]  }
 0x705   : > { %v2357_v52 = vmul.f32 1.442695, %v2355_v15  ;;  %v7561_v15 = vld [vmem:[#allocation6 + $0x38] sm:$0xff]  }
 0x707   : > { %7802 = vpow2.f32 %v2357_v52  ;;  %v1948_v52 = vadd.f32 %v8869_v23, %v8855_v13  ;;  %v7569_v23 = vld [vmem:[#allocation6 + $0x78] sm:$0xff]  }
 0x708   : > { %6896 = vmatpush3.bf16.msra.mxu0 %v7569_v23 }
 0x709   : > { %6921 = vmatprep.subr.bf16.mxu0 %v8262_v0 }
 0x70a   : > { %v2354_v16 = vpop.xlane.xlu1 %2353 }
 0x70b   : > { %v2356_v17 = vsub.f32 %v2348_v51, %v2354_v16  ;;  %v2663_v16 = vpack.c.bf16 %v1948_v52, %v1948_v52 }
 0x70d   : > { %v2359_v21 = vmul.f32 1.442695, %v2356_v17  ;;  %v1862_v17 = vadd.f32 %v8841_v7, %v8832_v1 }
 0x70f   : > { %7804 = vpow2.f32 %v2359_v21  ;;  %v2665_v21 = vpack.c.bf16 %v8897_v53, %v8897_v53 }
 0x711   : > { %v7803_v22 = vpop.eup %7802  ;;  %v2822_v13 = vsel %vm2154_vm1, %v2665_v21, 0 }
 0x712   : > { %v2361_v24 = vsel %vm2126_vm2, %v7803_v22, 0.0 }
 0x713   : > { %2362 = vadd.xlane.f32.xlu0 %v2361_v24 }
 0x719   : > { %v7805_v27 = vpop.eup %7804 }
 0x71a   : > { %v2364_v19 = vsel %vm2126_vm2, %v7805_v27, 0.0 }
 0x71b   : > { %2365 = vadd.xlane.f32.xlu1 %v2364_v19 }
 0x7a0   : > { %v2363_v36 = vpop.xlane.xlu0 %2362 }
 0x7a1   : > { %7806 = vrcp.f32 %v2363_v36 }
 0x7a8   : > { %v2366_v37 = vpop.xlane.xlu1 %2365 }
 0x7a9   : > { %7808 = vrcp.f32 %v2366_v37 }
 0x7ab   : > { %v7807_v38 = vpop.eup %7806 }
 0x7ac   : > { %v2369_v40 = vmul.f32 %v7807_v38, %v7803_v22  ;;  %v2661_v22 = vpack.c.bf16 %v1862_v17, %v1862_v17 }
 0x7ae   : > { %v2371_v41 = vpack.c.bf16 %v2369_v40, %v2369_v40 }
 0x7b0   : > { %6872 = vmatmul.mubr.msk.bf16.vlgmr.msra.gmra.mrb[36].mxu1 %vm2126_vm2, %v2371_v41 }
 0x7b1   : > { %6876 = vmatpush3.bf16.msra.mxu1 %v2423_v42  ;;  %6877 = vmatprep.mubr.msk.bf16.mxu1 %vm8263_vm0, %v8262_v0 }
 0x7b2   : > { %6901 = vmatprep.subr.bf16.mxu1 %v8262_v0 }
 0x7b3   : > { %v7809_v45 = vpop.eup %7808 }
 0x7b4   : > { %v2370_v46 = vmul.f32 %v7809_v45, %v7805_v27  ;;  %v2662_v27 = vpack.c.bf16 %v8861_v18, %v8861_v18 }
 0x7b6   : > { %v2372_v51 = vpack.c.bf16 %v2370_v46, %v2370_v46 }
 0x7b8   : > { %6878 = vmatmul.mubr.msk.bf16.vlgmr.msra.gmra.mrb[40].mxu1 %vm2126_vm2, %v2372_v51 }
 0x7b9   : > { %6902 = vmatpush3.bf16.msra.mxu1 %v7554_v49  ;;  %6917 = vmatprep.mubr.msk.bf16.mxu1 %vm8263_vm0, %v8262_v0 }
 0x7ba   : > { %6903 = vmatprep.subr.bf16.mxu1 %v8262_v0 }
 0x7bd   : > { %6904 = vmatpush3.bf16.msra.mxu1 %v7555_v59 }
 0x7be   : > { %6905 = vmatprep.subr.bf16.mxu1 %v8262_v0 }
 0x7c1   : > { %6906 = vmatpush3.bf16.msra.mxu1 %v7556_v56 }
 0x7c2   : > { %6907 = vmatprep.subr.bf16.mxu1 %v8262_v0 }
 0x7c5   : > { %6908 = vmatpush3.bf16.msra.mxu1 %v7557_v57 }
 0x7c6   : > { %6909 = vmatprep.subr.bf16.mxu1 %v8262_v0 }
 0x7c9   : > { %6910 = vmatpush3.bf16.msra.mxu1 %v7558_v2 }
 0x7ca   : > { %6911 = vmatprep.subr.bf16.mxu1 %v8262_v0 }
 0x7cd   : > { %6912 = vmatpush3.bf16.msra.mxu1 %v7559_v6 }
 0x7ce   : > { %6913 = vmatprep.subr.bf16.mxu1 %v8262_v0 }
 0x7d1   : > { %6914 = vmatpush3.bf16.msra.mxu1 %v7560_v12 }
 0x7d2   : > { %6915 = vmatprep.subr.bf16.mxu1 %v8262_v0 }
 0x7d5   : > { %6916 = vmatpush3.bf16.msra.mxu1 %v7561_v15 }
 0x7d6   : > { %6927 = vmatprep.subr.bf16.mxu1 %v8262_v0 }
 0x7d8   : > { %6918 = vmatmul.mubr.bf16.vlgmr.msra.gmra.mrb[44].mxu1 %v2244_v47 }
 0x7d9   : > { %6929 = vmatprep.mubr.msk.bf16.mxu1 %vm8263_vm0, %v8262_v0 }
 0x7de   : > { %6928 = vmatpush3.bf16.xpose.msra.mxu1 %v2663_v16 }
 0x7df   : > { %6939 = vmatprep.subr.bf16.mxu1 %v8262_v0 }
 0x7e5   : > { %6930 = vmatmul.mubr.bf16.vlgmr.msra.gmra.mrb[48].mxu1 %v2661_v22  ;;  %v1270_v22 = vsub.s32 7, %v8823_v61 }
 0x7e6   : > { %6940 = vmatpush3.bf16.msra.mxu1 %v2822_v13  ;;  %6941 = vmatprep.mubr.msk.bf16.mxu1 %vm8263_vm0, %v8262_v0 }
 0x7e7   : > { %6965 = vmatprep.subr.bf16.mxu1 %v8262_v0  ;;  %v1271_v13 = vrot.slane %v8828_v63, %v1270_v22 }
 0x883   : > { %v2413_v1 = vpop.f32.mrb[36].mxu1 }
 0x884   : > { %v6873_v7 = vpop.f32.mrb[37].mxu1 }
 0x885   : > { %v2416_v25 = vpop.f32.mrb[38].mxu1 }
 0x886   : > { %v6874_v33 = vpop.f32.mrb[39].mxu1  ;;  %v1255_v25 = vrot.slane %v8828_v63, %v8885_v35 }
 0x888   : > { %v1864_v63 = vadd.f32 %v8845_v9, %v1255_v25 }
 0x88b   : > { %v2459_v47 = vpop.f32.mrb[40].mxu1 }
 0x88c   : > { %v2465_v53 = vpack.c.bf16 %v2459_v47, %v2413_v1  ;;  %v6879_v24 = vpop.f32.mrb[41].mxu1  ;;  %v1946_v1 = vadd.f32 %v8865_v20, %v1271_v13 }
 0x88d   : > { %v2462_v19 = vpop.f32.mrb[42].mxu1  ;;  %v1950_v24 = vadd.f32 %v8873_v26, %v1271_v13 }
 0x88e   : > { %v6880_v28 = vpop.f32.mrb[43].mxu1  ;;  %6898 = vmatmul.mubr.bf16.vlgmr.msra.gmra.mrb[16].mxu0 %v2465_v53  ;;  %v2974_v47 = vpack.c.bf16 %v1946_v1, %v1946_v1  ;;  %v1860_v53 = vadd.f32 %v8839_v5, %v1255_v25  ;;  %v2976_v19 = vpack.c.bf16 %v8895_v48, %v8895_v48  ;;  %v7571_v25 = vld [vmem:[#allocation6 + $0x88] sm:$0xff]  }
 0x88f   : > { %6922 = vmatpush3.bf16.xpose.msra.mxu0 %v2662_v27  ;;  %6923 = vmatprep.mubr.msk.bf16.mxu0 %vm8263_vm0, %v8262_v0  ;;  %v2975_v20 = vpack.c.bf16 %v1950_v24, %v1950_v24  ;;  %v2973_v28 = vpack.c.bf16 %v1864_v63, %v1864_v63  ;;  %v7575_v24 = vld [vmem:[#allocation6 + $0xa8] sm:$0xff]  }
 0x890   : > { %6933 = vmatprep.subr.bf16.mxu0 %v8262_v0  ;;  %v2972_v27 = vpack.c.bf16 %v1860_v53, %v1860_v53  ;;  %v3088_v5 = vsel %vm2154_vm1, %v2976_v19, 0  ;;  %v7574_v53 = vld [vmem:[#allocation6 + $0xa0] sm:$0xff]  }
 0x896   : > { %6924 = vmatmul.mubr.bf16.vlgmr.msra.gmra.mrb[20].mxu0 %v2660_v30 }
 0x897   : > { %6934 = vmatpush3.bf16.msra.mxu0 %v2776_v4  ;;  %6935 = vmatprep.mubr.msk.bf16.mxu0 %vm8263_vm0, %v8262_v0 }
 0x898   : > { %6945 = vmatprep.subr.bf16.mxu0 %v8262_v0 }
 0x8ab   : > { %v2653_v18 = vpop.f32.mrb[44].mxu1 }
 0x8ac   : > { %v6919_v31 = vpop.f32.mrb[45].mxu1 }
 0x8ad   : > { %v2656_v32 = vpop.f32.mrb[46].mxu1 }
 0x8ae   : > { %v6920_v8 = vpop.f32.mrb[47].mxu1 }
 0x8b8   : > { %v2740_v36 = vpop.f32.mrb[48].mxu1 }
 0x8b9   : > { %v2747_v37 = vmul.f32 0.25, %v2740_v36  ;;  %v6931_v38 = vpop.f32.mrb[49].mxu1 }
 0x8ba   : > { %v2743_v43 = vpop.f32.mrb[50].mxu1 }
 0x8bb   : > { %v6932_v39 = vpop.f32.mrb[51].mxu1  ;;  %v2751_v3 = vsel %vm2126_vm2, %v2747_v37, -inf }
 0x8bc   : > { %2752 = vmax.xlane.f32.xlu0 %v2751_v3 }
 0x949   : > { %v2753_v40 = vpop.xlane.xlu0 %2752 }
 0x94a   : > { %v2755_v41 = vsub.f32 %v2747_v37, %v2753_v40 }
 0x94c   : > { %v2758_v42 = vmul.f32 1.442695, %v2755_v41 }
 0x94e   : > { %7810 = vpow2.f32 %v2758_v42 }
 0x958   : > { %v7811_v45 = vpop.eup %7810 }
 0x959   : > { %v2763_v46 = vsel %vm2126_vm2, %v7811_v45, 0.0 }
 0x95a   : > { %2764 = vadd.xlane.f32.xlu1 %v2763_v46 }
 0x961   : > { %v2564_v49 = vpop.f32.mrb[16].mxu0 }
 0x962   : > { %v9004_v51 = vadd.f32 %v2653_v18, %v2564_v49  ;;  %v6899_v59 = vpop.f32.mrb[17].mxu0 }
 0x963   : > { %v2567_v56 = vpop.f32.mrb[18].mxu0 }
 0x964   : > { %v9006_v57 = vadd.f32 %v2656_v32, %v2567_v56  ;;  %v6900_v2 = vpop.f32.mrb[19].mxu0 }
 0x969   : > { %v2700_v6 = vpop.f32.mrb[20].mxu0 }
 0x96a   : > { %v2746_v12 = vmul.f32 0.25, %v2700_v6  ;;  %v6925_v15 = vpop.f32.mrb[21].mxu0 }
 0x96b   : > { %v2703_v52 = vpop.f32.mrb[22].mxu0 }
 0x96c   : > { %v6926_v16 = vpop.f32.mrb[23].mxu0  ;;  %v2748_v17 = vsel %vm2126_vm2, %v2746_v12, -inf }
 0x96d   : > { %2749 = vmax.xlane.f32.xlu0 %v2748_v17 }
 0x9e7   : > { %v2765_v21 = vpop.xlane.xlu1 %2764 }
 0x9e8   : > { %7812 = vrcp.f32 %v2765_v21 }
 0x9f2   : > { %v7813_v23 = vpop.eup %7812 }
 0x9f3   : > { %v2769_v7 = vmul.f32 %v7813_v23, %v7811_v45 }
 0x9f5   : > { %v2771_v33 = vpack.c.bf16 %v2769_v7, %v2769_v7  ;;  %v7570_v7 = vld [vmem:[#allocation6 + $0x80] sm:$0xff]  }
 0x9f7   : > { %6942 = vmatmul.mubr.msk.bf16.vlgmr.msra.gmra.mrb[52].mxu1 %vm2126_vm2, %v2771_v33  ;;  %v7572_v33 = vld [vmem:[#allocation6 + $0x90] sm:$0xff]  }
 0x9f8   : > { %6966 = vmatpush3.bf16.xpose.msra.mxu1 %v2974_v47  ;;  %6967 = vmatprep.mubr.msk.bf16.mxu1 %vm8263_vm0, %v8262_v0  ;;  %v7573_v47 = vld [vmem:[#allocation6 + $0x98] sm:$0xff]  }
 0x9f9   : > { %6971 = vmatprep.subr.bf16.mxu1 %v8262_v0 }
 0x9fa   : > { %v2750_v26 = vpop.xlane.xlu0 %2749 }
 0x9fb   : > { %v2754_v29 = vsub.f32 %v2746_v12, %v2750_v26 }
 0x9fd   : > { %v2756_v30 = vmul.f32 1.442695, %v2754_v29 }
 0x9ff   : > { %6968 = vmatmul.mubr.bf16.vlgmr.msra.gmra.mrb[56].mxu1 %v2972_v27  ;;  %7814 = vpow2.f32 %v2756_v30  ;;  %v7576_v27 = vld [vmem:[#allocation6 + $0xb0] sm:$0xff]  }
 0xa00   : > { %6972 = vmatpush3.bf16.xpose.msra.mxu1 %v2975_v20  ;;  %6973 = vmatprep.mubr.msk.bf16.mxu1 %vm8263_vm0, %v8262_v0  ;;  %v7577_v20 = vld [vmem:[#allocation6 + $0xb8] sm:$0xff]  }
 0xa01   : > { %6977 = vmatprep.subr.bf16.mxu1 %v8262_v0 }
 0xa07   : > { %6974 = vmatmul.mubr.bf16.vlgmr.msra.gmra.mrb[60].mxu1 %v2973_v28 }
 0xa08   : > { %6978 = vmatpush3.bf16.msra.mxu1 %v3088_v5  ;;  %6979 = vmatprep.mubr.msk.bf16.mxu1 %vm8263_vm0, %v8262_v0  ;;  %v2977_v5 = vpack.c.bf16 %v8901_v58, %v8901_v58 }
 0xa09   : > { %6983 = vmatprep.subr.bf16.mxu1 %v8262_v0  ;;  %v7815_v43 = vpop.eup %7814 }
 0xa0a   : > { %v2760_v39 = vsel %vm2126_vm2, %v7815_v43, 0.0  ;;  %v3134_v30 = vsel %vm2154_vm1, %v2977_v5, 0 }
 0xaca   : > { %v9032_v4 = vpop.f32.mrb[52].mxu1 }
 0xacb   : > { %v6943_v9 = vpop.f32.mrb[53].mxu1 }
 0xacc   : > { %v2861_v18 = vpop.f32.mrb[54].mxu1 }
 0xacd   : > { %v6944_v31 = vpop.f32.mrb[55].mxu1 }
 0xad2   : > { %v3012_v48 = vpop.f32.mrb[56].mxu1 }
 0xad3   : > { %v3058_v32 = vmul.f32 0.25, %v3012_v48  ;;  %v6969_v8 = vpop.f32.mrb[57].mxu1  ;;  %v7578_v48 = vld [vmem:[#allocation6 + $0xc0] sm:$0xff]  }
 0xad4   : > { %v3015_v36 = vpop.f32.mrb[58].mxu1 }
 0xad5   : > { %v6970_v37 = vpop.f32.mrb[59].mxu1  ;;  %v3060_v38 = vsel %vm2126_vm2, %v3058_v32, -inf }
 0xad6   : > { %3061 = vmax.xlane.f32.xlu1 %v3060_v38  ;;  %v7579_v38 = vld [vmem:[#allocation6 + $0xc8] sm:$0xff]  }
 0xada   : > { %v3052_v3 = vpop.f32.mrb[60].mxu1  ;;  %2761 = vadd.xlane.f32.xlu1 %v2760_v39  ;;  %v7581_v39 = vld [vmem:[#allocation6 + $0xd8] sm:$0xff]  }
 0xadb   : > { %v3059_v40 = vmul.f32 0.25, %v3052_v3  ;;  %v6975_v41 = vpop.f32.mrb[61].mxu1  ;;  %v7583_v3 = vld [vmem:[#allocation6 + $0xe8] sm:$0xff]  }
 0xadc   : > { %v3055_v42 = vpop.f32.mrb[62].mxu1  ;;  %v7585_v41 = vld [vmem:[#allocation6 + $0xf8] sm:$0xff]  }
 0xadd   : > { %v6976_v45 = vpop.f32.mrb[63].mxu1  ;;  %v3063_v46 = vsel %vm2126_vm2, %v3059_v40, -inf }
 0xade   : > { %3064 = vmax.xlane.f32.xlu0 %v3063_v46 }
 0xb63   : > { %v3062_v49 = vpop.xlane.xlu1 %3061 }
 0xb64   : > { %v3066_v59 = vsub.f32 %v3058_v32, %v3062_v49 }
 0xb66   : > { %v3068_v56 = vmul.f32 1.442695, %v3066_v59 }
 0xb67   : > { %v2762_v2 = vpop.xlane.xlu1 %2761 }
 0xb68   : > { %7816 = vpow2.f32 %v3068_v56 }
 0xb69   : > { %7818 = vrcp.f32 %v2762_v2 }
 0xb6b   : > { %v3065_v6 = vpop.xlane.xlu0 %3064 }
 0xb6c   : > { %v3067_v12 = vsub.f32 %v3059_v40, %v3065_v6  ;;  %v7584_v40 = vld [vmem:[#allocation6 + $0xf0] sm:$0xff]  }
 0xb6e   : > { %v3070_v15 = vmul.f32 1.442695, %v3067_v12 }
 0xb70   : > { %7820 = vpow2.f32 %v3070_v15 }
 0xb72   : > { %v7817_v52 = vpop.eup %7816 }
 0xb73   : > { %v7819_v16 = vpop.eup %7818  ;;  %v3072_v17 = vsel %vm2126_vm2, %v7817_v52, 0.0 }
 0xb74   : > { %v2768_v21 = vmul.f32 %v7819_v16, %v7815_v43  ;;  %3073 = vadd.xlane.f32.xlu0 %v3072_v17  ;;  %v7580_v43 = vld [vmem:[#allocation6 + $0xd0] sm:$0xff]  }
 0xb76   : > { %v2770_v13 = vpack.c.bf16 %v2768_v21, %v2768_v21 }
 0xb78   : > { %6936 = vmatmul.mubr.msk.bf16.vlgmr.msra.gmra.mrb[24].mxu0 %vm2126_vm2, %v2770_v13 }
 0xb79   : > { %6961 = vmatprep.mubr.msk.bf16.mxu0 %vm8263_vm0, %v8262_v0  ;;  %6946 = vmatpush3.bf16.msra.mxu0 %v7570_v7 }
 0xb7a   : > { %v7821_v23 = vpop.eup %7820  ;;  %6947 = vmatprep.subr.bf16.mxu0 %v8262_v0 }
 0xb7b   : > { %v3075_v1 = vsel %vm2126_vm2, %v7821_v23, 0.0 }
 0xb7c   : > { %3076 = vadd.xlane.f32.xlu1 %v3075_v1  ;;  %v6439_v1 = vld [vmem:[%s9557_s28] ss:$0 sm:$0xff] }
 0xb7d   : > { %6948 = vmatpush3.bf16.msra.mxu0 %v7571_v25 }
 0xb7e   : > { %6949 = vmatprep.subr.bf16.mxu0 %v8262_v0 }
 0xb81   : > { %6950 = vmatpush3.bf16.msra.mxu0 %v7572_v33 }
 0xb82   : > { %6951 = vmatprep.subr.bf16.mxu0 %v8262_v0 }
 0xb85   : > { %6952 = vmatpush3.bf16.msra.mxu0 %v7573_v47 }
 0xb86   : > { %6953 = vmatprep.subr.bf16.mxu0 %v8262_v0 }
 0xb89   : > { %6954 = vmatpush3.bf16.msra.mxu0 %v7574_v53 }
 0xb8a   : > { %6955 = vmatprep.subr.bf16.mxu0 %v8262_v0 }
 0xb8d   : > { %6956 = vmatpush3.bf16.msra.mxu0 %v7575_v24 }
 0xb8e   : > { %6957 = vmatprep.subr.bf16.mxu0 %v8262_v0 }
 0xb91   : > { %6958 = vmatpush3.bf16.msra.mxu0 %v7576_v27 }
 0xb92   : > { %6959 = vmatprep.subr.bf16.mxu0 %v8262_v0 }
 0xb95   : > { %6960 = vmatpush3.bf16.msra.mxu0 %v7577_v20 }
 0xb96   : > { %6989 = vmatprep.subr.bf16.mxu0 %v8262_v0 }
 0xc01   : > { %v3074_v63 = vpop.xlane.xlu0 %3073 }
 0xc02   : > { %7822 = vrcp.f32 %v3074_v63  ;;  %v7587_v63 = vld [vmem:[%s9558_s5 + $0x8] sm:$0xff]  }
 0xc09   : > { %v3077_v19 = vpop.xlane.xlu1 %3076 }
 0xc0a   : > { %7824 = vrcp.f32 %v3077_v19 }
 0xc0c   : > { %v7823_v28 = vpop.eup %7822 }
 0xc0d   : > { %v3080_v26 = vmul.f32 %v7823_v28, %v7817_v52 }
 0xc0f   : > { %v3082_v29 = vpack.c.bf16 %v3080_v26, %v3080_v26 }
 0xc11   : > { %6980 = vmatmul.mubr.msk.bf16.vlgmr.msra.gmra.mrb[64].mxu1 %vm2126_vm2, %v3082_v29 }
 0xc12   : > { %6984 = vmatpush3.bf16.msra.mxu1 %v3134_v30  ;;  %6985 = vmatprep.mubr.msk.bf16.mxu1 %vm8263_vm0, %v8262_v0 }
 0xc13   : > { %7009 = vmatprep.subr.bf16.mxu1 %v8262_v0 }
 0xc14   : > { %v7825_v9 = vpop.eup %7824 }
 0xc15   : > { %v3081_v18 = vmul.f32 %v7825_v9, %v7821_v23 }
 0xc17   : > { %v3083_v31 = vpack.c.bf16 %v3081_v18, %v3081_v18 }
 0xc19   : > { %6986 = vmatmul.mubr.msk.bf16.vlgmr.msra.gmra.mrb[68].mxu1 %vm2126_vm2, %v3083_v31 }
 0xc1a   : > { %7025 = vmatprep.mubr.msk.bf16.mxu1 %vm8263_vm0, %v8262_v0 }
 0xc4b   : > { %v2812_v58 = vpop.f32.mrb[24].mxu0 }
 0xc4c   : > { %v2864_v32 = vpack.c.bf16 %v9032_v4, %v2812_v58  ;;  %v6937_v8 = vpop.f32.mrb[25].mxu0  ;;  %v7582_v4 = vld [vmem:[#allocation6 + $0xe0] sm:$0xff]  }
 0xc4d   : > { %v2815_v36 = vpop.f32.mrb[26].mxu0  ;;  %v7588_v58 = vld [vmem:[%s9558_s5 + $0x10] sm:$0xff]  }
 0xc4e   : > { %v6938_v37 = vpop.f32.mrb[27].mxu0  ;;  %6962 = vmatmul.mubr.bf16.vlgmr.msra.gmra.mrb[28].mxu0 %v2864_v32  ;;  %v7591_v32 = vld [vmem:[%s9558_s5 + $0x28] sm:$0xff]   ;;  %v7592_v8 = vld [vmem:[%s9558_s5 + $0x30] sm:$0xff]   ;;  %v7593_v36 = vld [vmem:[%s9558_s5 + $0x38] sm:$0xff]  }
 0xc4f   : > { %6990 = vmatpush3.bf16.msra.mxu0 %v7578_v48  ;;  %7005 = vmatprep.mubr.msk.bf16.mxu0 %vm8263_vm0, %v8262_v0  ;;  %v7590_v48 = vld [vmem:[%s9558_s5 + $0x20] sm:$0xff]  }
 0xc50   : > { %6991 = vmatprep.subr.bf16.mxu0 %v8262_v0  ;;  %v7594_v37 = vld [vmem:[#allocation12] sm:$0xff]  }
 0xc53   : > { %6992 = vmatpush3.bf16.msra.mxu0 %v7579_v38  ;;  %v7595_v38 = vld [vmem:[#allocation12 + $0x8] sm:$0xff]  }
 0xc54   : > { %6993 = vmatprep.subr.bf16.mxu0 %v8262_v0 }
 0xc57   : > { %6994 = vmatpush3.bf16.msra.mxu0 %v7580_v43  ;;  %v7596_v43 = vld [vmem:[#allocation12 + $0x10] sm:$0xff]  }
 0xc58   : > { %6995 = vmatprep.subr.bf16.mxu0 %v8262_v0 }
 0xc5b   : > { %6996 = vmatpush3.bf16.msra.mxu0 %v7581_v39  ;;  %v7597_v39 = vld [vmem:[#allocation12 + $0x18] sm:$0xff]  }
 0xc5c   : > { %6997 = vmatprep.subr.bf16.mxu0 %v8262_v0 }
 0xc5f   : > { %6998 = vmatpush3.bf16.msra.mxu0 %v7582_v4  ;;  %v7598_v4 = vld [vmem:[#allocation12 + $0x20] sm:$0xff]  }
 0xc60   : > { %6999 = vmatprep.subr.bf16.mxu0 %v8262_v0 }
 0xc63   : > { %7000 = vmatpush3.bf16.msra.mxu0 %v7583_v3  ;;  %v7599_v3 = vld [vmem:[#allocation12 + $0x28] sm:$0xff]  }
 0xc64   : > { %7001 = vmatprep.subr.bf16.mxu0 %v8262_v0 }
 0xc67   : > { %7002 = vmatpush3.bf16.msra.mxu0 %v7584_v40 }
 0xc68   : > { %7003 = vmatprep.subr.bf16.mxu0 %v8262_v0 }
 0xc6b   : > { %7004 = vmatpush3.bf16.msra.mxu0 %v7585_v41 }
 0xc6c   : > { %7029 = vmatprep.subr.bf16.mxu0 %v8262_v0 }
 0xce4   : > { %v3124_v42 = vpop.f32.mrb[64].mxu1 }
 0xce5   : > { %v6981_v45 = vpop.f32.mrb[65].mxu1 }
 0xce6   : > { %v3127_v46 = vpop.f32.mrb[66].mxu1 }
 0xce7   : > { %v6982_v49 = vpop.f32.mrb[67].mxu1 }
 0xcec   : > { %v3170_v59 = vpop.f32.mrb[68].mxu1 }
 0xced   : > { %v3176_v56 = vpack.c.bf16 %v3170_v59, %v3124_v42  ;;  %v6987_v2 = vpop.f32.mrb[69].mxu1 }
 0xcee   : > { %v3173_v6 = vpop.f32.mrb[70].mxu1 }
 0xcef   : > { %v6988_v12 = vpop.f32.mrb[71].mxu1  ;;  %7006 = vmatmul.mubr.bf16.vlgmr.msra.gmra.mrb[32].mxu0 %v3176_v56  ;;  %v6440_v56 = vld [vmem:[#allocation7] ss:$0 sm:$0xff] }
 0xcf0   : > { %7045 = vmatprep.mubr.msk.bf16.mxu0 %vm8263_vm0, %v8262_v0  ;;  %7030 = vmatpush3.bf16.msra.mxu0 %v7594_v37 }
 0xcf1   : > { %7031 = vmatprep.subr.bf16.mxu0 %v8262_v0 }
 0xcf4   : > { %7032 = vmatpush3.bf16.msra.mxu0 %v7595_v38 }
 0xcf5   : > { %7033 = vmatprep.subr.bf16.mxu0 %v8262_v0 }
 0xcf8   : > { %7034 = vmatpush3.bf16.msra.mxu0 %v7596_v43 }
 0xcf9   : > { %7035 = vmatprep.subr.bf16.mxu0 %v8262_v0 }
 0xcfc   : > { %7036 = vmatpush3.bf16.msra.mxu0 %v7597_v39 }
 0xcfd   : > { %7037 = vmatprep.subr.bf16.mxu0 %v8262_v0 }
 0xd00   : > { %7038 = vmatpush3.bf16.msra.mxu0 %v7598_v4 }
 0xd01   : > { %7039 = vmatprep.subr.bf16.mxu0 %v8262_v0 }
 0xd04   : > { %7040 = vmatpush3.bf16.msra.mxu0 %v7599_v3 }
 0xd05   : > { %7041 = vmatprep.subr.bf16.mxu0 %v8262_v0 }
 0xd21   : > { %v2963_v15 = vpop.f32.mrb[28].mxu0 }
 0xd22   : > { %v2970_v52 = vadd.f32 %v2963_v15, %v9004_v51  ;;  %v6963_v16 = vpop.f32.mrb[29].mxu0 }
 0xd23   : > { %v2966_v17 = vpop.f32.mrb[30].mxu0 }
 0xd24   : > { %v2971_v21 = vadd.f32 %v2966_v17, %v9006_v57  ;;  %v6964_v13 = vpop.f32.mrb[31].mxu0  ;;  %v7586_v57 = vld [vmem:[%s9558_s5] sm:$0xff]  }
 0xd25   : > { %7010 = vmatpush3.bf16.msra.mxu1 %v7586_v57 }
 0xd26   : > { %7011 = vmatprep.subr.bf16.mxu1 %v8262_v0 }
 0xd29   : > { %7012 = vmatpush3.bf16.msra.mxu1 %v7587_v63  ;;  %v6451_v63 = vld [vmem:[#allocation13] ss:$0 sm:$0xff] }
 0xd2a   : > { %7013 = vmatprep.subr.bf16.mxu1 %v8262_v0 }
 0xd2d   : > { %7014 = vmatpush3.bf16.msra.mxu1 %v7588_v58  ;;  %v7610_v58 = vld [vmem:[#allocation15 + $0x64] ss:$48 sps:$4 sm:$0xff]  }
 0xd2e   : > { %7015 = vmatprep.subr.bf16.mxu1 %v8262_v0 }
 0xdc2   : > { %v3275_v23 = vpop.f32.mrb[32].mxu0 }
 0xdc3   : > { %v3282_v7 = vadd.f32 %v3275_v23, %v2970_v52  ;;  %v7007_v25 = vpop.f32.mrb[33].mxu0  ;;  %v6441_v52 = vld [vmem:[#allocation9] ss:$0 sm:$0xff]  ;;  %v7600_v23 = vld [vmem:[#allocation12 + $0x30] sm:$0xff]  }
 0xdc4   : > { %v3278_v33 = vpop.f32.mrb[34].mxu0  ;;  %7042 = vmatpush3.bf16.msra.mxu0 %v7600_v23  ;;  %v7635_v23 = vld [vmem:[#allocation15 + $0x1e8] ss:$48 sps:$4 sm:$0xff]  }
 0xdc5   : > { %v3291_v47 = vadd.f32 %v6439_v1, %v3282_v7  ;;  %v3283_v53 = vadd.f32 %v3278_v33, %v2971_v21  ;;  %v7008_v24 = vpop.f32.mrb[35].mxu0  ;;  %7043 = vmatprep.subr.bf16.mxu0 %v8262_v0  ;;  %v6442_v7 = vld [vmem:[#allocation10] ss:$0 sm:$0xff] }
 0xdc7   : > { %v3292_v27 = vadd.f32 %v6439_v1, %v3283_v53  ;;  %v3293_v20 = vadd.f32 %v3291_v47, %v8798_v54  ;;  %v9089_v54 = vand.u32 127, %v1240_v60  ;;  %v7589_v60 = vld [vmem:[%s9558_s5 + $0x18] sm:$0xff]  }
 0xdc8   : > { %7016 = vmatpush3.bf16.msra.mxu1 %v7589_v60  ;;  %v7601_v1 = vld [vmem:[#allocation12 + $0x38] sm:$0xff]  }
 0xdc9   : > { %3300 = vadd.xlane.f32.xlu0 %v3293_v20  ;;  %v3294_v51 = vadd.f32 %v3292_v27, %v8800_v55  ;;  %vm3299_vm3 = vcmp.lt.s32.totalorder %v9089_v54, 64  ;;  %7017 = vmatprep.subr.bf16.mxu1 %v8262_v0  ;;  %v7613_v60 = vld [vmem:[#allocation15 + $0x6c] ss:$48 sps:$4 sm:$0xff]   ;;  %vm3570_vm4 = vcmp.lt.s32.totalorder %v9089_v54, 32 }
 0xdca   : > { %7044 = vmatpush3.bf16.msra.mxu0 %v7601_v1  ;;  %v7640_v1 = vld [vmem:[#allocation15 + $0x244] ss:$48 sps:$4 sm:$0xff]  }
 0xdcb   : > { %3302 = vadd.xlane.f32.xlu1 %v3294_v51 }
 0xdcc   : > { %7018 = vmatpush3.bf16.msra.mxu1 %v7590_v48  ;;  %v7608_v48 = vld [vmem:[#allocation15 + $0x60] ss:$48 sps:$4 sm:$0xff]  }
 0xdcd   : > { %7019 = vmatprep.subr.bf16.mxu1 %v8262_v0 }
 0xdd0   : > { %7020 = vmatpush3.bf16.msra.mxu1 %v7591_v32  ;;  %v7611_v32 = vld [vmem:[#allocation15 + $0x68] ss:$48 sps:$4 sm:$0xff]  }
 0xdd1   : > { %7021 = vmatprep.subr.bf16.mxu1 %v8262_v0 }
 0xdd4   : > { %7022 = vmatpush3.bf16.msra.mxu1 %v7592_v8 }
 0xdd5   : > { %7023 = vmatprep.subr.bf16.mxu1 %v8262_v0 }
 0xdd8   : > { %7024 = vmatpush3.bf16.msra.mxu1 %v7593_v36 }
 0xe56   : > { %v3301_v19 = vpop.xlane.xlu0 %3300 }
 0xe57   : > { %v3304_v55 = vmul.f32 0.015625, %v3301_v19 }
 0xe58   : > { %v3303_v28 = vpop.xlane.xlu1 %3302 }
 0xe59   : > { %v3306_v5 = vsub.f32 %v3293_v20, %v3304_v55  ;;  %v3305_v26 = vmul.f32 0.015625, %v3303_v28 }
 0xe5b   : > { %v3307_v29 = vsub.f32 %v3294_v51, %v3305_v26  ;;  %v3308_v30 = vsel %vm3299_vm3, %v3306_v5, 0.0 }
 0xe5c   : > { %v3310_v9 = vmul.f32 %v3308_v30, %v3308_v30 }
 0xe5d   : > { %v3309_v18 = vsel %vm3299_vm3, %v3307_v29, 0.0 }
 0xe5e   : > { %3312 = vadd.xlane.f32.xlu0 %v3310_v9  ;;  %v3311_v31 = vmul.f32 %v3309_v18, %v3309_v18  ;;  %v7604_v9 = vld [vmem:[#allocation15 + $0x4] ss:$48 sps:$4 sm:$0xff]  }
 0xe5f   : > { %4252 = vmatprep.subr.bf16.mxu1 %v7604_v9 }
 0xe60   : > { %3314 = vadd.xlane.f32.xlu1 %v3311_v31  ;;  %v7607_v31 = vld [vmem:[#allocation15 + $0xc] ss:$48 sps:$4 sm:$0xff]  }
 0xe61   : > { %4295 = vmatprep.subr.bf16.mxu0 %v7607_v31 }
 0xeeb   : > { %v3313_v40 = vpop.xlane.xlu0 %3312 }
 0xeec   : > { %v3316_v41 = vmul.f32 0.015625, %v3313_v40 }
 0xeed   : > { %v3315_v42 = vpop.xlane.xlu1 %3314 }
 0xeee   : > { %v3318_v45 = vadd.f32 1e-05, %v3316_v41  ;;  %v3317_v46 = vmul.f32 0.015625, %v3315_v42  ;;  %v7616_v42 = vld [vmem:[#allocation15 + $0xc4] ss:$48 sps:$4 sm:$0xff]  }
 0xef0   : > { %7826 = vrsqrt.f32 %v3318_v45  ;;  %v3319_v49 = vadd.f32 1e-05, %v3317_v46  ;;  %v7619_v45 = vld [vmem:[#allocation15 + $0xcc] ss:$48 sps:$4 sm:$0xff]   ;;  %v7614_v46 = vld [vmem:[#allocation15 + $0xc0] ss:$48 sps:$4 sm:$0xff]  }
 0xef2   : > { %7828 = vrsqrt.f32 %v3319_v49  ;;  %v7617_v49 = vld [vmem:[#allocation15 + $0xc8] ss:$48 sps:$4 sm:$0xff]  }
 0xefa   : > { %v7827_v59 = vpop.eup %7826 }
 0xefb   : > { %v3322_v2 = vmul.f32 %v7827_v59, %v3308_v30  ;;  %v7602_v30 = vld [vmem:[#allocation15] ss:$48 sps:$4 sm:$0xff]   ;;  %v7622_v59 = vld [vmem:[#allocation15 + $0x124] ss:$48 sps:$4 sm:$0xff]  }
 0xefc   : > { %v7829_v6 = vpop.eup %7828 }
 0xefd   : > { %v3323_v12 = vmul.f32 %v7829_v6, %v3309_v18  ;;  %v3330_v15 = vmul.f32 %v6440_v56, %v3322_v2  ;;  %v7605_v18 = vld [vmem:[#allocation15 + $0x8] ss:$48 sps:$4 sm:$0xff]   ;;  %v7620_v2 = vld [vmem:[#allocation15 + $0x120] ss:$48 sps:$4 sm:$0xff]  }
 0xefe   : > { %v7623_v6 = vld [vmem:[#allocation15 + $0x128] ss:$48 sps:$4 sm:$0xff]  }
 0xeff   : > { %v3331_v16 = vmul.f32 %v6440_v56, %v3323_v12  ;;  %v3338_v17 = vadd.f32 %v6441_v52, %v3330_v15  ;;  %v7625_v56 = vld [vmem:[#allocation15 + $0x12c] ss:$48 sps:$4 sm:$0xff]   ;;  %v7628_v12 = vld [vmem:[#allocation15 + $0x184] ss:$48 sps:$4 sm:$0xff]  }
 0xf00   : > { %v7631_v15 = vld [vmem:[#allocation15 + $0x18c] ss:$48 sps:$4 sm:$0xff]  }
 0xf01   : > { %v3339_v21 = vadd.f32 %v6441_v52, %v3331_v16  ;;  %v7626_v52 = vld [vmem:[#allocation15 + $0x180] ss:$48 sps:$4 sm:$0xff]   ;;  %v7629_v16 = vld [vmem:[#allocation15 + $0x188] ss:$48 sps:$4 sm:$0xff]  }
 0xf03   : > { %v3340_v13 = vpack.c.bf16 %v3339_v21, %v3338_v17  ;;  %v7634_v17 = vld [vmem:[#allocation15 + $0x1e4] ss:$48 sps:$4 sm:$0xff]   ;;  %v7637_v21 = vld [vmem:[#allocation15 + $0x1ec] ss:$48 sps:$4 sm:$0xff]  }
 0xf05   : > { %7026 = vmatmul.mubr.bf16.vlgmr.msra.gmra.mrb[72].mxu1 %v3340_v13  ;;  %v7632_v13 = vld [vmem:[#allocation15 + $0x1e0] ss:$48 sps:$4 sm:$0xff]  }
 0xf06   : > { %4284 = vmatprep.mubr.bf16.mxu1 %v8264_v44  ;;  %4253 = vmatpush1.bf16.msra.mxu1 %v7602_v30 }
 0xf07   : > { %4254 = vmatprep.subr.bf16.mxu1 %v7610_v58  ;;  %v6461_v58 = vld [vmem:[%s9472_s15] ss:$0 sm:$0xff] }
 0xf0a   : > { %4255 = vmatpush1.bf16.msra.mxu1 %v7608_v48 }
 0xf0b   : > { %4256 = vmatprep.subr.bf16.mxu1 %v7616_v42  ;;  %v7665_v42 = vld [vmem:[#allocation15 + $0xd8] ss:$48 sps:$4 sm:$0xff]  }
 0xf0e   : > { %4257 = vmatpush1.bf16.msra.mxu1 %v7614_v46  ;;  %v7673_v46 = vld [vmem:[#allocation15 + $0x13c] ss:$48 sps:$4 sm:$0xff]  }
 0xf0f   : > { %4258 = vmatprep.subr.bf16.mxu1 %v7622_v59  ;;  %v7671_v59 = vld [vmem:[#allocation15 + $0x138] ss:$48 sps:$4 sm:$0xff]  }
 0xf12   : > { %4259 = vmatpush1.bf16.msra.mxu1 %v7620_v2  ;;  %v7679_v2 = vld [vmem:[#allocation15 + $0x19c] ss:$48 sps:$4 sm:$0xff]  }
 0xf13   : > { %4260 = vmatprep.subr.bf16.mxu1 %v7628_v12  ;;  %v7677_v12 = vld [vmem:[#allocation15 + $0x198] ss:$48 sps:$4 sm:$0xff]  }
 0xf16   : > { %4261 = vmatpush1.bf16.msra.mxu1 %v7626_v52  ;;  %v7685_v52 = vld [vmem:[#allocation15 + $0x1fc] ss:$48 sps:$4 sm:$0xff]  }
 0xf17   : > { %4262 = vmatprep.subr.bf16.mxu1 %v7634_v17  ;;  %v7683_v17 = vld [vmem:[#allocation15 + $0x1f8] ss:$48 sps:$4 sm:$0xff]  }
 0xf1a   : > { %4263 = vmatpush1.bf16.msra.mxu1 %v7632_v13  ;;  %v7691_v13 = vld [vmem:[#allocation15 + $0x25c] ss:$48 sps:$4 sm:$0xff]  }
 0xf1b   : > { %4264 = vmatprep.subr.bf16.mxu1 %v7640_v1  ;;  %v7689_v1 = vld [vmem:[#allocation15 + $0x258] ss:$48 sps:$4 sm:$0xff]  }
 0xfd8   : > { %v3446_v25 = vpop.f32.mrb[72].mxu1 }
 0xfd9   : > { %v3447_v33 = vadd.f32 %v6442_v7, %v3446_v25  ;;  %v7027_v47 = vpop.f32.mrb[73].mxu1  ;;  %v7638_v25 = vld [vmem:[#allocation15 + $0x240] ss:$48 sps:$4 sm:$0xff]  }
 0xfda   : > { %v3449_v53 = vpop.f32.mrb[74].mxu1  ;;  %4265 = vmatpush1.bf16.msra.mxu1 %v7638_v25  ;;  %v7646_v47 = vld [vmem:[#allocation15 + $0x2a4] ss:$48 sps:$4 sm:$0xff]   ;;  %v7697_v25 = vld [vmem:[#allocation15 + $0x2bc] ss:$48 sps:$4 sm:$0xff]  }
 0xfdb   : > { %v3450_v24 = vadd.f32 %v6442_v7, %v3449_v53  ;;  %v7028_v27 = vpop.f32.mrb[75].mxu1  ;;  %v3453_v20 = vmax.f32 %v3447_v33, 0.0  ;;  %v7643_v7 = vld [vmem:[#allocation15 + $0x24c] ss:$48 sps:$4 sm:$0xff]   ;;  %v7641_v33 = vld [vmem:[#allocation15 + $0x248] ss:$48 sps:$4 sm:$0xff]   ;;  %4266 = vmatprep.subr.bf16.mxu1 %v7646_v47 }
 0xfdc   : > { %v7649_v53 = vld [vmem:[#allocation15 + $0x2ac] ss:$48 sps:$4 sm:$0xff]   ;;  %v7647_v27 = vld [vmem:[#allocation15 + $0x2a8] ss:$48 sps:$4 sm:$0xff]  }
 0xfdd   : > { %v3454_v51 = vmax.f32 %v3450_v24, 0.0  ;;  %v7644_v24 = vld [vmem:[#allocation15 + $0x2a0] ss:$48 sps:$4 sm:$0xff]   ;;  %v7695_v47 = vld [vmem:[#allocation15 + $0x2b8] ss:$48 sps:$4 sm:$0xff]  }
 0xfde   : > { %4267 = vmatpush1.bf16.msra.mxu1 %v7644_v24  ;;  %v7703_v24 = vld [vmem:[#allocation15 + $0x2c] ss:$48 sps:$4 sm:$0xff]  }
 0xfdf   : > { %v3455_v57 = vpack.c.bf16 %v3454_v51, %v3453_v20  ;;  %v7652_v20 = vld [vmem:[#allocation15 + $0x14] ss:$48 sps:$4 sm:$0xff]   ;;  %v7655_v51 = vld [vmem:[#allocation15 + $0x1c] ss:$48 sps:$4 sm:$0xff]  }
 0xfe0   : > { %4338 = vmatprep.subr.bf16.mxu1 %v7652_v20  ;;  %v7701_v20 = vld [vmem:[#allocation15 + $0x28] ss:$48 sps:$4 sm:$0xff]  }
 0xfe1   : > { %7046 = vmatmul.mubr.bf16.vlgmr.msra.gmra.mrb[36].mxu0 %v3455_v57 }
 0xfe2   : > { %4327 = vmatprep.mubr.bf16.mxu0 %v8264_v44  ;;  %4296 = vmatpush1.bf16.msra.mxu0 %v7605_v18 }
 0xfe3   : > { %4297 = vmatprep.subr.bf16.mxu0 %v7613_v60 }
 0xfe6   : > { %4298 = vmatpush1.bf16.msra.mxu0 %v7611_v32 }
 0xfe7   : > { %4299 = vmatprep.subr.bf16.mxu0 %v7619_v45  ;;  %v7670_v45 = vld [vmem:[#allocation15 + $0x134] ss:$48 sps:$4 sm:$0xff]  }
 0xfea   : > { %4300 = vmatpush1.bf16.msra.mxu0 %v7617_v49  ;;  %v7668_v49 = vld [vmem:[#allocation15 + $0x130] ss:$48 sps:$4 sm:$0xff]  }
 0xfeb   : > { %4301 = vmatprep.subr.bf16.mxu0 %v7625_v56  ;;  %v7676_v56 = vld [vmem:[#allocation15 + $0x194] ss:$48 sps:$4 sm:$0xff]  }
 0xfee   : > { %4302 = vmatpush1.bf16.msra.mxu0 %v7623_v6  ;;  %v7674_v6 = vld [vmem:[#allocation15 + $0x190] ss:$48 sps:$4 sm:$0xff]  }
 0xfef   : > { %4303 = vmatprep.subr.bf16.mxu0 %v7631_v15  ;;  %v7682_v15 = vld [vmem:[#allocation15 + $0x1f4] ss:$48 sps:$4 sm:$0xff]  }
 0xff2   : > { %4304 = vmatpush1.bf16.msra.mxu0 %v7629_v16  ;;  %v7680_v16 = vld [vmem:[#allocation15 + $0x1f0] ss:$48 sps:$4 sm:$0xff]  }
 0xff3   : > { %4305 = vmatprep.subr.bf16.mxu0 %v7637_v21  ;;  %v7688_v21 = vld [vmem:[#allocation15 + $0x254] ss:$48 sps:$4 sm:$0xff]  }
 0xff6   : > { %4306 = vmatpush1.bf16.msra.mxu0 %v7635_v23  ;;  %v7686_v23 = vld [vmem:[#allocation15 + $0x250] ss:$48 sps:$4 sm:$0xff]  }
 0xff7   : > { %4307 = vmatprep.subr.bf16.mxu0 %v7643_v7  ;;  %v7694_v7 = vld [vmem:[#allocation15 + $0x2b4] ss:$48 sps:$4 sm:$0xff]  }
 0xffa   : > { %4308 = vmatpush1.bf16.msra.mxu0 %v7641_v33  ;;  %v7692_v33 = vld [vmem:[#allocation15 + $0x2b0] ss:$48 sps:$4 sm:$0xff]  }
 0xffb   : > { %4309 = vmatprep.subr.bf16.mxu0 %v7649_v53  ;;  %v7700_v53 = vld [vmem:[#allocation15 + $0x24] ss:$48 sps:$4 sm:$0xff]  }
 0xffe   : > { %4310 = vmatpush1.bf16.msra.mxu0 %v7647_v27  ;;  %v7698_v27 = vld [vmem:[#allocation15 + $0x20] ss:$48 sps:$4 sm:$0xff]  }
 0xfff   : > { %4381 = vmatprep.subr.bf16.mxu0 %v7655_v51  ;;  %v7706_v51 = vld [vmem:[#allocation15 + $0x84] ss:$48 sps:$4 sm:$0xff]  }
0x10b4   : > { %v3561_v19 = vpop.f32.mrb[36].mxu0 }
0x10b5   : > { %v3562_v55 = vadd.f32 %v6451_v63, %v3561_v19  ;;  %v7047_v28 = vpop.f32.mrb[37].mxu0 }
0x10b6   : > { %v3564_v5 = vpop.f32.mrb[38].mxu0 }
0x10b7   : > { %v3565_v26 = vadd.f32 %v6451_v63, %v3564_v5  ;;  %3571 = vadd.xlane.f32.xlu0 %v3562_v55  ;;  %v7048_v29 = vpop.f32.mrb[39].mxu0 }
0x10b8   : > { %v6460_v29 = vld [vmem:[%s9471_s14] ss:$0 sm:$0xff] }
0x10b9   : > { %3573 = vadd.xlane.f32.xlu1 %v3565_v26 }
0x1144   : > { %v3572_v8 = vpop.xlane.xlu0 %3571 }
0x1145   : > { %v3575_v36 = vmul.f32 0.03125, %v3572_v8  ;;  %v7650_v8 = vld [vmem:[#allocation15 + $0x10] ss:$48 sps:$4 sm:$0xff]  }
0x1146   : > { %v3574_v37 = vpop.xlane.xlu1 %3573 }
0x1147   : > { %v3577_v38 = vsub.f32 %v3562_v55, %v3575_v36  ;;  %v3576_v43 = vmul.f32 0.03125, %v3574_v37  ;;  %v7653_v36 = vld [vmem:[#allocation15 + $0x18] ss:$48 sps:$4 sm:$0xff]  }
0x1149   : > { %v3578_v39 = vsub.f32 %v3565_v26, %v3576_v43  ;;  %v9127_v4 = vsel %vm3570_vm4, %v3577_v38, 0.0  ;;  %v7658_v38 = vld [vmem:[#allocation15 + $0x74] ss:$48 sps:$4 sm:$0xff]   ;;  %v7661_v43 = vld [vmem:[#allocation15 + $0x7c] ss:$48 sps:$4 sm:$0xff]  }
0x114a   : > { %v3581_v3 = vmul.f32 %v9127_v4, %v9127_v4 }
0x114b   : > { %v9133_v40 = vsel %vm3570_vm4, %v3578_v39, 0.0  ;;  %v7656_v39 = vld [vmem:[#allocation15 + $0x70] ss:$48 sps:$4 sm:$0xff]  }
0x114c   : > { %3583 = vadd.xlane.f32.xlu0 %v3581_v3  ;;  %v3582_v41 = vmul.f32 %v9133_v40, %v9133_v40  ;;  %v7664_v3 = vld [vmem:[#allocation15 + $0xd4] ss:$48 sps:$4 sm:$0xff]  }
0x114e   : > { %3585 = vadd.xlane.f32.xlu1 %v3582_v41  ;;  %v7662_v41 = vld [vmem:[#allocation15 + $0xd0] ss:$48 sps:$4 sm:$0xff]  }
0x11d9   : > { %v3584_v57 = vpop.xlane.xlu0 %3583 }
0x11da   : > { %v3587_v63 = vmul.f32 0.03125, %v3584_v57  ;;  %v7709_v57 = vld [vmem:[#allocation15 + $0x8c] ss:$48 sps:$4 sm:$0xff]  }
0x11db   : > { %v3586_v19 = vpop.xlane.xlu1 %3585 }
0x11dc   : > { %v3589_v55 = vadd.f32 1e-05, %v3587_v63  ;;  %v3588_v28 = vmul.f32 0.03125, %v3586_v19  ;;  %v7704_v63 = vld [vmem:[#allocation15 + $0x80] ss:$48 sps:$4 sm:$0xff]  }
0x11dd   : > { %v7707_v19 = vld [vmem:[#allocation15 + $0x88] ss:$48 sps:$4 sm:$0xff]  }
0x11de   : > { %7830 = vrsqrt.f32 %v3589_v55  ;;  %v3590_v5 = vadd.f32 1e-05, %v3588_v28  ;;  %v7712_v55 = vld [vmem:[#allocation15 + $0xe4] ss:$48 sps:$4 sm:$0xff]   ;;  %v7715_v28 = vld [vmem:[#allocation15 + $0xec] ss:$48 sps:$4 sm:$0xff]  }
0x11e0   : > { %7832 = vrsqrt.f32 %v3590_v5  ;;  %v7710_v5 = vld [vmem:[#allocation15 + $0xe0] ss:$48 sps:$4 sm:$0xff]  }
0x11e8   : > { %v7831_v26 = vpop.eup %7830 }
0x11e9   : > { %v3593_v30 = vmul.f32 %v7831_v26, %v9127_v4  ;;  %v7659_v4 = vld [vmem:[#allocation15 + $0x78] ss:$48 sps:$4 sm:$0xff]  }
0x11ea   : > { %v7833_v9 = vpop.eup %7832  ;;  %v7713_v26 = vld [vmem:[#allocation15 + $0xe8] ss:$48 sps:$4 sm:$0xff]  }
0x11eb   : > { %v3601_v18 = vmul.f32 %v6460_v29, %v3593_v30  ;;  %v3594_v31 = vmul.f32 %v7833_v9, %v9133_v40  ;;  %v7667_v40 = vld [vmem:[#allocation15 + $0xdc] ss:$48 sps:$4 sm:$0xff]   ;;  %v7716_v9 = vld [vmem:[#allocation15 + $0x140] ss:$48 sps:$4 sm:$0xff]  }
0x11ec   : > { %v7721_v30 = vld [vmem:[#allocation15 + $0x14c] ss:$48 sps:$4 sm:$0xff]  }
0x11ed   : > { %v3602_v60 = vmul.f32 %v6460_v29, %v3594_v31  ;;  %v9145_v48 = vadd.f32 %v6461_v58, %v3601_v18  ;;  %v7718_v29 = vld [vmem:[#allocation15 + $0x144] ss:$48 sps:$4 sm:$0xff]   ;;  %v7719_v18 = vld [vmem:[#allocation15 + $0x148] ss:$48 sps:$4 sm:$0xff]  }
0x11ee   : > { %v7724_v31 = vld [vmem:[#allocation15 + $0x1a4] ss:$48 sps:$4 sm:$0xff]  }
0x11ef   : > { %v9147_v32 = vadd.f32 %v6461_v58, %v3602_v60  ;;  %v7727_v58 = vld [vmem:[#allocation15 + $0x1ac] ss:$48 sps:$4 sm:$0xff]   ;;  %v7722_v60 = vld [vmem:[#allocation15 + $0x1a0] ss:$48 sps:$4 sm:$0xff]  }
0x11f1   : > { %v9151_v37 = vpack.c.bf16 %v9147_v32, %v9145_v48 }
0x11f3   : > { %4285 = vmatmul.mubr.bf16.vlgmr.msra.gmra.mrb[76].mxu1 %v9151_v37  ;;  %4328 = vmatmul.mubr.bf16.vlgmr.msra.gmra.mrb[40].mxu0 %v9151_v37 }
0x11f4   : > { %4339 = vmatpush1.bf16.msra.mxu1 %v7650_v8  ;;  %4382 = vmatpush1.bf16.msra.mxu0 %v7653_v36  ;;  %v7730_v8 = vld [vmem:[#allocation15 + $0x204] ss:$48 sps:$4 sm:$0xff]   ;;  %v7733_v36 = vld [vmem:[#allocation15 + $0x20c] ss:$48 sps:$4 sm:$0xff]  }
0x11f5   : > { %4340 = vmatprep.subr.bf16.mxu1 %v7658_v38  ;;  %4383 = vmatprep.subr.bf16.mxu0 %v7661_v43  ;;  %v7728_v38 = vld [vmem:[#allocation15 + $0x200] ss:$48 sps:$4 sm:$0xff]   ;;  %v7731_v43 = vld [vmem:[#allocation15 + $0x208] ss:$48 sps:$4 sm:$0xff]  }
0x11f6   : > { %4370 = vmatprep.mubr.bf16.mxu1 %v8264_v44  ;;  %4413 = vmatprep.mubr.bf16.mxu0 %v8264_v44 }
0x11f8   : > { %4341 = vmatpush1.bf16.msra.mxu1 %v7656_v39  ;;  %4384 = vmatpush1.bf16.msra.mxu0 %v7659_v4  ;;  %v7736_v39 = vld [vmem:[#allocation15 + $0x264] ss:$48 sps:$4 sm:$0xff]   ;;  %v7739_v4 = vld [vmem:[#allocation15 + $0x26c] ss:$48 sps:$4 sm:$0xff]  }
0x11f9   : > { %4342 = vmatprep.subr.bf16.mxu1 %v7664_v3  ;;  %4385 = vmatprep.subr.bf16.mxu0 %v7667_v40  ;;  %v7734_v3 = vld [vmem:[#allocation15 + $0x260] ss:$48 sps:$4 sm:$0xff]   ;;  %v7737_v40 = vld [vmem:[#allocation15 + $0x268] ss:$48 sps:$4 sm:$0xff]  }
0x11fc   : > { %4343 = vmatpush1.bf16.msra.mxu1 %v7662_v41  ;;  %4386 = vmatpush1.bf16.msra.mxu0 %v7665_v42  ;;  %v7742_v41 = vld [vmem:[#allocation15 + $0x2c4] ss:$48 sps:$4 sm:$0xff]   ;;  %v7745_v42 = vld [vmem:[#allocation15 + $0x2cc] ss:$48 sps:$4 sm:$0xff]  }
0x11fd   : > { %4344 = vmatprep.subr.bf16.mxu1 %v7670_v45  ;;  %4387 = vmatprep.subr.bf16.mxu0 %v7673_v46  ;;  %v7740_v45 = vld [vmem:[#allocation15 + $0x2c0] ss:$48 sps:$4 sm:$0xff]   ;;  %v7743_v46 = vld [vmem:[#allocation15 + $0x2c8] ss:$48 sps:$4 sm:$0xff]  }
0x1200   : > { %4345 = vmatpush1.bf16.msra.mxu1 %v7668_v49  ;;  %4388 = vmatpush1.bf16.msra.mxu0 %v7671_v59  ;;  %v9172_v49 = vld [vmem:[%s9474_s17] sm:$0xff] }
0x1201   : > { %4346 = vmatprep.subr.bf16.mxu1 %v7676_v56  ;;  %4389 = vmatprep.subr.bf16.mxu0 %v7679_v2  ;;  %v9176_v59 = vrot.slane %v9172_v49, %v8826_v62 }
0x1204   : > { %4347 = vmatpush1.bf16.msra.mxu1 %v7674_v6  ;;  %4390 = vmatpush1.bf16.msra.mxu0 %v7677_v12 }
0x1205   : > { %4348 = vmatprep.subr.bf16.mxu1 %v7682_v15  ;;  %4391 = vmatprep.subr.bf16.mxu0 %v7685_v52  ;;  %v3719_v15 = vrot.slane %v9172_v49, %v8882_v34 }
0x1208   : > { %4349 = vmatpush1.bf16.msra.mxu1 %v7680_v16  ;;  %4392 = vmatpush1.bf16.msra.mxu0 %v7683_v17 }
0x1209   : > { %4350 = vmatprep.subr.bf16.mxu1 %v7688_v21  ;;  %4393 = vmatprep.subr.bf16.mxu0 %v7691_v13 }
0x120c   : > { %4351 = vmatpush1.bf16.msra.mxu1 %v7686_v23  ;;  %4394 = vmatpush1.bf16.msra.mxu0 %v7689_v1  ;;  %v3731_v23 = vrot.slane %v9172_v49, %v1258_v10  ;;  %v9197_v1 = vrot.slane %v9172_v49, %v1266_v11  ;;  %v3715_v10 = vrot.slane %v9172_v49, %v8858_v14 }
0x120d   : > { %4352 = vmatprep.subr.bf16.mxu1 %v7694_v7  ;;  %4395 = vmatprep.subr.bf16.mxu0 %v7697_v25  ;;  %v3735_v7 = vrot.slane %v9172_v49, %v1262_v50 }
0x1210   : > { %4353 = vmatpush1.bf16.msra.mxu1 %v7692_v33  ;;  %4396 = vmatpush1.bf16.msra.mxu0 %v7695_v47 }
0x1211   : > { %4424 = vmatprep.subr.bf16.mxu1 %v7700_v53  ;;  %4467 = vmatprep.subr.bf16.mxu0 %v7703_v24 }
0x1213   : > { %4371 = vmatmul.mubr.bf16.vlgmr.msra.gmra.mrb[80].mxu1 %v9151_v37  ;;  %4414 = vmatmul.mubr.bf16.vlgmr.msra.gmra.mrb[44].mxu0 %v9151_v37 }
0x1214   : > { %4425 = vmatpush1.bf16.msra.mxu1 %v7698_v27  ;;  %4468 = vmatpush1.bf16.msra.mxu0 %v7701_v20 }
0x1215   : > { %4426 = vmatprep.subr.bf16.mxu1 %v7706_v51  ;;  %4469 = vmatprep.subr.bf16.mxu0 %v7709_v57 }
0x1216   : > { %4456 = vmatprep.mubr.bf16.mxu1 %v8264_v44  ;;  %4499 = vmatprep.mubr.bf16.mxu0 %v8264_v44  ;;  %v7725_v44 = vld [vmem:[#allocation15 + $0x1a8] ss:$48 sps:$4 sm:$0xff]  }
0x1218   : > { %4427 = vmatpush1.bf16.msra.mxu1 %v7704_v63  ;;  %4470 = vmatpush1.bf16.msra.mxu0 %v7707_v19 }
0x1219   : > { %4428 = vmatprep.subr.bf16.mxu1 %v7712_v55  ;;  %4471 = vmatprep.subr.bf16.mxu0 %v7715_v28 }
0x121c   : > { %4429 = vmatpush1.bf16.msra.mxu1 %v7710_v5  ;;  %4472 = vmatpush1.bf16.msra.mxu0 %v7713_v26 }
0x121d   : > { %4430 = vmatprep.subr.bf16.mxu1 %v7718_v29  ;;  %4473 = vmatprep.subr.bf16.mxu0 %v7721_v30 }
0x1220   : > { %4431 = vmatpush1.bf16.msra.mxu1 %v7716_v9  ;;  %4474 = vmatpush1.bf16.msra.mxu0 %v7719_v18 }
0x1221   : > { %4432 = vmatprep.subr.bf16.mxu1 %v7724_v31  ;;  %4475 = vmatprep.subr.bf16.mxu0 %v7727_v58  ;;  %v3709_v58 = vld [vmem:[%s9474_s17 + $0x8] sm:$0xf] }
0x1224   : > { %4433 = vmatpush1.bf16.msra.mxu1 %v7722_v60  ;;  %4476 = vmatpush1.bf16.msra.mxu0 %v7725_v44  ;;  %v3747_v60 = vrot.slane %v3709_v58, %v8858_v14  ;;  %v3755_v44 = vrot.slane %v3709_v58, %v8826_v62 }
0x1225   : > { %4434 = vmatprep.subr.bf16.mxu1 %v7730_v8  ;;  %4477 = vmatprep.subr.bf16.mxu0 %v7733_v36  ;;  %v3751_v8 = vrot.slane %v3709_v58, %v8882_v34  ;;  %v3759_v36 = vrot.slane %v3709_v58, %v8885_v35 }
0x1228   : > { %4435 = vmatpush1.bf16.msra.mxu1 %v7728_v38  ;;  %4478 = vmatpush1.bf16.msra.mxu0 %v7731_v43 }
0x1229   : > { %4436 = vmatprep.subr.bf16.mxu1 %v7736_v39  ;;  %4479 = vmatprep.subr.bf16.mxu0 %v7739_v4 }
0x122c   : > { %4437 = vmatpush1.bf16.msra.mxu1 %v7734_v3  ;;  %4480 = vmatpush1.bf16.msra.mxu0 %v7737_v40 }
0x122d   : > { %4438 = vmatprep.subr.bf16.mxu1 %v7742_v41  ;;  %4481 = vmatprep.subr.bf16.mxu0 %v7745_v42 }
0x1230   : > { %4439 = vmatpush1.bf16.msra.mxu1 %v7740_v45  ;;  %4482 = vmatpush1.bf16.msra.mxu0 %v7743_v46 }
0x1231   : > { %7049 = vmatprep.subr.bf16.mxu1 %v8262_v0  ;;  %7073 = vmatprep.subr.bf16.mxu0 %v8262_v0 }
0x1233   : > { %4457 = vmatmul.mubr.bf16.vlgmr.msra.gmra.mrb[84].mxu1 %v9151_v37  ;;  %4500 = vmatmul.mubr.bf16.vlgmr.msra.gmra.mrb[48].mxu0 %v9151_v37 }
0x1234   : > { %7051 = vmatprep.mubr.msk.bf16.mxu1 %vm8263_vm0, %v8262_v0  ;;  %7075 = vmatprep.mubr.msk.bf16.mxu0 %vm8263_vm0, %v8262_v0 }
0x12c6   : > { %v4286_v56 = vpop.f32.mrb[76].mxu1  ;;  %v4329_v2 = vpop.f32.mrb[40].mxu0 }
0x12c7   : > { %v9179_v6 = vadd.f32 %v4329_v2, %v9176_v59  ;;  %v4288_v37 = vpop.f32.mrb[77].mxu1  ;;  %v9181_v12 = vpop.f32.mrb[41].mxu0  ;;  %v4287_v28 = vadd.f32 %v4286_v56, %v3715_v10 }
0x12c8   : > { %v4290_v52 = vpop.f32.mrb[78].mxu1  ;;  %v9185_v16 = vpop.f32.mrb[42].mxu0  ;;  %v4289_v5 = vadd.f32 %v4288_v37, %v3719_v15 }
0x12c9   : > { %v4292_v17 = vpop.f32.mrb[79].mxu1  ;;  %v9187_v21 = vpop.f32.mrb[43].mxu0  ;;  %v4510_v29 = vpack.c.bf16 %v4287_v28, %v4287_v28  ;;  %v4291_v18 = vadd.f32 %v4290_v52, %v3715_v10 }
0x12ca   : > { %v9189_v13 = vadd.f32 %v4292_v17, %v3719_v15  ;;  %v4731_v30 = vpack.c.bf16 %v4289_v5, %v4289_v5 }
0x12cb   : > { %v4511_v31 = vpack.c.bf16 %v4291_v18, %v4291_v18 }
0x12e6   : > { %v4372_v25 = vpop.f32.mrb[80].mxu1  ;;  %v4415_v33 = vpop.f32.mrb[44].mxu0 }
0x12e7   : > { %v4373_v47 = vadd.f32 %v4372_v25, %v3731_v23  ;;  %v9203_v53 = vadd.f32 %v4415_v33, %v9197_v1  ;;  %v4374_v24 = vpop.f32.mrb[81].mxu1  ;;  %v9205_v27 = vpop.f32.mrb[45].mxu0 }
0x12e8   : > { %v4375_v20 = vadd.f32 %v4374_v24, %v3735_v7  ;;  %v4376_v51 = vpop.f32.mrb[82].mxu1  ;;  %v9209_v11 = vpop.f32.mrb[46].mxu0 }
0x12e9   : > { %v4512_v57 = vpack.c.bf16 %v4373_v47, %v4373_v47  ;;  %v4378_v63 = vpop.f32.mrb[83].mxu1  ;;  %v9211_v19 = vpop.f32.mrb[47].mxu0  ;;  %v4377_v26 = vadd.f32 %v4376_v51, %v3731_v23 }
0x12ea   : > { %v4733_v50 = vpack.c.bf16 %v4375_v20, %v4375_v20  ;;  %v9213_v55 = vadd.f32 %v4378_v63, %v3735_v7 }
0x12eb   : > { %7050 = vmatpush3.bf16.xpose.msra.mxu1 %v4512_v57  ;;  %v4513_v9 = vpack.c.bf16 %v4377_v26, %v4377_v26 }
0x12ec   : > { %7074 = vmatpush3.bf16.xpose.msra.mxu0 %v4733_v50  ;;  %7055 = vmatprep.subr.bf16.mxu1 %v8262_v0 }
0x12ed   : > { %7085 = vmatprep.subr.bf16.mxu0 %v8262_v0 }
0x12f2   : > { %7052 = vmatmul.mubr.bf16.vlgmr.msra.gmra.mrb[88].mxu1 %v4510_v29 }
0x12f3   : > { %7056 = vmatpush3.bf16.xpose.msra.mxu1 %v4513_v9  ;;  %7076 = vmatmul.mubr.bf16.vlgmr.msra.gmra.mrb[52].mxu0 %v4731_v30 }
0x12f4   : > { %7057 = vmatprep.mubr.msk.bf16.mxu1 %vm8263_vm0, %v8262_v0  ;;  %7061 = vmatprep.subr.bf16.mxu1 %v8262_v0 }
0x12f5   : > { %7087 = vmatprep.mubr.msk.bf16.mxu0 %vm8263_vm0, %v8262_v0 }
0x12fa   : > { %7058 = vmatmul.mubr.bf16.vlgmr.msra.gmra.mrb[92].mxu1 %v4511_v31 }
0x12fb   : > { %7063 = vmatprep.mubr.msk.bf16.mxu1 %vm8263_vm0, %v8262_v0 }
0x1306   : > { %v4458_v38 = vpop.f32.mrb[84].mxu1  ;;  %v4501_v43 = vpop.f32.mrb[48].mxu0 }
0x1307   : > { %v4459_v39 = vadd.f32 %v4458_v38, %v3747_v60  ;;  %v9231_v4 = vadd.f32 %v4501_v43, %v3755_v44  ;;  %v4460_v3 = vpop.f32.mrb[85].mxu1  ;;  %v4503_v40 = vpop.f32.mrb[49].mxu0 }
0x1308   : > { %v4461_v41 = vadd.f32 %v4460_v3, %v3751_v8  ;;  %v9233_v42 = vadd.f32 %v4503_v40, %v3759_v36  ;;  %v4462_v45 = vpop.f32.mrb[86].mxu1  ;;  %v4505_v46 = vpop.f32.mrb[50].mxu0 }
0x1309   : > { %v4514_v56 = vpack.c.bf16 %v4459_v39, %v4459_v39  ;;  %v4463_v14 = vadd.f32 %v4462_v45, %v3747_v60  ;;  %v9235_v2 = vadd.f32 %v4505_v46, %v3755_v44  ;;  %v4464_v62 = vpop.f32.mrb[87].mxu1  ;;  %v4507_v34 = vpop.f32.mrb[51].mxu0 }
0x130a   : > { %v4735_v37 = vpack.c.bf16 %v4461_v41, %v4461_v41  ;;  %v9237_v15 = vadd.f32 %v4464_v62, %v3751_v8  ;;  %v9239_v52 = vadd.f32 %v4507_v34, %v3759_v36 }
0x130b   : > { %v4626_v17 = vsel %vm2154_vm1, %v4514_v56, 0  ;;  %v4515_v41 = vpack.c.bf16 %v4463_v14, %v4463_v14 }
0x130c   : > { %v4847_v23 = vsel %vm2154_vm1, %v4735_v37, 0  ;;  %7062 = vmatpush3.bf16.msra.mxu1 %v4626_v17  ;;  %v4734_v17 = vpack.c.bf16 %v9213_v55, %v9213_v55  ;;  %v4736_v14 = vpack.c.bf16 %v9237_v15, %v9237_v15 }
0x130d   : > { %7086 = vmatpush3.bf16.msra.mxu0 %v4847_v23  ;;  %7067 = vmatprep.subr.bf16.mxu1 %v8262_v0  ;;  %v4672_v56 = vsel %vm2154_vm1, %v4515_v41, 0  ;;  %v4732_v23 = vpack.c.bf16 %v9189_v13, %v9189_v13  ;;  %v7746_v41 = vld [vmem:[#allocation16] sm:$0xff]  }
0x130e   : > { %7097 = vmatprep.subr.bf16.mxu0 %v8262_v0 }
0x13c5   : > { %v4550_v7 = vpop.f32.mrb[88].mxu1 }
0x13c6   : > { %v4596_v25 = vmul.f32 0.35355338, %v4550_v7  ;;  %v7053_v33 = vpop.f32.mrb[89].mxu1  ;;  %v9245_v47 = vpop.f32.mrb[52].mxu0  ;;  %v4893_v7 = vsel %vm2154_vm1, %v4736_v14, 0  ;;  %v7755_v14 = vld [vmem:[#allocation16 + $0x48] sm:$0xff]  }
0x13c7   : > { %v4553_v24 = vpop.f32.mrb[90].mxu1  ;;  %v7077_v10 = vpop.f32.mrb[53].mxu0 }
0x13c8   : > { %v7054_v20 = vpop.f32.mrb[91].mxu1  ;;  %v4774_v51 = vpop.f32.mrb[54].mxu0  ;;  %v4598_v57 = vsel %vm2126_vm2, %v4596_v25, -inf }
0x13c9   : > { %4599 = vmax.xlane.f32.xlu0 %v4598_v57  ;;  %v7078_v63 = vpop.f32.mrb[55].mxu0 }
0x13cd   : > { %v4590_v50 = vpop.f32.mrb[92].mxu1 }
0x13ce   : > { %v4597_v28 = vmul.f32 0.35355338, %v4590_v50  ;;  %v7059_v5 = vpop.f32.mrb[93].mxu1 }
0x13cf   : > { %v4593_v26 = vpop.f32.mrb[94].mxu1  ;;  %v4817_v5 = vmul.f32 0.35355338, %v9245_v47 }
0x13d0   : > { %v7060_v29 = vpop.f32.mrb[95].mxu1  ;;  %v4601_v30 = vsel %vm2126_vm2, %v4597_v28, -inf }
0x13d1   : > { %4602 = vmax.xlane.f32.xlu1 %v4601_v30  ;;  %v4819_v30 = vsel %vm2126_vm2, %v4817_v5, -inf }
0x1456   : > { %v4600_v9 = vpop.xlane.xlu0 %4599 }
0x1457   : > { %v4604_v18 = vsub.f32 %v4596_v25, %v4600_v9 }
0x1459   : > { %v4606_v31 = vmul.f32 1.442695, %v4604_v18 }
0x145b   : > { %7834 = vpow2.f32 %v4606_v31 }
0x145e   : > { %v4603_v58 = vpop.xlane.xlu1 %4602 }
0x145f   : > { %v4605_v60 = vsub.f32 %v4597_v28, %v4603_v58 }
0x1461   : > { %v4608_v44 = vmul.f32 1.442695, %v4605_v60 }
0x1463   : > { %7836 = vpow2.f32 %v4608_v44 }
0x1465   : > { %v7835_v8 = vpop.eup %7834 }
0x1466   : > { %v4610_v36 = vsel %vm2126_vm2, %v7835_v8, 0.0 }
0x1467   : > { %4611 = vadd.xlane.f32.xlu0 %v4610_v36 }
0x146d   : > { %v7837_v38 = vpop.eup %7836 }
0x146e   : > { %v4613_v43 = vsel %vm2126_vm2, %v7837_v38, 0.0 }
0x146f   : > { %4614 = vadd.xlane.f32.xlu1 %v4613_v43 }
0x14f4   : > { %v4612_v39 = vpop.xlane.xlu0 %4611 }
0x14f5   : > { %7838 = vrcp.f32 %v4612_v39 }
0x14fc   : > { %v4615_v3 = vpop.xlane.xlu1 %4614 }
0x14fd   : > { %7840 = vrcp.f32 %v4615_v3 }
0x14ff   : > { %v7839_v40 = vpop.eup %7838 }
0x1500   : > { %v4618_v45 = vmul.f32 %v7839_v40, %v7835_v8 }
0x1502   : > { %v4620_v46 = vpack.c.bf16 %v4618_v45, %v4618_v45 }
0x1504   : > { %7064 = vmatmul.mubr.msk.bf16.vlgmr.msra.gmra.mrb[96].mxu1 %vm2126_vm2, %v4620_v46 }
0x1505   : > { %7068 = vmatpush3.bf16.msra.mxu1 %v4672_v56  ;;  %7069 = vmatprep.mubr.msk.bf16.mxu1 %vm8263_vm0, %v8262_v0 }
0x1506   : > { %7079 = vmatprep.subr.bf16.mxu1 %v8262_v0 }
0x1507   : > { %v7841_v62 = vpop.eup %7840 }
0x1508   : > { %v4619_v34 = vmul.f32 %v7841_v62, %v7837_v38  ;;  %v7747_v62 = vld [vmem:[#allocation16 + $0x8] sm:$0xff]  }
0x150a   : > { %v4621_v37 = vpack.c.bf16 %v4619_v34, %v4619_v34  ;;  %v7754_v34 = vld [vmem:[#allocation16 + $0x40] sm:$0xff]  }
0x150c   : > { %7070 = vmatmul.mubr.msk.bf16.vlgmr.msra.gmra.mrb[100].mxu1 %vm2126_vm2, %v4621_v37 }
0x150d   : > { %7081 = vmatprep.mubr.msk.bf16.mxu1 %vm8263_vm0, %v8262_v0 }
0x150e   : > { %7080 = vmatpush3.bf16.xpose.msra.mxu1 %v4734_v17  ;;  %v7748_v17 = vld [vmem:[#allocation16 + $0x10] sm:$0xff]  }
0x150f   : > { %7091 = vmatprep.subr.bf16.mxu1 %v8262_v0 }
0x1515   : > { %7082 = vmatmul.mubr.bf16.vlgmr.msra.gmra.mrb[104].mxu1 %v4732_v23  ;;  %v7749_v23 = vld [vmem:[#allocation16 + $0x18] sm:$0xff]  }
0x1516   : > { %7092 = vmatpush3.bf16.msra.mxu1 %v4893_v7  ;;  %7093 = vmatprep.mubr.msk.bf16.mxu1 %vm8263_vm0, %v8262_v0  ;;  %v7756_v7 = vld [vmem:[#allocation16 + $0x50] sm:$0xff]  }
0x1517   : > { %7117 = vmatprep.subr.bf16.mxu1 %v8262_v0 }
0x15d7   : > { %v9270_v55 = vpop.f32.mrb[96].mxu1 }
0x15d8   : > { %v7065_v25 = vpop.f32.mrb[97].mxu1 }
0x15d9   : > { %v4665_v33 = vpop.f32.mrb[98].mxu1  ;;  %v7750_v25 = vld [vmem:[#allocation16 + $0x20] sm:$0xff]  }
0x15da   : > { %v7066_v24 = vpop.f32.mrb[99].mxu1  ;;  %v7757_v33 = vld [vmem:[#allocation16 + $0x58] sm:$0xff]  }
0x15db   : > { %v7751_v24 = vld [vmem:[#allocation16 + $0x28] sm:$0xff]  }
0x15df   : > { %v9272_v10 = vpop.f32.mrb[100].mxu1 }
0x15e0   : > { %v4714_v15 = vpack.c.bf16 %v9272_v10, %v9270_v55  ;;  %v7071_v13 = vpop.f32.mrb[101].mxu1 }
0x15e1   : > { %v4711_v20 = vpop.f32.mrb[102].mxu1  ;;  %v7758_v13 = vld [vmem:[#allocation16 + $0x60] sm:$0xff]  }
0x15e2   : > { %v7072_v51 = vpop.f32.mrb[103].mxu1  ;;  %v7752_v20 = vld [vmem:[#allocation16 + $0x30] sm:$0xff]  }
0x15e3   : > { %v7759_v51 = vld [vmem:[#allocation16 + $0x68] sm:$0xff]  }
0x15e8   : > { %v4811_v57 = vpop.f32.mrb[104].mxu1 }
0x15e9   : > { %v4818_v63 = vmul.f32 0.35355338, %v4811_v57  ;;  %v7083_v50 = vpop.f32.mrb[105].mxu1  ;;  %v7753_v57 = vld [vmem:[#allocation16 + $0x38] sm:$0xff]  }
0x15ea   : > { %v4814_v28 = vpop.f32.mrb[106].mxu1  ;;  %v7761_v50 = vld [vmem:[#allocation16 + $0x78] sm:$0xff]  }
0x15eb   : > { %v7084_v26 = vpop.f32.mrb[107].mxu1  ;;  %v4822_v29 = vsel %vm2126_vm2, %v4818_v63, -inf  ;;  %v4420_v28 = vadd.f32 %v9209_v11, %v9197_v1  ;;  %v5135_v1 = vpack.c.bf16 %v9235_v2, %v9235_v2  ;;  %v5132_v2 = vpack.c.bf16 %v9203_v53, %v9203_v53 }
0x15ec   : > { %4823 = vmax.xlane.f32.xlu0 %v4822_v29  ;;  %v4334_v26 = vadd.f32 %v9185_v16, %v9176_v59 }
0x15ed   : > { %v5292_v55 = vsel %vm2154_vm1, %v5135_v1, 0 }
0x15ee   : > { %v5131_v11 = vpack.c.bf16 %v4334_v26, %v4334_v26 }
0x15f0   : > { %4820 = vmax.xlane.f32.xlu0 %v4819_v30 }
0x1679   : > { %v4824_v9 = vpop.xlane.xlu0 %4823 }
0x167a   : > { %v4826_v18 = vsub.f32 %v4818_v63, %v4824_v9  ;;  %v7760_v63 = vld [vmem:[#allocation16 + $0x70] sm:$0xff]  }
0x167c   : > { %v4829_v31 = vmul.f32 1.442695, %v4826_v18 }
0x167d   : > { %v4821_v58 = vpop.xlane.xlu0 %4820 }
0x167e   : > { %7842 = vpow2.f32 %v4829_v31  ;;  %v4825_v60 = vsub.f32 %v4817_v5, %v4821_v58  ;;  %v5133_v5 = vpack.c.bf16 %v4420_v28, %v4420_v28  ;;  %v5134_v58 = vpack.c.bf16 %v9231_v4, %v9231_v4 }
0x1680   : > { %v4827_v44 = vmul.f32 1.442695, %v4825_v60  ;;  %v5130_v60 = vpack.c.bf16 %v9179_v6, %v9179_v6 }
0x1682   : > { %7844 = vpow2.f32 %v4827_v44  ;;  %v5246_v44 = vsel %vm2154_vm1, %v5134_v58, 0 }
0x1688   : > { %v7843_v8 = vpop.eup %7842 }
0x1689   : > { %v4834_v36 = vsel %vm2126_vm2, %v7843_v8, 0.0 }
0x168a   : > { %4835 = vadd.xlane.f32.xlu1 %v4834_v36 }
0x168c   : > { %v7845_v47 = vpop.eup %7844 }
0x168d   : > { %v4831_v38 = vsel %vm2126_vm2, %v7845_v47, 0.0 }
0x168e   : > { %4832 = vadd.xlane.f32.xlu1 %v4831_v38 }
0x1717   : > { %v4836_v43 = vpop.xlane.xlu1 %4835 }
0x1718   : > { %7846 = vrcp.f32 %v4836_v43 }
0x171b   : > { %v4833_v39 = vpop.xlane.xlu1 %4832 }
0x171c   : > { %7848 = vrcp.f32 %v4833_v39 }
0x1722   : > { %v7847_v3 = vpop.eup %7846 }
0x1723   : > { %v4840_v40 = vmul.f32 %v7847_v3, %v7843_v8 }
0x1725   : > { %v4842_v45 = vpack.c.bf16 %v4840_v40, %v4840_v40 }
0x1726   : > { %v7849_v46 = vpop.eup %7848 }
0x1727   : > { %v4839_v56 = vmul.f32 %v7849_v46, %v7845_v47  ;;  %7094 = vmatmul.mubr.msk.bf16.vlgmr.msra.gmra.mrb[108].mxu1 %vm2126_vm2, %v4842_v45 }
0x1728   : > { %7118 = vmatpush3.bf16.msra.mxu1 %v7746_v41  ;;  %7133 = vmatprep.mubr.msk.bf16.mxu1 %vm8263_vm0, %v8262_v0 }
0x1729   : > { %7119 = vmatprep.subr.bf16.mxu1 %v8262_v0  ;;  %v4841_v37 = vpack.c.bf16 %v4839_v56, %v4839_v56 }
0x172b   : > { %7088 = vmatmul.mubr.msk.bf16.vlgmr.msra.gmra.mrb[56].mxu0 %vm2126_vm2, %v4841_v37 }
0x172c   : > { %7120 = vmatpush3.bf16.msra.mxu1 %v7747_v62  ;;  %7098 = vmatpush3.bf16.msra.mxu0 %v7754_v34 }
0x172d   : > { %7121 = vmatprep.subr.bf16.mxu1 %v8262_v0  ;;  %7099 = vmatprep.subr.bf16.mxu0 %v8262_v0 }
0x172e   : > { %7113 = vmatprep.mubr.msk.bf16.mxu0 %vm8263_vm0, %v8262_v0 }
0x1730   : > { %7122 = vmatpush3.bf16.msra.mxu1 %v7748_v17  ;;  %7100 = vmatpush3.bf16.msra.mxu0 %v7755_v14 }
0x1731   : > { %7123 = vmatprep.subr.bf16.mxu1 %v8262_v0  ;;  %7101 = vmatprep.subr.bf16.mxu0 %v8262_v0 }
0x1734   : > { %7124 = vmatpush3.bf16.msra.mxu1 %v7749_v23  ;;  %7102 = vmatpush3.bf16.msra.mxu0 %v7756_v7 }
0x1735   : > { %7125 = vmatprep.subr.bf16.mxu1 %v8262_v0  ;;  %7103 = vmatprep.subr.bf16.mxu0 %v8262_v0 }
0x1738   : > { %7126 = vmatpush3.bf16.msra.mxu1 %v7750_v25  ;;  %7104 = vmatpush3.bf16.msra.mxu0 %v7757_v33 }
0x1739   : > { %7127 = vmatprep.subr.bf16.mxu1 %v8262_v0  ;;  %7105 = vmatprep.subr.bf16.mxu0 %v8262_v0 }
0x173c   : > { %7128 = vmatpush3.bf16.msra.mxu1 %v7751_v24  ;;  %7106 = vmatpush3.bf16.msra.mxu0 %v7758_v13 }
0x173d   : > { %7129 = vmatprep.subr.bf16.mxu1 %v8262_v0  ;;  %7107 = vmatprep.subr.bf16.mxu0 %v8262_v0 }
0x1740   : > { %7130 = vmatpush3.bf16.msra.mxu1 %v7752_v20  ;;  %7108 = vmatpush3.bf16.msra.mxu0 %v7759_v51 }
0x1741   : > { %7131 = vmatprep.subr.bf16.mxu1 %v8262_v0  ;;  %7109 = vmatprep.subr.bf16.mxu0 %v8262_v0 }
0x1744   : > { %7132 = vmatpush3.bf16.msra.mxu1 %v7753_v57  ;;  %7110 = vmatpush3.bf16.msra.mxu0 %v7760_v63  ;;  %v3743_v57 = vrot.slane %v9172_v49, %v1270_v22 }
0x1745   : > { %7143 = vmatprep.subr.bf16.mxu1 %v8262_v0  ;;  %7111 = vmatprep.subr.bf16.mxu0 %v8262_v0 }
0x1746   : > { %v4422_v61 = vadd.f32 %v9211_v19, %v3743_v57 }
0x1747   : > { %7134 = vmatmul.mubr.bf16.vlgmr.msra.gmra.mrb[112].mxu1 %v4714_v15 }
0x1748   : > { %7145 = vmatprep.mubr.msk.bf16.mxu1 %vm8263_vm0, %v8262_v0  ;;  %7112 = vmatpush3.bf16.msra.mxu0 %v7761_v50  ;;  %v4418_v50 = vadd.f32 %v9205_v27, %v3743_v57  ;;  %v5445_v27 = vpack.c.bf16 %v4422_v61, %v4422_v61  ;;  %v7769_v57 = vld [vmem:[#allocation16 + $0xb8] sm:$0xff]  }
0x1749   : > { %7137 = vmatprep.subr.bf16.mxu0 %v8262_v0 }
0x174a   : > { %v5444_v1 = vpack.c.bf16 %v4418_v50, %v4418_v50 }
0x174d   : > { %7144 = vmatpush3.bf16.xpose.msra.mxu1 %v5133_v5  ;;  %v3727_v5 = vrot.slane %v9172_v49, %v8885_v35  ;;  %v5446_v49 = vpack.c.bf16 %v9233_v42, %v9233_v42 }
0x174e   : > { %7155 = vmatprep.subr.bf16.mxu1 %v8262_v0 }
0x174f   : > { %v4336_v35 = vadd.f32 %v9187_v21, %v3727_v5 }
0x1754   : > { %7146 = vmatmul.mubr.bf16.vlgmr.msra.gmra.mrb[116].mxu1 %v5131_v11  ;;  %v4332_v11 = vadd.f32 %v9181_v12, %v3727_v5  ;;  %v5558_v12 = vsel %vm2154_vm1, %v5446_v49, 0  ;;  %v5447_v5 = vpack.c.bf16 %v9239_v52, %v9239_v52 }
0x1755   : > { %7156 = vmatpush3.bf16.msra.mxu1 %v5292_v55  ;;  %7157 = vmatprep.mubr.msk.bf16.mxu1 %vm8263_vm0, %v8262_v0  ;;  %v5443_v55 = vpack.c.bf16 %v4336_v35, %v4336_v35  ;;  %v7770_v35 = vld [vmem:[#allocation16 + $0xc0] sm:$0xff]  }
0x1756   : > { %7181 = vmatprep.subr.bf16.mxu1 %v8262_v0  ;;  %v5442_v22 = vpack.c.bf16 %v4332_v11, %v4332_v11  ;;  %v5604_v11 = vsel %vm2154_vm1, %v5447_v5, 0  ;;  %v7784_v5 = vld [vmem:[#allocation18 + $0x30] sm:$0xff]  }
0x17fa   : > { %v4929_v10 = vpop.f32.mrb[108].mxu1 }
0x17fb   : > { %v7095_v15 = vpop.f32.mrb[109].mxu1 }
0x17fc   : > { %v4932_v29 = vpop.f32.mrb[110].mxu1 }
0x17fd   : > { %v7096_v30 = vpop.f32.mrb[111].mxu1 }
0x17fe   : > { %v4883_v59 = vpop.f32.mrb[56].mxu0 }
0x17ff   : > { %v4935_v16 = vpack.c.bf16 %v4929_v10, %v4883_v59  ;;  %v7089_v9 = vpop.f32.mrb[57].mxu0 }
0x1800   : > { %v4886_v18 = vpop.f32.mrb[58].mxu0 }
0x1801   : > { %v7090_v31 = vpop.f32.mrb[59].mxu0  ;;  %7114 = vmatmul.mubr.bf16.vlgmr.msra.gmra.mrb[60].mxu0 %v4935_v16 }
0x1802   : > { %7138 = vmatpush3.bf16.xpose.msra.mxu0 %v5132_v2  ;;  %7139 = vmatprep.mubr.msk.bf16.mxu0 %vm8263_vm0, %v8262_v0 }
0x1803   : > { %7149 = vmatprep.subr.bf16.mxu0 %v8262_v0 }
0x1809   : > { %7140 = vmatmul.mubr.bf16.vlgmr.msra.gmra.mrb[64].mxu0 %v5130_v60 }
0x180a   : > { %7150 = vmatpush3.bf16.msra.mxu0 %v5246_v44  ;;  %7151 = vmatprep.mubr.msk.bf16.mxu0 %vm8263_vm0, %v8262_v0 }
0x180b   : > { %7161 = vmatprep.subr.bf16.mxu0 %v8262_v0 }
0x181a   : > { %v5123_v53 = vpop.f32.mrb[112].mxu1 }
0x181b   : > { %v7135_v8 = vpop.f32.mrb[113].mxu1 }
0x181c   : > { %v5126_v36 = vpop.f32.mrb[114].mxu1 }
0x181d   : > { %v7136_v47 = vpop.f32.mrb[115].mxu1 }
0x1827   : > { %v5210_v38 = vpop.f32.mrb[116].mxu1 }
0x1828   : > { %v5217_v43 = vmul.f32 0.35355338, %v5210_v38  ;;  %v7147_v39 = vpop.f32.mrb[117].mxu1 }
0x1829   : > { %v5213_v4 = vpop.f32.mrb[118].mxu1 }
0x182a   : > { %v7148_v3 = vpop.f32.mrb[119].mxu1  ;;  %v5221_v6 = vsel %vm2126_vm2, %v5217_v43, -inf }
0x182b   : > { %5222 = vmax.xlane.f32.xlu0 %v5221_v6 }
0x18b8   : > { %v5223_v40 = vpop.xlane.xlu0 %5222 }
0x18b9   : > { %v5225_v41 = vsub.f32 %v5217_v43, %v5223_v40 }
0x18bb   : > { %v5228_v45 = vmul.f32 1.442695, %v5225_v41 }
0x18bd   : > { %7850 = vpow2.f32 %v5228_v45 }
0x18c7   : > { %v7851_v46 = vpop.eup %7850 }
0x18c8   : > { %v5233_v56 = vsel %vm2126_vm2, %v7851_v46, 0.0 }
0x18c9   : > { %5234 = vadd.xlane.f32.xlu1 %v5233_v56 }
0x18d4   : > { %v5034_v62 = vpop.f32.mrb[60].mxu0 }
0x18d5   : > { %v9334_v34 = vadd.f32 %v5123_v53, %v5034_v62  ;;  %v7115_v37 = vpop.f32.mrb[61].mxu0 }
0x18d6   : > { %v5037_v17 = vpop.f32.mrb[62].mxu0 }
0x18d7   : > { %v9336_v14 = vadd.f32 %v5126_v36, %v5037_v17  ;;  %v7116_v23 = vpop.f32.mrb[63].mxu0 }
0x18dc   : > { %v5170_v7 = vpop.f32.mrb[64].mxu0 }
0x18dd   : > { %v5216_v25 = vmul.f32 0.35355338, %v5170_v7  ;;  %v7141_v33 = vpop.f32.mrb[65].mxu0  ;;  %v7762_v7 = vld [vmem:[#allocation16 + $0x80] sm:$0xff]  }
0x18de   : > { %v5173_v24 = vpop.f32.mrb[66].mxu0  ;;  %v7764_v33 = vld [vmem:[#allocation16 + $0x90] sm:$0xff]  }
0x18df   : > { %v7142_v13 = vpop.f32.mrb[67].mxu0  ;;  %v5218_v20 = vsel %vm2126_vm2, %v5216_v25, -inf  ;;  %v7765_v24 = vld [vmem:[#allocation16 + $0x98] sm:$0xff]  }
0x18e0   : > { %5219 = vmax.xlane.f32.xlu0 %v5218_v20  ;;  %v7766_v13 = vld [vmem:[#allocation16 + $0xa0] sm:$0xff]   ;;  %v7767_v20 = vld [vmem:[#allocation16 + $0xa8] sm:$0xff]  }
0x1956   : > { %v5235_v51 = vpop.xlane.xlu1 %5234 }
0x1957   : > { %7852 = vrcp.f32 %v5235_v51  ;;  %v7768_v51 = vld [vmem:[#allocation16 + $0xb0] sm:$0xff]  }
0x1961   : > { %v7853_v63 = vpop.eup %7852 }
0x1962   : > { %v5239_v28 = vmul.f32 %v7853_v63, %v7851_v46 }
0x1964   : > { %v5241_v26 = vpack.c.bf16 %v5239_v28, %v5239_v28 }
0x1966   : > { %7158 = vmatmul.mubr.msk.bf16.vlgmr.msra.gmra.mrb[120].mxu1 %vm2126_vm2, %v5241_v26 }
0x1967   : > { %7182 = vmatpush3.bf16.xpose.msra.mxu1 %v5444_v1  ;;  %7183 = vmatprep.mubr.msk.bf16.mxu1 %vm8263_vm0, %v8262_v0 }
0x1968   : > { %7187 = vmatprep.subr.bf16.mxu1 %v8262_v0 }
0x196d   : > { %v5220_v19 = vpop.xlane.xlu0 %5219 }
0x196e   : > { %7184 = vmatmul.mubr.bf16.vlgmr.msra.gmra.mrb[124].mxu1 %v5442_v22  ;;  %v5224_v10 = vsub.f32 %v5216_v25, %v5220_v19  ;;  %v7763_v25 = vld [vmem:[#allocation16 + $0x88] sm:$0xff]  }
0x196f   : > { %7188 = vmatpush3.bf16.xpose.msra.mxu1 %v5445_v27  ;;  %7189 = vmatprep.mubr.msk.bf16.mxu1 %vm8263_vm0, %v8262_v0 }
0x1970   : > { %7193 = vmatprep.subr.bf16.mxu1 %v8262_v0  ;;  %v5226_v15 = vmul.f32 1.442695, %v5224_v10  ;;  %v7771_v10 = vld [vmem:[#allocation16 + $0xc8] sm:$0xff]  }
0x1972   : > { %7854 = vpow2.f32 %v5226_v15  ;;  %v7772_v15 = vld [vmem:[#allocation16 + $0xd0] sm:$0xff]  }
0x1976   : > { %7190 = vmatmul.mubr.bf16.vlgmr.msra.gmra.mrb[128].mxu1 %v5443_v55 }
0x1977   : > { %7194 = vmatpush3.bf16.msra.mxu1 %v5558_v12  ;;  %7195 = vmatprep.mubr.msk.bf16.mxu1 %vm8263_vm0, %v8262_v0 }
0x1978   : > { %7199 = vmatprep.subr.bf16.mxu1 %v8262_v0 }
0x197c   : > { %v7855_v58 = vpop.eup %7854 }
0x197d   : > { %v5230_v60 = vsel %vm2126_vm2, %v7855_v58, 0.0 }
0x1a39   : > { %v9361_v29 = vpop.f32.mrb[120].mxu1 }
0x1a3a   : > { %v7159_v21 = vpop.f32.mrb[121].mxu1 }
0x1a3b   : > { %v5331_v30 = vpop.f32.mrb[122].mxu1  ;;  %v7773_v21 = vld [vmem:[#allocation16 + $0xd8] sm:$0xff]  }
0x1a3c   : > { %v7160_v59 = vpop.f32.mrb[123].mxu1  ;;  %v7775_v30 = vld [vmem:[#allocation16 + $0xe8] sm:$0xff]  }
0x1a3d   : > { %v7776_v59 = vld [vmem:[#allocation16 + $0xf0] sm:$0xff]  }
0x1a41   : > { %v5482_v42 = vpop.f32.mrb[124].mxu1 }
0x1a42   : > { %v5528_v16 = vmul.f32 0.35355338, %v5482_v42  ;;  %v7185_v9 = vpop.f32.mrb[125].mxu1  ;;  %v7777_v42 = vld [vmem:[#allocation16 + $0xf8] sm:$0xff]  }
0x1a43   : > { %v5485_v2 = vpop.f32.mrb[126].mxu1 }
0x1a44   : > { %v7186_v18 = vpop.f32.mrb[127].mxu1  ;;  %v5530_v31 = vsel %vm2126_vm2, %v5528_v16, -inf }
0x1a45   : > { %5531 = vmax.xlane.f32.xlu1 %v5530_v31 }
0x1a49   : > { %v5522_v44 = vpop.f32.mrb[128].mxu1  ;;  %5231 = vadd.xlane.f32.xlu1 %v5230_v60 }
0x1a4a   : > { %v5529_v53 = vmul.f32 0.35355338, %v5522_v44  ;;  %v7191_v8 = vpop.f32.mrb[129].mxu1 }
0x1a4b   : > { %v5525_v36 = vpop.f32.mrb[130].mxu1 }
0x1a4c   : > { %v7192_v47 = vpop.f32.mrb[131].mxu1  ;;  %v5533_v38 = vsel %vm2126_vm2, %v5529_v53, -inf }
0x1a4d   : > { %5534 = vmax.xlane.f32.xlu0 %v5533_v38 }
0x1ad2   : > { %v5532_v43 = vpop.xlane.xlu1 %5531 }
0x1ad3   : > { %v5536_v39 = vsub.f32 %v5528_v16, %v5532_v43 }
0x1ad5   : > { %v5538_v4 = vmul.f32 1.442695, %v5536_v39 }
0x1ad6   : > { %v5232_v3 = vpop.xlane.xlu1 %5231 }
0x1ad7   : > { %7856 = vpow2.f32 %v5538_v4 }
0x1ad8   : > { %7858 = vrcp.f32 %v5232_v3  ;;  %v6598_v3 = vld [vmem:[%s9476_s19] ss:$0 sm:$0xff] }
0x1ada   : > { %v5535_v6 = vpop.xlane.xlu0 %5534 }
0x1adb   : > { %v5537_v40 = vsub.f32 %v5529_v53, %v5535_v6 }
0x1add   : > { %v5540_v41 = vmul.f32 1.442695, %v5537_v40 }
0x1adf   : > { %7860 = vpow2.f32 %v5540_v41 }
0x1ae1   : > { %v7857_v45 = vpop.eup %7856 }
0x1ae2   : > { %v7859_v46 = vpop.eup %7858  ;;  %v5542_v56 = vsel %vm2126_vm2, %v7857_v45, 0.0 }
0x1ae3   : > { %v5238_v62 = vmul.f32 %v7859_v46, %v7855_v58  ;;  %5543 = vadd.xlane.f32.xlu0 %v5542_v56 }
0x1ae5   : > { %v5240_v37 = vpack.c.bf16 %v5238_v62, %v5238_v62 }
0x1ae7   : > { %7152 = vmatmul.mubr.msk.bf16.vlgmr.msra.gmra.mrb[68].mxu0 %vm2126_vm2, %v5240_v37 }
0x1ae8   : > { %7177 = vmatprep.mubr.msk.bf16.mxu0 %vm8263_vm0, %v8262_v0  ;;  %7162 = vmatpush3.bf16.msra.mxu0 %v7762_v7 }
0x1ae9   : > { %v7861_v17 = vpop.eup %7860  ;;  %7163 = vmatprep.subr.bf16.mxu0 %v8262_v0 }
0x1aea   : > { %v5545_v23 = vsel %vm2126_vm2, %v7861_v17, 0.0 }
0x1aeb   : > { %5546 = vadd.xlane.f32.xlu1 %v5545_v23 }
0x1aec   : > { %7164 = vmatpush3.bf16.msra.mxu0 %v7763_v25 }
0x1aed   : > { %7165 = vmatprep.subr.bf16.mxu0 %v8262_v0 }
0x1af0   : > { %7166 = vmatpush3.bf16.msra.mxu0 %v7764_v33 }
0x1af1   : > { %7167 = vmatprep.subr.bf16.mxu0 %v8262_v0 }
0x1af4   : > { %7168 = vmatpush3.bf16.msra.mxu0 %v7765_v24 }
0x1af5   : > { %7169 = vmatprep.subr.bf16.mxu0 %v8262_v0 }
0x1af8   : > { %7170 = vmatpush3.bf16.msra.mxu0 %v7766_v13 }
0x1af9   : > { %7171 = vmatprep.subr.bf16.mxu0 %v8262_v0 }
0x1afc   : > { %7172 = vmatpush3.bf16.msra.mxu0 %v7767_v20 }
0x1afd   : > { %7173 = vmatprep.subr.bf16.mxu0 %v8262_v0 }
0x1b00   : > { %7174 = vmatpush3.bf16.msra.mxu0 %v7768_v51 }
0x1b01   : > { %7175 = vmatprep.subr.bf16.mxu0 %v8262_v0 }
0x1b04   : > { %7176 = vmatpush3.bf16.msra.mxu0 %v7769_v57  ;;  %v7780_v57 = vld [vmem:[#allocation18 + $0x10] sm:$0xff]  }
0x1b05   : > { %7205 = vmatprep.subr.bf16.mxu0 %v8262_v0 }
0x1b70   : > { %v5544_v63 = vpop.xlane.xlu0 %5543 }
0x1b71   : > { %7862 = vrcp.f32 %v5544_v63  ;;  %v7781_v63 = vld [vmem:[#allocation18 + $0x18] sm:$0xff]  }
0x1b78   : > { %v5547_v50 = vpop.xlane.xlu1 %5546 }
0x1b79   : > { %7864 = vrcp.f32 %v5547_v50  ;;  %v7782_v50 = vld [vmem:[#allocation18 + $0x20] sm:$0xff]  }
0x1b7b   : > { %v7863_v28 = vpop.eup %7862 }
0x1b7c   : > { %v5550_v26 = vmul.f32 %v7863_v28, %v7857_v45  ;;  %v7783_v28 = vld [vmem:[#allocation18 + $0x28] sm:$0xff]  }
0x1b7e   : > { %v5552_v1 = vpack.c.bf16 %v5550_v26, %v5550_v26  ;;  %v7785_v26 = vld [vmem:[#allocation18 + $0x38] sm:$0xff]  }
0x1b80   : > { %7196 = vmatmul.mubr.msk.bf16.vlgmr.msra.gmra.mrb[132].mxu1 %vm2126_vm2, %v5552_v1  ;;  %v7786_v1 = vld [vmem:[#allocation19] sm:$0xff]  }
0x1b81   : > { %7200 = vmatpush3.bf16.msra.mxu1 %v5604_v11  ;;  %7201 = vmatprep.mubr.msk.bf16.mxu1 %vm8263_vm0, %v8262_v0  ;;  %v7787_v11 = vld [vmem:[#allocation19 + $0x8] sm:$0xff]  }
0x1b82   : > { %7225 = vmatprep.subr.bf16.mxu1 %v8262_v0 }
0x1b83   : > { %v7865_v61 = vpop.eup %7864 }
0x1b84   : > { %v5551_v22 = vmul.f32 %v7865_v61, %v7861_v17  ;;  %v7779_v17 = vld [vmem:[#allocation18 + $0x8] sm:$0xff]   ;;  %v7788_v61 = vld [vmem:[#allocation19 + $0x10] sm:$0xff]  }
0x1b86   : > { %v5553_v27 = vpack.c.bf16 %v5551_v22, %v5551_v22  ;;  %v7789_v22 = vld [vmem:[#allocation19 + $0x18] sm:$0xff]  }
0x1b88   : > { %7202 = vmatmul.mubr.msk.bf16.vlgmr.msra.gmra.mrb[136].mxu1 %vm2126_vm2, %v5553_v27  ;;  %v7790_v27 = vld [vmem:[#allocation19 + $0x20] sm:$0xff]  }
0x1b89   : > { %7241 = vmatprep.mubr.msk.bf16.mxu1 %vm8263_vm0, %v8262_v0 }
0x1bba   : > { %v5282_v52 = vpop.f32.mrb[68].mxu0 }
0x1bbb   : > { %v5334_v49 = vpack.c.bf16 %v9361_v29, %v5282_v52  ;;  %v7153_v55 = vpop.f32.mrb[69].mxu0  ;;  %v7774_v29 = vld [vmem:[#allocation16 + $0xe0] sm:$0xff]   ;;  %v7791_v52 = vld [vmem:[#allocation19 + $0x28] sm:$0xff]  }
0x1bbc   : > { %v5285_v12 = vpop.f32.mrb[70].mxu0 }
0x1bbd   : > { %v7154_v19 = vpop.f32.mrb[71].mxu0  ;;  %7178 = vmatmul.mubr.bf16.vlgmr.msra.gmra.mrb[72].mxu0 %v5334_v49 }
0x1bbe   : > { %7206 = vmatpush3.bf16.msra.mxu0 %v7770_v35  ;;  %7221 = vmatprep.mubr.msk.bf16.mxu0 %vm8263_vm0, %v8262_v0 }
0x1bbf   : > { %7207 = vmatprep.subr.bf16.mxu0 %v8262_v0 }
0x1bc2   : > { %7208 = vmatpush3.bf16.msra.mxu0 %v7771_v10 }
0x1bc3   : > { %7209 = vmatprep.subr.bf16.mxu0 %v8262_v0 }
0x1bc6   : > { %7210 = vmatpush3.bf16.msra.mxu0 %v7772_v15 }
0x1bc7   : > { %7211 = vmatprep.subr.bf16.mxu0 %v8262_v0 }
0x1bca   : > { %7212 = vmatpush3.bf16.msra.mxu0 %v7773_v21  ;;  %v6599_v21 = vld [vmem:[%s9477_s20] ss:$0 sm:$0xff] }
0x1bcb   : > { %7213 = vmatprep.subr.bf16.mxu0 %v8262_v0 }
0x1bce   : > { %7214 = vmatpush3.bf16.msra.mxu0 %v7774_v29 }
0x1bcf   : > { %7215 = vmatprep.subr.bf16.mxu0 %v8262_v0 }
0x1bd2   : > { %7216 = vmatpush3.bf16.msra.mxu0 %v7775_v30 }
0x1bd3   : > { %7217 = vmatprep.subr.bf16.mxu0 %v8262_v0 }
0x1bd6   : > { %7218 = vmatpush3.bf16.msra.mxu0 %v7776_v59 }
0x1bd7   : > { %7219 = vmatprep.subr.bf16.mxu0 %v8262_v0 }
0x1bda   : > { %7220 = vmatpush3.bf16.msra.mxu0 %v7777_v42 }
0x1bdb   : > { %7245 = vmatprep.subr.bf16.mxu0 %v8262_v0 }
0x1c53   : > { %v5594_v16 = vpop.f32.mrb[132].mxu1 }
0x1c54   : > { %v7197_v9 = vpop.f32.mrb[133].mxu1 }
0x1c55   : > { %v5597_v2 = vpop.f32.mrb[134].mxu1 }
0x1c56   : > { %v7198_v18 = vpop.f32.mrb[135].mxu1 }
0x1c5b   : > { %v5640_v31 = vpop.f32.mrb[136].mxu1 }
0x1c5c   : > { %v5646_v58 = vpack.c.bf16 %v5640_v31, %v5594_v16  ;;  %v7203_v60 = vpop.f32.mrb[137].mxu1  ;;  %v6600_v16 = vld [vmem:[%s9559_s23] ss:$0 sm:$0xff]  ;;  %s1012_s23 = scalar_lea.vmem %s9564_s30, %s6290_s0 }
0x1c5d   : > { %v5643_v44 = vpop.f32.mrb[138].mxu1  ;;  %v7793_v60 = vld [vmem:[#allocation19 + $0x38] sm:$0xff]  }
0x1c5e   : > { %v7204_v53 = vpop.f32.mrb[139].mxu1  ;;  %7222 = vmatmul.mubr.bf16.vlgmr.msra.gmra.mrb[76].mxu0 %v5646_v58  ;;  %v7792_v58 = vld [vmem:[#allocation19 + $0x30] sm:$0xff]   ;;  %v6601_v44 = vld [vmem:[%s9560_s29] ss:$0 sm:$0xff] }
0x1c5f   : > { %7261 = vmatprep.mubr.msk.bf16.mxu0 %vm8263_vm0, %v8262_v0  ;;  %7246 = vmatpush3.bf16.msra.mxu0 %v7786_v1  ;;  %v6620_v1 = vld [vmem:[%s9563_s9] ss:$0 sm:$0xff] }
0x1c60   : > { %7247 = vmatprep.subr.bf16.mxu0 %v8262_v0 }
0x1c63   : > { %7248 = vmatpush3.bf16.msra.mxu0 %v7787_v11 }
0x1c64   : > { %7249 = vmatprep.subr.bf16.mxu0 %v8262_v0 }
0x1c67   : > { %7250 = vmatpush3.bf16.msra.mxu0 %v7788_v61 }
0x1c68   : > { %7251 = vmatprep.subr.bf16.mxu0 %v8262_v0 }
0x1c6b   : > { %7252 = vmatpush3.bf16.msra.mxu0 %v7789_v22 }
0x1c6c   : > { %7253 = vmatprep.subr.bf16.mxu0 %v8262_v0 }
0x1c6f   : > { %7254 = vmatpush3.bf16.msra.mxu0 %v7790_v27 }
0x1c70   : > { %7255 = vmatprep.subr.bf16.mxu0 %v8262_v0 }
0x1c73   : > { %7256 = vmatpush3.bf16.msra.mxu0 %v7791_v52 }
0x1c74   : > { %7257 = vmatprep.subr.bf16.mxu0 %v8262_v0 }
0x1c77   : > { %7258 = vmatpush3.bf16.msra.mxu0 %v7792_v58 }
0x1c78   : > { %7259 = vmatprep.subr.bf16.mxu0 %v8262_v0 }
0x1c7b   : > { %7260 = vmatpush3.bf16.msra.mxu0 %v7793_v60 }
0x1c90   : > { %v5433_v8 = vpop.f32.mrb[72].mxu0 }
0x1c91   : > { %v5440_v36 = vadd.f32 %v5433_v8, %v9334_v34  ;;  %v7179_v47 = vpop.f32.mrb[73].mxu0 }
0x1c92   : > { %v5436_v38 = vpop.f32.mrb[74].mxu0 }
0x1c93   : > { %v5441_v43 = vadd.f32 %v5436_v38, %v9336_v14  ;;  %v7180_v39 = vpop.f32.mrb[75].mxu0  ;;  %v7778_v14 = vld [vmem:[#allocation18] sm:$0xff]  }
0x1c94   : > { %7226 = vmatpush3.bf16.msra.mxu1 %v7778_v14 }
0x1c95   : > { %7227 = vmatprep.subr.bf16.mxu1 %v8262_v0 }
0x1c98   : > { %7228 = vmatpush3.bf16.msra.mxu1 %v7779_v17 }
0x1c99   : > { %7229 = vmatprep.subr.bf16.mxu1 %v8262_v0 }
0x1c9c   : > { %7230 = vmatpush3.bf16.msra.mxu1 %v7780_v57 }
0x1c9d   : > { %7231 = vmatprep.subr.bf16.mxu1 %v8262_v0 }
0x1ca0   : > { %7232 = vmatpush3.bf16.msra.mxu1 %v7781_v63 }
0x1ca1   : > { %7233 = vmatprep.subr.bf16.mxu1 %v8262_v0 }
0x1ca4   : > { %7234 = vmatpush3.bf16.msra.mxu1 %v7782_v50  ;;  %v6619_v50 = vld [vmem:[%s9562_s1] ss:$0 sm:$0xff] }
0x1ca5   : > { %7235 = vmatprep.subr.bf16.mxu1 %v8262_v0 }
0x1ca8   : > { %7236 = vmatpush3.bf16.msra.mxu1 %v7783_v28 }
0x1ca9   : > { %7237 = vmatprep.subr.bf16.mxu1 %v8262_v0 }
0x1cac   : > { %7238 = vmatpush3.bf16.msra.mxu1 %v7784_v5 }
0x1cad   : > { %7239 = vmatprep.subr.bf16.mxu1 %v8262_v0  ;;  %v6610_v0 = vld [vmem:[%s9561_s11] ss:$0 sm:$0xff] }
0x1cb0   : > { %7240 = vmatpush3.bf16.msra.mxu1 %v7785_v26 }
0x1d31   : > { %v5745_v4 = vpop.f32.mrb[76].mxu0 }
0x1d32   : > { %v5752_v6 = vadd.f32 %v5745_v4, %v5440_v36  ;;  %v7223_v40 = vpop.f32.mrb[77].mxu0 }
0x1d33   : > { %v5748_v41 = vpop.f32.mrb[78].mxu0 }
0x1d34   : > { %v5761_v45 = vadd.f32 %v6598_v3, %v5752_v6  ;;  %v5753_v46 = vadd.f32 %v5748_v41, %v5441_v43  ;;  %v7224_v56 = vpop.f32.mrb[79].mxu0 }
0x1d36   : > { %v5762_v62 = vadd.f32 %v6598_v3, %v5753_v46  ;;  %v5763_v37 = vadd.f32 %v5761_v45, %v9145_v48 }
0x1d38   : > { %5767 = vadd.xlane.f32.xlu0 %v5763_v37  ;;  %v5764_v34 = vadd.f32 %v5762_v62, %v9147_v32 }
0x1d3a   : > { %5769 = vadd.xlane.f32.xlu1 %v5764_v34 }
0x1dc5   : > { %v5768_v23 = vpop.xlane.xlu0 %5767 }
0x1dc6   : > { %v5771_v7 = vmul.f32 0.03125, %v5768_v23 }
0x1dc7   : > { %v5770_v25 = vpop.xlane.xlu1 %5769 }
0x1dc8   : > { %v5773_v33 = vsub.f32 %v5763_v37, %v5771_v7  ;;  %v5772_v24 = vmul.f32 0.03125, %v5770_v25 }
0x1dca   : > { %v5774_v13 = vsub.f32 %v5764_v34, %v5772_v24  ;;  %v5775_v48 = vsel %vm3570_vm4, %v5773_v33, 0.0 }
0x1dcb   : > { %v5777_v20 = vmul.f32 %v5775_v48, %v5775_v48 }
0x1dcc   : > { %v5776_v32 = vsel %vm3570_vm4, %v5774_v13, 0.0 }
0x1dcd   : > { %5779 = vadd.xlane.f32.xlu0 %v5777_v20  ;;  %v5778_v51 = vmul.f32 %v5776_v32, %v5776_v32 }
0x1dcf   : > { %5781 = vadd.xlane.f32.xlu1 %v5778_v51 }
0x1e5a   : > { %v5780_v35 = vpop.xlane.xlu0 %5779 }
0x1e5b   : > { %v5783_v49 = vmul.f32 0.03125, %v5780_v35 }
0x1e5c   : > { %v5782_v55 = vpop.xlane.xlu1 %5781 }
0x1e5d   : > { %v5785_v12 = vadd.f32 1e-05, %v5783_v49  ;;  %v5784_v19 = vmul.f32 0.03125, %v5782_v55 }
0x1e5f   : > { %7866 = vrsqrt.f32 %v5785_v12  ;;  %v5786_v10 = vadd.f32 1e-05, %v5784_v19 }
0x1e61   : > { %7868 = vrsqrt.f32 %v5786_v10 }
0x1e69   : > { %v7867_v15 = vpop.eup %7866 }
0x1e6a   : > { %v5789_v29 = vmul.f32 %v7867_v15, %v5775_v48 }
0x1e6b   : > { %v7869_v30 = vpop.eup %7868 }
0x1e6c   : > { %v5790_v59 = vmul.f32 %v7869_v30, %v5776_v32  ;;  %v5797_v42 = vmul.f32 %v6599_v21, %v5789_v29 }
0x1e6e   : > { %v5798_v9 = vmul.f32 %v6599_v21, %v5790_v59  ;;  %v5805_v2 = vadd.f32 %v6600_v16, %v5797_v42 }
0x1e70   : > { %v5806_v18 = vadd.f32 %v6600_v16, %v5798_v9 }
0x1e72   : > { %v5807_v31 = vpack.c.bf16 %v5806_v18, %v5805_v2 }
0x1e74   : > { %7242 = vmatmul.mubr.bf16.vlgmr.msra.gmra.mrb[140].mxu1 %v5807_v31 }
0x1f47   : > { %v5913_v53 = vpop.f32.mrb[140].mxu1 }
0x1f48   : > { %v5914_v8 = vadd.f32 %v6601_v44, %v5913_v53  ;;  %v7243_v36 = vpop.f32.mrb[141].mxu1 }
0x1f49   : > { %v5916_v47 = vpop.f32.mrb[142].mxu1 }
0x1f4a   : > { %v5917_v38 = vadd.f32 %v6601_v44, %v5916_v47  ;;  %v7244_v43 = vpop.f32.mrb[143].mxu1  ;;  %v5920_v39 = vmax.f32 %v5914_v8, 0.0 }
0x1f4c   : > { %v5921_v4 = vmax.f32 %v5917_v38, 0.0 }
0x1f4e   : > { %v5922_v3 = vpack.c.bf16 %v5921_v4, %v5920_v39 }
0x1f50   : > { %7262 = vmatmul.mubr.bf16.vlgmr.msra.gmra.mrb[80].mxu0 %v5922_v3 }
0x2023   : > { %v6028_v6 = vpop.f32.mrb[80].mxu0 }
0x2024   : > { %v6029_v40 = vadd.f32 %v6610_v0, %v6028_v6  ;;  %v7263_v41 = vpop.f32.mrb[81].mxu0 }
0x2025   : > { %v6031_v45 = vpop.f32.mrb[82].mxu0 }
0x2026   : > { %v6032_v46 = vadd.f32 %v6610_v0, %v6031_v45  ;;  %6037 = vadd.xlane.f32.xlu0 %v6029_v40  ;;  %v7264_v56 = vpop.f32.mrb[83].mxu0 }
0x2028   : > { %6039 = vadd.xlane.f32.xlu1 %v6032_v46 }
0x20b3   : > { %v6038_v62 = vpop.xlane.xlu0 %6037 }
0x20b4   : > { %v6041_v37 = vmul.f32 0.03125, %v6038_v62 }
0x20b5   : > { %v6040_v34 = vpop.xlane.xlu1 %6039 }
0x20b6   : > { %v6043_v14 = vsub.f32 %v6029_v40, %v6041_v37  ;;  %v6042_v17 = vmul.f32 0.03125, %v6040_v34 }
0x20b8   : > { %v6044_v23 = vsub.f32 %v6032_v46, %v6042_v17  ;;  %v6045_v7 = vsel %vm3570_vm4, %v6043_v14, 0.0 }
0x20b9   : > { %v6047_v25 = vmul.f32 %v6045_v7, %v6045_v7 }
0x20ba   : > { %v6046_v33 = vsel %vm3570_vm4, %v6044_v23, 0.0 }
0x20bb   : > { %6049 = vadd.xlane.f32.xlu0 %v6047_v25  ;;  %v6048_v24 = vmul.f32 %v6046_v33, %v6046_v33 }
0x20bd   : > { %6051 = vadd.xlane.f32.xlu1 %v6048_v24 }
0x2148   : > { %v6050_v13 = vpop.xlane.xlu0 %6049 }
0x2149   : > { %v6053_v48 = vmul.f32 0.03125, %v6050_v13 }
0x214a   : > { %v6052_v20 = vpop.xlane.xlu1 %6051 }
0x214b   : > { %v6055_v32 = vadd.f32 1e-05, %v6053_v48  ;;  %v6054_v51 = vmul.f32 0.03125, %v6052_v20 }
0x214d   : > { %7870 = vrsqrt.f32 %v6055_v32  ;;  %v6056_v57 = vadd.f32 1e-05, %v6054_v51 }
0x214f   : > { %7872 = vrsqrt.f32 %v6056_v57 }
0x2157   : > { %v7871_v63 = vpop.eup %7870 }
0x2158   : > { %v6059_v28 = vmul.f32 %v7871_v63, %v6045_v7 }
0x2159   : > { %v7873_v54 = vpop.eup %7872 }
0x215a   : > { %v6067_v5 = vmul.f32 %v6619_v50, %v6059_v28  ;;  %v6060_v26 = vmul.f32 %v7873_v54, %v6046_v33 }
0x215c   : > { %v6068_v11 = vmul.f32 %v6619_v50, %v6060_v26  ;;  %v6075_v61 = vadd.f32 %v6620_v1, %v6067_v5 }
0x215e   : > { %v6076_v22 = vadd.f32 %v6620_v1, %v6068_v11 }
0x2160   : > { %v6630_v27 = vpack.c.bf16 %v6076_v22, %v6075_v61 }
0x2162   : > { %6631 = vst [vmem:[%s1012_s23] sm:$0xff] %v6630_v27  }
0x2163 PF: > { %s45_s8 = sadd.s32 1, %s8244_s8  }
0x2164   : > { %p42_p3 = scmp.ge.s32.totalorder %s45_s8, 4  }
0x2166   :  { %44 = sbr.rel (!%p42_p3) target bundleno = 29 (0x1d), region = 211 }
0x216d   :  { %6109 = vsyncpa [#allocation3], 1 }
0x216e   :  { %6111 = vsyncpa [#allocation3 + $0x1], 1 }
0x216f   :  { %6112 = vsyncpa [#allocation5], 1 }
0x2170   :  { %6113 = vsyncpa [#allocation8], 1 }
0x2171   :  { %6114 = vsyncpa [#allocation11], 1 }
0x2172   :  { %6115 = vsyncpa [#allocation14], 1 }
0x2173   :  { %6116 = vsyncpa [#allocation17], 1 }
0x2174   :  { %6117 = vsyncpa [#allocation20], 1 }

// kernel: articles_nn_forward.1
= control target key start
LH: loop header
LB: loop body
LE: loop exit
PB: predicated region body
PF: predicated region fallthrough
CT: control target
= control target key end

     0   :  { %s9457_s0 = inlined_call_operand.vmem [shape: bf16[4,8,128], index: 0, kind: input, shape index: {}]   ;;  %s9458_s1 = inlined_call_operand.vmem [shape: bf16[128,128], index: 1, kind: input, shape index: {}]   ;;  %s9459_s2 = inlined_call_operand.vmem [shape: f32[1,128], index: 2, kind: input, shape index: {}]   ;;  %s9460_s3 = inlined_call_operand.vmem [shape: f32[16,128], index: 3, kind: input, shape index: {}]   ;;  %s9461_s4 = inlined_call_operand.hbm [shape: bf16[128,1536], index: 4, kind: input, shape index: {}]   ;;  %s9462_s5 = inlined_call_operand.hbm [shape: f32[1,1536], index: 5, kind: input, shape index: {}]   ;;  %s9463_s6 = inlined_call_operand.hbm [shape: bf16[512,128], index: 6, kind: input, shape index: {}]   ;;  %s9464_s7 = inlined_call_operand.vmem [shape: f32[1,128], index: 7, kind: input, shape index: {}]   ;;  %s9465_s8 = inlined_call_operand.hbm [shape: f32[1,128], index: 8, kind: input, shape index: {}]   ;;  %s9466_s9 = inlined_call_operand.hbm [shape: f32[1,128], index: 9, kind: input, shape index: {}]   ;;  %s9467_s10 = inlined_call_operand.vmem [shape: bf16[128,128], index: 10, kind: input, shape index: {}]   ;;  %s9468_s11 = inlined_call_operand.hbm [shape: f32[1,128], index: 11, kind: input, shape index: {}]   ;;  %s9469_s12 = inlined_call_operand.hbm [shape: bf16[128,128], index: 12, kind: input, shape index: {}]   ;;  %s9470_s13 = inlined_call_operand.hbm [shape: f32[1,128], index: 13, kind: input, shape index: {}]   ;;  %s9471_s14 = inlined_call_operand.vmem [shape: f32[1,128], index: 14, kind: input, shape index: {}]   ;;  %s9472_s15 = inlined_call_operand.vmem [shape: f32[1,128], index: 15, kind: input, shape index: {}]   ;;  %s9473_s16 = inlined_call_operand.hbm [shape: bf16[128,1536], index: 16, kind: input, shape index: {}]   ;;  %s9474_s17 = inlined_call_operand.vmem [shape: f32[1,1536], index: 17, kind: input, shape index: {}]   ;;  %s9475_s18 = inlined_call_operand.hbm [shape: bf16[512,128], index: 18, kind: input, shape index: {}]   ;;  %s9476_s19 = inlined_call_operand.vmem [shape: f32[1,128], index: 19, kind: input, shape index: {}]   ;;  %s9477_s20 = inlined_call_operand.vmem [shape: f32[1,128], index: 20, kind: input, shape index: {}]   ;;  %s9478_s21 = inlined_call_operand.vmem [shape: f32[1,128], index: 21, kind: input, shape index: {}]   ;;  %s9479_s22 = inlined_call_operand.hbm [shape: bf16[128,128], index: 22, kind: input, shape index: {}]   ;;  %s9480_s23 = inlined_call_operand.vmem [shape: f32[1,128], index: 23, kind: input, shape index: {}]   ;;  %s9481_s24 = inlined_call_operand.hbm [shape: bf16[128,128], index: 24, kind: input, shape index: {}]   ;;  %s9482_s25 = inlined_call_operand.vmem [shape: f32[1,128], index: 25, kind: input, shape index: {}]   ;;  %s9483_s26 = inlined_call_operand.vmem [shape: f32[1,128], index: 26, kind: input, shape index: {}]   ;;  %s9484_s27 = inlined_call_operand.vmem [shape: f32[1,128], index: 27, kind: input, shape index: {}]   ;;  %s9485_s28 = inlined_call_operand.vmem [shape: bf16[4,8,128], index: 28, kind: output, shape index: {}]  }
   0x1   :  { %9512 = sst [smem:[#allocation28_spill]] %s9457_s0 }
   0x2   :  { %9513 = sst [smem:[#allocation29_spill]] %s9458_s1 }
   0x3   :  { %9514 = sst [smem:[#allocation30_spill]] %s9459_s2 }
   0x4   :  { %9515 = sst [smem:[#allocation31_spill]] %s9460_s3 }
   0x5   :  { %9516 = sst [smem:[#allocation32_spill]] %s9461_s4 }
   0x6   :  { %9517 = sst [smem:[#allocation33_spill]] %s9462_s5 }
   0x7   :  { %9518 = sst [smem:[#allocation34_spill]] %s9463_s6 }
   0x8   :  { %9519 = sst [smem:[#allocation35_spill]] %s9464_s7 }
   0x9   :  { %9520 = sst [smem:[#allocation36_spill]] %s9465_s8 }
   0xa   :  { %9521 = sst [smem:[#allocation37_spill]] %s9466_s9 }
   0xb   :  { %9522 = sst [smem:[#allocation38_spill]] %s9467_s10 }
   0xc   :  { %9523 = sst [smem:[#allocation39_spill]] %s9468_s11 }
   0xd   :  { %9524 = sst [smem:[#allocation40_spill]] %s9469_s12 }
   0xe   :  { %9525 = sst [smem:[#allocation41_spill]] %s9470_s13 }
   0xf   :  { %9526 = sst [smem:[#allocation42_spill]] %s9475_s18 }
  0x10   :  { %9527 = sst [smem:[#allocation43_spill]] %s9478_s21 }
  0x11   :  { %9528 = sst [smem:[#allocation44_spill]] %s9480_s23 }
  0x12   :  { %9529 = sst [smem:[#allocation45_spill]] %s9482_s25 }
  0x13   :  { %9530 = sst [smem:[#allocation46_spill]] %s9483_s26 }
  0x14   :  { %9531 = sst [smem:[#allocation47_spill]] %s9484_s27 }
  0x15   :  { %9532 = sst [smem:[#allocation48_spill]] %s9485_s28 }
  0x16   :  { %33 = vsyncpa [#allocation3], 0 }
  0x17   :  { %34 = vsyncpa [#allocation5], 0 }
  0x18   :  { %35 = vsyncpa [#allocation8], 0 }
  0x19   :  { %36 = vsyncpa [#allocation11], 0 }
  0x1a   :  { %37 = vsyncpa [#allocation14], 0 }
  0x1b   :  { %38 = vsyncpa [#allocation17], 0 }
  0x1c   :  { %39 = vsyncpa [#allocation20], 0  ;;  %s8410_s8 = smov 0  }
  0x1d LB: > { %s8246_s5 = smov [#allocation4]   ;;  %s9496_s30 = sadd.s32 4294967295, %s8244_s8   ;;  %s8244_s8 = sphi %s8410_s8, %s45_s8  }
  0x1e   : > { %s704_s9 = sshll.u32 %s8246_s5, 4  ;;  %p6262_p0 = scmp.ge.s32.totalorder %s8244_s8, 1  ;;  %s8424_s9 = int_to_ptr.vmem [resolvable:$true] %s704_s9 }
  0x1f   : > { %p669_p1 = scmp.lt.s32.totalorder %s8244_s8, 3  ;;  %p8420_p2 = scmp.eq.s32.totalorder %s9496_s30, 0 }
  0x20   : > { %s8247_s10 = smov [#allocation7]   ;;  %s8248_s11 = smov [#allocation10]  }
  0x21   : > { %s9533_s3 = scalar_select %p8420_p2, 1, 0 }
  0x22   : > { %p8426_p3 = pnand %p6262_p0, %p669_p1  ;;  %s731_s0 = sshll.u32 %s8247_s10, 4  ;;  %s8432_s0 = int_to_ptr.vmem [resolvable:$true] %s731_s0 }
  0x23   : > { %s756_s29 = sshll.u32 %s8248_s11, 4  ;;  %s8249_s7 = smov [#allocation13]   ;;  %s8440_s29 = int_to_ptr.vmem [resolvable:$true] %s756_s29 }
  0x24   : > { %s9534_s6 = scalar_select %p8426_p3, 1, 0 }
  0x25   : > { %p7313_p4 = pneg %p8426_p3  ;;  %s780_s12 = sshll.u32 %s8249_s7, 4  ;;  %s8442_s12 = int_to_ptr.vmem [resolvable:$true] %s780_s12 }
  0x26   : > { %s9536_s5 = sld [smem:[#allocation33_spill]] }
  0x27   : > { %p8436_p5 = pnand %p8420_p2, %p7313_p4 }
  0x29   : > { %p8452_p7 = pneg %p8436_p5 }
  0x2c   : > { %s7874_s10 = scalar_lea.hbm %s9536_s5, 192 }
  0x2d   : > { %p7875_p6 = scmp.ne.s32.totalorder %s9536_s5, %s7874_s10  ;;  %p7881_p10 = scmp.lt.u32.totalorder %s7874_s10, %s9536_s5 }
  0x2f   : > { %p7877_p8 = pnand %p8452_p7, %p7875_p6 }
  0x31   : > { %p7878_p9 = pneg %p7877_p8 }
  0x33   : > { %p7883_p11 = pnand %p7881_p10, %p7878_p9 }
  0x35   : > { %7886 = shalt.err (!%p7883_p11)
}
  0x36   : > { %s7887_s28 = scalar_lea.vmem %s8424_s9, 192  ;;  %p7895_p1 = scmp.lt.s32.totalorder %s8424_s9, %s8424_s9 }
  0x37   : > { %p7888_p12 = scmp.ne.s32.totalorder %s8424_s9, %s7887_s28  ;;  %p7896_p4 = scmp.lt.s32.totalorder %s7887_s28, %s7887_s28 }
  0x39   : > { %p7890_p13 = pnand %p7888_p12, %p8452_p7  ;;  %p7897_p6 = por %p7896_p4, %p7895_p1 }
  0x3b   : > { %p7891_p0 = pneg %p7890_p13 }
  0x3d   : > { %p7898_p8 = pnand %p7897_p6, %p7891_p0 }
  0x3f   : > { %7901 = shalt.err (!%p7898_p8)
}
  0x40   : > { %7319 = dma.hbm_to_vmem [thread:$0]  (!%p8436_p5), %s9536_s5, 192, %s8424_s9, [#allocation5]  }
  0x41   : > { %s9538_s10 = sld [smem:[#allocation36_spill]] }
  0x47   : > { %s7902_s7 = scalar_lea.hbm %s9538_s10, 16 }
  0x48   : > { %p7903_p9 = scmp.ne.s32.totalorder %s9538_s10, %s7902_s7  ;;  %p7909_p12 = scmp.lt.u32.totalorder %s7902_s7, %s9538_s10 }
  0x4a   : > { %p7905_p10 = pnand %p7903_p9, %p8452_p7 }
  0x4c   : > { %p7906_p11 = pneg %p7905_p10 }
  0x4e   : > { %p7911_p13 = pnand %p7909_p12, %p7906_p11 }
  0x50   : > { %7914 = shalt.err (!%p7911_p13)
}
  0x51   : > { %s7915_s9 = scalar_lea.vmem %s8432_s0, 16  ;;  %s7922_s25 = scalar_lea.vmem %s8432_s0, 32 }
  0x52   : > { %p7916_p0 = scmp.ne.s32.totalorder %s8432_s0, %s7915_s9  ;;  %p7923_p6 = scmp.lt.s32.totalorder %s8432_s0, %s8432_s0 }
  0x53   : > { %p7924_p8 = scmp.lt.s32.totalorder %s7922_s25, %s7915_s9 }
  0x54   : > { %p7918_p1 = pnand %p7916_p0, %p8452_p7 }
  0x55   : > { %p7925_p9 = por %p7924_p8, %p7923_p6 }
  0x56   : > { %p7919_p4 = pneg %p7918_p1 }
  0x58   : > { %p7926_p10 = pnand %p7925_p9, %p7919_p4 }
  0x5a   : > { %7929 = shalt.err (!%p7926_p10)
}
  0x5b   : > { %7325 = dma.hbm_to_vmem [thread:$0]  (!%p8436_p5), %s9538_s10, 16, %s8432_s0, [#allocation8]  }
  0x5c   : > { %s9539_s1 = sld [smem:[#allocation39_spill]] }
  0x62   : > { %s7930_s4 = scalar_lea.hbm %s9539_s1, 16 }
  0x63   : > { %p7931_p11 = scmp.ne.s32.totalorder %s9539_s1, %s7930_s4  ;;  %p7937_p0 = scmp.lt.u32.totalorder %s7930_s4, %s9539_s1 }
  0x65   : > { %p7933_p12 = pnand %p7931_p11, %p8452_p7 }
  0x67   : > { %p7934_p13 = pneg %p7933_p12 }
  0x69   : > { %p7939_p1 = pnand %p7937_p0, %p7934_p13 }
  0x6b   : > { %7942 = shalt.err (!%p7939_p1)
}
  0x6c   : > { %s7943_s0 = scalar_lea.vmem %s8440_s29, 16  ;;  %s7950_s23 = scalar_lea.vmem %s8440_s29, 32 }
  0x6d   : > { %p7944_p4 = scmp.ne.s32.totalorder %s8440_s29, %s7943_s0  ;;  %p7951_p9 = scmp.lt.s32.totalorder %s8440_s29, %s8440_s29 }
  0x6e   : > { %p7952_p10 = scmp.lt.s32.totalorder %s7950_s23, %s7943_s0 }
  0x6f   : > { %p7946_p6 = pnand %p7944_p4, %p8452_p7 }
  0x70   : > { %p7953_p11 = por %p7952_p10, %p7951_p9 }
  0x71   : > { %p7947_p8 = pneg %p7946_p6 }
  0x73   : > { %p7954_p12 = pnand %p7953_p11, %p7947_p8 }
  0x75   : > { %7957 = shalt.err (!%p7954_p12)
}
  0x76   : > { %7331 = dma.hbm_to_vmem [thread:$0]  (!%p8436_p5), %s9539_s1, 16, %s8440_s29, [#allocation11]  }
  0x77   : > { %s9540_s13 = sld [smem:[#allocation41_spill]] }
  0x7d   : > { %s7958_s7 = scalar_lea.hbm %s9540_s13, 16 }
  0x7e   : > { %p7959_p13 = scmp.ne.s32.totalorder %s9540_s13, %s7958_s7  ;;  %p7965_p4 = scmp.lt.u32.totalorder %s7958_s7, %s9540_s13 }
  0x80   : > { %p7961_p0 = pnand %p7959_p13, %p8452_p7 }
  0x82   : > { %p7962_p1 = pneg %p7961_p0 }
  0x84   : > { %p7967_p6 = pnand %p7965_p4, %p7962_p1 }
  0x86   : > { %7970 = shalt.err (!%p7967_p6)
}
  0x87   : > { %s7971_s29 = scalar_lea.vmem %s8442_s12, 16  ;;  %s7978_s23 = scalar_lea.vmem %s8442_s12, 32 }
  0x88   : > { %p7972_p8 = scmp.ne.s32.totalorder %s8442_s12, %s7971_s29  ;;  %p7979_p11 = scmp.lt.s32.totalorder %s8442_s12, %s8442_s12 }
  0x89   : > { %p7980_p12 = scmp.lt.s32.totalorder %s7978_s23, %s7971_s29 }
  0x8a   : > { %p7974_p9 = pnand %p7972_p8, %p8452_p7 }
  0x8b   : > { %p7981_p13 = por %p7980_p12, %p7979_p11 }
  0x8c   : > { %p7975_p10 = pneg %p7974_p9 }
  0x8e   : > { %p7982_p0 = pnand %p7981_p13, %p7975_p10 }
  0x90   : > { %7985 = shalt.err (!%p7982_p0)
}
  0x91   : > { %7337 = dma.hbm_to_vmem [thread:$0]  (!%p8436_p5), %s9540_s13, 16, %s8442_s12, [#allocation14]  }
  0x92   : > { %s8250_s30 = smov [#allocation16]   ;;  %s8251_s7 = smov [#allocation2]  }
  0x93   : > { %s812_s4 = sshll.u32 %s8250_s30, 4  ;;  %s690_s28 = sshll.u32 %s8251_s7, 4  ;;  %s813_s4 = int_to_ptr.vmem [resolvable:$true] %s812_s4  ;;  %s691_s28 = int_to_ptr.vmem [resolvable:$true] %s690_s28 }
  0x94   : > { %s9541_s18 = sld [smem:[#allocation42_spill]] }
  0x9a   : > { %s7986_s0 = scalar_lea.hbm %s9541_s18, 4096 }
  0x9b   : > { %p7987_p1 = scmp.ne.s32.totalorder %s9541_s18, %s7986_s0  ;;  %p7993_p8 = scmp.lt.u32.totalorder %s7986_s0, %s9541_s18 }
  0x9d   : > { %p7989_p4 = pnand %p7987_p1, %p8452_p7 }
  0x9f   : > { %p7990_p6 = pneg %p7989_p4 }
  0xa1   : > { %p7995_p9 = pnand %p7993_p8, %p7990_p6 }
  0xa3   : > { %7998 = shalt.err (!%p7995_p9)
}
  0xa4   : > { %s7999_s12 = scalar_lea.vmem %s813_s4, 4096  ;;  %p8007_p13 = scmp.lt.s32.totalorder %s813_s4, %s813_s4 }
  0xa5   : > { %p8000_p10 = scmp.ne.s32.totalorder %s813_s4, %s7999_s12  ;;  %p8008_p0 = scmp.lt.s32.totalorder %s7999_s12, %s7999_s12 }
  0xa7   : > { %p8002_p11 = pnand %p8000_p10, %p8452_p7  ;;  %p8009_p2 = por %p8008_p0, %p8007_p13 }
  0xa9   : > { %p8003_p12 = pneg %p8002_p11 }
  0xab   : > { %p8010_p3 = pnand %p8009_p2, %p8003_p12 }
  0xad   : > { %8013 = shalt.err (!%p8010_p3)
}
  0xae   : > { %s9502_s27 = smov 64   ;;  %s9504_s30 = smov 4  }
  0xaf   : > { %7343 = dma.hbm_to_vmem [thread:$0]  (!%p8436_p5), %s9541_s18, 4096, %s813_s4, [#allocation17], %s9502_s27, %s9502_s27, %s9504_s30  }
  0xb0   : > { %s9542_s0 = sld [smem:[#allocation32_spill]] }
  0xb6   : > { %s8014_s29 = scalar_lea.hbm %s9542_s0, 12288 }
  0xb7   : > { %p8015_p2 = scmp.ne.s32.totalorder %s9542_s0, %s8014_s29  ;;  %p8021_p4 = scmp.lt.u32.totalorder %s8014_s29, %s9542_s0 }
  0xb9   : > { %p8017_p3 = pnand %p8015_p2, %p8452_p7 }
  0xbb   : > { %p8018_p1 = pneg %p8017_p3 }
  0xbd   : > { %p8023_p6 = pnand %p8021_p4, %p8018_p1 }
  0xbf   : > { %8026 = shalt.err (!%p8023_p6)
}
  0xc0   : > { %s8027_s1 = scalar_lea.vmem %s691_s28, 12288  ;;  %p8035_p11 = scmp.lt.s32.totalorder %s691_s28, %s691_s28 }
  0xc1   : > { %p8028_p8 = scmp.ne.s32.totalorder %s691_s28, %s8027_s1  ;;  %p8036_p12 = scmp.lt.s32.totalorder %s8027_s1, %s8027_s1 }
  0xc3   : > { %p8030_p9 = pnand %p8028_p8, %p8452_p7  ;;  %p8037_p13 = por %p8036_p12, %p8035_p11 }
  0xc5   : > { %p8031_p10 = pneg %p8030_p9 }
  0xc7   : > { %p8038_p0 = pnand %p8037_p13, %p8031_p10 }
  0xc9   : > { %8041 = shalt.err (!%p8038_p0)
}
  0xca   : > { %s9507_s4 = smov 768   ;;  %s9508_s7 = smov 48  }
  0xcb   : > { %7316 = dma.hbm_to_vmem [thread:$0]  (!%p8436_p5), %s9542_s0, 12288, %s691_s28, [#allocation3], %s9507_s4, %s9507_s4, %s9508_s7  }
  0xcc   : > { %s8256_s25 = smov [#allocation6]   ;;  %s8257_s23 = smov [#allocation9]  }
  0xcd   : > { %s714_s29 = sshll.u32 %s8256_s25, 4  ;;  %s742_s26 = sshll.u32 %s8257_s23, 4  ;;  %s715_s29 = int_to_ptr.vmem [resolvable:$true] %s714_s29  ;;  %s743_s26 = int_to_ptr.vmem [resolvable:$true] %s742_s26 }
  0xce   : > { %s9543_s27 = sld [smem:[#allocation34_spill]] }
  0xd4   : > { %s8042_s30 = scalar_lea.hbm %s9543_s27, 4096 }
  0xd5   : > { %p8043_p2 = scmp.ne.s32.totalorder %s9543_s27, %s8042_s30  ;;  %p8049_p4 = scmp.lt.u32.totalorder %s8042_s30, %s9543_s27 }
  0xd7   : > { %p8045_p3 = pnand %p8043_p2, %p8452_p7 }
  0xd9   : > { %p8046_p1 = pneg %p8045_p3 }
  0xdb   : > { %p8051_p6 = pnand %p8049_p4, %p8046_p1 }
  0xdd   : > { %8054 = shalt.err (!%p8051_p6)
}
  0xde   : > { %s8055_s28 = scalar_lea.vmem %s715_s29, 4096  ;;  %p8063_p11 = scmp.lt.s32.totalorder %s715_s29, %s715_s29 }
  0xdf   : > { %p8056_p8 = scmp.ne.s32.totalorder %s715_s29, %s8055_s28  ;;  %p8064_p12 = scmp.lt.s32.totalorder %s8055_s28, %s8055_s28 }
  0xe1   : > { %p8058_p9 = pnand %p8056_p8, %p8452_p7  ;;  %p8065_p13 = por %p8064_p12, %p8063_p11 }
  0xe3   : > { %p8059_p10 = pneg %p8058_p9 }
  0xe5   : > { %p8066_p0 = pnand %p8065_p13, %p8059_p10 }
  0xe7   : > { %8069 = shalt.err (!%p8066_p0)
}
  0xe8   : > { %s9544_s13 = smov 4   ;;  %s9545_s10 = smov 64  }
  0xe9   : > { %7322 = dma.hbm_to_vmem [thread:$0]  (!%p8436_p5), %s9543_s27, 4096, %s715_s29, [#allocation5], %s9545_s10, %s9545_s10, %s9544_s13  }
  0xea   : > { %s9546_s9 = sld [smem:[#allocation37_spill]] }
  0xf0   : > { %s8070_s25 = scalar_lea.hbm %s9546_s9, 16 }
  0xf1   : > { %p8071_p2 = scmp.ne.s32.totalorder %s9546_s9, %s8070_s25  ;;  %p8077_p4 = scmp.lt.u32.totalorder %s8070_s25, %s9546_s9 }
  0xf3   : > { %p8073_p3 = pnand %p8071_p2, %p8452_p7 }
  0xf5   : > { %p8074_p1 = pneg %p8073_p3 }
  0xf7   : > { %p8079_p6 = pnand %p8077_p4, %p8074_p1 }
  0xf9   : > { %8082 = shalt.err (!%p8079_p6)
}
  0xfa   : > { %s8083_s18 = scalar_lea.vmem %s743_s26, 16  ;;  %s8090_s29 = scalar_lea.vmem %s743_s26, 32 }
  0xfb   : > { %p8084_p8 = scmp.ne.s32.totalorder %s743_s26, %s8083_s18  ;;  %p8091_p11 = scmp.lt.s32.totalorder %s743_s26, %s743_s26 }
  0xfc   : > { %p8092_p12 = scmp.lt.s32.totalorder %s8090_s29, %s8083_s18 }
  0xfd   : > { %p8086_p9 = pnand %p8084_p8, %p8452_p7 }
  0xfe   : > { %p8093_p13 = por %p8092_p12, %p8091_p11 }
  0xff   : > { %p8087_p10 = pneg %p8086_p9 }
 0x101   : > { %p8094_p0 = pnand %p8093_p13, %p8087_p10 }
 0x103   : > { %8097 = shalt.err (!%p8094_p0)
}
 0x104   : > { %7328 = dma.hbm_to_vmem [thread:$0]  (!%p8436_p5), %s9546_s9, 16, %s743_s26, [#allocation8]  }
 0x105   : > { %s8258_s5 = smov [#allocation12]   ;;  %s8259_s23 = smov [#allocation15]  }
 0x106   : > { %s766_s25 = sshll.u32 %s8258_s5, 4  ;;  %s796_s12 = sshll.u32 %s8259_s23, 4  ;;  %s767_s25 = int_to_ptr.vmem [resolvable:$true] %s766_s25  ;;  %s797_s12 = int_to_ptr.vmem [resolvable:$true] %s796_s12 }
 0x107   : > { %s9547_s4 = sld [smem:[#allocation40_spill]] }
 0x10d   : > { %s8098_s7 = scalar_lea.hbm %s9547_s4, 1024 }
 0x10e   : > { %p8099_p2 = scmp.ne.s32.totalorder %s9547_s4, %s8098_s7  ;;  %p8105_p4 = scmp.lt.u32.totalorder %s8098_s7, %s9547_s4 }
 0x110   : > { %p8101_p3 = pnand %p8099_p2, %p8452_p7 }
 0x112   : > { %p8102_p1 = pneg %p8101_p3 }
 0x114   : > { %p8107_p6 = pnand %p8105_p4, %p8102_p1 }
 0x116   : > { %8110 = shalt.err (!%p8107_p6)
}
 0x117   : > { %s8111_s26 = scalar_lea.vmem %s767_s25, 1024  ;;  %p8119_p11 = scmp.lt.s32.totalorder %s767_s25, %s767_s25 }
 0x118   : > { %p8112_p8 = scmp.ne.s32.totalorder %s767_s25, %s8111_s26  ;;  %p8120_p12 = scmp.lt.s32.totalorder %s8111_s26, %s8111_s26 }
 0x11a   : > { %p8114_p9 = pnand %p8112_p8, %p8452_p7  ;;  %p8121_p13 = por %p8120_p12, %p8119_p11 }
 0x11c   : > { %p8115_p10 = pneg %p8114_p9 }
 0x11e   : > { %p8122_p0 = pnand %p8121_p13, %p8115_p10 }
 0x120   : > { %8125 = shalt.err (!%p8122_p0)
}
 0x121   : > { %7334 = dma.hbm_to_vmem [thread:$0]  (!%p8436_p5), %s9547_s4, 1024, %s767_s25, [#allocation11], %s9545_s10, %s9545_s10, %s9544_s13  }
 0x122   : > { %s8126_s23 = scalar_lea.hbm %s9473_s16, 12288 }
 0x123   : > { %p8127_p2 = scmp.ne.s32.totalorder %s9473_s16, %s8126_s23  ;;  %p8133_p4 = scmp.lt.u32.totalorder %s8126_s23, %s9473_s16 }
 0x125   : > { %p8129_p3 = pnand %p8127_p2, %p8452_p7 }
 0x127   : > { %p8130_p1 = pneg %p8129_p3 }
 0x129   : > { %p8135_p6 = pnand %p8133_p4, %p8130_p1 }
 0x12b   : > { %8138 = shalt.err (!%p8135_p6)
}
 0x12c   : > { %s8139_s21 = scalar_lea.vmem %s797_s12, 12288  ;;  %p8147_p11 = scmp.lt.s32.totalorder %s797_s12, %s797_s12 }
 0x12d   : > { %p8140_p8 = scmp.ne.s32.totalorder %s797_s12, %s8139_s21  ;;  %p8148_p12 = scmp.lt.s32.totalorder %s8139_s21, %s8139_s21 }
 0x12f   : > { %p8142_p9 = pnand %p8140_p8, %p8452_p7  ;;  %p8149_p13 = por %p8148_p12, %p8147_p11 }
 0x131   : > { %p8143_p10 = pneg %p8142_p9 }
 0x133   : > { %p8150_p0 = pnand %p8149_p13, %p8143_p10 }
 0x135   : > { %8153 = shalt.err (!%p8150_p0)
}
 0x136   : > { %s9548_s25 = smov 48   ;;  %s9549_s26 = smov 768  }
 0x137   : > { %7340 = dma.hbm_to_vmem [thread:$0]  (!%p8436_p5), %s9473_s16, 12288, %s797_s12, [#allocation14], %s9549_s26, %s9549_s26, %s9548_s25  }
 0x138   : > { %s8260_s30 = smov [#allocation18]   ;;  %s8261_s23 = smov [#allocation19]  }
 0x139   : > { %s834_s5 = sshll.u32 %s8260_s30, 4  ;;  %s850_s1 = sshll.u32 %s8261_s23, 4  ;;  %s835_s5 = int_to_ptr.vmem [resolvable:$true] %s834_s5  ;;  %s851_s1 = int_to_ptr.vmem [resolvable:$true] %s850_s1 }
 0x13a   : > { %s8154_s29 = scalar_lea.hbm %s9479_s22, 1024 }
 0x13b   : > { %p8155_p2 = scmp.ne.s32.totalorder %s9479_s22, %s8154_s29  ;;  %p8161_p4 = scmp.lt.u32.totalorder %s8154_s29, %s9479_s22 }
 0x13d   : > { %p8157_p3 = pnand %p8155_p2, %p8452_p7 }
 0x13f   : > { %p8158_p1 = pneg %p8157_p3 }
 0x141   : > { %p8163_p6 = pnand %p8161_p4, %p8158_p1 }
 0x143   : > { %8166 = shalt.err (!%p8163_p6)
}
 0x144   : > { %s8167_s12 = scalar_lea.vmem %s835_s5, 1024  ;;  %p8175_p11 = scmp.lt.s32.totalorder %s835_s5, %s835_s5 }
 0x145   : > { %p8168_p8 = scmp.ne.s32.totalorder %s835_s5, %s8167_s12  ;;  %p8176_p12 = scmp.lt.s32.totalorder %s8167_s12, %s8167_s12 }
 0x147   : > { %p8170_p9 = pnand %p8168_p8, %p8452_p7  ;;  %p8177_p13 = por %p8176_p12, %p8175_p11 }
 0x149   : > { %p8171_p10 = pneg %p8170_p9 }
 0x14b   : > { %p8178_p0 = pnand %p8177_p13, %p8171_p10 }
 0x14d   : > { %8181 = shalt.err (!%p8178_p0)
}
 0x14e   : > { %7346 = dma.hbm_to_vmem [thread:$0]  (!%p8436_p5), %s9479_s22, 1024, %s835_s5, [#allocation17], %s9545_s10, %s9545_s10, %s9544_s13  }
 0x14f   : > { %s8182_s7 = scalar_lea.hbm %s9481_s24, 1024 }
 0x150   : > { %p8183_p2 = scmp.ne.s32.totalorder %s9481_s24, %s8182_s7  ;;  %p8189_p4 = scmp.lt.u32.totalorder %s8182_s7, %s9481_s24 }
 0x152   : > { %p8185_p3 = pnand %p8183_p2, %p8452_p7 }
 0x154   : > { %p8186_p1 = pneg %p8185_p3 }
 0x156   : > { %p8191_p6 = pnand %p8189_p4, %p8186_p1 }
 0x158   : > { %8194 = shalt.err (!%p8191_p6)
}
 0x159   : > { %s8195_s29 = scalar_lea.vmem %s851_s1, 1024  ;;  %p8203_p11 = scmp.lt.s32.totalorder %s851_s1, %s851_s1 }
 0x15a   : > { %p8196_p8 = scmp.ne.s32.totalorder %s851_s1, %s8195_s29  ;;  %p8204_p12 = scmp.lt.s32.totalorder %s8195_s29, %s8195_s29 }
 0x15c   : > { %p8198_p9 = pnand %p8196_p8, %p8452_p7  ;;  %p8205_p13 = por %p8204_p12, %p8203_p11 }
 0x15e   : > { %p8199_p10 = pneg %p8198_p9 }
 0x160   : > { %p8206_p0 = pnand %p8205_p13, %p8199_p10 }
 0x162   : > { %8209 = shalt.err (!%p8206_p0)
}
 0x163   : > { %7349 = dma.hbm_to_vmem [thread:$0]  (!%p8436_p5), %s9481_s24, 1024, %s851_s1, [#allocation20], %s9545_s10, %s9545_s10, %s9544_s13  }
 0x164   : > { %p9550_p2 = scmp.ne.s32.totalorder %s9534_s6, 0 }
 0x165   : > { %p9551_p7 = scmp.ne.s32.totalorder (!%p9550_p2), %s9533_s3, 0 }
 0x166   : > { %884 = sbr.rel (%p9550_p2) target bundleno = 8547 (0x2163), region = 132 }
 0x16d   : > { %8215 = dma.done.wait (%p9551_p7), [#allocation3], 12288  }
 0x16e   : > { %8217 = vsyncadd (%p9551_p7), [#allocation3], 4294955008 }
 0x16f   : > { %8219 = dma.done.wait (%p9551_p7), [#allocation5], 4288  }
 0x170   : > { %8221 = vsyncadd (%p9551_p7), [#allocation5], 4294963008 }
 0x171   : > { %8223 = dma.done.wait (%p9551_p7), [#allocation8], 32  }
 0x172   : > { %8225 = vsyncadd (%p9551_p7), [#allocation8], 4294967264 }
 0x173   : > { %8227 = dma.done.wait (%p9551_p7), [#allocation11], 1040  }
 0x174   : > { %8229 = vsyncadd (%p9551_p7), [#allocation11], 4294966256 }
 0x175   : > { %8231 = dma.done.wait (%p9551_p7), [#allocation14], 12304  }
 0x176   : > { %8233 = vsyncadd (%p9551_p7), [#allocation14], 4294954992 }
 0x177   : > { %8235 = dma.done.wait (%p9551_p7), [#allocation17], 5120  }
 0x178   : > { %8237 = vsyncadd (%p9551_p7), [#allocation17], 4294962176 }
 0x179   : > { %8239 = dma.done.wait (%p9551_p7), [#allocation20], 1024  }
 0x17a   : > { %8241 = vsyncadd (%p9551_p7), [#allocation20], 4294966272  ;;  %s9552_s6 = sadd.s32 4294967295, %s8244_s8   ;;  %v8262_v0 = vmov 0.0   ;;  %vm8263_vm0 = vmmov 0   ;;  %s9553_s10 = sld [smem:[#allocation29_spill]] }
 0x17b   : > { %s6289_s2 = sshll.u32 %s9552_s6, 1  ;;  %6813 = vmatprep.subr.bf16.mxu0 %v8262_v0  ;;  %6829 = vmatprep.mubr.msk.bf16.mxu0 %vm8263_vm0, %v8262_v0  ;;  %s9554_s26 = sld [smem:[#allocation28_spill]]  ;;  %v7410_v4 = vld [vmem:[#allocation2 + $0x4] ss:$48 sps:$4 sm:$0xff]   ;;  %v7415_v6 = vld [vmem:[#allocation2] ss:$48 sps:$4 sm:$0xff]  }
 0x17c   : > { %p1003_p5 = scmp.lt.s32.totalorder %s6289_s2, 3  ;;  %1780 = vmatprep.subr.bf16.mxu1 %v7410_v4  ;;  %v7416_v7 = vld [vmem:[#allocation2 + $0x64] ss:$48 sps:$4 sm:$0xff]   ;;  %v7421_v9 = vld [vmem:[#allocation2 + $0x60] ss:$48 sps:$4 sm:$0xff]   ;;  %v8264_v44 = vmov 0  }
 0x17d   : > { %1781 = vmatpush1.bf16.msra.mxu1 %v7415_v6  ;;  %v7422_v10 = vld [vmem:[#allocation2 + $0xc4] ss:$48 sps:$4 sm:$0xff]   ;;  %v7427_v12 = vld [vmem:[#allocation2 + $0xc0] ss:$48 sps:$4 sm:$0xff]   ;;  %v7414_v19 = vld [vmem:[#allocation2 + $0xc] ss:$48 sps:$4 sm:$0xff]   ;;  %1812 = vmatprep.mubr.bf16.mxu1 %v8264_v44 }
 0x17e   : > { %s9566_s2 = smov (!%p1003_p5, %s6289_s2), 3  ;;  %1782 = vmatprep.subr.bf16.mxu1 %v7416_v7  ;;  %v7428_v13 = vld [vmem:[#allocation2 + $0x124] ss:$48 sps:$4 sm:$0xff]   ;;  %v7433_v15 = vld [vmem:[#allocation2 + $0x120] ss:$48 sps:$4 sm:$0xff]   ;;  %s9555_s12 = sld [smem:[#allocation30_spill]] }
 0x17f   : > { %s6290_s0 = sshll.u32 %s9566_s2, 2  ;;  %v7434_v16 = vld [vmem:[#allocation2 + $0x184] ss:$48 sps:$4 sm:$0xff]   ;;  %v7439_v18 = vld [vmem:[#allocation2 + $0x180] ss:$48 sps:$4 sm:$0xff]   ;;  %s9556_s25 = sld [smem:[#allocation31_spill]] }
 0x180   : > { %v7401_v1 = vld [vmem:[%s9553_s10] sm:$0xff]   ;;  %v7402_v2 = vld [vmem:[%s9553_s10 + $0x8] sm:$0xff]   ;;  %v7403_v3 = vld [vmem:[%s9553_s10 + $0x10] sm:$0xff]   ;;  %vm2154_vm1 = vcmask 1043456   ;;  %vm2126_vm2 = vcmask 64512   ;;  %s9557_s28 = sld [smem:[#allocation35_spill]] }
 0x181   : > { %6814 = vmatpush3.bf16.msra.mxu0 %v7401_v1  ;;  %s8764_s7 = scalar_lea.vmem %s9554_s26, %s6290_s0  ;;  %v7404_v5 = vld [vmem:[%s9553_s10 + $0x18] sm:$0xff]   ;;  %v7405_v8 = vld [vmem:[%s9553_s10 + $0x20] sm:$0xff]   ;;  %v7406_v11 = vld [vmem:[%s9553_s10 + $0x28] sm:$0xff]   ;;  %1783 = vmatpush1.bf16.msra.mxu1 %v7421_v9  ;;  %s9558_s5 = sld [smem:[#allocation38_spill]] }
 0x182   : > { %6815 = vmatprep.subr.bf16.mxu0 %v8262_v0  ;;  %1784 = vmatprep.subr.bf16.mxu1 %v7422_v10  ;;  %v7407_v14 = vld [vmem:[%s9553_s10 + $0x30] sm:$0xff]   ;;  %v7408_v17 = vld [vmem:[%s9553_s10 + $0x38] sm:$0xff]   ;;  %v7409_v21 = vld [vmem:[%s8764_s7] sm:$0xff]   ;;  %s9559_s23 = sld [smem:[#allocation43_spill]]  ;;  %s9560_s29 = sld [smem:[#allocation44_spill]] }
 0x183   : > { %v7440_v20 = vld [vmem:[#allocation2 + $0x1e4] ss:$48 sps:$4 sm:$0xff]   ;;  %v7445_v22 = vld [vmem:[#allocation2 + $0x1e0] ss:$48 sps:$4 sm:$0xff]   ;;  %v7412_v23 = vld [vmem:[#allocation2 + $0x8] ss:$48 sps:$4 sm:$0xff]  }
 0x184   : > { %v7420_v24 = vld [vmem:[#allocation2 + $0x6c] ss:$48 sps:$4 sm:$0xff]   ;;  %v7418_v25 = vld [vmem:[#allocation2 + $0x68] ss:$48 sps:$4 sm:$0xff]   ;;  %v7446_v34 = vld [vmem:[#allocation2 + $0x244] ss:$48 sps:$4 sm:$0xff]  }
 0x185   : > { %6816 = vmatpush3.bf16.msra.mxu0 %v7402_v2  ;;  %1785 = vmatpush1.bf16.msra.mxu1 %v7427_v12  ;;  %v7426_v26 = vld [vmem:[#allocation2 + $0xcc] ss:$48 sps:$4 sm:$0xff]   ;;  %v7424_v27 = vld [vmem:[#allocation2 + $0xc8] ss:$48 sps:$4 sm:$0xff]   ;;  %v7451_v37 = vld [vmem:[#allocation2 + $0x240] ss:$48 sps:$4 sm:$0xff]  }
 0x186   : > { %6817 = vmatprep.subr.bf16.mxu0 %v8262_v0  ;;  %1786 = vmatprep.subr.bf16.mxu1 %v7428_v13  ;;  %v7432_v28 = vld [vmem:[#allocation2 + $0x12c] ss:$48 sps:$4 sm:$0xff]   ;;  %v7430_v29 = vld [vmem:[#allocation2 + $0x128] ss:$48 sps:$4 sm:$0xff]   ;;  %v7452_v38 = vld [vmem:[#allocation2 + $0x2a4] ss:$48 sps:$4 sm:$0xff]  }
 0x187   : > { %v7438_v30 = vld [vmem:[#allocation2 + $0x18c] ss:$48 sps:$4 sm:$0xff]   ;;  %v7436_v31 = vld [vmem:[#allocation2 + $0x188] ss:$48 sps:$4 sm:$0xff]   ;;  %v7457_v41 = vld [vmem:[#allocation2 + $0x2a0] ss:$48 sps:$4 sm:$0xff]  }
 0x188   : > { %v7444_v32 = vld [vmem:[#allocation2 + $0x1ec] ss:$48 sps:$4 sm:$0xff]   ;;  %v7442_v33 = vld [vmem:[#allocation2 + $0x1e8] ss:$48 sps:$4 sm:$0xff]   ;;  %v7460_v42 = vld [vmem:[#allocation2 + $0x14] ss:$48 sps:$4 sm:$0xff]  }
 0x189   : > { %6818 = vmatpush3.bf16.msra.mxu0 %v7403_v3  ;;  %1787 = vmatpush1.bf16.msra.mxu1 %v7433_v15  ;;  %v7450_v35 = vld [vmem:[#allocation2 + $0x24c] ss:$48 sps:$4 sm:$0xff]   ;;  %v7448_v36 = vld [vmem:[#allocation2 + $0x248] ss:$48 sps:$4 sm:$0xff]   ;;  %v1136_v51 = vld [vmem:[%s9556_s25 + $0x8] sm:$0xff]  ;;  %s9561_s11 = sld [smem:[#allocation45_spill]] }
 0x18a   : > { %6819 = vmatprep.subr.bf16.mxu0 %v8262_v0  ;;  %1788 = vmatprep.subr.bf16.mxu1 %v7434_v16  ;;  %v7456_v39 = vld [vmem:[#allocation2 + $0x2ac] ss:$48 sps:$4 sm:$0xff]   ;;  %v7454_v40 = vld [vmem:[#allocation2 + $0x2a8] ss:$48 sps:$4 sm:$0xff]   ;;  %v7458_v56 = vld [vmem:[#allocation2 + $0x10] ss:$48 sps:$4 sm:$0xff]  }
 0x18b   : > { %v7463_v43 = vld [vmem:[#allocation2 + $0x1c] ss:$48 sps:$4 sm:$0xff]   ;;  %v6293_v45 = vld [vmem:[%s9555_s12] ss:$0 sm:$0xff]  ;;  %v7466_v59 = vld [vmem:[#allocation2 + $0x74] ss:$48 sps:$4 sm:$0xff]  }
 0x18c   : > { %v1135_v49 = vld [vmem:[%s9556_s25] sm:$0xff]  ;;  %v7464_v61 = vld [vmem:[#allocation2 + $0x70] ss:$48 sps:$4 sm:$0xff]   ;;  %v7472_v63 = vld [vmem:[#allocation2 + $0xd4] ss:$48 sps:$4 sm:$0xff]   ;;  %s9562_s1 = sld [smem:[#allocation46_spill]] }
 0x18d   : > { %6820 = vmatpush3.bf16.msra.mxu0 %v7404_v5  ;;  %1789 = vmatpush1.bf16.msra.mxu1 %v7439_v18  ;;  %v7461_v57 = vld [vmem:[#allocation2 + $0x18] ss:$48 sps:$4 sm:$0xff]   ;;  %v7469_v60 = vld [vmem:[#allocation2 + $0x7c] ss:$48 sps:$4 sm:$0xff]   ;;  %v7470_v2 = vld [vmem:[#allocation2 + $0xd0] ss:$48 sps:$4 sm:$0xff]  }
 0x18e   : > { %6821 = vmatprep.subr.bf16.mxu0 %v8262_v0  ;;  %1790 = vmatprep.subr.bf16.mxu1 %v7440_v20  ;;  %v7467_v62 = vld [vmem:[#allocation2 + $0x78] ss:$48 sps:$4 sm:$0xff]   ;;  %v7475_v1 = vld [vmem:[#allocation2 + $0xdc] ss:$48 sps:$4 sm:$0xff]   ;;  %v7478_v4 = vld [vmem:[#allocation2 + $0x134] ss:$48 sps:$4 sm:$0xff]  }
 0x18f   : > { %v7473_v3 = vld [vmem:[#allocation2 + $0xd8] ss:$48 sps:$4 sm:$0xff]   ;;  %v7481_v5 = vld [vmem:[#allocation2 + $0x13c] ss:$48 sps:$4 sm:$0xff]   ;;  %v7476_v6 = vld [vmem:[#allocation2 + $0x130] ss:$48 sps:$4 sm:$0xff]  }
 0x190   : > { %v7479_v7 = vld [vmem:[#allocation2 + $0x138] ss:$48 sps:$4 sm:$0xff]   ;;  %v7487_v9 = vld [vmem:[#allocation2 + $0x19c] ss:$48 sps:$4 sm:$0xff]   ;;  %v7482_v10 = vld [vmem:[#allocation2 + $0x190] ss:$48 sps:$4 sm:$0xff]  }
 0x191   : > { %6822 = vmatpush3.bf16.msra.mxu0 %v7405_v8  ;;  %1791 = vmatpush1.bf16.msra.mxu1 %v7445_v22  ;;  %v7484_v8 = vld [vmem:[#allocation2 + $0x194] ss:$48 sps:$4 sm:$0xff]   ;;  %v7493_v13 = vld [vmem:[#allocation2 + $0x1fc] ss:$48 sps:$4 sm:$0xff]   ;;  %v7491_v15 = vld [vmem:[#allocation2 + $0x1f8] ss:$48 sps:$4 sm:$0xff]  }
 0x192   : > { %6823 = vmatprep.subr.bf16.mxu0 %v8262_v0  ;;  %1792 = vmatprep.subr.bf16.mxu1 %v7446_v34  ;;  %v7490_v12 = vld [vmem:[#allocation2 + $0x1f4] ss:$48 sps:$4 sm:$0xff]   ;;  %v7494_v18 = vld [vmem:[#allocation2 + $0x250] ss:$48 sps:$4 sm:$0xff]   ;;  %s9563_s9 = sld [smem:[#allocation47_spill]]  ;;  %s9564_s30 = sld [smem:[#allocation48_spill]] }
 0x193   : > { %v7496_v16 = vld [vmem:[#allocation2 + $0x254] ss:$48 sps:$4 sm:$0xff]   ;;  %v7500_v22 = vld [vmem:[#allocation2 + $0x2b0] ss:$48 sps:$4 sm:$0xff]  }
 0x194   : > { %v7502_v20 = vld [vmem:[#allocation2 + $0x2b4] ss:$48 sps:$4 sm:$0xff]   ;;  %v7518_v34 = vld [vmem:[#allocation2 + $0xe0] ss:$48 sps:$4 sm:$0xff]  }
 0x195   : > { %6824 = vmatpush3.bf16.msra.mxu0 %v7406_v11  ;;  %1793 = vmatpush1.bf16.msra.mxu1 %v7451_v37  ;;  %v7485_v11 = vld [vmem:[#allocation2 + $0x198] ss:$48 sps:$4 sm:$0xff]   ;;  %v7529_v37 = vld [vmem:[#allocation2 + $0x14c] ss:$48 sps:$4 sm:$0xff]  }
 0x196   : > { %6825 = vmatprep.subr.bf16.mxu0 %v8262_v0  ;;  %1794 = vmatprep.subr.bf16.mxu1 %v7452_v38  ;;  %v7524_v38 = vld [vmem:[#allocation2 + $0x140] ss:$48 sps:$4 sm:$0xff]  }
 0x199   : > { %6826 = vmatpush3.bf16.msra.mxu0 %v7407_v14  ;;  %1795 = vmatpush1.bf16.msra.mxu1 %v7457_v41  ;;  %v7488_v14 = vld [vmem:[#allocation2 + $0x1f0] ss:$48 sps:$4 sm:$0xff]   ;;  %v7535_v41 = vld [vmem:[#allocation2 + $0x1ac] ss:$48 sps:$4 sm:$0xff]  }
 0x19a   : > { %6827 = vmatprep.subr.bf16.mxu0 %v8262_v0  ;;  %1866 = vmatprep.subr.bf16.mxu1 %v7460_v42  ;;  %v7530_v42 = vld [vmem:[#allocation2 + $0x1a0] ss:$48 sps:$4 sm:$0xff]  }
 0x19d   : > { %6828 = vmatpush3.bf16.msra.mxu0 %v7408_v17  ;;  %v7499_v17 = vld [vmem:[#allocation2 + $0x25c] ss:$48 sps:$4 sm:$0xff]  }
 0x19e   : > { %1823 = vmatprep.subr.bf16.mxu0 %v7414_v19  ;;  %v7497_v19 = vld [vmem:[#allocation2 + $0x258] ss:$48 sps:$4 sm:$0xff]  }
 0x1a0   : > { %6830 = vmatmul.mubr.bf16.vlgmr.msra.gmra.mrb[0].mxu0 %v7409_v21  ;;  %v7505_v21 = vld [vmem:[#allocation2 + $0x2bc] ss:$48 sps:$4 sm:$0xff]  }
 0x1a1   : > { %1824 = vmatpush1.bf16.msra.mxu0 %v7412_v23  ;;  %1855 = vmatprep.mubr.bf16.mxu0 %v8264_v44  ;;  %v7503_v23 = vld [vmem:[#allocation2 + $0x2b8] ss:$48 sps:$4 sm:$0xff]  }
 0x1a2   : > { %1825 = vmatprep.subr.bf16.mxu0 %v7420_v24  ;;  %v7508_v24 = vld [vmem:[#allocation2 + $0x24] ss:$48 sps:$4 sm:$0xff]  }
 0x1a5   : > { %1826 = vmatpush1.bf16.msra.mxu0 %v7418_v25  ;;  %v7511_v25 = vld [vmem:[#allocation2 + $0x2c] ss:$48 sps:$4 sm:$0xff]  }
 0x1a6   : > { %1827 = vmatprep.subr.bf16.mxu0 %v7426_v26  ;;  %v7506_v26 = vld [vmem:[#allocation2 + $0x20] ss:$48 sps:$4 sm:$0xff]  }
 0x1a9   : > { %1828 = vmatpush1.bf16.msra.mxu0 %v7424_v27  ;;  %v7509_v27 = vld [vmem:[#allocation2 + $0x28] ss:$48 sps:$4 sm:$0xff]  }
 0x1aa   : > { %1829 = vmatprep.subr.bf16.mxu0 %v7432_v28  ;;  %v7514_v28 = vld [vmem:[#allocation2 + $0x84] ss:$48 sps:$4 sm:$0xff]  }
 0x1ad   : > { %1830 = vmatpush1.bf16.msra.mxu0 %v7430_v29  ;;  %v7517_v29 = vld [vmem:[#allocation2 + $0x8c] ss:$48 sps:$4 sm:$0xff]  }
 0x1ae   : > { %1831 = vmatprep.subr.bf16.mxu0 %v7438_v30  ;;  %v7512_v30 = vld [vmem:[#allocation2 + $0x80] ss:$48 sps:$4 sm:$0xff]  }
 0x1b1   : > { %1832 = vmatpush1.bf16.msra.mxu0 %v7436_v31  ;;  %v7515_v31 = vld [vmem:[#allocation2 + $0x88] ss:$48 sps:$4 sm:$0xff]  }
 0x1b2   : > { %1833 = vmatprep.subr.bf16.mxu0 %v7444_v32  ;;  %v7520_v32 = vld [vmem:[#allocation2 + $0xe4] ss:$48 sps:$4 sm:$0xff]  }
 0x1b5   : > { %1834 = vmatpush1.bf16.msra.mxu0 %v7442_v33  ;;  %v7523_v33 = vld [vmem:[#allocation2 + $0xec] ss:$48 sps:$4 sm:$0xff]  }
 0x1b6   : > { %1835 = vmatprep.subr.bf16.mxu0 %v7450_v35  ;;  %v7521_v35 = vld [vmem:[#allocation2 + $0xe8] ss:$48 sps:$4 sm:$0xff]  }
 0x1b9   : > { %1836 = vmatpush1.bf16.msra.mxu0 %v7448_v36  ;;  %v7526_v36 = vld [vmem:[#allocation2 + $0x144] ss:$48 sps:$4 sm:$0xff]  }
 0x1ba   : > { %1837 = vmatprep.subr.bf16.mxu0 %v7456_v39  ;;  %v7527_v39 = vld [vmem:[#allocation2 + $0x148] ss:$48 sps:$4 sm:$0xff]  }
 0x1bd   : > { %1838 = vmatpush1.bf16.msra.mxu0 %v7454_v40  ;;  %v7532_v40 = vld [vmem:[#allocation2 + $0x1a4] ss:$48 sps:$4 sm:$0xff]  }
 0x1be   : > { %1909 = vmatprep.subr.bf16.mxu0 %v7463_v43  ;;  %v7533_v43 = vld [vmem:[#allocation2 + $0x1a8] ss:$48 sps:$4 sm:$0xff]  }
 0x273   : > { %v1128_v46 = vpop.f32.mrb[0].mxu0 }
 0x274   : > { %v1129_v47 = vadd.f32 %v6293_v45, %v1128_v46  ;;  %v6831_v48 = vpop.f32.mrb[1].mxu0  ;;  %v7541_v46 = vld [vmem:[#allocation2 + $0x20c] ss:$48 sps:$4 sm:$0xff]  }
 0x275   : > { %v1131_v50 = vpop.f32.mrb[2].mxu0  ;;  %v7539_v48 = vld [vmem:[#allocation2 + $0x208] ss:$48 sps:$4 sm:$0xff]  }
 0x276   : > { %v1132_v52 = vadd.f32 %v6293_v45, %v1131_v50  ;;  %v6832_v53 = vpop.f32.mrb[3].mxu0  ;;  %v8798_v54 = vadd.f32 %v1135_v49, %v1129_v47  ;;  %v7538_v45 = vld [vmem:[#allocation2 + $0x204] ss:$48 sps:$4 sm:$0xff]   ;;  %v7536_v47 = vld [vmem:[#allocation2 + $0x200] ss:$48 sps:$4 sm:$0xff]  }
 0x277   : > { %v7544_v49 = vld [vmem:[#allocation2 + $0x264] ss:$48 sps:$4 sm:$0xff]   ;;  %v7547_v50 = vld [vmem:[#allocation2 + $0x26c] ss:$48 sps:$4 sm:$0xff]  }
 0x278   : > { %v8800_v55 = vadd.f32 %v1136_v51, %v1132_v52  ;;  %v7542_v51 = vld [vmem:[#allocation2 + $0x260] ss:$48 sps:$4 sm:$0xff]   ;;  %v7545_v52 = vld [vmem:[#allocation2 + $0x268] ss:$48 sps:$4 sm:$0xff]   ;;  %v7550_v53 = vld [vmem:[#allocation2 + $0x2c4] ss:$48 sps:$4 sm:$0xff]  }
 0x27a   : > { %v8804_v58 = vpack.c.bf16 %v8800_v55, %v8798_v54 }
 0x27c   : > { %1813 = vmatmul.mubr.bf16.vlgmr.msra.gmra.mrb[0].mxu1 %v8804_v58  ;;  %1856 = vmatmul.mubr.bf16.vlgmr.msra.gmra.mrb[4].mxu0 %v8804_v58 }
 0x27d   : > { %1867 = vmatpush1.bf16.msra.mxu1 %v7458_v56  ;;  %1910 = vmatpush1.bf16.msra.mxu0 %v7461_v57  ;;  %v7553_v56 = vld [vmem:[#allocation2 + $0x2cc] ss:$48 sps:$4 sm:$0xff]   ;;  %v7548_v57 = vld [vmem:[#allocation2 + $0x2c0] ss:$48 sps:$4 sm:$0xff]  }
 0x27e   : > { %1868 = vmatprep.subr.bf16.mxu1 %v7466_v59  ;;  %1911 = vmatprep.subr.bf16.mxu0 %v7469_v60  ;;  %v7551_v59 = vld [vmem:[#allocation2 + $0x2c8] ss:$48 sps:$4 sm:$0xff]   ;;  %v1240_v60 = vlaneseq }
 0x27f   : > { %1898 = vmatprep.mubr.bf16.mxu1 %v8264_v44  ;;  %1941 = vmatprep.mubr.bf16.mxu0 %v8264_v44 }
 0x281   : > { %1869 = vmatpush1.bf16.msra.mxu1 %v7464_v61  ;;  %1912 = vmatpush1.bf16.msra.mxu0 %v7467_v62  ;;  %v8823_v61 = vshrl.u32 %v1240_v60, 7 }
 0x282   : > { %1870 = vmatprep.subr.bf16.mxu1 %v7472_v63  ;;  %1913 = vmatprep.subr.bf16.mxu0 %v7475_v1  ;;  %v8828_v63 = vld [vmem:[#allocation4] sm:$0xff] }
 0x283   : > { %v8826_v62 = vsub.s32 2, %v8823_v61 }
 0x285   : > { %1871 = vmatpush1.bf16.msra.mxu1 %v7470_v2  ;;  %1914 = vmatpush1.bf16.msra.mxu0 %v7473_v3  ;;  %v8832_v1 = vrot.slane %v8828_v63, %v8826_v62 }
 0x286   : > { %1872 = vmatprep.subr.bf16.mxu1 %v7478_v4  ;;  %1915 = vmatprep.subr.bf16.mxu0 %v7481_v5 }
 0x289   : > { %1873 = vmatpush1.bf16.msra.mxu1 %v7476_v6  ;;  %1916 = vmatpush1.bf16.msra.mxu0 %v7479_v7 }
 0x28a   : > { %1874 = vmatprep.subr.bf16.mxu1 %v7484_v8  ;;  %1917 = vmatprep.subr.bf16.mxu0 %v7487_v9 }
 0x28d   : > { %1875 = vmatpush1.bf16.msra.mxu1 %v7482_v10  ;;  %1918 = vmatpush1.bf16.msra.mxu0 %v7485_v11  ;;  %v1258_v10 = vsub.s32 4, %v8823_v61  ;;  %v1266_v11 = vsub.s32 6, %v8823_v61 }
 0x28e   : > { %1876 = vmatprep.subr.bf16.mxu1 %v7490_v12  ;;  %1919 = vmatprep.subr.bf16.mxu0 %v7493_v13 }
 0x28f   : > { %v1259_v12 = vrot.slane %v8828_v63, %v1258_v10  ;;  %v8855_v13 = vrot.slane %v8828_v63, %v1266_v11 }
 0x291   : > { %1877 = vmatpush1.bf16.msra.mxu1 %v7488_v14  ;;  %1920 = vmatpush1.bf16.msra.mxu0 %v7491_v15  ;;  %v8858_v14 = vsub.s32 0, %v8823_v61 }
 0x292   : > { %1878 = vmatprep.subr.bf16.mxu1 %v7496_v16  ;;  %1921 = vmatprep.subr.bf16.mxu0 %v7499_v17 }
 0x295   : > { %1879 = vmatpush1.bf16.msra.mxu1 %v7494_v18  ;;  %1922 = vmatpush1.bf16.msra.mxu0 %v7497_v19 }
 0x296   : > { %1880 = vmatprep.subr.bf16.mxu1 %v7502_v20  ;;  %1923 = vmatprep.subr.bf16.mxu0 %v7505_v21  ;;  %v1243_v21 = vrot.slane %v8828_v63, %v8858_v14 }
 0x299   : > { %1881 = vmatpush1.bf16.msra.mxu1 %v7500_v22  ;;  %1924 = vmatpush1.bf16.msra.mxu0 %v7503_v23 }
 0x29a   : > { %1952 = vmatprep.subr.bf16.mxu1 %v7508_v24  ;;  %1995 = vmatprep.subr.bf16.mxu0 %v7511_v25 }
 0x29c   : > { %1899 = vmatmul.mubr.bf16.vlgmr.msra.gmra.mrb[4].mxu1 %v8804_v58  ;;  %1942 = vmatmul.mubr.bf16.vlgmr.msra.gmra.mrb[8].mxu0 %v8804_v58 }
 0x29d   : > { %1953 = vmatpush1.bf16.msra.mxu1 %v7506_v26  ;;  %1996 = vmatpush1.bf16.msra.mxu0 %v7509_v27 }
 0x29e   : > { %1954 = vmatprep.subr.bf16.mxu1 %v7514_v28  ;;  %1997 = vmatprep.subr.bf16.mxu0 %v7517_v29 }
 0x29f   : > { %1984 = vmatprep.mubr.bf16.mxu1 %v8264_v44  ;;  %2027 = vmatprep.mubr.bf16.mxu0 %v8264_v44 }
 0x2a1   : > { %1955 = vmatpush1.bf16.msra.mxu1 %v7512_v30  ;;  %1998 = vmatpush1.bf16.msra.mxu0 %v7515_v31 }
 0x2a2   : > { %1956 = vmatprep.subr.bf16.mxu1 %v7520_v32  ;;  %1999 = vmatprep.subr.bf16.mxu0 %v7523_v33  ;;  %v1237_v33 = vld [vmem:[#allocation4 + $0x8] sm:$0xf] }
 0x2a5   : > { %1957 = vmatpush1.bf16.msra.mxu1 %v7518_v34  ;;  %2000 = vmatpush1.bf16.msra.mxu0 %v7521_v35  ;;  %v8882_v34 = vsub.s32 1, %v8823_v61  ;;  %v8885_v35 = vsub.s32 3, %v8823_v61 }
 0x2a6   : > { %1958 = vmatprep.subr.bf16.mxu1 %v7526_v36  ;;  %2001 = vmatprep.subr.bf16.mxu0 %v7529_v37  ;;  %v1275_v36 = vrot.slane %v1237_v33, %v8858_v14  ;;  %v1283_v37 = vrot.slane %v1237_v33, %v8826_v62 }
 0x2a9   : > { %1959 = vmatpush1.bf16.msra.mxu1 %v7524_v38  ;;  %2002 = vmatpush1.bf16.msra.mxu0 %v7527_v39  ;;  %v1279_v38 = vrot.slane %v1237_v33, %v8882_v34  ;;  %v1287_v39 = vrot.slane %v1237_v33, %v8885_v35 }
 0x2aa   : > { %1960 = vmatprep.subr.bf16.mxu1 %v7532_v40  ;;  %2003 = vmatprep.subr.bf16.mxu0 %v7535_v41 }
 0x2ad   : > { %1961 = vmatpush1.bf16.msra.mxu1 %v7530_v42  ;;  %2004 = vmatpush1.bf16.msra.mxu0 %v7533_v43 }
 0x2ae   : > { %1962 = vmatprep.subr.bf16.mxu1 %v7538_v45  ;;  %2005 = vmatprep.subr.bf16.mxu0 %v7541_v46 }
 0x2b1   : > { %1963 = vmatpush1.bf16.msra.mxu1 %v7536_v47  ;;  %2006 = vmatpush1.bf16.msra.mxu0 %v7539_v48 }
 0x2b2   : > { %1964 = vmatprep.subr.bf16.mxu1 %v7544_v49  ;;  %2007 = vmatprep.subr.bf16.mxu0 %v7547_v50 }
 0x2b5   : > { %1965 = vmatpush1.bf16.msra.mxu1 %v7542_v51  ;;  %2008 = vmatpush1.bf16.msra.mxu0 %v7545_v52 }
 0x2b6   : > { %1966 = vmatprep.subr.bf16.mxu1 %v7550_v53  ;;  %2009 = vmatprep.subr.bf16.mxu0 %v7553_v56 }
 0x2b9   : > { %1967 = vmatpush1.bf16.msra.mxu1 %v7548_v57  ;;  %2010 = vmatpush1.bf16.msra.mxu0 %v7551_v59 }
 0x2ba   : > { %6833 = vmatprep.subr.bf16.mxu1 %v8262_v0  ;;  %6881 = vmatprep.subr.bf16.mxu0 %v8262_v0 }
 0x2bc   : > { %1985 = vmatmul.mubr.bf16.vlgmr.msra.gmra.mrb[8].mxu1 %v8804_v58  ;;  %2028 = vmatmul.mubr.bf16.vlgmr.msra.gmra.mrb[12].mxu0 %v8804_v58 }
 0x2bd   : > { %6835 = vmatprep.mubr.msk.bf16.mxu1 %vm8263_vm0, %v8262_v0  ;;  %6897 = vmatprep.mubr.msk.bf16.mxu0 %vm8263_vm0, %v8262_v0 }
 0x34f   : > { %v1814_v58 = vpop.f32.mrb[0].mxu1  ;;  %v1857_v2 = vpop.f32.mrb[4].mxu0 }
 0x350   : > { %v8835_v3 = vadd.f32 %v1857_v2, %v8832_v1  ;;  %v8837_v4 = vpop.f32.mrb[1].mxu1  ;;  %v8839_v5 = vpop.f32.mrb[5].mxu0  ;;  %v1815_v27 = vadd.f32 %v1814_v58, %v1243_v21 }
 0x351   : > { %v1818_v6 = vpop.f32.mrb[2].mxu1  ;;  %v8841_v7 = vpop.f32.mrb[6].mxu0 }
 0x352   : > { %v8843_v8 = vpop.f32.mrb[3].mxu1  ;;  %v8845_v9 = vpop.f32.mrb[7].mxu0  ;;  %v2038_v29 = vpack.c.bf16 %v1815_v27, %v1815_v27  ;;  %v1819_v31 = vadd.f32 %v1818_v6, %v1243_v21 }
 0x354   : > { %v2039_v32 = vpack.c.bf16 %v1819_v31, %v1819_v31 }
 0x36f   : > { %v1900_v15 = vpop.f32.mrb[4].mxu1  ;;  %v1943_v16 = vpop.f32.mrb[8].mxu0 }
 0x370   : > { %v1901_v17 = vadd.f32 %v1900_v15, %v1259_v12  ;;  %v8861_v18 = vadd.f32 %v1943_v16, %v8855_v13  ;;  %v8863_v19 = vpop.f32.mrb[5].mxu1  ;;  %v8865_v20 = vpop.f32.mrb[9].mxu0 }
 0x371   : > { %v1904_v22 = vpop.f32.mrb[6].mxu1  ;;  %v8869_v23 = vpop.f32.mrb[10].mxu0 }
 0x372   : > { %v2040_v24 = vpack.c.bf16 %v1901_v17, %v1901_v17  ;;  %v8871_v25 = vpop.f32.mrb[7].mxu1  ;;  %v8873_v26 = vpop.f32.mrb[11].mxu0  ;;  %v1905_v28 = vadd.f32 %v1904_v22, %v1259_v12 }
 0x374   : > { %6834 = vmatpush3.bf16.xpose.msra.mxu1 %v2040_v24  ;;  %v2041_v30 = vpack.c.bf16 %v1905_v28, %v1905_v28 }
 0x375   : > { %6839 = vmatprep.subr.bf16.mxu1 %v8262_v0 }
 0x37b   : > { %6836 = vmatmul.mubr.bf16.vlgmr.msra.gmra.mrb[12].mxu1 %v2038_v29 }
 0x37c   : > { %6840 = vmatpush3.bf16.xpose.msra.mxu1 %v2041_v30  ;;  %6841 = vmatprep.mubr.msk.bf16.mxu1 %vm8263_vm0, %v8262_v0 }
 0x37d   : > { %6845 = vmatprep.subr.bf16.mxu1 %v8262_v0 }
 0x383   : > { %6842 = vmatmul.mubr.bf16.vlgmr.msra.gmra.mrb[16].mxu1 %v2039_v32 }
 0x384   : > { %6847 = vmatprep.mubr.msk.bf16.mxu1 %vm8263_vm0, %v8262_v0 }
 0x38f   : > { %v1986_v40 = vpop.f32.mrb[8].mxu1  ;;  %v2029_v41 = vpop.f32.mrb[12].mxu0 }
 0x390   : > { %v1987_v42 = vadd.f32 %v1986_v40, %v1275_v36  ;;  %v8891_v43 = vadd.f32 %v2029_v41, %v1283_v37  ;;  %v1988_v45 = vpop.f32.mrb[9].mxu1  ;;  %v2031_v46 = vpop.f32.mrb[13].mxu0 }
 0x391   : > { %v8893_v47 = vadd.f32 %v1988_v45, %v1279_v38  ;;  %v8895_v48 = vadd.f32 %v2031_v46, %v1287_v39  ;;  %v1990_v49 = vpop.f32.mrb[10].mxu1  ;;  %v2033_v50 = vpop.f32.mrb[14].mxu0 }
 0x392   : > { %v2042_v51 = vpack.c.bf16 %v1987_v42, %v1987_v42  ;;  %v1991_v52 = vadd.f32 %v1990_v49, %v1275_v36  ;;  %v8897_v53 = vadd.f32 %v2033_v50, %v1283_v37  ;;  %v1992_v56 = vpop.f32.mrb[11].mxu1  ;;  %v2035_v57 = vpop.f32.mrb[15].mxu0  ;;  %v1262_v50 = vsub.s32 5, %v8823_v61 }
 0x393   : > { %v8899_v59 = vadd.f32 %v1992_v56, %v1279_v38  ;;  %v8901_v58 = vadd.f32 %v2035_v57, %v1287_v39 }
 0x394   : > { %v2156_v2 = vsel %vm2154_vm1, %v2042_v51, 0  ;;  %v2043_v51 = vpack.c.bf16 %v1991_v52, %v1991_v52 }
 0x395   : > { %6846 = vmatpush3.bf16.msra.mxu1 %v2156_v2  ;;  %v1263_v2 = vrot.slane %v8828_v63, %v1262_v50 }
 0x396   : > { %6851 = vmatprep.subr.bf16.mxu1 %v8262_v0 }
 0x44e   : > { %v2078_v6 = vpop.f32.mrb[12].mxu1 }
 0x44f   : > { %v2124_v12 = vmul.f32 0.25, %v2078_v6  ;;  %v6837_v15 = vpop.f32.mrb[13].mxu1  ;;  %v2202_v6 = vsel %vm2154_vm1, %v2043_v51, 0 }
 0x450   : > { %v2081_v16 = vpop.f32.mrb[14].mxu1  ;;  %v1903_v15 = vadd.f32 %v8863_v19, %v1263_v2 }
 0x451   : > { %v6838_v17 = vpop.f32.mrb[15].mxu1  ;;  %v2127_v21 = vsel %vm2126_vm2, %v2124_v12, -inf }
 0x452   : > { %2128 = vmax.xlane.f32.xlu0 %v2127_v21  ;;  %v1247_v17 = vrot.slane %v8828_v63, %v8882_v34  ;;  %v2263_v21 = vpack.c.bf16 %v1903_v15, %v1903_v15 }
 0x456   : > { %v2118_v22 = vpop.f32.mrb[16].mxu1 }
 0x457   : > { %v2125_v24 = vmul.f32 0.25, %v2118_v22  ;;  %v6843_v27 = vpop.f32.mrb[17].mxu1  ;;  %v1817_v22 = vadd.f32 %v8837_v4, %v1247_v17 }
 0x458   : > { %v2121_v28 = vpop.f32.mrb[18].mxu1 }
 0x459   : > { %v6844_v29 = vpop.f32.mrb[19].mxu1  ;;  %v2130_v30 = vsel %vm2126_vm2, %v2125_v24, -inf  ;;  %v2261_v27 = vpack.c.bf16 %v1817_v22, %v1817_v22  ;;  %v1821_v28 = vadd.f32 %v8843_v8, %v1247_v17 }
 0x45a   : > { %2131 = vmax.xlane.f32.xlu0 %v2130_v30  ;;  %v2265_v29 = vpack.c.bf16 %v8893_v47, %v8893_v47 }
 0x45b   : > { %v2262_v30 = vpack.c.bf16 %v1821_v28, %v1821_v28  ;;  %v7562_v28 = vld [vmem:[#allocation6 + $0x40] sm:$0xff]  }
 0x45c   : > { %v2377_v4 = vsel %vm2154_vm1, %v2265_v29, 0  ;;  %6882 = vmatpush3.bf16.msra.mxu0 %v7562_v28  ;;  %v7563_v29 = vld [vmem:[#allocation6 + $0x48] sm:$0xff]  }
 0x45d   : > { %6883 = vmatprep.subr.bf16.mxu0 %v8262_v0 }
 0x460   : > { %6884 = vmatpush3.bf16.msra.mxu0 %v7563_v29  ;;  %v2664_v29 = vpack.c.bf16 %v8891_v43, %v8891_v43 }
 0x461   : > { %6885 = vmatprep.subr.bf16.mxu0 %v8262_v0 }
 0x4df   : > { %v2129_v31 = vpop.xlane.xlu0 %2128 }
 0x4e0   : > { %v2133_v32 = vsub.f32 %v2124_v12, %v2129_v31 }
 0x4e2   : > { %v2135_v33 = vmul.f32 1.442695, %v2133_v32 }
 0x4e4   : > { %7794 = vpow2.f32 %v2135_v33 }
 0x4e7   : > { %v2132_v36 = vpop.xlane.xlu0 %2131 }
 0x4e8   : > { %v2134_v37 = vsub.f32 %v2125_v24, %v2132_v36  ;;  %v1907_v24 = vadd.f32 %v8871_v25, %v1263_v2 }
 0x4ea   : > { %v2137_v38 = vmul.f32 1.442695, %v2134_v37  ;;  %v2264_v19 = vpack.c.bf16 %v1907_v24, %v1907_v24 }
 0x4ec   : > { %7796 = vpow2.f32 %v2137_v38 }
 0x4ee   : > { %v7795_v39 = vpop.eup %7794 }
 0x4ef   : > { %v2139_v40 = vsel %vm2126_vm2, %v7795_v39, 0.0 }
 0x4f0   : > { %2140 = vadd.xlane.f32.xlu1 %v2139_v40 }
 0x4f6   : > { %v7797_v41 = vpop.eup %7796 }
 0x4f7   : > { %v2142_v42 = vsel %vm2126_vm2, %v7797_v41, 0.0 }
 0x4f8   : > { %2143 = vadd.xlane.f32.xlu1 %v2142_v42 }
 0x57d   : > { %v2141_v45 = vpop.xlane.xlu1 %2140 }
 0x57e   : > { %7798 = vrcp.f32 %v2141_v45 }
 0x585   : > { %v2144_v46 = vpop.xlane.xlu1 %2143 }
 0x586   : > { %7800 = vrcp.f32 %v2144_v46 }
 0x588   : > { %v7799_v49 = vpop.eup %7798 }
 0x589   : > { %v2147_v56 = vmul.f32 %v7799_v49, %v7795_v39 }
 0x58b   : > { %v2149_v57 = vpack.c.bf16 %v2147_v56, %v2147_v56 }
 0x58d   : > { %6848 = vmatmul.mubr.msk.bf16.vlgmr.msra.gmra.mrb[20].mxu1 %vm2126_vm2, %v2149_v57 }
 0x58e   : > { %6852 = vmatpush3.bf16.msra.mxu1 %v2202_v6  ;;  %6853 = vmatprep.mubr.msk.bf16.mxu1 %vm8263_vm0, %v8262_v0 }
 0x58f   : > { %6857 = vmatprep.subr.bf16.mxu1 %v8262_v0 }
 0x590   : > { %v7801_v12 = vpop.eup %7800 }
 0x591   : > { %v2148_v52 = vmul.f32 %v7801_v12, %v7797_v41 }
 0x593   : > { %v2150_v16 = vpack.c.bf16 %v2148_v52, %v2148_v52 }
 0x595   : > { %6854 = vmatmul.mubr.msk.bf16.vlgmr.msra.gmra.mrb[24].mxu1 %vm2126_vm2, %v2150_v16 }
 0x596   : > { %6859 = vmatprep.mubr.msk.bf16.mxu1 %vm8263_vm0, %v8262_v0 }
 0x597   : > { %6858 = vmatpush3.bf16.xpose.msra.mxu1 %v2263_v21 }
 0x598   : > { %6863 = vmatprep.subr.bf16.mxu1 %v8262_v0 }
 0x59e   : > { %6860 = vmatmul.mubr.bf16.vlgmr.msra.gmra.mrb[28].mxu1 %v2261_v27 }
 0x59f   : > { %6864 = vmatpush3.bf16.xpose.msra.mxu1 %v2264_v19  ;;  %6865 = vmatprep.mubr.msk.bf16.mxu1 %vm8263_vm0, %v8262_v0 }
 0x5a0   : > { %6869 = vmatprep.subr.bf16.mxu1 %v8262_v0 }
 0x5a6   : > { %6866 = vmatmul.mubr.bf16.vlgmr.msra.gmra.mrb[32].mxu1 %v2262_v30  ;;  %v7564_v30 = vld [vmem:[#allocation6 + $0x50] sm:$0xff]  }
 0x5a7   : > { %6870 = vmatpush3.bf16.msra.mxu1 %v2377_v4  ;;  %6871 = vmatprep.mubr.msk.bf16.mxu1 %vm8263_vm0, %v8262_v0  ;;  %v7565_v4 = vld [vmem:[#allocation6 + $0x58] sm:$0xff]  }
 0x5a8   : > { %6875 = vmatprep.subr.bf16.mxu1 %v8262_v0  ;;  %6886 = vmatpush3.bf16.msra.mxu0 %v7564_v30  ;;  %v2660_v30 = vpack.c.bf16 %v8835_v3, %v8835_v3 }
 0x5a9   : > { %6887 = vmatprep.subr.bf16.mxu0 %v8262_v0 }
 0x5ac   : > { %6888 = vmatpush3.bf16.msra.mxu0 %v7565_v4  ;;  %v2776_v4 = vsel %vm2154_vm1, %v2664_v29, 0 }
 0x5ad   : > { %6889 = vmatprep.subr.bf16.mxu0 %v8262_v0 }
 0x660   : > { %v8937_v25 = vpop.f32.mrb[20].mxu1 }
 0x661   : > { %v6849_v31 = vpop.f32.mrb[21].mxu1 }
 0x662   : > { %v2195_v32 = vpop.f32.mrb[22].mxu1  ;;  %v7566_v31 = vld [vmem:[#allocation6 + $0x60] sm:$0xff]  }
 0x663   : > { %v6850_v8 = vpop.f32.mrb[23].mxu1  ;;  %6890 = vmatpush3.bf16.msra.mxu0 %v7566_v31  ;;  %v7567_v32 = vld [vmem:[#allocation6 + $0x68] sm:$0xff]  }
 0x664   : > { %6891 = vmatprep.subr.bf16.mxu0 %v8262_v0  ;;  %v7568_v8 = vld [vmem:[#allocation6 + $0x70] sm:$0xff]  }
 0x667   : > { %6892 = vmatpush3.bf16.msra.mxu0 %v7567_v32 }
 0x668   : > { %v8939_v33 = vpop.f32.mrb[24].mxu1  ;;  %6893 = vmatprep.subr.bf16.mxu0 %v8262_v0 }
 0x669   : > { %v2244_v47 = vpack.c.bf16 %v8939_v33, %v8937_v25  ;;  %v6855_v36 = vpop.f32.mrb[25].mxu1 }
 0x66a   : > { %v2241_v37 = vpop.f32.mrb[26].mxu1 }
 0x66b   : > { %v6856_v38 = vpop.f32.mrb[27].mxu1  ;;  %6894 = vmatpush3.bf16.msra.mxu0 %v7568_v8 }
 0x66c   : > { %6895 = vmatprep.subr.bf16.mxu0 %v8262_v0 }
 0x671   : > { %v2301_v39 = vpop.f32.mrb[28].mxu1 }
 0x672   : > { %v2347_v40 = vmul.f32 0.25, %v2301_v39  ;;  %v6861_v41 = vpop.f32.mrb[29].mxu1  ;;  %v2266_v39 = vpack.c.bf16 %v8899_v59, %v8899_v59  ;;  %v7555_v59 = vld [vmem:[#allocation6 + $0x8] sm:$0xff]  }
 0x673   : > { %v2304_v42 = vpop.f32.mrb[30].mxu1 }
 0x674   : > { %v6862_v45 = vpop.f32.mrb[31].mxu1  ;;  %v2349_v46 = vsel %vm2126_vm2, %v2347_v40, -inf  ;;  %v2423_v42 = vsel %vm2154_vm1, %v2266_v39, 0 }
 0x675   : > { %2350 = vmax.xlane.f32.xlu0 %v2349_v46 }
 0x679   : > { %v2341_v49 = vpop.f32.mrb[32].mxu1 }
 0x67a   : > { %v2348_v51 = vmul.f32 0.25, %v2341_v49  ;;  %v6867_v56 = vpop.f32.mrb[33].mxu1  ;;  %v7554_v49 = vld [vmem:[#allocation6] sm:$0xff]  }
 0x67b   : > { %v2344_v57 = vpop.f32.mrb[34].mxu1  ;;  %v7556_v56 = vld [vmem:[#allocation6 + $0x10] sm:$0xff]  }
 0x67c   : > { %v6868_v2 = vpop.f32.mrb[35].mxu1  ;;  %v2352_v6 = vsel %vm2126_vm2, %v2348_v51, -inf  ;;  %v7557_v57 = vld [vmem:[#allocation6 + $0x18] sm:$0xff]  }
 0x67d   : > { %2353 = vmax.xlane.f32.xlu1 %v2352_v6  ;;  %v7558_v2 = vld [vmem:[#allocation6 + $0x20] sm:$0xff]   ;;  %v7559_v6 = vld [vmem:[#allocation6 + $0x28] sm:$0xff]  }
 0x702   : > { %v2351_v12 = vpop.xlane.xlu0 %2350 }
 0x703   : > { %v2355_v15 = vsub.f32 %v2347_v40, %v2351_v12  ;;  %v7560_v12 = vld [vmem:[#allocation6 + $0x30] sm:$0xff]  }
 0x705   : > { %v2357_v52 = vmul.f32 1.442695, %v2355_v15  ;;  %v7561_v15 = vld [vmem:[#allocation6 + $0x38] sm:$0xff]  }
 0x707   : > { %7802 = vpow2.f32 %v2357_v52  ;;  %v1948_v52 = vadd.f32 %v8869_v23, %v8855_v13  ;;  %v7569_v23 = vld [vmem:[#allocation6 + $0x78] sm:$0xff]  }
 0x708   : > { %6896 = vmatpush3.bf16.msra.mxu0 %v7569_v23 }
 0x709   : > { %6921 = vmatprep.subr.bf16.mxu0 %v8262_v0 }
 0x70a   : > { %v2354_v16 = vpop.xlane.xlu1 %2353 }
 0x70b   : > { %v2356_v17 = vsub.f32 %v2348_v51, %v2354_v16  ;;  %v2663_v16 = vpack.c.bf16 %v1948_v52, %v1948_v52 }
 0x70d   : > { %v2359_v21 = vmul.f32 1.442695, %v2356_v17  ;;  %v1862_v17 = vadd.f32 %v8841_v7, %v8832_v1 }
 0x70f   : > { %7804 = vpow2.f32 %v2359_v21  ;;  %v2665_v21 = vpack.c.bf16 %v8897_v53, %v8897_v53 }
 0x711   : > { %v7803_v22 = vpop.eup %7802  ;;  %v2822_v13 = vsel %vm2154_vm1, %v2665_v21, 0 }
 0x712   : > { %v2361_v24 = vsel %vm2126_vm2, %v7803_v22, 0.0 }
 0x713   : > { %2362 = vadd.xlane.f32.xlu0 %v2361_v24 }
 0x719   : > { %v7805_v27 = vpop.eup %7804 }
 0x71a   : > { %v2364_v19 = vsel %vm2126_vm2, %v7805_v27, 0.0 }
 0x71b   : > { %2365 = vadd.xlane.f32.xlu1 %v2364_v19 }
 0x7a0   : > { %v2363_v36 = vpop.xlane.xlu0 %2362 }
 0x7a1   : > { %7806 = vrcp.f32 %v2363_v36 }
 0x7a8   : > { %v2366_v37 = vpop.xlane.xlu1 %2365 }
 0x7a9   : > { %7808 = vrcp.f32 %v2366_v37 }
 0x7ab   : > { %v7807_v38 = vpop.eup %7806 }
 0x7ac   : > { %v2369_v40 = vmul.f32 %v7807_v38, %v7803_v22  ;;  %v2661_v22 = vpack.c.bf16 %v1862_v17, %v1862_v17 }
 0x7ae   : > { %v2371_v41 = vpack.c.bf16 %v2369_v40, %v2369_v40 }
 0x7b0   : > { %6872 = vmatmul.mubr.msk.bf16.vlgmr.msra.gmra.mrb[36].mxu1 %vm2126_vm2, %v2371_v41 }
 0x7b1   : > { %6876 = vmatpush3.bf16.msra.mxu1 %v2423_v42  ;;  %6877 = vmatprep.mubr.msk.bf16.mxu1 %vm8263_vm0, %v8262_v0 }
 0x7b2   : > { %6901 = vmatprep.subr.bf16.mxu1 %v8262_v0 }
 0x7b3   : > { %v7809_v45 = vpop.eup %7808 }
 0x7b4   : > { %v2370_v46 = vmul.f32 %v7809_v45, %v7805_v27  ;;  %v2662_v27 = vpack.c.bf16 %v8861_v18, %v8861_v18 }
 0x7b6   : > { %v2372_v51 = vpack.c.bf16 %v2370_v46, %v2370_v46 }
 0x7b8   : > { %6878 = vmatmul.mubr.msk.bf16.vlgmr.msra.gmra.mrb[40].mxu1 %vm2126_vm2, %v2372_v51 }
 0x7b9   : > { %6902 = vmatpush3.bf16.msra.mxu1 %v7554_v49  ;;  %6917 = vmatprep.mubr.msk.bf16.mxu1 %vm8263_vm0, %v8262_v0 }
 0x7ba   : > { %6903 = vmatprep.subr.bf16.mxu1 %v8262_v0 }
 0x7bd   : > { %6904 = vmatpush3.bf16.msra.mxu1 %v7555_v59 }
 0x7be   : > { %6905 = vmatprep.subr.bf16.mxu1 %v8262_v0 }
 0x7c1   : > { %6906 = vmatpush3.bf16.msra.mxu1 %v7556_v56 }
 0x7c2   : > { %6907 = vmatprep.subr.bf16.mxu1 %v8262_v0 }
 0x7c5   : > { %6908 = vmatpush3.bf16.msra.mxu1 %v7557_v57 }
 0x7c6   : > { %6909 = vmatprep.subr.bf16.mxu1 %v8262_v0 }
 0x7c9   : > { %6910 = vmatpush3.bf16.msra.mxu1 %v7558_v2 }
 0x7ca   : > { %6911 = vmatprep.subr.bf16.mxu1 %v8262_v0 }
 0x7cd   : > { %6912 = vmatpush3.bf16.msra.mxu1 %v7559_v6 }
 0x7ce   : > { %6913 = vmatprep.subr.bf16.mxu1 %v8262_v0 }
 0x7d1   : > { %6914 = vmatpush3.bf16.msra.mxu1 %v7560_v12 }
 0x7d2   : > { %6915 = vmatprep.subr.bf16.mxu1 %v8262_v0 }
 0x7d5   : > { %6916 = vmatpush3.bf16.msra.mxu1 %v7561_v15 }
 0x7d6   : > { %6927 = vmatprep.subr.bf16.mxu1 %v8262_v0 }
 0x7d8   : > { %6918 = vmatmul.mubr.bf16.vlgmr.msra.gmra.mrb[44].mxu1 %v2244_v47 }
 0x7d9   : > { %6929 = vmatprep.mubr.msk.bf16.mxu1 %vm8263_vm0, %v8262_v0 }
 0x7de   : > { %6928 = vmatpush3.bf16.xpose.msra.mxu1 %v2663_v16 }
 0x7df   : > { %6939 = vmatprep.subr.bf16.mxu1 %v8262_v0 }
 0x7e5   : > { %6930 = vmatmul.mubr.bf16.vlgmr.msra.gmra.mrb[48].mxu1 %v2661_v22  ;;  %v1270_v22 = vsub.s32 7, %v8823_v61 }
 0x7e6   : > { %6940 = vmatpush3.bf16.msra.mxu1 %v2822_v13  ;;  %6941 = vmatprep.mubr.msk.bf16.mxu1 %vm8263_vm0, %v8262_v0 }
 0x7e7   : > { %6965 = vmatprep.subr.bf16.mxu1 %v8262_v0  ;;  %v1271_v13 = vrot.slane %v8828_v63, %v1270_v22 }
 0x883   : > { %v2413_v1 = vpop.f32.mrb[36].mxu1 }
 0x884   : > { %v6873_v7 = vpop.f32.mrb[37].mxu1 }
 0x885   : > { %v2416_v25 = vpop.f32.mrb[38].mxu1 }
 0x886   : > { %v6874_v33 = vpop.f32.mrb[39].mxu1  ;;  %v1255_v25 = vrot.slane %v8828_v63, %v8885_v35 }
 0x888   : > { %v1864_v63 = vadd.f32 %v8845_v9, %v1255_v25 }
 0x88b   : > { %v2459_v47 = vpop.f32.mrb[40].mxu1 }
 0x88c   : > { %v2465_v53 = vpack.c.bf16 %v2459_v47, %v2413_v1  ;;  %v6879_v24 = vpop.f32.mrb[41].mxu1  ;;  %v1946_v1 = vadd.f32 %v8865_v20, %v1271_v13 }
 0x88d   : > { %v2462_v19 = vpop.f32.mrb[42].mxu1  ;;  %v1950_v24 = vadd.f32 %v8873_v26, %v1271_v13 }
 0x88e   : > { %v6880_v28 = vpop.f32.mrb[43].mxu1  ;;  %6898 = vmatmul.mubr.bf16.vlgmr.msra.gmra.mrb[16].mxu0 %v2465_v53  ;;  %v2974_v47 = vpack.c.bf16 %v1946_v1, %v1946_v1  ;;  %v1860_v53 = vadd.f32 %v8839_v5, %v1255_v25  ;;  %v2976_v19 = vpack.c.bf16 %v8895_v48, %v8895_v48  ;;  %v7571_v25 = vld [vmem:[#allocation6 + $0x88] sm:$0xff]  }
 0x88f   : > { %6922 = vmatpush3.bf16.xpose.msra.mxu0 %v2662_v27  ;;  %6923 = vmatprep.mubr.msk.bf16.mxu0 %vm8263_vm0, %v8262_v0  ;;  %v2975_v20 = vpack.c.bf16 %v1950_v24, %v1950_v24  ;;  %v2973_v28 = vpack.c.bf16 %v1864_v63, %v1864_v63  ;;  %v7575_v24 = vld [vmem:[#allocation6 + $0xa8] sm:$0xff]  }
 0x890   : > { %6933 = vmatprep.subr.bf16.mxu0 %v8262_v0  ;;  %v2972_v27 = vpack.c.bf16 %v1860_v53, %v1860_v53  ;;  %v3088_v5 = vsel %vm2154_vm1, %v2976_v19, 0  ;;  %v7574_v53 = vld [vmem:[#allocation6 + $0xa0] sm:$0xff]  }
 0x896   : > { %6924 = vmatmul.mubr.bf16.vlgmr.msra.gmra.mrb[20].mxu0 %v2660_v30 }
 0x897   : > { %6934 = vmatpush3.bf16.msra.mxu0 %v2776_v4  ;;  %6935 = vmatprep.mubr.msk.bf16.mxu0 %vm8263_vm0, %v8262_v0 }
 0x898   : > { %6945 = vmatprep.subr.bf16.mxu0 %v8262_v0 }
 0x8ab   : > { %v2653_v18 = vpop.f32.mrb[44].mxu1 }
 0x8ac   : > { %v6919_v31 = vpop.f32.mrb[45].mxu1 }
 0x8ad   : > { %v2656_v32 = vpop.f32.mrb[46].mxu1 }
 0x8ae   : > { %v6920_v8 = vpop.f32.mrb[47].mxu1 }
 0x8b8   : > { %v2740_v36 = vpop.f32.mrb[48].mxu1 }
 0x8b9   : > { %v2747_v37 = vmul.f32 0.25, %v2740_v36  ;;  %v6931_v38 = vpop.f32.mrb[49].mxu1 }
 0x8ba   : > { %v2743_v43 = vpop.f32.mrb[50].mxu1 }
 0x8bb   : > { %v6932_v39 = vpop.f32.mrb[51].mxu1  ;;  %v2751_v3 = vsel %vm2126_vm2, %v2747_v37, -inf }
 0x8bc   : > { %2752 = vmax.xlane.f32.xlu0 %v2751_v3 }
 0x949   : > { %v2753_v40 = vpop.xlane.xlu0 %2752 }
 0x94a   : > { %v2755_v41 = vsub.f32 %v2747_v37, %v2753_v40 }
 0x94c   : > { %v2758_v42 = vmul.f32 1.442695, %v2755_v41 }
 0x94e   : > { %7810 = vpow2.f32 %v2758_v42 }
 0x958   : > { %v7811_v45 = vpop.eup %7810 }
 0x959   : > { %v2763_v46 = vsel %vm2126_vm2, %v7811_v45, 0.0 }
 0x95a   : > { %2764 = vadd.xlane.f32.xlu1 %v2763_v46 }
 0x961   : > { %v2564_v49 = vpop.f32.mrb[16].mxu0 }
 0x962   : > { %v9004_v51 = vadd.f32 %v2653_v18, %v2564_v49  ;;  %v6899_v59 = vpop.f32.mrb[17].mxu0 }
 0x963   : > { %v2567_v56 = vpop.f32.mrb[18].mxu0 }
 0x964   : > { %v9006_v57 = vadd.f32 %v2656_v32, %v2567_v56  ;;  %v6900_v2 = vpop.f32.mrb[19].mxu0 }
 0x969   : > { %v2700_v6 = vpop.f32.mrb[20].mxu0 }
 0x96a   : > { %v2746_v12 = vmul.f32 0.25, %v2700_v6  ;;  %v6925_v15 = vpop.f32.mrb[21].mxu0 }
 0x96b   : > { %v2703_v52 = vpop.f32.mrb[22].mxu0 }
 0x96c   : > { %v6926_v16 = vpop.f32.mrb[23].mxu0  ;;  %v2748_v17 = vsel %vm2126_vm2, %v2746_v12, -inf }
 0x96d   : > { %2749 = vmax.xlane.f32.xlu0 %v2748_v17 }
 0x9e7   : > { %v2765_v21 = vpop.xlane.xlu1 %2764 }
 0x9e8   : > { %7812 = vrcp.f32 %v2765_v21 }
 0x9f2   : > { %v7813_v23 = vpop.eup %7812 }
 0x9f3   : > { %v2769_v7 = vmul.f32 %v7813_v23, %v7811_v45 }
 0x9f5   : > { %v2771_v33 = vpack.c.bf16 %v2769_v7, %v2769_v7  ;;  %v7570_v7 = vld [vmem:[#allocation6 + $0x80] sm:$0xff]  }
 0x9f7   : > { %6942 = vmatmul.mubr.msk.bf16.vlgmr.msra.gmra.mrb[52].mxu1 %vm2126_vm2, %v2771_v33  ;;  %v7572_v33 = vld [vmem:[#allocation6 + $0x90] sm:$0xff]  }
 0x9f8   : > { %6966 = vmatpush3.bf16.xpose.msra.mxu1 %v2974_v47  ;;  %6967 = vmatprep.mubr.msk.bf16.mxu1 %vm8263_vm0, %v8262_v0  ;;  %v7573_v47 = vld [vmem:[#allocation6 + $0x98] sm:$0xff]  }
 0x9f9   : > { %6971 = vmatprep.subr.bf16.mxu1 %v8262_v0 }
 0x9fa   : > { %v2750_v26 = vpop.xlane.xlu0 %2749 }
 0x9fb   : > { %v2754_v29 = vsub.f32 %v2746_v12, %v2750_v26 }
 0x9fd   : > { %v2756_v30 = vmul.f32 1.442695, %v2754_v29 }
 0x9ff   : > { %6968 = vmatmul.mubr.bf16.vlgmr.msra.gmra.mrb[56].mxu1 %v2972_v27  ;;  %7814 = vpow2.f32 %v2756_v30  ;;  %v7576_v27 = vld [vmem:[#allocation6 + $0xb0] sm:$0xff]  }
 0xa00   : > { %6972 = vmatpush3.bf16.xpose.msra.mxu1 %v2975_v20  ;;  %6973 = vmatprep.mubr.msk.bf16.mxu1 %vm8263_vm0, %v8262_v0  ;;  %v7577_v20 = vld [vmem:[#allocation6 + $0xb8] sm:$0xff]  }
 0xa01   : > { %6977 = vmatprep.subr.bf16.mxu1 %v8262_v0 }
 0xa07   : > { %6974 = vmatmul.mubr.bf16.vlgmr.msra.gmra.mrb[60].mxu1 %v2973_v28 }
 0xa08   : > { %6978 = vmatpush3.bf16.msra.mxu1 %v3088_v5  ;;  %6979 = vmatprep.mubr.msk.bf16.mxu1 %vm8263_vm0, %v8262_v0  ;;  %v2977_v5 = vpack.c.bf16 %v8901_v58, %v8901_v58 }
 0xa09   : > { %6983 = vmatprep.subr.bf16.mxu1 %v8262_v0  ;;  %v7815_v43 = vpop.eup %7814 }
 0xa0a   : > { %v2760_v39 = vsel %vm2126_vm2, %v7815_v43, 0.0  ;;  %v3134_v30 = vsel %vm2154_vm1, %v2977_v5, 0 }
 0xaca   : > { %v9032_v4 = vpop.f32.mrb[52].mxu1 }
 0xacb   : > { %v6943_v9 = vpop.f32.mrb[53].mxu1 }
 0xacc   : > { %v2861_v18 = vpop.f32.mrb[54].mxu1 }
 0xacd   : > { %v6944_v31 = vpop.f32.mrb[55].mxu1 }
 0xad2   : > { %v3012_v48 = vpop.f32.mrb[56].mxu1 }
 0xad3   : > { %v3058_v32 = vmul.f32 0.25, %v3012_v48  ;;  %v6969_v8 = vpop.f32.mrb[57].mxu1  ;;  %v7578_v48 = vld [vmem:[#allocation6 + $0xc0] sm:$0xff]  }
 0xad4   : > { %v3015_v36 = vpop.f32.mrb[58].mxu1 }
 0xad5   : > { %v6970_v37 = vpop.f32.mrb[59].mxu1  ;;  %v3060_v38 = vsel %vm2126_vm2, %v3058_v32, -inf }
 0xad6   : > { %3061 = vmax.xlane.f32.xlu1 %v3060_v38  ;;  %v7579_v38 = vld [vmem:[#allocation6 + $0xc8] sm:$0xff]  }
 0xada   : > { %v3052_v3 = vpop.f32.mrb[60].mxu1  ;;  %2761 = vadd.xlane.f32.xlu1 %v2760_v39  ;;  %v7581_v39 = vld [vmem:[#allocation6 + $0xd8] sm:$0xff]  }
 0xadb   : > { %v3059_v40 = vmul.f32 0.25, %v3052_v3  ;;  %v6975_v41 = vpop.f32.mrb[61].mxu1  ;;  %v7583_v3 = vld [vmem:[#allocation6 + $0xe8] sm:$0xff]  }
 0xadc   : > { %v3055_v42 = vpop.f32.mrb[62].mxu1  ;;  %v7585_v41 = vld [vmem:[#allocation6 + $0xf8] sm:$0xff]  }
 0xadd   : > { %v6976_v45 = vpop.f32.mrb[63].mxu1  ;;  %v3063_v46 = vsel %vm2126_vm2, %v3059_v40, -inf }
 0xade   : > { %3064 = vmax.xlane.f32.xlu0 %v3063_v46 }
 0xb63   : > { %v3062_v49 = vpop.xlane.xlu1 %3061 }
 0xb64   : > { %v3066_v59 = vsub.f32 %v3058_v32, %v3062_v49 }
 0xb66   : > { %v3068_v56 = vmul.f32 1.442695, %v3066_v59 }
 0xb67   : > { %v2762_v2 = vpop.xlane.xlu1 %2761 }
 0xb68   : > { %7816 = vpow2.f32 %v3068_v56 }
 0xb69   : > { %7818 = vrcp.f32 %v2762_v2 }
 0xb6b   : > { %v3065_v6 = vpop.xlane.xlu0 %3064 }
 0xb6c   : > { %v3067_v12 = vsub.f32 %v3059_v40, %v3065_v6  ;;  %v7584_v40 = vld [vmem:[#allocation6 + $0xf0] sm:$0xff]  }
 0xb6e   : > { %v3070_v15 = vmul.f32 1.442695, %v3067_v12 }
 0xb70   : > { %7820 = vpow2.f32 %v3070_v15 }
 0xb72   : > { %v7817_v52 = vpop.eup %7816 }
 0xb73   : > { %v7819_v16 = vpop.eup %7818  ;;  %v3072_v17 = vsel %vm2126_vm2, %v7817_v52, 0.0 }
 0xb74   : > { %v2768_v21 = vmul.f32 %v7819_v16, %v7815_v43  ;;  %3073 = vadd.xlane.f32.xlu0 %v3072_v17  ;;  %v7580_v43 = vld [vmem:[#allocation6 + $0xd0] sm:$0xff]  }
 0xb76   : > { %v2770_v13 = vpack.c.bf16 %v2768_v21, %v2768_v21 }
 0xb78   : > { %6936 = vmatmul.mubr.msk.bf16.vlgmr.msra.gmra.mrb[24].mxu0 %vm2126_vm2, %v2770_v13 }
 0xb79   : > { %6961 = vmatprep.mubr.msk.bf16.mxu0 %vm8263_vm0, %v8262_v0  ;;  %6946 = vmatpush3.bf16.msra.mxu0 %v7570_v7 }
 0xb7a   : > { %v7821_v23 = vpop.eup %7820  ;;  %6947 = vmatprep.subr.bf16.mxu0 %v8262_v0 }
 0xb7b   : > { %v3075_v1 = vsel %vm2126_vm2, %v7821_v23, 0.0 }
 0xb7c   : > { %3076 = vadd.xlane.f32.xlu1 %v3075_v1  ;;  %v6439_v1 = vld [vmem:[%s9557_s28] ss:$0 sm:$0xff] }
 0xb7d   : > { %6948 = vmatpush3.bf16.msra.mxu0 %v7571_v25 }
 0xb7e   : > { %6949 = vmatprep.subr.bf16.mxu0 %v8262_v0 }
 0xb81   : > { %6950 = vmatpush3.bf16.msra.mxu0 %v7572_v33 }
 0xb82   : > { %6951 = vmatprep.subr.bf16.mxu0 %v8262_v0 }
 0xb85   : > { %6952 = vmatpush3.bf16.msra.mxu0 %v7573_v47 }
 0xb86   : > { %6953 = vmatprep.subr.bf16.mxu0 %v8262_v0 }
 0xb89   : > { %6954 = vmatpush3.bf16.msra.mxu0 %v7574_v53 }
 0xb8a   : > { %6955 = vmatprep.subr.bf16.mxu0 %v8262_v0 }
 0xb8d   : > { %6956 = vmatpush3.bf16.msra.mxu0 %v7575_v24 }
 0xb8e   : > { %6957 = vmatprep.subr.bf16.mxu0 %v8262_v0 }
 0xb91   : > { %6958 = vmatpush3.bf16.msra.mxu0 %v7576_v27 }
 0xb92   : > { %6959 = vmatprep.subr.bf16.mxu0 %v8262_v0 }
 0xb95   : > { %6960 = vmatpush3.bf16.msra.mxu0 %v7577_v20 }
 0xb96   : > { %6989 = vmatprep.subr.bf16.mxu0 %v8262_v0 }
 0xc01   : > { %v3074_v63 = vpop.xlane.xlu0 %3073 }
 0xc02   : > { %7822 = vrcp.f32 %v3074_v63  ;;  %v7587_v63 = vld [vmem:[%s9558_s5 + $0x8] sm:$0xff]  }
 0xc09   : > { %v3077_v19 = vpop.xlane.xlu1 %3076 }
 0xc0a   : > { %7824 = vrcp.f32 %v3077_v19 }
 0xc0c   : > { %v7823_v28 = vpop.eup %7822 }
 0xc0d   : > { %v3080_v26 = vmul.f32 %v7823_v28, %v7817_v52 }
 0xc0f   : > { %v3082_v29 = vpack.c.bf16 %v3080_v26, %v3080_v26 }
 0xc11   : > { %6980 = vmatmul.mubr.msk.bf16.vlgmr.msra.gmra.mrb[64].mxu1 %vm2126_vm2, %v3082_v29 }
 0xc12   : > { %6984 = vmatpush3.bf16.msra.mxu1 %v3134_v30  ;;  %6985 = vmatprep.mubr.msk.bf16.mxu1 %vm8263_vm0, %v8262_v0 }
 0xc13   : > { %7009 = vmatprep.subr.bf16.mxu1 %v8262_v0 }
 0xc14   : > { %v7825_v9 = vpop.eup %7824 }
 0xc15   : > { %v3081_v18 = vmul.f32 %v7825_v9, %v7821_v23 }
 0xc17   : > { %v3083_v31 = vpack.c.bf16 %v3081_v18, %v3081_v18 }
 0xc19   : > { %6986 = vmatmul.mubr.msk.bf16.vlgmr.msra.gmra.mrb[68].mxu1 %vm2126_vm2, %v3083_v31 }
 0xc1a   : > { %7025 = vmatprep.mubr.msk.bf16.mxu1 %vm8263_vm0, %v8262_v0 }
 0xc4b   : > { %v2812_v58 = vpop.f32.mrb[24].mxu0 }
 0xc4c   : > { %v2864_v32 = vpack.c.bf16 %v9032_v4, %v2812_v58  ;;  %v6937_v8 = vpop.f32.mrb[25].mxu0  ;;  %v7582_v4 = vld [vmem:[#allocation6 + $0xe0] sm:$0xff]  }
 0xc4d   : > { %v2815_v36 = vpop.f32.mrb[26].mxu0  ;;  %v7588_v58 = vld [vmem:[%s9558_s5 + $0x10] sm:$0xff]  }
 0xc4e   : > { %v6938_v37 = vpop.f32.mrb[27].mxu0  ;;  %6962 = vmatmul.mubr.bf16.vlgmr.msra.gmra.mrb[28].mxu0 %v2864_v32  ;;  %v7591_v32 = vld [vmem:[%s9558_s5 + $0x28] sm:$0xff]   ;;  %v7592_v8 = vld [vmem:[%s9558_s5 + $0x30] sm:$0xff]   ;;  %v7593_v36 = vld [vmem:[%s9558_s5 + $0x38] sm:$0xff]  }
 0xc4f   : > { %6990 = vmatpush3.bf16.msra.mxu0 %v7578_v48  ;;  %7005 = vmatprep.mubr.msk.bf16.mxu0 %vm8263_vm0, %v8262_v0  ;;  %v7590_v48 = vld [vmem:[%s9558_s5 + $0x20] sm:$0xff]  }
 0xc50   : > { %6991 = vmatprep.subr.bf16.mxu0 %v8262_v0  ;;  %v7594_v37 = vld [vmem:[#allocation12] sm:$0xff]  }
 0xc53   : > { %6992 = vmatpush3.bf16.msra.mxu0 %v7579_v38  ;;  %v7595_v38 = vld [vmem:[#allocation12 + $0x8] sm:$0xff]  }
 0xc54   : > { %6993 = vmatprep.subr.bf16.mxu0 %v8262_v0 }
 0xc57   : > { %6994 = vmatpush3.bf16.msra.mxu0 %v7580_v43  ;;  %v7596_v43 = vld [vmem:[#allocation12 + $0x10] sm:$0xff]  }
 0xc58   : > { %6995 = vmatprep.subr.bf16.mxu0 %v8262_v0 }
 0xc5b   : > { %6996 = vmatpush3.bf16.msra.mxu0 %v7581_v39  ;;  %v7597_v39 = vld [vmem:[#allocation12 + $0x18] sm:$0xff]  }
 0xc5c   : > { %6997 = vmatprep.subr.bf16.mxu0 %v8262_v0 }
 0xc5f   : > { %6998 = vmatpush3.bf16.msra.mxu0 %v7582_v4  ;;  %v7598_v4 = vld [vmem:[#allocation12 + $0x20] sm:$0xff]  }
 0xc60   : > { %6999 = vmatprep.subr.bf16.mxu0 %v8262_v0 }
 0xc63   : > { %7000 = vmatpush3.bf16.msra.mxu0 %v7583_v3  ;;  %v7599_v3 = vld [vmem:[#allocation12 + $0x28] sm:$0xff]  }
 0xc64   : > { %7001 = vmatprep.subr.bf16.mxu0 %v8262_v0 }
 0xc67   : > { %7002 = vmatpush3.bf16.msra.mxu0 %v7584_v40 }
 0xc68   : > { %7003 = vmatprep.subr.bf16.mxu0 %v8262_v0 }
 0xc6b   : > { %7004 = vmatpush3.bf16.msra.mxu0 %v7585_v41 }
 0xc6c   : > { %7029 = vmatprep.subr.bf16.mxu0 %v8262_v0 }
 0xce4   : > { %v3124_v42 = vpop.f32.mrb[64].mxu1 }
 0xce5   : > { %v6981_v45 = vpop.f32.mrb[65].mxu1 }
 0xce6   : > { %v3127_v46 = vpop.f32.mrb[66].mxu1 }
 0xce7   : > { %v6982_v49 = vpop.f32.mrb[67].mxu1 }
 0xcec   : > { %v3170_v59 = vpop.f32.mrb[68].mxu1 }
 0xced   : > { %v3176_v56 = vpack.c.bf16 %v3170_v59, %v3124_v42  ;;  %v6987_v2 = vpop.f32.mrb[69].mxu1 }
 0xcee   : > { %v3173_v6 = vpop.f32.mrb[70].mxu1 }
 0xcef   : > { %v6988_v12 = vpop.f32.mrb[71].mxu1  ;;  %7006 = vmatmul.mubr.bf16.vlgmr.msra.gmra.mrb[32].mxu0 %v3176_v56  ;;  %v6440_v56 = vld [vmem:[#allocation7] ss:$0 sm:$0xff] }
 0xcf0   : > { %7045 = vmatprep.mubr.msk.bf16.mxu0 %vm8263_vm0, %v8262_v0  ;;  %7030 = vmatpush3.bf16.msra.mxu0 %v7594_v37 }
 0xcf1   : > { %7031 = vmatprep.subr.bf16.mxu0 %v8262_v0 }
 0xcf4   : > { %7032 = vmatpush3.bf16.msra.mxu0 %v7595_v38 }
 0xcf5   : > { %7033 = vmatprep.subr.bf16.mxu0 %v8262_v0 }
 0xcf8   : > { %7034 = vmatpush3.bf16.msra.mxu0 %v7596_v43 }
 0xcf9   : > { %7035 = vmatprep.subr.bf16.mxu0 %v8262_v0 }
 0xcfc   : > { %7036 = vmatpush3.bf16.msra.mxu0 %v7597_v39 }
 0xcfd   : > { %7037 = vmatprep.subr.bf16.mxu0 %v8262_v0 }
 0xd00   : > { %7038 = vmatpush3.bf16.msra.mxu0 %v7598_v4 }
 0xd01   : > { %7039 = vmatprep.subr.bf16.mxu0 %v8262_v0 }
 0xd04   : > { %7040 = vmatpush3.bf16.msra.mxu0 %v7599_v3 }
 0xd05   : > { %7041 = vmatprep.subr.bf16.mxu0 %v8262_v0 }
 0xd21   : > { %v2963_v15 = vpop.f32.mrb[28].mxu0 }
 0xd22   : > { %v2970_v52 = vadd.f32 %v2963_v15, %v9004_v51  ;;  %v6963_v16 = vpop.f32.mrb[29].mxu0 }
 0xd23   : > { %v2966_v17 = vpop.f32.mrb[30].mxu0 }
 0xd24   : > { %v2971_v21 = vadd.f32 %v2966_v17, %v9006_v57  ;;  %v6964_v13 = vpop.f32.mrb[31].mxu0  ;;  %v7586_v57 = vld [vmem:[%s9558_s5] sm:$0xff]  }
 0xd25   : > { %7010 = vmatpush3.bf16.msra.mxu1 %v7586_v57 }
 0xd26   : > { %7011 = vmatprep.subr.bf16.mxu1 %v8262_v0 }
 0xd29   : > { %7012 = vmatpush3.bf16.msra.mxu1 %v7587_v63  ;;  %v6451_v63 = vld [vmem:[#allocation13] ss:$0 sm:$0xff] }
 0xd2a   : > { %7013 = vmatprep.subr.bf16.mxu1 %v8262_v0 }
 0xd2d   : > { %7014 = vmatpush3.bf16.msra.mxu1 %v7588_v58  ;;  %v7610_v58 = vld [vmem:[#allocation15 + $0x64] ss:$48 sps:$4 sm:$0xff]  }
 0xd2e   : > { %7015 = vmatprep.subr.bf16.mxu1 %v8262_v0 }
 0xdc2   : > { %v3275_v23 = vpop.f32.mrb[32].mxu0 }
 0xdc3   : > { %v3282_v7 = vadd.f32 %v3275_v23, %v2970_v52  ;;  %v7007_v25 = vpop.f32.mrb[33].mxu0  ;;  %v6441_v52 = vld [vmem:[#allocation9] ss:$0 sm:$0xff]  ;;  %v7600_v23 = vld [vmem:[#allocation12 + $0x30] sm:$0xff]  }
 0xdc4   : > { %v3278_v33 = vpop.f32.mrb[34].mxu0  ;;  %7042 = vmatpush3.bf16.msra.mxu0 %v7600_v23  ;;  %v7635_v23 = vld [vmem:[#allocation15 + $0x1e8] ss:$48 sps:$4 sm:$0xff]  }
 0xdc5   : > { %v3291_v47 = vadd.f32 %v6439_v1, %v3282_v7  ;;  %v3283_v53 = vadd.f32 %v3278_v33, %v2971_v21  ;;  %v7008_v24 = vpop.f32.mrb[35].mxu0  ;;  %7043 = vmatprep.subr.bf16.mxu0 %v8262_v0  ;;  %v6442_v7 = vld [vmem:[#allocation10] ss:$0 sm:$0xff] }
 0xdc7   : > { %v3292_v27 = vadd.f32 %v6439_v1, %v3283_v53  ;;  %v3293_v20 = vadd.f32 %v3291_v47, %v8798_v54  ;;  %v9089_v54 = vand.u32 127, %v1240_v60  ;;  %v7589_v60 = vld [vmem:[%s9558_s5 + $0x18] sm:$0xff]  }
 0xdc8   : > { %7016 = vmatpush3.bf16.msra.mxu1 %v7589_v60  ;;  %v7601_v1 = vld [vmem:[#allocation12 + $0x38] sm:$0xff]  }
 0xdc9   : > { %3300 = vadd.xlane.f32.xlu0 %v3293_v20  ;;  %v3294_v51 = vadd.f32 %v3292_v27, %v8800_v55  ;;  %vm3299_vm3 = vcmp.lt.s32.totalorder %v9089_v54, 64  ;;  %7017 = vmatprep.subr.bf16.mxu1 %v8262_v0  ;;  %v7613_v60 = vld [vmem:[#allocation15 + $0x6c] ss:$48 sps:$4 sm:$0xff]   ;;  %vm3570_vm4 = vcmp.lt.s32.totalorder %v9089_v54, 32 }
 0xdca   : > { %7044 = vmatpush3.bf16.msra.mxu0 %v7601_v1  ;;  %v7640_v1 = vld [vmem:[#allocation15 + $0x244] ss:$48 sps:$4 sm:$0xff]  }
 0xdcb   : > { %3302 = vadd.xlane.f32.xlu1 %v3294_v51 }
 0xdcc   : > { %7018 = vmatpush3.bf16.msra.mxu1 %v7590_v48  ;;  %v7608_v48 = vld [vmem:[#allocation15 + $0x60] ss:$48 sps:$4 sm:$0xff]  }
 0xdcd   : > { %7019 = vmatprep.subr.bf16.mxu1 %v8262_v0 }
 0xdd0   : > { %7020 = vmatpush3.bf16.msra.mxu1 %v7591_v32  ;;  %v7611_v32 = vld [vmem:[#allocation15 + $0x68] ss:$48 sps:$4 sm:$0xff]  }
 0xdd1   : > { %7021 = vmatprep.subr.bf16.mxu1 %v8262_v0 }
 0xdd4   : > { %7022 = vmatpush3.bf16.msra.mxu1 %v7592_v8 }
 0xdd5   : > { %7023 = vmatprep.subr.bf16.mxu1 %v8262_v0 }
 0xdd8   : > { %7024 = vmatpush3.bf16.msra.mxu1 %v7593_v36 }
 0xe56   : > { %v3301_v19 = vpop.xlane.xlu0 %3300 }
 0xe57   : > { %v3304_v55 = vmul.f32 0.015625, %v3301_v19 }
 0xe58   : > { %v3303_v28 = vpop.xlane.xlu1 %3302 }
 0xe59   : > { %v3306_v5 = vsub.f32 %v3293_v20, %v3304_v55  ;;  %v3305_v26 = vmul.f32 0.015625, %v3303_v28 }
 0xe5b   : > { %v3307_v29 = vsub.f32 %v3294_v51, %v3305_v26  ;;  %v3308_v30 = vsel %vm3299_vm3, %v3306_v5, 0.0 }
 0xe5c   : > { %v3310_v9 = vmul.f32 %v3308_v30, %v3308_v30 }
 0xe5d   : > { %v3309_v18 = vsel %vm3299_vm3, %v3307_v29, 0.0 }
 0xe5e   : > { %3312 = vadd.xlane.f32.xlu0 %v3310_v9  ;;  %v3311_v31 = vmul.f32 %v3309_v18, %v3309_v18  ;;  %v7604_v9 = vld [vmem:[#allocation15 + $0x4] ss:$48 sps:$4 sm:$0xff]  }
 0xe5f   : > { %4252 = vmatprep.subr.bf16.mxu1 %v7604_v9 }
 0xe60   : > { %3314 = vadd.xlane.f32.xlu1 %v3311_v31  ;;  %v7607_v31 = vld [vmem:[#allocation15 + $0xc] ss:$48 sps:$4 sm:$0xff]  }
 0xe61   : > { %4295 = vmatprep.subr.bf16.mxu0 %v7607_v31 }
 0xeeb   : > { %v3313_v40 = vpop.xlane.xlu0 %3312 }
 0xeec   : > { %v3316_v41 = vmul.f32 0.015625, %v3313_v40 }
 0xeed   : > { %v3315_v42 = vpop.xlane.xlu1 %3314 }
 0xeee   : > { %v3318_v45 = vadd.f32 1e-05, %v3316_v41  ;;  %v3317_v46 = vmul.f32 0.015625, %v3315_v42  ;;  %v7616_v42 = vld [vmem:[#allocation15 + $0xc4] ss:$48 sps:$4 sm:$0xff]  }
 0xef0   : > { %7826 = vrsqrt.f32 %v3318_v45  ;;  %v3319_v49 = vadd.f32 1e-05, %v3317_v46  ;;  %v7619_v45 = vld [vmem:[#allocation15 + $0xcc] ss:$48 sps:$4 sm:$0xff]   ;;  %v7614_v46 = vld [vmem:[#allocation15 + $0xc0] ss:$48 sps:$4 sm:$0xff]  }
 0xef2   : > { %7828 = vrsqrt.f32 %v3319_v49  ;;  %v7617_v49 = vld [vmem:[#allocation15 + $0xc8] ss:$48 sps:$4 sm:$0xff]  }
 0xefa   : > { %v7827_v59 = vpop.eup %7826 }
 0xefb   : > { %v3322_v2 = vmul.f32 %v7827_v59, %v3308_v30  ;;  %v7602_v30 = vld [vmem:[#allocation15] ss:$48 sps:$4 sm:$0xff]   ;;  %v7622_v59 = vld [vmem:[#allocation15 + $0x124] ss:$48 sps:$4 sm:$0xff]  }
 0xefc   : > { %v7829_v6 = vpop.eup %7828 }
 0xefd   : > { %v3323_v12 = vmul.f32 %v7829_v6, %v3309_v18  ;;  %v3330_v15 = vmul.f32 %v6440_v56, %v3322_v2  ;;  %v7605_v18 = vld [vmem:[#allocation15 + $0x8] ss:$48 sps:$4 sm:$0xff]   ;;  %v7620_v2 = vld [vmem:[#allocation15 + $0x120] ss:$48 sps:$4 sm:$0xff]  }
 0xefe   : > { %v7623_v6 = vld [vmem:[#allocation15 + $0x128] ss:$48 sps:$4 sm:$0xff]  }
 0xeff   : > { %v3331_v16 = vmul.f32 %v6440_v56, %v3323_v12  ;;  %v3338_v17 = vadd.f32 %v6441_v52, %v3330_v15  ;;  %v7625_v56 = vld [vmem:[#allocation15 + $0x12c] ss:$48 sps:$4 sm:$0xff]   ;;  %v7628_v12 = vld [vmem:[#allocation15 + $0x184] ss:$48 sps:$4 sm:$0xff]  }
 0xf00   : > { %v7631_v15 = vld [vmem:[#allocation15 + $0x18c] ss:$48 sps:$4 sm:$0xff]  }
 0xf01   : > { %v3339_v21 = vadd.f32 %v6441_v52, %v3331_v16  ;;  %v7626_v52 = vld [vmem:[#allocation15 + $0x180] ss:$48 sps:$4 sm:$0xff]   ;;  %v7629_v16 = vld [vmem:[#allocation15 + $0x188] ss:$48 sps:$4 sm:$0xff]  }
 0xf03   : > { %v3340_v13 = vpack.c.bf16 %v3339_v21, %v3338_v17  ;;  %v7634_v17 = vld [vmem:[#allocation15 + $0x1e4] ss:$48 sps:$4 sm:$0xff]   ;;  %v7637_v21 = vld [vmem:[#allocation15 + $0x1ec] ss:$48 sps:$4 sm:$0xff]  }
 0xf05   : > { %7026 = vmatmul.mubr.bf16.vlgmr.msra.gmra.mrb[72].mxu1 %v3340_v13  ;;  %v7632_v13 = vld [vmem:[#allocation15 + $0x1e0] ss:$48 sps:$4 sm:$0xff]  }
 0xf06   : > { %4284 = vmatprep.mubr.bf16.mxu1 %v8264_v44  ;;  %4253 = vmatpush1.bf16.msra.mxu1 %v7602_v30 }
 0xf07   : > { %4254 = vmatprep.subr.bf16.mxu1 %v7610_v58  ;;  %v6461_v58 = vld [vmem:[%s9472_s15] ss:$0 sm:$0xff] }
 0xf0a   : > { %4255 = vmatpush1.bf16.msra.mxu1 %v7608_v48 }
 0xf0b   : > { %4256 = vmatprep.subr.bf16.mxu1 %v7616_v42  ;;  %v7665_v42 = vld [vmem:[#allocation15 + $0xd8] ss:$48 sps:$4 sm:$0xff]  }
 0xf0e   : > { %4257 = vmatpush1.bf16.msra.mxu1 %v7614_v46  ;;  %v7673_v46 = vld [vmem:[#allocation15 + $0x13c] ss:$48 sps:$4 sm:$0xff]  }
 0xf0f   : > { %4258 = vmatprep.subr.bf16.mxu1 %v7622_v59  ;;  %v7671_v59 = vld [vmem:[#allocation15 + $0x138] ss:$48 sps:$4 sm:$0xff]  }
 0xf12   : > { %4259 = vmatpush1.bf16.msra.mxu1 %v7620_v2  ;;  %v7679_v2 = vld [vmem:[#allocation15 + $0x19c] ss:$48 sps:$4 sm:$0xff]  }
 0xf13   : > { %4260 = vmatprep.subr.bf16.mxu1 %v7628_v12  ;;  %v7677_v12 = vld [vmem:[#allocation15 + $0x198] ss:$48 sps:$4 sm:$0xff]  }
 0xf16   : > { %4261 = vmatpush1.bf16.msra.mxu1 %v7626_v52  ;;  %v7685_v52 = vld [vmem:[#allocation15 + $0x1fc] ss:$48 sps:$4 sm:$0xff]  }
 0xf17   : > { %4262 = vmatprep.subr.bf16.mxu1 %v7634_v17  ;;  %v7683_v17 = vld [vmem:[#allocation15 + $0x1f8] ss:$48 sps:$4 sm:$0xff]  }
 0xf1a   : > { %4263 = vmatpush1.bf16.msra.mxu1 %v7632_v13  ;;  %v7691_v13 = vld [vmem:[#allocation15 + $0x25c] ss:$48 sps:$4 sm:$0xff]  }
 0xf1b   : > { %4264 = vmatprep.subr.bf16.mxu1 %v7640_v1  ;;  %v7689_v1 = vld [vmem:[#allocation15 + $0x258] ss:$48 sps:$4 sm:$0xff]  }
 0xfd8   : > { %v3446_v25 = vpop.f32.mrb[72].mxu1 }
 0xfd9   : > { %v3447_v33 = vadd.f32 %v6442_v7, %v3446_v25  ;;  %v7027_v47 = vpop.f32.mrb[73].mxu1  ;;  %v7638_v25 = vld [vmem:[#allocation15 + $0x240] ss:$48 sps:$4 sm:$0xff]  }
 0xfda   : > { %v3449_v53 = vpop.f32.mrb[74].mxu1  ;;  %4265 = vmatpush1.bf16.msra.mxu1 %v7638_v25  ;;  %v7646_v47 = vld [vmem:[#allocation15 + $0x2a4] ss:$48 sps:$4 sm:$0xff]   ;;  %v7697_v25 = vld [vmem:[#allocation15 + $0x2bc] ss:$48 sps:$4 sm:$0xff]  }
 0xfdb   : > { %v3450_v24 = vadd.f32 %v6442_v7, %v3449_v53  ;;  %v7028_v27 = vpop.f32.mrb[75].mxu1  ;;  %v3453_v20 = vmax.f32 %v3447_v33, 0.0  ;;  %v7643_v7 = vld [vmem:[#allocation15 + $0x24c] ss:$48 sps:$4 sm:$0xff]   ;;  %v7641_v33 = vld [vmem:[#allocation15 + $0x248] ss:$48 sps:$4 sm:$0xff]   ;;  %4266 = vmatprep.subr.bf16.mxu1 %v7646_v47 }
 0xfdc   : > { %v7649_v53 = vld [vmem:[#allocation15 + $0x2ac] ss:$48 sps:$4 sm:$0xff]   ;;  %v7647_v27 = vld [vmem:[#allocation15 + $0x2a8] ss:$48 sps:$4 sm:$0xff]  }
 0xfdd   : > { %v3454_v51 = vmax.f32 %v3450_v24, 0.0  ;;  %v7644_v24 = vld [vmem:[#allocation15 + $0x2a0] ss:$48 sps:$4 sm:$0xff]   ;;  %v7695_v47 = vld [vmem:[#allocation15 + $0x2b8] ss:$48 sps:$4 sm:$0xff]  }
 0xfde   : > { %4267 = vmatpush1.bf16.msra.mxu1 %v7644_v24  ;;  %v7703_v24 = vld [vmem:[#allocation15 + $0x2c] ss:$48 sps:$4 sm:$0xff]  }
 0xfdf   : > { %v3455_v57 = vpack.c.bf16 %v3454_v51, %v3453_v20  ;;  %v7652_v20 = vld [vmem:[#allocation15 + $0x14] ss:$48 sps:$4 sm:$0xff]   ;;  %v7655_v51 = vld [vmem:[#allocation15 + $0x1c] ss:$48 sps:$4 sm:$0xff]  }
 0xfe0   : > { %4338 = vmatprep.subr.bf16.mxu1 %v7652_v20  ;;  %v7701_v20 = vld [vmem:[#allocation15 + $0x28] ss:$48 sps:$4 sm:$0xff]  }
 0xfe1   : > { %7046 = vmatmul.mubr.bf16.vlgmr.msra.gmra.mrb[36].mxu0 %v3455_v57 }
 0xfe2   : > { %4327 = vmatprep.mubr.bf16.mxu0 %v8264_v44  ;;  %4296 = vmatpush1.bf16.msra.mxu0 %v7605_v18 }
 0xfe3   : > { %4297 = vmatprep.subr.bf16.mxu0 %v7613_v60 }
 0xfe6   : > { %4298 = vmatpush1.bf16.msra.mxu0 %v7611_v32 }
 0xfe7   : > { %4299 = vmatprep.subr.bf16.mxu0 %v7619_v45  ;;  %v7670_v45 = vld [vmem:[#allocation15 + $0x134] ss:$48 sps:$4 sm:$0xff]  }
 0xfea   : > { %4300 = vmatpush1.bf16.msra.mxu0 %v7617_v49  ;;  %v7668_v49 = vld [vmem:[#allocation15 + $0x130] ss:$48 sps:$4 sm:$0xff]  }
 0xfeb   : > { %4301 = vmatprep.subr.bf16.mxu0 %v7625_v56  ;;  %v7676_v56 = vld [vmem:[#allocation15 + $0x194] ss:$48 sps:$4 sm:$0xff]  }
 0xfee   : > { %4302 = vmatpush1.bf16.msra.mxu0 %v7623_v6  ;;  %v7674_v6 = vld [vmem:[#allocation15 + $0x190] ss:$48 sps:$4 sm:$0xff]  }
 0xfef   : > { %4303 = vmatprep.subr.bf16.mxu0 %v7631_v15  ;;  %v7682_v15 = vld [vmem:[#allocation15 + $0x1f4] ss:$48 sps:$4 sm:$0xff]  }
 0xff2   : > { %4304 = vmatpush1.bf16.msra.mxu0 %v7629_v16  ;;  %v7680_v16 = vld [vmem:[#allocation15 + $0x1f0] ss:$48 sps:$4 sm:$0xff]  }
 0xff3   : > { %4305 = vmatprep.subr.bf16.mxu0 %v7637_v21  ;;  %v7688_v21 = vld [vmem:[#allocation15 + $0x254] ss:$48 sps:$4 sm:$0xff]  }
 0xff6   : > { %4306 = vmatpush1.bf16.msra.mxu0 %v7635_v23  ;;  %v7686_v23 = vld [vmem:[#allocation15 + $0x250] ss:$48 sps:$4 sm:$0xff]  }
 0xff7   : > { %4307 = vmatprep.subr.bf16.mxu0 %v7643_v7  ;;  %v7694_v7 = vld [vmem:[#allocation15 + $0x2b4] ss:$48 sps:$4 sm:$0xff]  }
 0xffa   : > { %4308 = vmatpush1.bf16.msra.mxu0 %v7641_v33  ;;  %v7692_v33 = vld [vmem:[#allocation15 + $0x2b0] ss:$48 sps:$4 sm:$0xff]  }
 0xffb   : > { %4309 = vmatprep.subr.bf16.mxu0 %v7649_v53  ;;  %v7700_v53 = vld [vmem:[#allocation15 + $0x24] ss:$48 sps:$4 sm:$0xff]  }
 0xffe   : > { %4310 = vmatpush1.bf16.msra.mxu0 %v7647_v27  ;;  %v7698_v27 = vld [vmem:[#allocation15 + $0x20] ss:$48 sps:$4 sm:$0xff]  }
 0xfff   : > { %4381 = vmatprep.subr.bf16.mxu0 %v7655_v51  ;;  %v7706_v51 = vld [vmem:[#allocation15 + $0x84] ss:$48 sps:$4 sm:$0xff]  }
0x10b4   : > { %v3561_v19 = vpop.f32.mrb[36].mxu0 }
0x10b5   : > { %v3562_v55 = vadd.f32 %v6451_v63, %v3561_v19  ;;  %v7047_v28 = vpop.f32.mrb[37].mxu0 }
0x10b6   : > { %v3564_v5 = vpop.f32.mrb[38].mxu0 }
0x10b7   : > { %v3565_v26 = vadd.f32 %v6451_v63, %v3564_v5  ;;  %3571 = vadd.xlane.f32.xlu0 %v3562_v55  ;;  %v7048_v29 = vpop.f32.mrb[39].mxu0 }
0x10b8   : > { %v6460_v29 = vld [vmem:[%s9471_s14] ss:$0 sm:$0xff] }
0x10b9   : > { %3573 = vadd.xlane.f32.xlu1 %v3565_v26 }
0x1144   : > { %v3572_v8 = vpop.xlane.xlu0 %3571 }
0x1145   : > { %v3575_v36 = vmul.f32 0.03125, %v3572_v8  ;;  %v7650_v8 = vld [vmem:[#allocation15 + $0x10] ss:$48 sps:$4 sm:$0xff]  }
0x1146   : > { %v3574_v37 = vpop.xlane.xlu1 %3573 }
0x1147   : > { %v3577_v38 = vsub.f32 %v3562_v55, %v3575_v36  ;;  %v3576_v43 = vmul.f32 0.03125, %v3574_v37  ;;  %v7653_v36 = vld [vmem:[#allocation15 + $0x18] ss:$48 sps:$4 sm:$0xff]  }
0x1149   : > { %v3578_v39 = vsub.f32 %v3565_v26, %v3576_v43  ;;  %v9127_v4 = vsel %vm3570_vm4, %v3577_v38, 0.0  ;;  %v7658_v38 = vld [vmem:[#allocation15 + $0x74] ss:$48 sps:$4 sm:$0xff]   ;;  %v7661_v43 = vld [vmem:[#allocation15 + $0x7c] ss:$48 sps:$4 sm:$0xff]  }
0x114a   : > { %v3581_v3 = vmul.f32 %v9127_v4, %v9127_v4 }
0x114b   : > { %v9133_v40 = vsel %vm3570_vm4, %v3578_v39, 0.0  ;;  %v7656_v39 = vld [vmem:[#allocation15 + $0x70] ss:$48 sps:$4 sm:$0xff]  }
0x114c   : > { %3583 = vadd.xlane.f32.xlu0 %v3581_v3  ;;  %v3582_v41 = vmul.f32 %v9133_v40, %v9133_v40  ;;  %v7664_v3 = vld [vmem:[#allocation15 + $0xd4] ss:$48 sps:$4 sm:$0xff]  }
0x114e   : > { %3585 = vadd.xlane.f32.xlu1 %v3582_v41  ;;  %v7662_v41 = vld [vmem:[#allocation15 + $0xd0] ss:$48 sps:$4 sm:$0xff]  }
0x11d9   : > { %v3584_v57 = vpop.xlane.xlu0 %3583 }
0x11da   : > { %v3587_v63 = vmul.f32 0.03125, %v3584_v57  ;;  %v7709_v57 = vld [vmem:[#allocation15 + $0x8c] ss:$48 sps:$4 sm:$0xff]  }
0x11db   : > { %v3586_v19 = vpop.xlane.xlu1 %3585 }
0x11dc   : > { %v3589_v55 = vadd.f32 1e-05, %v3587_v63  ;;  %v3588_v28 = vmul.f32 0.03125, %v3586_v19  ;;  %v7704_v63 = vld [vmem:[#allocation15 + $0x80] ss:$48 sps:$4 sm:$0xff]  }
0x11dd   : > { %v7707_v19 = vld [vmem:[#allocation15 + $0x88] ss:$48 sps:$4 sm:$0xff]  }
0x11de   : > { %7830 = vrsqrt.f32 %v3589_v55  ;;  %v3590_v5 = vadd.f32 1e-05, %v3588_v28  ;;  %v7712_v55 = vld [vmem:[#allocation15 + $0xe4] ss:$48 sps:$4 sm:$0xff]   ;;  %v7715_v28 = vld [vmem:[#allocation15 + $0xec] ss:$48 sps:$4 sm:$0xff]  }
0x11e0   : > { %7832 = vrsqrt.f32 %v3590_v5  ;;  %v7710_v5 = vld [vmem:[#allocation15 + $0xe0] ss:$48 sps:$4 sm:$0xff]  }
0x11e8   : > { %v7831_v26 = vpop.eup %7830 }
0x11e9   : > { %v3593_v30 = vmul.f32 %v7831_v26, %v9127_v4  ;;  %v7659_v4 = vld [vmem:[#allocation15 + $0x78] ss:$48 sps:$4 sm:$0xff]  }
0x11ea   : > { %v7833_v9 = vpop.eup %7832  ;;  %v7713_v26 = vld [vmem:[#allocation15 + $0xe8] ss:$48 sps:$4 sm:$0xff]  }
0x11eb   : > { %v3601_v18 = vmul.f32 %v6460_v29, %v3593_v30  ;;  %v3594_v31 = vmul.f32 %v7833_v9, %v9133_v40  ;;  %v7667_v40 = vld [vmem:[#allocation15 + $0xdc] ss:$48 sps:$4 sm:$0xff]   ;;  %v7716_v9 = vld [vmem:[#allocation15 + $0x140] ss:$48 sps:$4 sm:$0xff]  }
0x11ec   : > { %v7721_v30 = vld [vmem:[#allocation15 + $0x14c] ss:$48 sps:$4 sm:$0xff]  }
0x11ed   : > { %v3602_v60 = vmul.f32 %v6460_v29, %v3594_v31  ;;  %v9145_v48 = vadd.f32 %v6461_v58, %v3601_v18  ;;  %v7718_v29 = vld [vmem:[#allocation15 + $0x144] ss:$48 sps:$4 sm:$0xff]   ;;  %v7719_v18 = vld [vmem:[#allocation15 + $0x148] ss:$48 sps:$4 sm:$0xff]  }
0x11ee   : > { %v7724_v31 = vld [vmem:[#allocation15 + $0x1a4] ss:$48 sps:$4 sm:$0xff]  }
0x11ef   : > { %v9147_v32 = vadd.f32 %v6461_v58, %v3602_v60  ;;  %v7727_v58 = vld [vmem:[#allocation15 + $0x1ac] ss:$48 sps:$4 sm:$0xff]   ;;  %v7722_v60 = vld [vmem:[#allocation15 + $0x1a0] ss:$48 sps:$4 sm:$0xff]  }
0x11f1   : > { %v9151_v37 = vpack.c.bf16 %v9147_v32, %v9145_v48 }
0x11f3   : > { %4285 = vmatmul.mubr.bf16.vlgmr.msra.gmra.mrb[76].mxu1 %v9151_v37  ;;  %4328 = vmatmul.mubr.bf16.vlgmr.msra.gmra.mrb[40].mxu0 %v9151_v37 }
0x11f4   : > { %4339 = vmatpush1.bf16.msra.mxu1 %v7650_v8  ;;  %4382 = vmatpush1.bf16.msra.mxu0 %v7653_v36  ;;  %v7730_v8 = vld [vmem:[#allocation15 + $0x204] ss:$48 sps:$4 sm:$0xff]   ;;  %v7733_v36 = vld [vmem:[#allocation15 + $0x20c] ss:$48 sps:$4 sm:$0xff]  }
0x11f5   : > { %4340 = vmatprep.subr.bf16.mxu1 %v7658_v38  ;;  %4383 = vmatprep.subr.bf16.mxu0 %v7661_v43  ;;  %v7728_v38 = vld [vmem:[#allocation15 + $0x200] ss:$48 sps:$4 sm:$0xff]   ;;  %v7731_v43 = vld [vmem:[#allocation15 + $0x208] ss:$48 sps:$4 sm:$0xff]  }
0x11f6   : > { %4370 = vmatprep.mubr.bf16.mxu1 %v8264_v44  ;;  %4413 = vmatprep.mubr.bf16.mxu0 %v8264_v44 }
0x11f8   : > { %4341 = vmatpush1.bf16.msra.mxu1 %v7656_v39  ;;  %4384 = vmatpush1.bf16.msra.mxu0 %v7659_v4  ;;  %v7736_v39 = vld [vmem:[#allocation15 + $0x264] ss:$48 sps:$4 sm:$0xff]   ;;  %v7739_v4 = vld [vmem:[#allocation15 + $0x26c] ss:$48 sps:$4 sm:$0xff]  }
0x11f9   : > { %4342 = vmatprep.subr.bf16.mxu1 %v7664_v3  ;;  %4385 = vmatprep.subr.bf16.mxu0 %v7667_v40  ;;  %v7734_v3 = vld [vmem:[#allocation15 + $0x260] ss:$48 sps:$4 sm:$0xff]   ;;  %v7737_v40 = vld [vmem:[#allocation15 + $0x268] ss:$48 sps:$4 sm:$0xff]  }
0x11fc   : > { %4343 = vmatpush1.bf16.msra.mxu1 %v7662_v41  ;;  %4386 = vmatpush1.bf16.msra.mxu0 %v7665_v42  ;;  %v7742_v41 = vld [vmem:[#allocation15 + $0x2c4] ss:$48 sps:$4 sm:$0xff]   ;;  %v7745_v42 = vld [vmem:[#allocation15 + $0x2cc] ss:$48 sps:$4 sm:$0xff]  }
0x11fd   : > { %4344 = vmatprep.subr.bf16.mxu1 %v7670_v45  ;;  %4387 = vmatprep.subr.bf16.mxu0 %v7673_v46  ;;  %v7740_v45 = vld [vmem:[#allocation15 + $0x2c0] ss:$48 sps:$4 sm:$0xff]   ;;  %v7743_v46 = vld [vmem:[#allocation15 + $0x2c8] ss:$48 sps:$4 sm:$0xff]  }
0x1200   : > { %4345 = vmatpush1.bf16.msra.mxu1 %v7668_v49  ;;  %4388 = vmatpush1.bf16.msra.mxu0 %v7671_v59  ;;  %v9172_v49 = vld [vmem:[%s9474_s17] sm:$0xff] }
0x1201   : > { %4346 = vmatprep.subr.bf16.mxu1 %v7676_v56  ;;  %4389 = vmatprep.subr.bf16.mxu0 %v7679_v2  ;;  %v9176_v59 = vrot.slane %v9172_v49, %v8826_v62 }
0x1204   : > { %4347 = vmatpush1.bf16.msra.mxu1 %v7674_v6  ;;  %4390 = vmatpush1.bf16.msra.mxu0 %v7677_v12 }
0x1205   : > { %4348 = vmatprep.subr.bf16.mxu1 %v7682_v15  ;;  %4391 = vmatprep.subr.bf16.mxu0 %v7685_v52  ;;  %v3719_v15 = vrot.slane %v9172_v49, %v8882_v34 }
0x1208   : > { %4349 = vmatpush1.bf16.msra.mxu1 %v7680_v16  ;;  %4392 = vmatpush1.bf16.msra.mxu0 %v7683_v17 }
0x1209   : > { %4350 = vmatprep.subr.bf16.mxu1 %v7688_v21  ;;  %4393 = vmatprep.subr.bf16.mxu0 %v7691_v13 }
0x120c   : > { %4351 = vmatpush1.bf16.msra.mxu1 %v7686_v23  ;;  %4394 = vmatpush1.bf16.msra.mxu0 %v7689_v1  ;;  %v3731_v23 = vrot.slane %v9172_v49, %v1258_v10  ;;  %v9197_v1 = vrot.slane %v9172_v49, %v1266_v11  ;;  %v3715_v10 = vrot.slane %v9172_v49, %v8858_v14 }
0x120d   : > { %4352 = vmatprep.subr.bf16.mxu1 %v7694_v7  ;;  %4395 = vmatprep.subr.bf16.mxu0 %v7697_v25  ;;  %v3735_v7 = vrot.slane %v9172_v49, %v1262_v50 }
0x1210   : > { %4353 = vmatpush1.bf16.msra.mxu1 %v7692_v33  ;;  %4396 = vmatpush1.bf16.msra.mxu0 %v7695_v47 }
0x1211   : > { %4424 = vmatprep.subr.bf16.mxu1 %v7700_v53  ;;  %4467 = vmatprep.subr.bf16.mxu0 %v7703_v24 }
0x1213   : > { %4371 = vmatmul.mubr.bf16.vlgmr.msra.gmra.mrb[80].mxu1 %v9151_v37  ;;  %4414 = vmatmul.mubr.bf16.vlgmr.msra.gmra.mrb[44].mxu0 %v9151_v37 }
0x1214   : > { %4425 = vmatpush1.bf16.msra.mxu1 %v7698_v27  ;;  %4468 = vmatpush1.bf16.msra.mxu0 %v7701_v20 }
0x1215   : > { %4426 = vmatprep.subr.bf16.mxu1 %v7706_v51  ;;  %4469 = vmatprep.subr.bf16.mxu0 %v7709_v57 }
0x1216   : > { %4456 = vmatprep.mubr.bf16.mxu1 %v8264_v44  ;;  %4499 = vmatprep.mubr.bf16.mxu0 %v8264_v44  ;;  %v7725_v44 = vld [vmem:[#allocation15 + $0x1a8] ss:$48 sps:$4 sm:$0xff]  }
0x1218   : > { %4427 = vmatpush1.bf16.msra.mxu1 %v7704_v63  ;;  %4470 = vmatpush1.bf16.msra.mxu0 %v7707_v19 }
0x1219   : > { %4428 = vmatprep.subr.bf16.mxu1 %v7712_v55  ;;  %4471 = vmatprep.subr.bf16.mxu0 %v7715_v28 }
0x121c   : > { %4429 = vmatpush1.bf16.msra.mxu1 %v7710_v5  ;;  %4472 = vmatpush1.bf16.msra.mxu0 %v7713_v26 }
0x121d   : > { %4430 = vmatprep.subr.bf16.mxu1 %v7718_v29  ;;  %4473 = vmatprep.subr.bf16.mxu0 %v7721_v30 }
0x1220   : > { %4431 = vmatpush1.bf16.msra.mxu1 %v7716_v9  ;;  %4474 = vmatpush1.bf16.msra.mxu0 %v7719_v18 }
0x1221   : > { %4432 = vmatprep.subr.bf16.mxu1 %v7724_v31  ;;  %4475 = vmatprep.subr.bf16.mxu0 %v7727_v58  ;;  %v3709_v58 = vld [vmem:[%s9474_s17 + $0x8] sm:$0xf] }
0x1224   : > { %4433 = vmatpush1.bf16.msra.mxu1 %v7722_v60  ;;  %4476 = vmatpush1.bf16.msra.mxu0 %v7725_v44  ;;  %v3747_v60 = vrot.slane %v3709_v58, %v8858_v14  ;;  %v3755_v44 = vrot.slane %v3709_v58, %v8826_v62 }
0x1225   : > { %4434 = vmatprep.subr.bf16.mxu1 %v7730_v8  ;;  %4477 = vmatprep.subr.bf16.mxu0 %v7733_v36  ;;  %v3751_v8 = vrot.slane %v3709_v58, %v8882_v34  ;;  %v3759_v36 = vrot.slane %v3709_v58, %v8885_v35 }
0x1228   : > { %4435 = vmatpush1.bf16.msra.mxu1 %v7728_v38  ;;  %4478 = vmatpush1.bf16.msra.mxu0 %v7731_v43 }
0x1229   : > { %4436 = vmatprep.subr.bf16.mxu1 %v7736_v39  ;;  %4479 = vmatprep.subr.bf16.mxu0 %v7739_v4 }
0x122c   : > { %4437 = vmatpush1.bf16.msra.mxu1 %v7734_v3  ;;  %4480 = vmatpush1.bf16.msra.mxu0 %v7737_v40 }
0x122d   : > { %4438 = vmatprep.subr.bf16.mxu1 %v7742_v41  ;;  %4481 = vmatprep.subr.bf16.mxu0 %v7745_v42 }
0x1230   : > { %4439 = vmatpush1.bf16.msra.mxu1 %v7740_v45  ;;  %4482 = vmatpush1.bf16.msra.mxu0 %v7743_v46 }
0x1231   : > { %7049 = vmatprep.subr.bf16.mxu1 %v8262_v0  ;;  %7073 = vmatprep.subr.bf16.mxu0 %v8262_v0 }
0x1233   : > { %4457 = vmatmul.mubr.bf16.vlgmr.msra.gmra.mrb[84].mxu1 %v9151_v37  ;;  %4500 = vmatmul.mubr.bf16.vlgmr.msra.gmra.mrb[48].mxu0 %v9151_v37 }
0x1234   : > { %7051 = vmatprep.mubr.msk.bf16.mxu1 %vm8263_vm0, %v8262_v0  ;;  %7075 = vmatprep.mubr.msk.bf16.mxu0 %vm8263_vm0, %v8262_v0 }
0x12c6   : > { %v4286_v56 = vpop.f32.mrb[76].mxu1  ;;  %v4329_v2 = vpop.f32.mrb[40].mxu0 }
0x12c7   : > { %v9179_v6 = vadd.f32 %v4329_v2, %v9176_v59  ;;  %v4288_v37 = vpop.f32.mrb[77].mxu1  ;;  %v9181_v12 = vpop.f32.mrb[41].mxu0  ;;  %v4287_v28 = vadd.f32 %v4286_v56, %v3715_v10 }
0x12c8   : > { %v4290_v52 = vpop.f32.mrb[78].mxu1  ;;  %v9185_v16 = vpop.f32.mrb[42].mxu0  ;;  %v4289_v5 = vadd.f32 %v4288_v37, %v3719_v15 }
0x12c9   : > { %v4292_v17 = vpop.f32.mrb[79].mxu1  ;;  %v9187_v21 = vpop.f32.mrb[43].mxu0  ;;  %v4510_v29 = vpack.c.bf16 %v4287_v28, %v4287_v28  ;;  %v4291_v18 = vadd.f32 %v4290_v52, %v3715_v10 }
0x12ca   : > { %v9189_v13 = vadd.f32 %v4292_v17, %v3719_v15  ;;  %v4731_v30 = vpack.c.bf16 %v4289_v5, %v4289_v5 }
0x12cb   : > { %v4511_v31 = vpack.c.bf16 %v4291_v18, %v4291_v18 }
0x12e6   : > { %v4372_v25 = vpop.f32.mrb[80].mxu1  ;;  %v4415_v33 = vpop.f32.mrb[44].mxu0 }
0x12e7   : > { %v4373_v47 = vadd.f32 %v4372_v25, %v3731_v23  ;;  %v9203_v53 = vadd.f32 %v4415_v33, %v9197_v1  ;;  %v4374_v24 = vpop.f32.mrb[81].mxu1  ;;  %v9205_v27 = vpop.f32.mrb[45].mxu0 }
0x12e8   : > { %v4375_v20 = vadd.f32 %v4374_v24, %v3735_v7  ;;  %v4376_v51 = vpop.f32.mrb[82].mxu1  ;;  %v9209_v11 = vpop.f32.mrb[46].mxu0 }
0x12e9   : > { %v4512_v57 = vpack.c.bf16 %v4373_v47, %v4373_v47  ;;  %v4378_v63 = vpop.f32.mrb[83].mxu1  ;;  %v9211_v19 = vpop.f32.mrb[47].mxu0  ;;  %v4377_v26 = vadd.f32 %v4376_v51, %v3731_v23 }
0x12ea   : > { %v4733_v50 = vpack.c.bf16 %v4375_v20, %v4375_v20  ;;  %v9213_v55 = vadd.f32 %v4378_v63, %v3735_v7 }
0x12eb   : > { %7050 = vmatpush3.bf16.xpose.msra.mxu1 %v4512_v57  ;;  %v4513_v9 = vpack.c.bf16 %v4377_v26, %v4377_v26 }
0x12ec   : > { %7074 = vmatpush3.bf16.xpose.msra.mxu0 %v4733_v50  ;;  %7055 = vmatprep.subr.bf16.mxu1 %v8262_v0 }
0x12ed   : > { %7085 = vmatprep.subr.bf16.mxu0 %v8262_v0 }
0x12f2   : > { %7052 = vmatmul.mubr.bf16.vlgmr.msra.gmra.mrb[88].mxu1 %v4510_v29 }
0x12f3   : > { %7056 = vmatpush3.bf16.xpose.msra.mxu1 %v4513_v9  ;;  %7076 = vmatmul.mubr.bf16.vlgmr.msra.gmra.mrb[52].mxu0 %v4731_v30 }
0x12f4   : > { %7057 = vmatprep.mubr.msk.bf16.mxu1 %vm8263_vm0, %v8262_v0  ;;  %7061 = vmatprep.subr.bf16.mxu1 %v8262_v0 }
0x12f5   : > { %7087 = vmatprep.mubr.msk.bf16.mxu0 %vm8263_vm0, %v8262_v0 }
0x12fa   : > { %7058 = vmatmul.mubr.bf16.vlgmr.msra.gmra.mrb[92].mxu1 %v4511_v31 }
0x12fb   : > { %7063 = vmatprep.mubr.msk.bf16.mxu1 %vm8263_vm0, %v8262_v0 }
0x1306   : > { %v4458_v38 = vpop.f32.mrb[84].mxu1  ;;  %v4501_v43 = vpop.f32.mrb[48].mxu0 }
0x1307   : > { %v4459_v39 = vadd.f32 %v4458_v38, %v3747_v60  ;;  %v9231_v4 = vadd.f32 %v4501_v43, %v3755_v44  ;;  %v4460_v3 = vpop.f32.mrb[85].mxu1  ;;  %v4503_v40 = vpop.f32.mrb[49].mxu0 }
0x1308   : > { %v4461_v41 = vadd.f32 %v4460_v3, %v3751_v8  ;;  %v9233_v42 = vadd.f32 %v4503_v40, %v3759_v36  ;;  %v4462_v45 = vpop.f32.mrb[86].mxu1  ;;  %v4505_v46 = vpop.f32.mrb[50].mxu0 }
0x1309   : > { %v4514_v56 = vpack.c.bf16 %v4459_v39, %v4459_v39  ;;  %v4463_v14 = vadd.f32 %v4462_v45, %v3747_v60  ;;  %v9235_v2 = vadd.f32 %v4505_v46, %v3755_v44  ;;  %v4464_v62 = vpop.f32.mrb[87].mxu1  ;;  %v4507_v34 = vpop.f32.mrb[51].mxu0 }
0x130a   : > { %v4735_v37 = vpack.c.bf16 %v4461_v41, %v4461_v41  ;;  %v9237_v15 = vadd.f32 %v4464_v62, %v3751_v8  ;;  %v9239_v52 = vadd.f32 %v4507_v34, %v3759_v36 }
0x130b   : > { %v4626_v17 = vsel %vm2154_vm1, %v4514_v56, 0  ;;  %v4515_v41 = vpack.c.bf16 %v4463_v14, %v4463_v14 }
0x130c   : > { %v4847_v23 = vsel %vm2154_vm1, %v4735_v37, 0  ;;  %7062 = vmatpush3.bf16.msra.mxu1 %v4626_v17  ;;  %v4734_v17 = vpack.c.bf16 %v9213_v55, %v9213_v55  ;;  %v4736_v14 = vpack.c.bf16 %v9237_v15, %v9237_v15 }
0x130d   : > { %7086 = vmatpush3.bf16.msra.mxu0 %v4847_v23  ;;  %7067 = vmatprep.subr.bf16.mxu1 %v8262_v0  ;;  %v4672_v56 = vsel %vm2154_vm1, %v4515_v41, 0  ;;  %v4732_v23 = vpack.c.bf16 %v9189_v13, %v9189_v13  ;;  %v7746_v41 = vld [vmem:[#allocation16] sm:$0xff]  }
0x130e   : > { %7097 = vmatprep.subr.bf16.mxu0 %v8262_v0 }
0x13c5   : > { %v4550_v7 = vpop.f32.mrb[88].mxu1 }
0x13c6   : > { %v4596_v25 = vmul.f32 0.35355338, %v4550_v7  ;;  %v7053_v33 = vpop.f32.mrb[89].mxu1  ;;  %v9245_v47 = vpop.f32.mrb[52].mxu0  ;;  %v4893_v7 = vsel %vm2154_vm1, %v4736_v14, 0  ;;  %v7755_v14 = vld [vmem:[#allocation16 + $0x48] sm:$0xff]  }
0x13c7   : > { %v4553_v24 = vpop.f32.mrb[90].mxu1  ;;  %v7077_v10 = vpop.f32.mrb[53].mxu0 }
0x13c8   : > { %v7054_v20 = vpop.f32.mrb[91].mxu1  ;;  %v4774_v51 = vpop.f32.mrb[54].mxu0  ;;  %v4598_v57 = vsel %vm2126_vm2, %v4596_v25, -inf }
0x13c9   : > { %4599 = vmax.xlane.f32.xlu0 %v4598_v57  ;;  %v7078_v63 = vpop.f32.mrb[55].mxu0 }
0x13cd   : > { %v4590_v50 = vpop.f32.mrb[92].mxu1 }
0x13ce   : > { %v4597_v28 = vmul.f32 0.35355338, %v4590_v50  ;;  %v7059_v5 = vpop.f32.mrb[93].mxu1 }
0x13cf   : > { %v4593_v26 = vpop.f32.mrb[94].mxu1  ;;  %v4817_v5 = vmul.f32 0.35355338, %v9245_v47 }
0x13d0   : > { %v7060_v29 = vpop.f32.mrb[95].mxu1  ;;  %v4601_v30 = vsel %vm2126_vm2, %v4597_v28, -inf }
0x13d1   : > { %4602 = vmax.xlane.f32.xlu1 %v4601_v30  ;;  %v4819_v30 = vsel %vm2126_vm2, %v4817_v5, -inf }
0x1456   : > { %v4600_v9 = vpop.xlane.xlu0 %4599 }
0x1457   : > { %v4604_v18 = vsub.f32 %v4596_v25, %v4600_v9 }
0x1459   : > { %v4606_v31 = vmul.f32 1.442695, %v4604_v18 }
0x145b   : > { %7834 = vpow2.f32 %v4606_v31 }
0x145e   : > { %v4603_v58 = vpop.xlane.xlu1 %4602 }
0x145f   : > { %v4605_v60 = vsub.f32 %v4597_v28, %v4603_v58 }
0x1461   : > { %v4608_v44 = vmul.f32 1.442695, %v4605_v60 }
0x1463   : > { %7836 = vpow2.f32 %v4608_v44 }
0x1465   : > { %v7835_v8 = vpop.eup %7834 }
0x1466   : > { %v4610_v36 = vsel %vm2126_vm2, %v7835_v8, 0.0 }
0x1467   : > { %4611 = vadd.xlane.f32.xlu0 %v4610_v36 }
0x146d   : > { %v7837_v38 = vpop.eup %7836 }
0x146e   : > { %v4613_v43 = vsel %vm2126_vm2, %v7837_v38, 0.0 }
0x146f   : > { %4614 = vadd.xlane.f32.xlu1 %v4613_v43 }
0x14f4   : > { %v4612_v39 = vpop.xlane.xlu0 %4611 }
0x14f5   : > { %7838 = vrcp.f32 %v4612_v39 }
0x14fc   : > { %v4615_v3 = vpop.xlane.xlu1 %4614 }
0x14fd   : > { %7840 = vrcp.f32 %v4615_v3 }
0x14ff   : > { %v7839_v40 = vpop.eup %7838 }
0x1500   : > { %v4618_v45 = vmul.f32 %v7839_v40, %v7835_v8 }
0x1502   : > { %v4620_v46 = vpack.c.bf16 %v4618_v45, %v4618_v45 }
0x1504   : > { %7064 = vmatmul.mubr.msk.bf16.vlgmr.msra.gmra.mrb[96].mxu1 %vm2126_vm2, %v4620_v46 }
0x1505   : > { %7068 = vmatpush3.bf16.msra.mxu1 %v4672_v56  ;;  %7069 = vmatprep.mubr.msk.bf16.mxu1 %vm8263_vm0, %v8262_v0 }
0x1506   : > { %7079 = vmatprep.subr.bf16.mxu1 %v8262_v0 }
0x1507   : > { %v7841_v62 = vpop.eup %7840 }
0x1508   : > { %v4619_v34 = vmul.f32 %v7841_v62, %v7837_v38  ;;  %v7747_v62 = vld [vmem:[#allocation16 + $0x8] sm:$0xff]  }
0x150a   : > { %v4621_v37 = vpack.c.bf16 %v4619_v34, %v4619_v34  ;;  %v7754_v34 = vld [vmem:[#allocation16 + $0x40] sm:$0xff]  }
0x150c   : > { %7070 = vmatmul.mubr.msk.bf16.vlgmr.msra.gmra.mrb[100].mxu1 %vm2126_vm2, %v4621_v37 }
0x150d   : > { %7081 = vmatprep.mubr.msk.bf16.mxu1 %vm8263_vm0, %v8262_v0 }
0x150e   : > { %7080 = vmatpush3.bf16.xpose.msra.mxu1 %v4734_v17  ;;  %v7748_v17 = vld [vmem:[#allocation16 + $0x10] sm:$0xff]  }
0x150f   : > { %7091 = vmatprep.subr.bf16.mxu1 %v8262_v0 }
0x1515   : > { %7082 = vmatmul.mubr.bf16.vlgmr.msra.gmra.mrb[104].mxu1 %v4732_v23  ;;  %v7749_v23 = vld [vmem:[#allocation16 + $0x18] sm:$0xff]  }
0x1516   : > { %7092 = vmatpush3.bf16.msra.mxu1 %v4893_v7  ;;  %7093 = vmatprep.mubr.msk.bf16.mxu1 %vm8263_vm0, %v8262_v0  ;;  %v7756_v7 = vld [vmem:[#allocation16 + $0x50] sm:$0xff]  }
0x1517   : > { %7117 = vmatprep.subr.bf16.mxu1 %v8262_v0 }
0x15d7   : > { %v9270_v55 = vpop.f32.mrb[96].mxu1 }
0x15d8   : > { %v7065_v25 = vpop.f32.mrb[97].mxu1 }
0x15d9   : > { %v4665_v33 = vpop.f32.mrb[98].mxu1  ;;  %v7750_v25 = vld [vmem:[#allocation16 + $0x20] sm:$0xff]  }
0x15da   : > { %v7066_v24 = vpop.f32.mrb[99].mxu1  ;;  %v7757_v33 = vld [vmem:[#allocation16 + $0x58] sm:$0xff]  }
0x15db   : > { %v7751_v24 = vld [vmem:[#allocation16 + $0x28] sm:$0xff]  }
0x15df   : > { %v9272_v10 = vpop.f32.mrb[100].mxu1 }
0x15e0   : > { %v4714_v15 = vpack.c.bf16 %v9272_v10, %v9270_v55  ;;  %v7071_v13 = vpop.f32.mrb[101].mxu1 }
0x15e1   : > { %v4711_v20 = vpop.f32.mrb[102].mxu1  ;;  %v7758_v13 = vld [vmem:[#allocation16 + $0x60] sm:$0xff]  }
0x15e2   : > { %v7072_v51 = vpop.f32.mrb[103].mxu1  ;;  %v7752_v20 = vld [vmem:[#allocation16 + $0x30] sm:$0xff]  }
0x15e3   : > { %v7759_v51 = vld [vmem:[#allocation16 + $0x68] sm:$0xff]  }
0x15e8   : > { %v4811_v57 = vpop.f32.mrb[104].mxu1 }
0x15e9   : > { %v4818_v63 = vmul.f32 0.35355338, %v4811_v57  ;;  %v7083_v50 = vpop.f32.mrb[105].mxu1  ;;  %v7753_v57 = vld [vmem:[#allocation16 + $0x38] sm:$0xff]  }
0x15ea   : > { %v4814_v28 = vpop.f32.mrb[106].mxu1  ;;  %v7761_v50 = vld [vmem:[#allocation16 + $0x78] sm:$0xff]  }
0x15eb   : > { %v7084_v26 = vpop.f32.mrb[107].mxu1  ;;  %v4822_v29 = vsel %vm2126_vm2, %v4818_v63, -inf  ;;  %v4420_v28 = vadd.f32 %v9209_v11, %v9197_v1  ;;  %v5135_v1 = vpack.c.bf16 %v9235_v2, %v9235_v2  ;;  %v5132_v2 = vpack.c.bf16 %v9203_v53, %v9203_v53 }
0x15ec   : > { %4823 = vmax.xlane.f32.xlu0 %v4822_v29  ;;  %v4334_v26 = vadd.f32 %v9185_v16, %v9176_v59 }
0x15ed   : > { %v5292_v55 = vsel %vm2154_vm1, %v5135_v1, 0 }
0x15ee   : > { %v5131_v11 = vpack.c.bf16 %v4334_v26, %v4334_v26 }
0x15f0   : > { %4820 = vmax.xlane.f32.xlu0 %v4819_v30 }
0x1679   : > { %v4824_v9 = vpop.xlane.xlu0 %4823 }
0x167a   : > { %v4826_v18 = vsub.f32 %v4818_v63, %v4824_v9  ;;  %v7760_v63 = vld [vmem:[#allocation16 + $0x70] sm:$0xff]  }
0x167c   : > { %v4829_v31 = vmul.f32 1.442695, %v4826_v18 }
0x167d   : > { %v4821_v58 = vpop.xlane.xlu0 %4820 }
0x167e   : > { %7842 = vpow2.f32 %v4829_v31  ;;  %v4825_v60 = vsub.f32 %v4817_v5, %v4821_v58  ;;  %v5133_v5 = vpack.c.bf16 %v4420_v28, %v4420_v28  ;;  %v5134_v58 = vpack.c.bf16 %v9231_v4, %v9231_v4 }
0x1680   : > { %v4827_v44 = vmul.f32 1.442695, %v4825_v60  ;;  %v5130_v60 = vpack.c.bf16 %v9179_v6, %v9179_v6 }
0x1682   : > { %7844 = vpow2.f32 %v4827_v44  ;;  %v5246_v44 = vsel %vm2154_vm1, %v5134_v58, 0 }
0x1688   : > { %v7843_v8 = vpop.eup %7842 }
0x1689   : > { %v4834_v36 = vsel %vm2126_vm2, %v7843_v8, 0.0 }
0x168a   : > { %4835 = vadd.xlane.f32.xlu1 %v4834_v36 }
0x168c   : > { %v7845_v47 = vpop.eup %7844 }
0x168d   : > { %v4831_v38 = vsel %vm2126_vm2, %v7845_v47, 0.0 }
0x168e   : > { %4832 = vadd.xlane.f32.xlu1 %v4831_v38 }
0x1717   : > { %v4836_v43 = vpop.xlane.xlu1 %4835 }
0x1718   : > { %7846 = vrcp.f32 %v4836_v43 }
0x171b   : > { %v4833_v39 = vpop.xlane.xlu1 %4832 }
0x171c   : > { %7848 = vrcp.f32 %v4833_v39 }
0x1722   : > { %v7847_v3 = vpop.eup %7846 }
0x1723   : > { %v4840_v40 = vmul.f32 %v7847_v3, %v7843_v8 }
0x1725   : > { %v4842_v45 = vpack.c.bf16 %v4840_v40, %v4840_v40 }
0x1726   : > { %v7849_v46 = vpop.eup %7848 }
0x1727   : > { %v4839_v56 = vmul.f32 %v7849_v46, %v7845_v47  ;;  %7094 = vmatmul.mubr.msk.bf16.vlgmr.msra.gmra.mrb[108].mxu1 %vm2126_vm2, %v4842_v45 }
0x1728   : > { %7118 = vmatpush3.bf16.msra.mxu1 %v7746_v41  ;;  %7133 = vmatprep.mubr.msk.bf16.mxu1 %vm8263_vm0, %v8262_v0 }
0x1729   : > { %7119 = vmatprep.subr.bf16.mxu1 %v8262_v0  ;;  %v4841_v37 = vpack.c.bf16 %v4839_v56, %v4839_v56 }
0x172b   : > { %7088 = vmatmul.mubr.msk.bf16.vlgmr.msra.gmra.mrb[56].mxu0 %vm2126_vm2, %v4841_v37 }
0x172c   : > { %7120 = vmatpush3.bf16.msra.mxu1 %v7747_v62  ;;  %7098 = vmatpush3.bf16.msra.mxu0 %v7754_v34 }
0x172d   : > { %7121 = vmatprep.subr.bf16.mxu1 %v8262_v0  ;;  %7099 = vmatprep.subr.bf16.mxu0 %v8262_v0 }
0x172e   : > { %7113 = vmatprep.mubr.msk.bf16.mxu0 %vm8263_vm0, %v8262_v0 }
0x1730   : > { %7122 = vmatpush3.bf16.msra.mxu1 %v7748_v17  ;;  %7100 = vmatpush3.bf16.msra.mxu0 %v7755_v14 }
0x1731   : > { %7123 = vmatprep.subr.bf16.mxu1 %v8262_v0  ;;  %7101 = vmatprep.subr.bf16.mxu0 %v8262_v0 }
0x1734   : > { %7124 = vmatpush3.bf16.msra.mxu1 %v7749_v23  ;;  %7102 = vmatpush3.bf16.msra.mxu0 %v7756_v7 }
0x1735   : > { %7125 = vmatprep.subr.bf16.mxu1 %v8262_v0  ;;  %7103 = vmatprep.subr.bf16.mxu0 %v8262_v0 }
0x1738   : > { %7126 = vmatpush3.bf16.msra.mxu1 %v7750_v25  ;;  %7104 = vmatpush3.bf16.msra.mxu0 %v7757_v33 }
0x1739   : > { %7127 = vmatprep.subr.bf16.mxu1 %v8262_v0  ;;  %7105 = vmatprep.subr.bf16.mxu0 %v8262_v0 }
0x173c   : > { %7128 = vmatpush3.bf16.msra.mxu1 %v7751_v24  ;;  %7106 = vmatpush3.bf16.msra.mxu0 %v7758_v13 }
0x173d   : > { %7129 = vmatprep.subr.bf16.mxu1 %v8262_v0  ;;  %7107 = vmatprep.subr.bf16.mxu0 %v8262_v0 }
0x1740   : > { %7130 = vmatpush3.bf16.msra.mxu1 %v7752_v20  ;;  %7108 = vmatpush3.bf16.msra.mxu0 %v7759_v51 }
0x1741   : > { %7131 = vmatprep.subr.bf16.mxu1 %v8262_v0  ;;  %7109 = vmatprep.subr.bf16.mxu0 %v8262_v0 }
0x1744   : > { %7132 = vmatpush3.bf16.msra.mxu1 %v7753_v57  ;;  %7110 = vmatpush3.bf16.msra.mxu0 %v7760_v63  ;;  %v3743_v57 = vrot.slane %v9172_v49, %v1270_v22 }
0x1745   : > { %7143 = vmatprep.subr.bf16.mxu1 %v8262_v0  ;;  %7111 = vmatprep.subr.bf16.mxu0 %v8262_v0 }
0x1746   : > { %v4422_v61 = vadd.f32 %v9211_v19, %v3743_v57 }
0x1747   : > { %7134 = vmatmul.mubr.bf16.vlgmr.msra.gmra.mrb[112].mxu1 %v4714_v15 }
0x1748   : > { %7145 = vmatprep.mubr.msk.bf16.mxu1 %vm8263_vm0, %v8262_v0  ;;  %7112 = vmatpush3.bf16.msra.mxu0 %v7761_v50  ;;  %v4418_v50 = vadd.f32 %v9205_v27, %v3743_v57  ;;  %v5445_v27 = vpack.c.bf16 %v4422_v61, %v4422_v61  ;;  %v7769_v57 = vld [vmem:[#allocation16 + $0xb8] sm:$0xff]  }
0x1749   : > { %7137 = vmatprep.subr.bf16.mxu0 %v8262_v0 }
0x174a   : > { %v5444_v1 = vpack.c.bf16 %v4418_v50, %v4418_v50 }
0x174d   : > { %7144 = vmatpush3.bf16.xpose.msra.mxu1 %v5133_v5  ;;  %v3727_v5 = vrot.slane %v9172_v49, %v8885_v35  ;;  %v5446_v49 = vpack.c.bf16 %v9233_v42, %v9233_v42 }
0x174e   : > { %7155 = vmatprep.subr.bf16.mxu1 %v8262_v0 }
0x174f   : > { %v4336_v35 = vadd.f32 %v9187_v21, %v3727_v5 }
0x1754   : > { %7146 = vmatmul.mubr.bf16.vlgmr.msra.gmra.mrb[116].mxu1 %v5131_v11  ;;  %v4332_v11 = vadd.f32 %v9181_v12, %v3727_v5  ;;  %v5558_v12 = vsel %vm2154_vm1, %v5446_v49, 0  ;;  %v5447_v5 = vpack.c.bf16 %v9239_v52, %v9239_v52 }
0x1755   : > { %7156 = vmatpush3.bf16.msra.mxu1 %v5292_v55  ;;  %7157 = vmatprep.mubr.msk.bf16.mxu1 %vm8263_vm0, %v8262_v0  ;;  %v5443_v55 = vpack.c.bf16 %v4336_v35, %v4336_v35  ;;  %v7770_v35 = vld [vmem:[#allocation16 + $0xc0] sm:$0xff]  }
0x1756   : > { %7181 = vmatprep.subr.bf16.mxu1 %v8262_v0  ;;  %v5442_v22 = vpack.c.bf16 %v4332_v11, %v4332_v11  ;;  %v5604_v11 = vsel %vm2154_vm1, %v5447_v5, 0  ;;  %v7784_v5 = vld [vmem:[#allocation18 + $0x30] sm:$0xff]  }
0x17fa   : > { %v4929_v10 = vpop.f32.mrb[108].mxu1 }
0x17fb   : > { %v7095_v15 = vpop.f32.mrb[109].mxu1 }
0x17fc   : > { %v4932_v29 = vpop.f32.mrb[110].mxu1 }
0x17fd   : > { %v7096_v30 = vpop.f32.mrb[111].mxu1 }
0x17fe   : > { %v4883_v59 = vpop.f32.mrb[56].mxu0 }
0x17ff   : > { %v4935_v16 = vpack.c.bf16 %v4929_v10, %v4883_v59  ;;  %v7089_v9 = vpop.f32.mrb[57].mxu0 }
0x1800   : > { %v4886_v18 = vpop.f32.mrb[58].mxu0 }
0x1801   : > { %v7090_v31 = vpop.f32.mrb[59].mxu0  ;;  %7114 = vmatmul.mubr.bf16.vlgmr.msra.gmra.mrb[60].mxu0 %v4935_v16 }
0x1802   : > { %7138 = vmatpush3.bf16.xpose.msra.mxu0 %v5132_v2  ;;  %7139 = vmatprep.mubr.msk.bf16.mxu0 %vm8263_vm0, %v8262_v0 }
0x1803   : > { %7149 = vmatprep.subr.bf16.mxu0 %v8262_v0 }
0x1809   : > { %7140 = vmatmul.mubr.bf16.vlgmr.msra.gmra.mrb[64].mxu0 %v5130_v60 }
0x180a   : > { %7150 = vmatpush3.bf16.msra.mxu0 %v5246_v44  ;;  %7151 = vmatprep.mubr.msk.bf16.mxu0 %vm8263_vm0, %v8262_v0 }
0x180b   : > { %7161 = vmatprep.subr.bf16.mxu0 %v8262_v0 }
0x181a   : > { %v5123_v53 = vpop.f32.mrb[112].mxu1 }
0x181b   : > { %v7135_v8 = vpop.f32.mrb[113].mxu1 }
0x181c   : > { %v5126_v36 = vpop.f32.mrb[114].mxu1 }
0x181d   : > { %v7136_v47 = vpop.f32.mrb[115].mxu1 }
0x1827   : > { %v5210_v38 = vpop.f32.mrb[116].mxu1 }
0x1828   : > { %v5217_v43 = vmul.f32 0.35355338, %v5210_v38  ;;  %v7147_v39 = vpop.f32.mrb[117].mxu1 }
0x1829   : > { %v5213_v4 = vpop.f32.mrb[118].mxu1 }
0x182a   : > { %v7148_v3 = vpop.f32.mrb[119].mxu1  ;;  %v5221_v6 = vsel %vm2126_vm2, %v5217_v43, -inf }
0x182b   : > { %5222 = vmax.xlane.f32.xlu0 %v5221_v6 }
0x18b8   : > { %v5223_v40 = vpop.xlane.xlu0 %5222 }
0x18b9   : > { %v5225_v41 = vsub.f32 %v5217_v43, %v5223_v40 }
0x18bb   : > { %v5228_v45 = vmul.f32 1.442695, %v5225_v41 }
0x18bd   : > { %7850 = vpow2.f32 %v5228_v45 }
0x18c7   : > { %v7851_v46 = vpop.eup %7850 }
0x18c8   : > { %v5233_v56 = vsel %vm2126_vm2, %v7851_v46, 0.0 }
0x18c9   : > { %5234 = vadd.xlane.f32.xlu1 %v5233_v56 }
0x18d4   : > { %v5034_v62 = vpop.f32.mrb[60].mxu0 }
0x18d5   : > { %v9334_v34 = vadd.f32 %v5123_v53, %v5034_v62  ;;  %v7115_v37 = vpop.f32.mrb[61].mxu0 }
0x18d6   : > { %v5037_v17 = vpop.f32.mrb[62].mxu0 }
0x18d7   : > { %v9336_v14 = vadd.f32 %v5126_v36, %v5037_v17  ;;  %v7116_v23 = vpop.f32.mrb[63].mxu0 }
0x18dc   : > { %v5170_v7 = vpop.f32.mrb[64].mxu0 }
0x18dd   : > { %v5216_v25 = vmul.f32 0.35355338, %v5170_v7  ;;  %v7141_v33 = vpop.f32.mrb[65].mxu0  ;;  %v7762_v7 = vld [vmem:[#allocation16 + $0x80] sm:$0xff]  }
0x18de   : > { %v5173_v24 = vpop.f32.mrb[66].mxu0  ;;  %v7764_v33 = vld [vmem:[#allocation16 + $0x90] sm:$0xff]  }
0x18df   : > { %v7142_v13 = vpop.f32.mrb[67].mxu0  ;;  %v5218_v20 = vsel %vm2126_vm2, %v5216_v25, -inf  ;;  %v7765_v24 = vld [vmem:[#allocation16 + $0x98] sm:$0xff]  }
0x18e0   : > { %5219 = vmax.xlane.f32.xlu0 %v5218_v20  ;;  %v7766_v13 = vld [vmem:[#allocation16 + $0xa0] sm:$0xff]   ;;  %v7767_v20 = vld [vmem:[#allocation16 + $0xa8] sm:$0xff]  }
0x1956   : > { %v5235_v51 = vpop.xlane.xlu1 %5234 }
0x1957   : > { %7852 = vrcp.f32 %v5235_v51  ;;  %v7768_v51 = vld [vmem:[#allocation16 + $0xb0] sm:$0xff]  }
0x1961   : > { %v7853_v63 = vpop.eup %7852 }
0x1962   : > { %v5239_v28 = vmul.f32 %v7853_v63, %v7851_v46 }
0x1964   : > { %v5241_v26 = vpack.c.bf16 %v5239_v28, %v5239_v28 }
0x1966   : > { %7158 = vmatmul.mubr.msk.bf16.vlgmr.msra.gmra.mrb[120].mxu1 %vm2126_vm2, %v5241_v26 }
0x1967   : > { %7182 = vmatpush3.bf16.xpose.msra.mxu1 %v5444_v1  ;;  %7183 = vmatprep.mubr.msk.bf16.mxu1 %vm8263_vm0, %v8262_v0 }
0x1968   : > { %7187 = vmatprep.subr.bf16.mxu1 %v8262_v0 }
0x196d   : > { %v5220_v19 = vpop.xlane.xlu0 %5219 }
0x196e   : > { %7184 = vmatmul.mubr.bf16.vlgmr.msra.gmra.mrb[124].mxu1 %v5442_v22  ;;  %v5224_v10 = vsub.f32 %v5216_v25, %v5220_v19  ;;  %v7763_v25 = vld [vmem:[#allocation16 + $0x88] sm:$0xff]  }
0x196f   : > { %7188 = vmatpush3.bf16.xpose.msra.mxu1 %v5445_v27  ;;  %7189 = vmatprep.mubr.msk.bf16.mxu1 %vm8263_vm0, %v8262_v0 }
0x1970   : > { %7193 = vmatprep.subr.bf16.mxu1 %v8262_v0  ;;  %v5226_v15 = vmul.f32 1.442695, %v5224_v10  ;;  %v7771_v10 = vld [vmem:[#allocation16 + $0xc8] sm:$0xff]  }
0x1972   : > { %7854 = vpow2.f32 %v5226_v15  ;;  %v7772_v15 = vld [vmem:[#allocation16 + $0xd0] sm:$0xff]  }
0x1976   : > { %7190 = vmatmul.mubr.bf16.vlgmr.msra.gmra.mrb[128].mxu1 %v5443_v55 }
0x1977   : > { %7194 = vmatpush3.bf16.msra.mxu1 %v5558_v12  ;;  %7195 = vmatprep.mubr.msk.bf16.mxu1 %vm8263_vm0, %v8262_v0 }
0x1978   : > { %7199 = vmatprep.subr.bf16.mxu1 %v8262_v0 }
0x197c   : > { %v7855_v58 = vpop.eup %7854 }
0x197d   : > { %v5230_v60 = vsel %vm2126_vm2, %v7855_v58, 0.0 }
0x1a39   : > { %v9361_v29 = vpop.f32.mrb[120].mxu1 }
0x1a3a   : > { %v7159_v21 = vpop.f32.mrb[121].mxu1 }
0x1a3b   : > { %v5331_v30 = vpop.f32.mrb[122].mxu1  ;;  %v7773_v21 = vld [vmem:[#allocation16 + $0xd8] sm:$0xff]  }
0x1a3c   : > { %v7160_v59 = vpop.f32.mrb[123].mxu1  ;;  %v7775_v30 = vld [vmem:[#allocation16 + $0xe8] sm:$0xff]  }
0x1a3d   : > { %v7776_v59 = vld [vmem:[#allocation16 + $0xf0] sm:$0xff]  }
0x1a41   : > { %v5482_v42 = vpop.f32.mrb[124].mxu1 }
0x1a42   : > { %v5528_v16 = vmul.f32 0.35355338, %v5482_v42  ;;  %v7185_v9 = vpop.f32.mrb[125].mxu1  ;;  %v7777_v42 = vld [vmem:[#allocation16 + $0xf8] sm:$0xff]  }
0x1a43   : > { %v5485_v2 = vpop.f32.mrb[126].mxu1 }
0x1a44   : > { %v7186_v18 = vpop.f32.mrb[127].mxu1  ;;  %v5530_v31 = vsel %vm2126_vm2, %v5528_v16, -inf }
0x1a45   : > { %5531 = vmax.xlane.f32.xlu1 %v5530_v31 }
0x1a49   : > { %v5522_v44 = vpop.f32.mrb[128].mxu1  ;;  %5231 = vadd.xlane.f32.xlu1 %v5230_v60 }
0x1a4a   : > { %v5529_v53 = vmul.f32 0.35355338, %v5522_v44  ;;  %v7191_v8 = vpop.f32.mrb[129].mxu1 }
0x1a4b   : > { %v5525_v36 = vpop.f32.mrb[130].mxu1 }
0x1a4c   : > { %v7192_v47 = vpop.f32.mrb[131].mxu1  ;;  %v5533_v38 = vsel %vm2126_vm2, %v5529_v53, -inf }
0x1a4d   : > { %5534 = vmax.xlane.f32.xlu0 %v5533_v38 }
0x1ad2   : > { %v5532_v43 = vpop.xlane.xlu1 %5531 }
0x1ad3   : > { %v5536_v39 = vsub.f32 %v5528_v16, %v5532_v43 }
0x1ad5   : > { %v5538_v4 = vmul.f32 1.442695, %v5536_v39 }
0x1ad6   : > { %v5232_v3 = vpop.xlane.xlu1 %5231 }
0x1ad7   : > { %7856 = vpow2.f32 %v5538_v4 }
0x1ad8   : > { %7858 = vrcp.f32 %v5232_v3  ;;  %v6598_v3 = vld [vmem:[%s9476_s19] ss:$0 sm:$0xff] }
0x1ada   : > { %v5535_v6 = vpop.xlane.xlu0 %5534 }
0x1adb   : > { %v5537_v40 = vsub.f32 %v5529_v53, %v5535_v6 }
0x1add   : > { %v5540_v41 = vmul.f32 1.442695, %v5537_v40 }
0x1adf   : > { %7860 = vpow2.f32 %v5540_v41 }
0x1ae1   : > { %v7857_v45 = vpop.eup %7856 }
0x1ae2   : > { %v7859_v46 = vpop.eup %7858  ;;  %v5542_v56 = vsel %vm2126_vm2, %v7857_v45, 0.0 }
0x1ae3   : > { %v5238_v62 = vmul.f32 %v7859_v46, %v7855_v58  ;;  %5543 = vadd.xlane.f32.xlu0 %v5542_v56 }
0x1ae5   : > { %v5240_v37 = vpack.c.bf16 %v5238_v62, %v5238_v62 }
0x1ae7   : > { %7152 = vmatmul.mubr.msk.bf16.vlgmr.msra.gmra.mrb[68].mxu0 %vm2126_vm2, %v5240_v37 }
0x1ae8   : > { %7177 = vmatprep.mubr.msk.bf16.mxu0 %vm8263_vm0, %v8262_v0  ;;  %7162 = vmatpush3.bf16.msra.mxu0 %v7762_v7 }
0x1ae9   : > { %v7861_v17 = vpop.eup %7860  ;;  %7163 = vmatprep.subr.bf16.mxu0 %v8262_v0 }
0x1aea   : > { %v5545_v23 = vsel %vm2126_vm2, %v7861_v17, 0.0 }
0x1aeb   : > { %5546 = vadd.xlane.f32.xlu1 %v5545_v23 }
0x1aec   : > { %7164 = vmatpush3.bf16.msra.mxu0 %v7763_v25 }
0x1aed   : > { %7165 = vmatprep.subr.bf16.mxu0 %v8262_v0 }
0x1af0   : > { %7166 = vmatpush3.bf16.msra.mxu0 %v7764_v33 }
0x1af1   : > { %7167 = vmatprep.subr.bf16.mxu0 %v8262_v0 }
0x1af4   : > { %7168 = vmatpush3.bf16.msra.mxu0 %v7765_v24 }
0x1af5   : > { %7169 = vmatprep.subr.bf16.mxu0 %v8262_v0 }
0x1af8   : > { %7170 = vmatpush3.bf16.msra.mxu0 %v7766_v13 }
0x1af9   : > { %7171 = vmatprep.subr.bf16.mxu0 %v8262_v0 }
0x1afc   : > { %7172 = vmatpush3.bf16.msra.mxu0 %v7767_v20 }
0x1afd   : > { %7173 = vmatprep.subr.bf16.mxu0 %v8262_v0 }
0x1b00   : > { %7174 = vmatpush3.bf16.msra.mxu0 %v7768_v51 }
0x1b01   : > { %7175 = vmatprep.subr.bf16.mxu0 %v8262_v0 }
0x1b04   : > { %7176 = vmatpush3.bf16.msra.mxu0 %v7769_v57  ;;  %v7780_v57 = vld [vmem:[#allocation18 + $0x10] sm:$0xff]  }
0x1b05   : > { %7205 = vmatprep.subr.bf16.mxu0 %v8262_v0 }
0x1b70   : > { %v5544_v63 = vpop.xlane.xlu0 %5543 }
0x1b71   : > { %7862 = vrcp.f32 %v5544_v63  ;;  %v7781_v63 = vld [vmem:[#allocation18 + $0x18] sm:$0xff]  }
0x1b78   : > { %v5547_v50 = vpop.xlane.xlu1 %5546 }
0x1b79   : > { %7864 = vrcp.f32 %v5547_v50  ;;  %v7782_v50 = vld [vmem:[#allocation18 + $0x20] sm:$0xff]  }
0x1b7b   : > { %v7863_v28 = vpop.eup %7862 }
0x1b7c   : > { %v5550_v26 = vmul.f32 %v7863_v28, %v7857_v45  ;;  %v7783_v28 = vld [vmem:[#allocation18 + $0x28] sm:$0xff]  }
0x1b7e   : > { %v5552_v1 = vpack.c.bf16 %v5550_v26, %v5550_v26  ;;  %v7785_v26 = vld [vmem:[#allocation18 + $0x38] sm:$0xff]  }
0x1b80   : > { %7196 = vmatmul.mubr.msk.bf16.vlgmr.msra.gmra.mrb[132].mxu1 %vm2126_vm2, %v5552_v1  ;;  %v7786_v1 = vld [vmem:[#allocation19] sm:$0xff]  }
0x1b81   : > { %7200 = vmatpush3.bf16.msra.mxu1 %v5604_v11  ;;  %7201 = vmatprep.mubr.msk.bf16.mxu1 %vm8263_vm0, %v8262_v0  ;;  %v7787_v11 = vld [vmem:[#allocation19 + $0x8] sm:$0xff]  }
0x1b82   : > { %7225 = vmatprep.subr.bf16.mxu1 %v8262_v0 }
0x1b83   : > { %v7865_v61 = vpop.eup %7864 }
0x1b84   : > { %v5551_v22 = vmul.f32 %v7865_v61, %v7861_v17  ;;  %v7779_v17 = vld [vmem:[#allocation18 + $0x8] sm:$0xff]   ;;  %v7788_v61 = vld [vmem:[#allocation19 + $0x10] sm:$0xff]  }
0x1b86   : > { %v5553_v27 = vpack.c.bf16 %v5551_v22, %v5551_v22  ;;  %v7789_v22 = vld [vmem:[#allocation19 + $0x18] sm:$0xff]  }
0x1b88   : > { %7202 = vmatmul.mubr.msk.bf16.vlgmr.msra.gmra.mrb[136].mxu1 %vm2126_vm2, %v5553_v27  ;;  %v7790_v27 = vld [vmem:[#allocation19 + $0x20] sm:$0xff]  }
0x1b89   : > { %7241 = vmatprep.mubr.msk.bf16.mxu1 %vm8263_vm0, %v8262_v0 }
0x1bba   : > { %v5282_v52 = vpop.f32.mrb[68].mxu0 }
0x1bbb   : > { %v5334_v49 = vpack.c.bf16 %v9361_v29, %v5282_v52  ;;  %v7153_v55 = vpop.f32.mrb[69].mxu0  ;;  %v7774_v29 = vld [vmem:[#allocation16 + $0xe0] sm:$0xff]   ;;  %v7791_v52 = vld [vmem:[#allocation19 + $0x28] sm:$0xff]  }
0x1bbc   : > { %v5285_v12 = vpop.f32.mrb[70].mxu0 }
0x1bbd   : > { %v7154_v19 = vpop.f32.mrb[71].mxu0  ;;  %7178 = vmatmul.mubr.bf16.vlgmr.msra.gmra.mrb[72].mxu0 %v5334_v49 }
0x1bbe   : > { %7206 = vmatpush3.bf16.msra.mxu0 %v7770_v35  ;;  %7221 = vmatprep.mubr.msk.bf16.mxu0 %vm8263_vm0, %v8262_v0 }
0x1bbf   : > { %7207 = vmatprep.subr.bf16.mxu0 %v8262_v0 }
0x1bc2   : > { %7208 = vmatpush3.bf16.msra.mxu0 %v7771_v10 }
0x1bc3   : > { %7209 = vmatprep.subr.bf16.mxu0 %v8262_v0 }
0x1bc6   : > { %7210 = vmatpush3.bf16.msra.mxu0 %v7772_v15 }
0x1bc7   : > { %7211 = vmatprep.subr.bf16.mxu0 %v8262_v0 }
0x1bca   : > { %7212 = vmatpush3.bf16.msra.mxu0 %v7773_v21  ;;  %v6599_v21 = vld [vmem:[%s9477_s20] ss:$0 sm:$0xff] }
0x1bcb   : > { %7213 = vmatprep.subr.bf16.mxu0 %v8262_v0 }
0x1bce   : > { %7214 = vmatpush3.bf16.msra.mxu0 %v7774_v29 }
0x1bcf   : > { %7215 = vmatprep.subr.bf16.mxu0 %v8262_v0 }
0x1bd2   : > { %7216 = vmatpush3.bf16.msra.mxu0 %v7775_v30 }
0x1bd3   : > { %7217 = vmatprep.subr.bf16.mxu0 %v8262_v0 }
0x1bd6   : > { %7218 = vmatpush3.bf16.msra.mxu0 %v7776_v59 }
0x1bd7   : > { %7219 = vmatprep.subr.bf16.mxu0 %v8262_v0 }
0x1bda   : > { %7220 = vmatpush3.bf16.msra.mxu0 %v7777_v42 }
0x1bdb   : > { %7245 = vmatprep.subr.bf16.mxu0 %v8262_v0 }
0x1c53   : > { %v5594_v16 = vpop.f32.mrb[132].mxu1 }
0x1c54   : > { %v7197_v9 = vpop.f32.mrb[133].mxu1 }
0x1c55   : > { %v5597_v2 = vpop.f32.mrb[134].mxu1 }
0x1c56   : > { %v7198_v18 = vpop.f32.mrb[135].mxu1 }
0x1c5b   : > { %v5640_v31 = vpop.f32.mrb[136].mxu1 }
0x1c5c   : > { %v5646_v58 = vpack.c.bf16 %v5640_v31, %v5594_v16  ;;  %v7203_v60 = vpop.f32.mrb[137].mxu1  ;;  %v6600_v16 = vld [vmem:[%s9559_s23] ss:$0 sm:$0xff]  ;;  %s1012_s23 = scalar_lea.vmem %s9564_s30, %s6290_s0 }
0x1c5d   : > { %v5643_v44 = vpop.f32.mrb[138].mxu1  ;;  %v7793_v60 = vld [vmem:[#allocation19 + $0x38] sm:$0xff]  }
0x1c5e   : > { %v7204_v53 = vpop.f32.mrb[139].mxu1  ;;  %7222 = vmatmul.mubr.bf16.vlgmr.msra.gmra.mrb[76].mxu0 %v5646_v58  ;;  %v7792_v58 = vld [vmem:[#allocation19 + $0x30] sm:$0xff]   ;;  %v6601_v44 = vld [vmem:[%s9560_s29] ss:$0 sm:$0xff] }
0x1c5f   : > { %7261 = vmatprep.mubr.msk.bf16.mxu0 %vm8263_vm0, %v8262_v0  ;;  %7246 = vmatpush3.bf16.msra.mxu0 %v7786_v1  ;;  %v6620_v1 = vld [vmem:[%s9563_s9] ss:$0 sm:$0xff] }
0x1c60   : > { %7247 = vmatprep.subr.bf16.mxu0 %v8262_v0 }
0x1c63   : > { %7248 = vmatpush3.bf16.msra.mxu0 %v7787_v11 }
0x1c64   : > { %7249 = vmatprep.subr.bf16.mxu0 %v8262_v0 }
0x1c67   : > { %7250 = vmatpush3.bf16.msra.mxu0 %v7788_v61 }
0x1c68   : > { %7251 = vmatprep.subr.bf16.mxu0 %v8262_v0 }
0x1c6b   : > { %7252 = vmatpush3.bf16.msra.mxu0 %v7789_v22 }
0x1c6c   : > { %7253 = vmatprep.subr.bf16.mxu0 %v8262_v0 }
0x1c6f   : > { %7254 = vmatpush3.bf16.msra.mxu0 %v7790_v27 }
0x1c70   : > { %7255 = vmatprep.subr.bf16.mxu0 %v8262_v0 }
0x1c73   : > { %7256 = vmatpush3.bf16.msra.mxu0 %v7791_v52 }
0x1c74   : > { %7257 = vmatprep.subr.bf16.mxu0 %v8262_v0 }
0x1c77   : > { %7258 = vmatpush3.bf16.msra.mxu0 %v7792_v58 }
0x1c78   : > { %7259 = vmatprep.subr.bf16.mxu0 %v8262_v0 }
0x1c7b   : > { %7260 = vmatpush3.bf16.msra.mxu0 %v7793_v60 }
0x1c90   : > { %v5433_v8 = vpop.f32.mrb[72].mxu0 }
0x1c91   : > { %v5440_v36 = vadd.f32 %v5433_v8, %v9334_v34  ;;  %v7179_v47 = vpop.f32.mrb[73].mxu0 }
0x1c92   : > { %v5436_v38 = vpop.f32.mrb[74].mxu0 }
0x1c93   : > { %v5441_v43 = vadd.f32 %v5436_v38, %v9336_v14  ;;  %v7180_v39 = vpop.f32.mrb[75].mxu0  ;;  %v7778_v14 = vld [vmem:[#allocation18] sm:$0xff]  }
0x1c94   : > { %7226 = vmatpush3.bf16.msra.mxu1 %v7778_v14 }
0x1c95   : > { %7227 = vmatprep.subr.bf16.mxu1 %v8262_v0 }
0x1c98   : > { %7228 = vmatpush3.bf16.msra.mxu1 %v7779_v17 }
0x1c99   : > { %7229 = vmatprep.subr.bf16.mxu1 %v8262_v0 }
0x1c9c   : > { %7230 = vmatpush3.bf16.msra.mxu1 %v7780_v57 }
0x1c9d   : > { %7231 = vmatprep.subr.bf16.mxu1 %v8262_v0 }
0x1ca0   : > { %7232 = vmatpush3.bf16.msra.mxu1 %v7781_v63 }
0x1ca1   : > { %7233 = vmatprep.subr.bf16.mxu1 %v8262_v0 }
0x1ca4   : > { %7234 = vmatpush3.bf16.msra.mxu1 %v7782_v50  ;;  %v6619_v50 = vld [vmem:[%s9562_s1] ss:$0 sm:$0xff] }
0x1ca5   : > { %7235 = vmatprep.subr.bf16.mxu1 %v8262_v0 }
0x1ca8   : > { %7236 = vmatpush3.bf16.msra.mxu1 %v7783_v28 }
0x1ca9   : > { %7237 = vmatprep.subr.bf16.mxu1 %v8262_v0 }
0x1cac   : > { %7238 = vmatpush3.bf16.msra.mxu1 %v7784_v5 }
0x1cad   : > { %7239 = vmatprep.subr.bf16.mxu1 %v8262_v0  ;;  %v6610_v0 = vld [vmem:[%s9561_s11] ss:$0 sm:$0xff] }
0x1cb0   : > { %7240 = vmatpush3.bf16.msra.mxu1 %v7785_v26 }
0x1d31   : > { %v5745_v4 = vpop.f32.mrb[76].mxu0 }
0x1d32   : > { %v5752_v6 = vadd.f32 %v5745_v4, %v5440_v36  ;;  %v7223_v40 = vpop.f32.mrb[77].mxu0 }
0x1d33   : > { %v5748_v41 = vpop.f32.mrb[78].mxu0 }
0x1d34   : > { %v5761_v45 = vadd.f32 %v6598_v3, %v5752_v6  ;;  %v5753_v46 = vadd.f32 %v5748_v41, %v5441_v43  ;;  %v7224_v56 = vpop.f32.mrb[79].mxu0 }
0x1d36   : > { %v5762_v62 = vadd.f32 %v6598_v3, %v5753_v46  ;;  %v5763_v37 = vadd.f32 %v5761_v45, %v9145_v48 }
0x1d38   : > { %5767 = vadd.xlane.f32.xlu0 %v5763_v37  ;;  %v5764_v34 = vadd.f32 %v5762_v62, %v9147_v32 }
0x1d3a   : > { %5769 = vadd.xlane.f32.xlu1 %v5764_v34 }
0x1dc5   : > { %v5768_v23 = vpop.xlane.xlu0 %5767 }
0x1dc6   : > { %v5771_v7 = vmul.f32 0.03125, %v5768_v23 }
0x1dc7   : > { %v5770_v25 = vpop.xlane.xlu1 %5769 }
0x1dc8   : > { %v5773_v33 = vsub.f32 %v5763_v37, %v5771_v7  ;;  %v5772_v24 = vmul.f32 0.03125, %v5770_v25 }
0x1dca   : > { %v5774_v13 = vsub.f32 %v5764_v34, %v5772_v24  ;;  %v5775_v48 = vsel %vm3570_vm4, %v5773_v33, 0.0 }
0x1dcb   : > { %v5777_v20 = vmul.f32 %v5775_v48, %v5775_v48 }
0x1dcc   : > { %v5776_v32 = vsel %vm3570_vm4, %v5774_v13, 0.0 }
0x1dcd   : > { %5779 = vadd.xlane.f32.xlu0 %v5777_v20  ;;  %v5778_v51 = vmul.f32 %v5776_v32, %v5776_v32 }
0x1dcf   : > { %5781 = vadd.xlane.f32.xlu1 %v5778_v51 }
0x1e5a   : > { %v5780_v35 = vpop.xlane.xlu0 %5779 }
0x1e5b   : > { %v5783_v49 = vmul.f32 0.03125, %v5780_v35 }
0x1e5c   : > { %v5782_v55 = vpop.xlane.xlu1 %5781 }
0x1e5d   : > { %v5785_v12 = vadd.f32 1e-05, %v5783_v49  ;;  %v5784_v19 = vmul.f32 0.03125, %v5782_v55 }
0x1e5f   : > { %7866 = vrsqrt.f32 %v5785_v12  ;;  %v5786_v10 = vadd.f32 1e-05, %v5784_v19 }
0x1e61   : > { %7868 = vrsqrt.f32 %v5786_v10 }
0x1e69   : > { %v7867_v15 = vpop.eup %7866 }
0x1e6a   : > { %v5789_v29 = vmul.f32 %v7867_v15, %v5775_v48 }
0x1e6b   : > { %v7869_v30 = vpop.eup %7868 }
0x1e6c   : > { %v5790_v59 = vmul.f32 %v7869_v30, %v5776_v32  ;;  %v5797_v42 = vmul.f32 %v6599_v21, %v5789_v29 }
0x1e6e   : > { %v5798_v9 = vmul.f32 %v6599_v21, %v5790_v59  ;;  %v5805_v2 = vadd.f32 %v6600_v16, %v5797_v42 }
0x1e70   : > { %v5806_v18 = vadd.f32 %v6600_v16, %v5798_v9 }
0x1e72   : > { %v5807_v31 = vpack.c.bf16 %v5806_v18, %v5805_v2 }
0x1e74   : > { %7242 = vmatmul.mubr.bf16.vlgmr.msra.gmra.mrb[140].mxu1 %v5807_v31 }
0x1f47   : > { %v5913_v53 = vpop.f32.mrb[140].mxu1 }
0x1f48   : > { %v5914_v8 = vadd.f32 %v6601_v44, %v5913_v53  ;;  %v7243_v36 = vpop.f32.mrb[141].mxu1 }
0x1f49   : > { %v5916_v47 = vpop.f32.mrb[142].mxu1 }
0x1f4a   : > { %v5917_v38 = vadd.f32 %v6601_v44, %v5916_v47  ;;  %v7244_v43 = vpop.f32.mrb[143].mxu1  ;;  %v5920_v39 = vmax.f32 %v5914_v8, 0.0 }
0x1f4c   : > { %v5921_v4 = vmax.f32 %v5917_v38, 0.0 }
0x1f4e   : > { %v5922_v3 = vpack.c.bf16 %v5921_v4, %v5920_v39 }
0x1f50   : > { %7262 = vmatmul.mubr.bf16.vlgmr.msra.gmra.mrb[80].mxu0 %v5922_v3 }
0x2023   : > { %v6028_v6 = vpop.f32.mrb[80].mxu0 }
0x2024   : > { %v6029_v40 = vadd.f32 %v6610_v0, %v6028_v6  ;;  %v7263_v41 = vpop.f32.mrb[81].mxu0 }
0x2025   : > { %v6031_v45 = vpop.f32.mrb[82].mxu0 }
0x2026   : > { %v6032_v46 = vadd.f32 %v6610_v0, %v6031_v45  ;;  %6037 = vadd.xlane.f32.xlu0 %v6029_v40  ;;  %v7264_v56 = vpop.f32.mrb[83].mxu0 }
0x2028   : > { %6039 = vadd.xlane.f32.xlu1 %v6032_v46 }
0x20b3   : > { %v6038_v62 = vpop.xlane.xlu0 %6037 }
0x20b4   : > { %v6041_v37 = vmul.f32 0.03125, %v6038_v62 }
0x20b5   : > { %v6040_v34 = vpop.xlane.xlu1 %6039 }
0x20b6   : > { %v6043_v14 = vsub.f32 %v6029_v40, %v6041_v37  ;;  %v6042_v17 = vmul.f32 0.03125, %v6040_v34 }
0x20b8   : > { %v6044_v23 = vsub.f32 %v6032_v46, %v6042_v17  ;;  %v6045_v7 = vsel %vm3570_vm4, %v6043_v14, 0.0 }
0x20b9   : > { %v6047_v25 = vmul.f32 %v6045_v7, %v6045_v7 }
0x20ba   : > { %v6046_v33 = vsel %vm3570_vm4, %v6044_v23, 0.0 }
0x20bb   : > { %6049 = vadd.xlane.f32.xlu0 %v6047_v25  ;;  %v6048_v24 = vmul.f32 %v6046_v33, %v6046_v33 }
0x20bd   : > { %6051 = vadd.xlane.f32.xlu1 %v6048_v24 }
0x2148   : > { %v6050_v13 = vpop.xlane.xlu0 %6049 }
0x2149   : > { %v6053_v48 = vmul.f32 0.03125, %v6050_v13 }
0x214a   : > { %v6052_v20 = vpop.xlane.xlu1 %6051 }
0x214b   : > { %v6055_v32 = vadd.f32 1e-05, %v6053_v48  ;;  %v6054_v51 = vmul.f32 0.03125, %v6052_v20 }
0x214d   : > { %7870 = vrsqrt.f32 %v6055_v32  ;;  %v6056_v57 = vadd.f32 1e-05, %v6054_v51 }
0x214f   : > { %7872 = vrsqrt.f32 %v6056_v57 }
0x2157   : > { %v7871_v63 = vpop.eup %7870 }
0x2158   : > { %v6059_v28 = vmul.f32 %v7871_v63, %v6045_v7 }
0x2159   : > { %v7873_v54 = vpop.eup %7872 }
0x215a   : > { %v6067_v5 = vmul.f32 %v6619_v50, %v6059_v28  ;;  %v6060_v26 = vmul.f32 %v7873_v54, %v6046_v33 }
0x215c   : > { %v6068_v11 = vmul.f32 %v6619_v50, %v6060_v26  ;;  %v6075_v61 = vadd.f32 %v6620_v1, %v6067_v5 }
0x215e   : > { %v6076_v22 = vadd.f32 %v6620_v1, %v6068_v11 }
0x2160   : > { %v6630_v27 = vpack.c.bf16 %v6076_v22, %v6075_v61 }
0x2162   : > { %6631 = vst [vmem:[%s1012_s23] sm:$0xff] %v6630_v27  }
0x2163 PF: > { %s45_s8 = sadd.s32 1, %s8244_s8  }
0x2164   : > { %p42_p3 = scmp.ge.s32.totalorder %s45_s8, 4  }
0x2166   :  { %44 = sbr.rel (!%p42_p3) target bundleno = 29 (0x1d), region = 211 }
0x216d   :  { %6109 = vsyncpa [#allocation3], 1 }
0x216e   :  { %6111 = vsyncpa [#allocation3 + $0x1], 1 }
0x216f   :  { %6112 = vsyncpa [#allocation5], 1 }
0x2170   :  { %6113 = vsyncpa [#allocation8], 1 }
0x2171   :  { %6114 = vsyncpa [#allocation11], 1 }
0x2172   :  { %6115 = vsyncpa [#allocation14], 1 }
0x2173   :  { %6116 = vsyncpa [#allocation17], 1 }
0x2174   :  { %6117 = vsyncpa [#allocation20], 1 }

</bundles_post_ra>
